<compile_context>
chip_gen: v6e
topology: v6e:2x2x1
jax: 0.10.0
libtpu: 0.0.40
codegen_flags: <defaults>
</compile_context>

<pallas_src>
import math

import jax
import jax.numpy as jnp
from jax.experimental import pallas as pl
from jax.experimental.pallas import tpu as pltpu


IMG = 28 * 28                                  # 784
DIMS = [IMG, 900, 625, 400, 625, 900, IMG]     # 6 Linear layers
LANE = 128


def _round_up(x, m):
    return ((x + m - 1) // m) * m


# Lane-aligned (padded) layer widths: [896, 1024, 640, 512, 640, 1024, 896]
PDIMS = [_round_up(d, LANE) for d in DIMS]


def vae_kernel(x_ref,
               w1_ref, b1_ref, w2_ref, b2_ref, w3_ref, b3_ref,
               w4_ref, b4_ref, w5_ref, b5_ref, w6_ref, b6_ref,
               o_ref):
    """Fused 6x (Linear + Sigmoid) chain on one (TM, 896) batch tile."""

    def layer(h, w_ref, b_ref):
        # bf16 x bf16 -> f32 accumulation on the MXU.
        y = jnp.dot(h.astype(jnp.bfloat16), w_ref[...],
                    preferred_element_type=jnp.float32)
        y = y + b_ref[...]                       # (1, Np) broadcasts over batch
        # sigmoid(y) = 1 / (1 + exp(-y)); exp + rcp run on the EUP slot.
        return pl.reciprocal(1.0 + jnp.exp(-y), approx=True)

    h = x_ref[...]                               # f32, (TM, 896)
    h = layer(h, w1_ref, b1_ref)                 # 896  -> 1024  (784 -> 900)
    h = layer(h, w2_ref, b2_ref)                 # 1024 -> 640   (900 -> 625)
    h = layer(h, w3_ref, b3_ref)                 # 640  -> 512   (625 -> 400)
    h = layer(h, w4_ref, b4_ref)                 # 512  -> 640   (400 -> 625)
    h = layer(h, w5_ref, b5_ref)                 # 640  -> 1024  (625 -> 900)
    h = layer(h, w6_ref, b6_ref)                 # 1024 -> 896   (900 -> 784)
    o_ref[...] = h.astype(o_ref.dtype)


def init_params(key):
    """nn.Linear-style init: U(-1/sqrt(fan_in), 1/sqrt(fan_in)).

    Weights stored as (in_features, out_features) = W^T, biases as (1, out).
    Kept in f32 / true (unpadded) shapes; the kernel wrapper pads + casts.
    """
    params = []
    for i in range(6):
        fan_in, fan_out = DIMS[i], DIMS[i + 1]
        key, kw, kb = jax.random.split(key, 3)
        bound = 1.0 / math.sqrt(fan_in)
        w = jax.random.uniform(kw, (fan_in, fan_out), jnp.float32, -bound, bound)
        b = jax.random.uniform(kb, (1, fan_out), jnp.float32, -bound, bound)
        params.append((w, b))
    return params


def prepare_kernel_params(params):
    """Zero-pad to lane-aligned shapes; weights -> bf16, biases stay f32.

    Padded weight rows are ZERO so padded activation columns (sigmoid(0)=0.5)
    from the previous layer contribute nothing to the next layer.
    """
    kparams = []
    for i, (w, b) in enumerate(params):
        kp, np_ = PDIMS[i], PDIMS[i + 1]
        w_p = jnp.zeros((kp, np_), jnp.float32).at[:w.shape[0], :w.shape[1]].set(w)
        b_p = jnp.zeros((1, np_), jnp.float32).at[:, :b.shape[1]].set(b)
        kparams.append((w_p.astype(jnp.bfloat16), b_p))
    return kparams


def vae_forward(x, params):
    """x: any shape with leading batch dim and prod(rest) == 784."""
    batch = x.shape[0]
    x_flat = x.reshape(batch, -1).astype(jnp.float32)
    assert x_flat.shape[1] == IMG, "VAENet expects 28*28 = 784 features per example"

    # Batch tile: 256 rows when the batch is large, else one sublane-aligned tile.
    tm = 256 if batch >= 256 else max(8, _round_up(batch, 8))
    b_pad = _round_up(batch, tm)

    # Pad input: features 784 -> 896 (zeros), batch -> multiple of tm (zeros).
    x_p = jnp.zeros((b_pad, PDIMS[0]), jnp.float32).at[:batch, :IMG].set(x_flat)

    kparams = prepare_kernel_params(params)

    flat_args = [x_p]
    in_specs = [pl.BlockSpec((tm, PDIMS[0]), lambda i: (i, 0))]
    for w, b in kparams:
        flat_args.extend([w, b])
        # Weights / biases: full-array blocks, constant index -> resident in VMEM.
        in_specs.append(pl.BlockSpec(w.shape, lambda i: (0, 0)))
        in_specs.append(pl.BlockSpec(b.shape, lambda i: (0, 0)))

    # Advisory cost estimate for XLA's scheduler.
    flops = 2 * b_pad * sum(PDIMS[i] * PDIMS[i + 1] for i in range(6))
    transcendentals = 2 * b_pad * sum(PDIMS[1:])           # exp + rcp per element
    bytes_accessed = (sum(int(w.size) * 2 + int(b.size) * 4 for w, b in kparams)
                      + 2 * b_pad * PDIMS[0] * 4)

    out = pl.pallas_call(
        vae_kernel,
        out_shape=jax.ShapeDtypeStruct((b_pad, PDIMS[0]), jnp.float32),
        grid=(b_pad // tm,),
        in_specs=in_specs,
        out_specs=pl.BlockSpec((tm, PDIMS[0]), lambda i: (i, 0)),
        compiler_params=pltpu.CompilerParams(
            dimension_semantics=("parallel",),      # shard batch tiles across TCs
            vmem_limit_bytes=48 << 20,              # headroom on v7x's 64 MiB VMEM
        ),
        cost_estimate=pl.CostEstimate(
            flops=flops,
            transcendentals=transcendentals,
            bytes_accessed=bytes_accessed,
        ),
    )(*flat_args)

    y = out[:batch, :IMG]
    return y.reshape(x.shape)


def vae_forward_ref(x, params, match_kernel_dtypes=True):
    """Pure-JAX reference.  With match_kernel_dtypes, mirrors the kernel's
    bf16-matmul / f32-epilogue arithmetic for a tight comparison."""
    h = x.reshape(x.shape[0], -1).astype(jnp.float32)
    for w, b in params:
        if match_kernel_dtypes:
            y = jnp.dot(h.astype(jnp.bfloat16), w.astype(jnp.bfloat16),
                        preferred_element_type=jnp.float32) + b
        else:
            y = h @ w + b
        h = jax.nn.sigmoid(y)
    return h.reshape(x.shape)


if __name__ == "__main__":
    key = jax.random.PRNGKey(0)
    k_param, k_x = jax.random.split(key)

    params = init_params(k_param)

    # Small batch, MNIST-shaped NCHW input (VAENet's flatten implies 28x28).
    x = jax.random.uniform(k_x, (2, 1, 28, 28), jnp.float32)

    y = jax.block_until_ready(vae_forward(x, params))

    y_ref = vae_forward_ref(x, params)
    assert y.shape == x.shape
    max_err = float(jnp.max(jnp.abs(y - y_ref)))
    assert max_err < 5e-3, f"mismatch vs. reference: max abs err {max_err}"

    print("KERNEL_OK")
</pallas_src>

<mosaic_0001>
module attributes {stable_mosaic.version = 11 : i64} {
  func.func @vae_kernel(%arg0: i32, %arg1: memref<8x896xf32, #tpu.memory_space<vmem>>, %arg2: memref<896x1024xbf16, #tpu.memory_space<vmem>>, %arg3: memref<1x1024xf32, #tpu.memory_space<vmem>>, %arg4: memref<1024x640xbf16, #tpu.memory_space<vmem>>, %arg5: memref<1x640xf32, #tpu.memory_space<vmem>>, %arg6: memref<640x512xbf16, #tpu.memory_space<vmem>>, %arg7: memref<1x512xf32, #tpu.memory_space<vmem>>, %arg8: memref<512x640xbf16, #tpu.memory_space<vmem>>, %arg9: memref<1x640xf32, #tpu.memory_space<vmem>>, %arg10: memref<640x1024xbf16, #tpu.memory_space<vmem>>, %arg11: memref<1x1024xf32, #tpu.memory_space<vmem>>, %arg12: memref<1024x896xbf16, #tpu.memory_space<vmem>>, %arg13: memref<1x896xf32, #tpu.memory_space<vmem>>, %arg14: memref<8x896xf32, #tpu.memory_space<vmem>>) attributes {dimension_semantics = [#tpu.dimension_semantics<parallel>], iteration_bounds = array<i64: 1>, scalar_prefetch = 0 : i64, scratch_operands = 0 : i64, tpu.core_type = #tpu.core_type<tc>, window_params = [{transform_indices = @transform_0, window_bounds = array<i64: 8, 896>}, {pipeline_mode = #tpu.pipeline_mode<synchronous>, transform_indices = @transform_1, window_bounds = array<i64: 896, 1024>}, {pipeline_mode = #tpu.pipeline_mode<synchronous>, transform_indices = @transform_2, window_bounds = array<i64: 1, 1024>}, {pipeline_mode = #tpu.pipeline_mode<synchronous>, transform_indices = @transform_3, window_bounds = array<i64: 1024, 640>}, {pipeline_mode = #tpu.pipeline_mode<synchronous>, transform_indices = @transform_4, window_bounds = array<i64: 1, 640>}, {pipeline_mode = #tpu.pipeline_mode<synchronous>, transform_indices = @transform_5, window_bounds = array<i64: 640, 512>}, {pipeline_mode = #tpu.pipeline_mode<synchronous>, transform_indices = @transform_6, window_bounds = array<i64: 1, 512>}, {pipeline_mode = #tpu.pipeline_mode<synchronous>, transform_indices = @transform_7, window_bounds = array<i64: 512, 640>}, {pipeline_mode = #tpu.pipeline_mode<synchronous>, transform_indices = @transform_8, window_bounds = array<i64: 1, 640>}, {pipeline_mode = #tpu.pipeline_mode<synchronous>, transform_indices = @transform_9, window_bounds = array<i64: 640, 1024>}, {pipeline_mode = #tpu.pipeline_mode<synchronous>, transform_indices = @transform_10, window_bounds = array<i64: 1, 1024>}, {pipeline_mode = #tpu.pipeline_mode<synchronous>, transform_indices = @transform_11, window_bounds = array<i64: 1024, 896>}, {pipeline_mode = #tpu.pipeline_mode<synchronous>, transform_indices = @transform_12, window_bounds = array<i64: 1, 896>}, {transform_indices = @transform_13, window_bounds = array<i64: 8, 896>}]} {
    %c0 = arith.constant 0 : index
    %c0_0 = arith.constant 0 : index
    %0 = vector.load %arg1[%c0, %c0_0] : memref<8x896xf32, #tpu.memory_space<vmem>>, vector<8x896xf32>
    %1 = arith.truncf %0 : vector<8x896xf32> to vector<8x896xbf16>
    %c0_1 = arith.constant 0 : index
    %c0_2 = arith.constant 0 : index
    %2 = vector.load %arg2[%c0_1, %c0_2] : memref<896x1024xbf16, #tpu.memory_space<vmem>>, vector<896x1024xbf16>
    %cst = arith.constant dense<0.000000e+00> : vector<8x1024xf32>
    %3 = tpu.matmul %1, %2, %cst {dimension_numbers = #tpu.dot_dimension_numbers<[1], [0], [0], [1], [0, 0, 1, 1], [], []>} : vector<8x896xbf16>, vector<896x1024xbf16>, vector<8x1024xf32> -> vector<8x1024xf32>
    %c0_3 = arith.constant 0 : index
    %c0_4 = arith.constant 0 : index
    %4 = vector.load %arg3[%c0_3, %c0_4] : memref<1x1024xf32, #tpu.memory_space<vmem>>, vector<1x1024xf32>
    %5 = vector.broadcast %4 : vector<1x1024xf32> to vector<8x1024xf32>
    %6 = arith.addf %3, %5 : vector<8x1024xf32>
    %cst_5 = arith.constant 0.000000e+00 : f32
    %7 = vector.broadcast %cst_5 : f32 to vector<8x1024xf32>
    %8 = arith.subf %7, %6 : vector<8x1024xf32>
    %9 = math.exp %8 : vector<8x1024xf32>
    %cst_6 = arith.constant 1.000000e+00 : f32
    %10 = vector.broadcast %cst_6 : f32 to vector<8x1024xf32>
    %11 = arith.addf %10, %9 : vector<8x1024xf32>
    %12 = tpu.reciprocal %11 {approx = true} : vector<8x1024xf32> -> vector<8x1024xf32>
    %13 = arith.truncf %12 : vector<8x1024xf32> to vector<8x1024xbf16>
    %c0_7 = arith.constant 0 : index
    %c0_8 = arith.constant 0 : index
    %14 = vector.load %arg4[%c0_7, %c0_8] : memref<1024x640xbf16, #tpu.memory_space<vmem>>, vector<1024x640xbf16>
    %cst_9 = arith.constant dense<0.000000e+00> : vector<8x640xf32>
    %15 = tpu.matmul %13, %14, %cst_9 {dimension_numbers = #tpu.dot_dimension_numbers<[1], [0], [0], [1], [0, 0, 1, 1], [], []>} : vector<8x1024xbf16>, vector<1024x640xbf16>, vector<8x640xf32> -> vector<8x640xf32>
    %c0_10 = arith.constant 0 : index
    %c0_11 = arith.constant 0 : index
    %16 = vector.load %arg5[%c0_10, %c0_11] : memref<1x640xf32, #tpu.memory_space<vmem>>, vector<1x640xf32>
    %17 = vector.broadcast %16 : vector<1x640xf32> to vector<8x640xf32>
    %18 = arith.addf %15, %17 : vector<8x640xf32>
    %cst_12 = arith.constant 0.000000e+00 : f32
    %19 = vector.broadcast %cst_12 : f32 to vector<8x640xf32>
    %20 = arith.subf %19, %18 : vector<8x640xf32>
    %21 = math.exp %20 : vector<8x640xf32>
    %cst_13 = arith.constant 1.000000e+00 : f32
    %22 = vector.broadcast %cst_13 : f32 to vector<8x640xf32>
    %23 = arith.addf %22, %21 : vector<8x640xf32>
    %24 = tpu.reciprocal %23 {approx = true} : vector<8x640xf32> -> vector<8x640xf32>
    %25 = arith.truncf %24 : vector<8x640xf32> to vector<8x640xbf16>
    %c0_14 = arith.constant 0 : index
    %c0_15 = arith.constant 0 : index
    %26 = vector.load %arg6[%c0_14, %c0_15] : memref<640x512xbf16, #tpu.memory_space<vmem>>, vector<640x512xbf16>
    %cst_16 = arith.constant dense<0.000000e+00> : vector<8x512xf32>
    %27 = tpu.matmul %25, %26, %cst_16 {dimension_numbers = #tpu.dot_dimension_numbers<[1], [0], [0], [1], [0, 0, 1, 1], [], []>} : vector<8x640xbf16>, vector<640x512xbf16>, vector<8x512xf32> -> vector<8x512xf32>
    %c0_17 = arith.constant 0 : index
    %c0_18 = arith.constant 0 : index
    %28 = vector.load %arg7[%c0_17, %c0_18] : memref<1x512xf32, #tpu.memory_space<vmem>>, vector<1x512xf32>
    %29 = vector.broadcast %28 : vector<1x512xf32> to vector<8x512xf32>
    %30 = arith.addf %27, %29 : vector<8x512xf32>
    %cst_19 = arith.constant 0.000000e+00 : f32
    %31 = vector.broadcast %cst_19 : f32 to vector<8x512xf32>
    %32 = arith.subf %31, %30 : vector<8x512xf32>
    %33 = math.exp %32 : vector<8x512xf32>
    %cst_20 = arith.constant 1.000000e+00 : f32
    %34 = vector.broadcast %cst_20 : f32 to vector<8x512xf32>
    %35 = arith.addf %34, %33 : vector<8x512xf32>
    %36 = tpu.reciprocal %35 {approx = true} : vector<8x512xf32> -> vector<8x512xf32>
    %37 = arith.truncf %36 : vector<8x512xf32> to vector<8x512xbf16>
    %c0_21 = arith.constant 0 : index
    %c0_22 = arith.constant 0 : index
    %38 = vector.load %arg8[%c0_21, %c0_22] : memref<512x640xbf16, #tpu.memory_space<vmem>>, vector<512x640xbf16>
    %cst_23 = arith.constant dense<0.000000e+00> : vector<8x640xf32>
    %39 = tpu.matmul %37, %38, %cst_23 {dimension_numbers = #tpu.dot_dimension_numbers<[1], [0], [0], [1], [0, 0, 1, 1], [], []>} : vector<8x512xbf16>, vector<512x640xbf16>, vector<8x640xf32> -> vector<8x640xf32>
    %c0_24 = arith.constant 0 : index
    %c0_25 = arith.constant 0 : index
    %40 = vector.load %arg9[%c0_24, %c0_25] : memref<1x640xf32, #tpu.memory_space<vmem>>, vector<1x640xf32>
    %41 = vector.broadcast %40 : vector<1x640xf32> to vector<8x640xf32>
    %42 = arith.addf %39, %41 : vector<8x640xf32>
    %cst_26 = arith.constant 0.000000e+00 : f32
    %43 = vector.broadcast %cst_26 : f32 to vector<8x640xf32>
    %44 = arith.subf %43, %42 : vector<8x640xf32>
    %45 = math.exp %44 : vector<8x640xf32>
    %cst_27 = arith.constant 1.000000e+00 : f32
    %46 = vector.broadcast %cst_27 : f32 to vector<8x640xf32>
    %47 = arith.addf %46, %45 : vector<8x640xf32>
    %48 = tpu.reciprocal %47 {approx = true} : vector<8x640xf32> -> vector<8x640xf32>
    %49 = arith.truncf %48 : vector<8x640xf32> to vector<8x640xbf16>
    %c0_28 = arith.constant 0 : index
    %c0_29 = arith.constant 0 : index
    %50 = vector.load %arg10[%c0_28, %c0_29] : memref<640x1024xbf16, #tpu.memory_space<vmem>>, vector<640x1024xbf16>
    %cst_30 = arith.constant dense<0.000000e+00> : vector<8x1024xf32>
    %51 = tpu.matmul %49, %50, %cst_30 {dimension_numbers = #tpu.dot_dimension_numbers<[1], [0], [0], [1], [0, 0, 1, 1], [], []>} : vector<8x640xbf16>, vector<640x1024xbf16>, vector<8x1024xf32> -> vector<8x1024xf32>
    %c0_31 = arith.constant 0 : index
    %c0_32 = arith.constant 0 : index
    %52 = vector.load %arg11[%c0_31, %c0_32] : memref<1x1024xf32, #tpu.memory_space<vmem>>, vector<1x1024xf32>
    %53 = vector.broadcast %52 : vector<1x1024xf32> to vector<8x1024xf32>
    %54 = arith.addf %51, %53 : vector<8x1024xf32>
    %cst_33 = arith.constant 0.000000e+00 : f32
    %55 = vector.broadcast %cst_33 : f32 to vector<8x1024xf32>
    %56 = arith.subf %55, %54 : vector<8x1024xf32>
    %57 = math.exp %56 : vector<8x1024xf32>
    %cst_34 = arith.constant 1.000000e+00 : f32
    %58 = vector.broadcast %cst_34 : f32 to vector<8x1024xf32>
    %59 = arith.addf %58, %57 : vector<8x1024xf32>
    %60 = tpu.reciprocal %59 {approx = true} : vector<8x1024xf32> -> vector<8x1024xf32>
    %61 = arith.truncf %60 : vector<8x1024xf32> to vector<8x1024xbf16>
    %c0_35 = arith.constant 0 : index
    %c0_36 = arith.constant 0 : index
    %62 = vector.load %arg12[%c0_35, %c0_36] : memref<1024x896xbf16, #tpu.memory_space<vmem>>, vector<1024x896xbf16>
    %cst_37 = arith.constant dense<0.000000e+00> : vector<8x896xf32>
    %63 = tpu.matmul %61, %62, %cst_37 {dimension_numbers = #tpu.dot_dimension_numbers<[1], [0], [0], [1], [0, 0, 1, 1], [], []>} : vector<8x1024xbf16>, vector<1024x896xbf16>, vector<8x896xf32> -> vector<8x896xf32>
    %c0_38 = arith.constant 0 : index
    %c0_39 = arith.constant 0 : index
    %64 = vector.load %arg13[%c0_38, %c0_39] : memref<1x896xf32, #tpu.memory_space<vmem>>, vector<1x896xf32>
    %65 = vector.broadcast %64 : vector<1x896xf32> to vector<8x896xf32>
    %66 = arith.addf %63, %65 : vector<8x896xf32>
    %cst_40 = arith.constant 0.000000e+00 : f32
    %67 = vector.broadcast %cst_40 : f32 to vector<8x896xf32>
    %68 = arith.subf %67, %66 : vector<8x896xf32>
    %69 = math.exp %68 : vector<8x896xf32>
    %cst_41 = arith.constant 1.000000e+00 : f32
    %70 = vector.broadcast %cst_41 : f32 to vector<8x896xf32>
    %71 = arith.addf %70, %69 : vector<8x896xf32>
    %72 = tpu.reciprocal %71 {approx = true} : vector<8x896xf32> -> vector<8x896xf32>
    %c0_42 = arith.constant 0 : index
    %c0_43 = arith.constant 0 : index
    %73 = vector.load %arg14[%c0_42, %c0_43] : memref<8x896xf32, #tpu.memory_space<vmem>>, vector<8x896xf32>
    tpu.vector_store %arg14[%c0_42, %c0_43], %72 {strides = array<i32>} : memref<8x896xf32, #tpu.memory_space<vmem>>, vector<8x896xf32>,
    return
  }
  func.func @transform_0(%arg0: i32) -> (i32, i32) {
    %c0_i32 = arith.constant 0 : i32
    %c0_i32_0 = arith.constant 0 : i32
    return %arg0, %c0_i32 : i32, i32
  }
  func.func @transform_1(%arg0: i32) -> (i32, i32) {
    %c0_i32 = arith.constant 0 : i32
    %c0_i32_0 = arith.constant 0 : i32
    %c0_i32_1 = arith.constant 0 : i32
    return %c0_i32, %c0_i32_0 : i32, i32
  }
  func.func @transform_2(%arg0: i32) -> (i32, i32) {
    %c0_i32 = arith.constant 0 : i32
    %c0_i32_0 = arith.constant 0 : i32
    %c0_i32_1 = arith.constant 0 : i32
    return %c0_i32, %c0_i32_0 : i32, i32
  }
  func.func @transform_3(%arg0: i32) -> (i32, i32) {
    %c0_i32 = arith.constant 0 : i32
    %c0_i32_0 = arith.constant 0 : i32
    %c0_i32_1 = arith.constant 0 : i32
    return %c0_i32, %c0_i32_0 : i32, i32
  }
  func.func @transform_4(%arg0: i32) -> (i32, i32) {
    %c0_i32 = arith.constant 0 : i32
    %c0_i32_0 = arith.constant 0 : i32
    %c0_i32_1 = arith.constant 0 : i32
    return %c0_i32, %c0_i32_0 : i32, i32
  }
  func.func @transform_5(%arg0: i32) -> (i32, i32) {
    %c0_i32 = arith.constant 0 : i32
    %c0_i32_0 = arith.constant 0 : i32
    %c0_i32_1 = arith.constant 0 : i32
    return %c0_i32, %c0_i32_0 : i32, i32
  }
  func.func @transform_6(%arg0: i32) -> (i32, i32) {
    %c0_i32 = arith.constant 0 : i32
    %c0_i32_0 = arith.constant 0 : i32
    %c0_i32_1 = arith.constant 0 : i32
    return %c0_i32, %c0_i32_0 : i32, i32
  }
  func.func @transform_7(%arg0: i32) -> (i32, i32) {
    %c0_i32 = arith.constant 0 : i32
    %c0_i32_0 = arith.constant 0 : i32
    %c0_i32_1 = arith.constant 0 : i32
    return %c0_i32, %c0_i32_0 : i32, i32
  }
  func.func @transform_8(%arg0: i32) -> (i32, i32) {
    %c0_i32 = arith.constant 0 : i32
    %c0_i32_0 = arith.constant 0 : i32
    %c0_i32_1 = arith.constant 0 : i32
    return %c0_i32, %c0_i32_0 : i32, i32
  }
  func.func @transform_9(%arg0: i32) -> (i32, i32) {
    %c0_i32 = arith.constant 0 : i32
    %c0_i32_0 = arith.constant 0 : i32
    %c0_i32_1 = arith.constant 0 : i32
    return %c0_i32, %c0_i32_0 : i32, i32
  }
  func.func @transform_10(%arg0: i32) -> (i32, i32) {
    %c0_i32 = arith.constant 0 : i32
    %c0_i32_0 = arith.constant 0 : i32
    %c0_i32_1 = arith.constant 0 : i32
    return %c0_i32, %c0_i32_0 : i32, i32
  }
  func.func @transform_11(%arg0: i32) -> (i32, i32) {
    %c0_i32 = arith.constant 0 : i32
    %c0_i32_0 = arith.constant 0 : i32
    %c0_i32_1 = arith.constant 0 : i32
    return %c0_i32, %c0_i32_0 : i32, i32
  }
  func.func @transform_12(%arg0: i32) -> (i32, i32) {
    %c0_i32 = arith.constant 0 : i32
    %c0_i32_0 = arith.constant 0 : i32
    %c0_i32_1 = arith.constant 0 : i32
    return %c0_i32, %c0_i32_0 : i32, i32
  }
  func.func @transform_13(%arg0: i32) -> (i32, i32) {
    %c0_i32 = arith.constant 0 : i32
    %c0_i32_0 = arith.constant 0 : i32
    return %arg0, %c0_i32 : i32, i32
  }
}

</mosaic_0001>

<bundles_post_ra>
// kernel: tpu_custom_call.1
= control target key start
LH: loop header
LB: loop body
LE: loop exit
PB: predicated region body
PF: predicated region fallthrough
CT: control target
= control target key end

     0   :  { %18 = vsyncpa [#allocation3], 0  ;;  %s19642_s0 = inlined_call_operand.hbm [shape: f32[8,896], index: 0, kind: input, shape index: {}]   ;;  %s19643_s1 = inlined_call_operand.hbm [shape: bf16[896,1024], index: 1, kind: input, shape index: {}]   ;;  %s19644_s2 = inlined_call_operand.hbm [shape: f32[1,1024], index: 2, kind: input, shape index: {}]   ;;  %s19645_s3 = inlined_call_operand.hbm [shape: bf16[1024,640], index: 3, kind: input, shape index: {}]   ;;  %s19646_s4 = inlined_call_operand.hbm [shape: f32[1,640], index: 4, kind: input, shape index: {}]   ;;  %s19647_s5 = inlined_call_operand.hbm [shape: bf16[640,512], index: 5, kind: input, shape index: {}]   ;;  %s19648_s6 = inlined_call_operand.hbm [shape: f32[1,512], index: 6, kind: input, shape index: {}]   ;;  %s19649_s7 = inlined_call_operand.hbm [shape: bf16[512,640], index: 7, kind: input, shape index: {}]   ;;  %s19650_s8 = inlined_call_operand.hbm [shape: f32[1,640], index: 8, kind: input, shape index: {}]   ;;  %s19651_s9 = inlined_call_operand.hbm [shape: bf16[640,1024], index: 9, kind: input, shape index: {}]   ;;  %s19652_s10 = inlined_call_operand.hbm [shape: f32[1,1024], index: 10, kind: input, shape index: {}]   ;;  %s19653_s11 = inlined_call_operand.hbm [shape: bf16[1024,896], index: 11, kind: input, shape index: {}]   ;;  %s19654_s12 = inlined_call_operand.hbm [shape: f32[1,896], index: 12, kind: input, shape index: {}]   ;;  %s19655_s13 = inlined_call_operand.hbm [shape: f32[8,896], index: 13, kind: output, shape index: {}]  }
   0x1   :  { %19 = vsyncpa [#allocation6], 0 }
   0x2   :  { %20 = vsyncpa [#allocation9], 0 }
   0x3   :  { %21 = vsyncpa [#allocation12], 0 }
   0x4   :  { %22 = vsyncpa [#allocation15], 0 }
   0x5   :  { %23 = vsyncpa [#allocation18], 0 }
   0x6   :  { %24 = vsyncpa [#allocation21], 0 }
   0x7   :  { %25 = vsyncpa [#allocation4], 0  ;;  %s18996_s25 = smov [#allocation5]  }
   0x8   :  { %s41_s26 = sshll.u32 %s18996_s25, 4  ;;  %s42_s26 = int_to_ptr.vmem [resolvable:$true] %s41_s26 }
   0x9   :  { %s18708_s27 = scalar_lea.vmem %s42_s26, 57344  ;;  %p18713_p1 = scmp.lt.s32.totalorder %s42_s26, %s42_s26 }
   0xa   :  { %p18709_p0 = scmp.ne.s32.totalorder %s42_s26, %s18708_s27  ;;  %p18714_p2 = scmp.lt.s32.totalorder %s18708_s27, %s18708_s27 }
   0xc   :  { %p18715_p3 = por %p18714_p2, %p18713_p1 }
   0xe   :  { %p18716_p4 = pnand %p18715_p3, %p18709_p0 }
  0x10   :  { %18719 = shalt.err (!%p18716_p4)
}
  0x11   :  { %s18997_s28 = smov 512   ;;  %s18998_s29 = smov 32  }
  0x12   :  { %47 = dma.hbm_to_vmem [thread:$0]  %s19643_s1, 57344, %s42_s26, [#allocation6], %s18997_s28, %s18997_s28, %s18998_s29  }
  0x13   :  { %s18999_s15 = smov [#allocation8]  }
  0x14   :  { %s63_s16 = sshll.u32 %s18999_s15, 4  ;;  %s64_s16 = int_to_ptr.vmem [resolvable:$true] %s63_s16 }
  0x15   :  { %s18728_s17 = scalar_lea.vmem %s64_s16, 40960  ;;  %p18733_p6 = scmp.lt.s32.totalorder %s64_s16, %s64_s16 }
  0x16   :  { %p18729_p5 = scmp.ne.s32.totalorder %s64_s16, %s18728_s17  ;;  %p18734_p7 = scmp.lt.s32.totalorder %s18728_s17, %s18728_s17 }
  0x18   :  { %p18735_p8 = por %p18734_p7, %p18733_p6 }
  0x1a   :  { %p18736_p9 = pnand %p18735_p8, %p18729_p5 }
  0x1c   :  { %18739 = shalt.err (!%p18736_p9)
}
  0x1d   :  { %s19000_s18 = smov 320   ;;  %s19001_s19 = smov 20  }
  0x1e   :  { %69 = dma.hbm_to_vmem [thread:$0]  %s19645_s3, 40960, %s64_s16, [#allocation9], %s19000_s18, %s19000_s18, %s19001_s19  }
  0x1f   :  { %s19002_s1 = smov [#allocation11]  }
  0x20   :  { %s85_s22 = sshll.u32 %s19002_s1, 4  ;;  %s86_s22 = int_to_ptr.vmem [resolvable:$true] %s85_s22 }
  0x21   :  { %s18748_s23 = scalar_lea.vmem %s86_s22, 20480  ;;  %p18753_p11 = scmp.lt.s32.totalorder %s86_s22, %s86_s22 }
  0x22   :  { %p18749_p10 = scmp.ne.s32.totalorder %s86_s22, %s18748_s23  ;;  %p18754_p12 = scmp.lt.s32.totalorder %s18748_s23, %s18748_s23 }
  0x24   :  { %p18755_p13 = por %p18754_p12, %p18753_p11 }
  0x26   :  { %p18756_p0 = pnand %p18755_p13, %p18749_p10 }
  0x28   :  { %18759 = shalt.err (!%p18756_p0)
}
  0x29   :  { %s19003_s24 = smov 256   ;;  %s19004_s25 = smov 16  }
  0x2a   :  { %91 = dma.hbm_to_vmem [thread:$0]  %s19647_s5, 20480, %s86_s22, [#allocation12], %s19003_s24, %s19003_s24, %s19004_s25  }
  0x2b   :  { %s19005_s30 = smov [#allocation14]   ;;  %s19006_s3 = smov [#allocation17]  }
  0x2c   :  { %s107_s14 = sshll.u32 %s19005_s30, 4  ;;  %s129_s15 = sshll.u32 %s19006_s3, 4  ;;  %s108_s14 = int_to_ptr.vmem [resolvable:$true] %s107_s14  ;;  %s130_s15 = int_to_ptr.vmem [resolvable:$true] %s129_s15 }
  0x2d   :  { %s18768_s16 = scalar_lea.vmem %s108_s14, 20480  ;;  %p18773_p2 = scmp.lt.s32.totalorder %s108_s14, %s108_s14 }
  0x2e   :  { %p18769_p1 = scmp.ne.s32.totalorder %s108_s14, %s18768_s16  ;;  %p18774_p3 = scmp.lt.s32.totalorder %s18768_s16, %s18768_s16 }
  0x30   :  { %p18775_p4 = por %p18774_p3, %p18773_p2 }
  0x32   :  { %p18776_p5 = pnand %p18775_p4, %p18769_p1 }
  0x34   :  { %18779 = shalt.err (!%p18776_p5)
}
  0x35   :  { %113 = dma.hbm_to_vmem [thread:$0]  %s19649_s7, 20480, %s108_s14, [#allocation15], %s19000_s18, %s19000_s18, %s19001_s19  }
  0x36   :  { %s18788_s5 = scalar_lea.vmem %s130_s15, 40960  ;;  %p18793_p7 = scmp.lt.s32.totalorder %s130_s15, %s130_s15 }
  0x37   :  { %p18789_p6 = scmp.ne.s32.totalorder %s130_s15, %s18788_s5  ;;  %p18794_p8 = scmp.lt.s32.totalorder %s18788_s5, %s18788_s5 }
  0x39   :  { %p18795_p9 = por %p18794_p8, %p18793_p7 }
  0x3b   :  { %p18796_p10 = pnand %p18795_p9, %p18789_p6 }
  0x3d   :  { %18799 = shalt.err (!%p18796_p10)
}
  0x3e   :  { %135 = dma.hbm_to_vmem [thread:$0]  %s19651_s9, 40960, %s130_s15, [#allocation18], %s18997_s28, %s18997_s28, %s18998_s29  }
  0x3f   :  { %s19007_s22 = smov [#allocation20]  }
  0x40   :  { %s151_s23 = sshll.u32 %s19007_s22, 4  ;;  %s152_s23 = int_to_ptr.vmem [resolvable:$true] %s151_s23 }
  0x41   :  { %s18808_s24 = scalar_lea.vmem %s152_s23, 57344  ;;  %p18813_p12 = scmp.lt.s32.totalorder %s152_s23, %s152_s23 }
  0x42   :  { %p18809_p11 = scmp.ne.s32.totalorder %s152_s23, %s18808_s24  ;;  %p18814_p13 = scmp.lt.s32.totalorder %s18808_s24, %s18808_s24 }
  0x44   :  { %p18815_p0 = por %p18814_p13, %p18813_p12 }
  0x46   :  { %p18816_p1 = pnand %p18815_p0, %p18809_p11 }
  0x48   :  { %18819 = shalt.err (!%p18816_p1)
}
  0x49   :  { %s19008_s7 = smov 448   ;;  %s19009_s18 = smov 28  }
  0x4a   :  { %157 = dma.hbm_to_vmem [thread:$0]  %s19653_s11, 57344, %s152_s23, [#allocation21], %s19008_s7, %s19008_s7, %s19009_s18  }
  0x4b   :  { %s19010_s26 = smov [#allocation2]   ;;  %s19011_s30 = smov [#allocation7]  }
  0x4c   :  { %s32_s27 = sshll.u32 %s19010_s26, 4  ;;  %s54_s9 = sshll.u32 %s19011_s30, 4  ;;  %s33_s27 = int_to_ptr.vmem [resolvable:$true] %s32_s27  ;;  %s55_s9 = int_to_ptr.vmem [resolvable:$true] %s54_s9 }
  0x4d   :  { %s18828_s28 = scalar_lea.vmem %s33_s27, 896  ;;  %p18833_p3 = scmp.lt.s32.totalorder %s33_s27, %s33_s27 }
  0x4e   :  { %p18829_p2 = scmp.ne.s32.totalorder %s33_s27, %s18828_s28  ;;  %p18834_p4 = scmp.lt.s32.totalorder %s18828_s28, %s18828_s28 }
  0x50   :  { %p18835_p5 = por %p18834_p4, %p18833_p3 }
  0x52   :  { %p18836_p6 = pnand %p18835_p5, %p18829_p2 }
  0x54   :  { %18839 = shalt.err (!%p18836_p6)
}
  0x55   :  { %35 = dma.hbm_to_vmem [thread:$0]  %s19642_s0, 896, %s33_s27, [#allocation3]  }
  0x56   :  { %s18848_s3 = scalar_lea.vmem %s55_s9, 128  ;;  %p18853_p8 = scmp.lt.s32.totalorder %s55_s9, %s55_s9 }
  0x57   :  { %p18849_p7 = scmp.ne.s32.totalorder %s55_s9, %s18848_s3  ;;  %p18854_p9 = scmp.lt.s32.totalorder %s18848_s3, %s18848_s3 }
  0x59   :  { %p18855_p10 = por %p18854_p9, %p18853_p8 }
  0x5b   :  { %p18856_p11 = pnand %p18855_p10, %p18849_p7 }
  0x5d   :  { %18859 = shalt.err (!%p18856_p11)
}
  0x5e   :  { %57 = dma.hbm_to_vmem [thread:$0]  %s19644_s2, 128, %s55_s9, [#allocation6]  }
  0x5f   :  { %s19012_s16 = smov [#allocation10]   ;;  %s19013_s20 = smov [#allocation13]  }
  0x60   :  { %s76_s17 = sshll.u32 %s19012_s16, 4  ;;  %s98_s5 = sshll.u32 %s19013_s20, 4  ;;  %s77_s17 = int_to_ptr.vmem [resolvable:$true] %s76_s17  ;;  %s99_s5 = int_to_ptr.vmem [resolvable:$true] %s98_s5 }
  0x61   :  { %s18868_s21 = scalar_lea.vmem %s77_s17, 80  ;;  %s18872_s0 = scalar_lea.vmem %s77_s17, 96 }
  0x62   :  { %p18869_p12 = scmp.ne.s32.totalorder %s77_s17, %s18868_s21  ;;  %p18873_p13 = scmp.lt.s32.totalorder %s77_s17, %s77_s17 }
  0x63   :  { %p18874_p0 = scmp.lt.s32.totalorder %s18872_s0, %s18868_s21 }
  0x65   :  { %p18875_p1 = por %p18874_p0, %p18873_p13 }
  0x67   :  { %p18876_p2 = pnand %p18875_p1, %p18869_p12 }
  0x69   :  { %18879 = shalt.err (!%p18876_p2)
}
  0x6a   :  { %79 = dma.hbm_to_vmem [thread:$0]  %s19646_s4, 80, %s77_s17, [#allocation9]  }
  0x6b   :  { %s18888_s23 = scalar_lea.vmem %s99_s5, 64  ;;  %p18893_p4 = scmp.lt.s32.totalorder %s99_s5, %s99_s5 }
  0x6c   :  { %p18889_p3 = scmp.ne.s32.totalorder %s99_s5, %s18888_s23  ;;  %p18894_p5 = scmp.lt.s32.totalorder %s18888_s23, %s18888_s23 }
  0x6e   :  { %p18895_p6 = por %p18894_p5, %p18893_p4 }
  0x70   :  { %p18896_p7 = pnand %p18895_p6, %p18889_p3 }
  0x72   :  { %18899 = shalt.err (!%p18896_p7)
}
  0x73   :  { %101 = dma.hbm_to_vmem [thread:$0]  %s19648_s6, 64, %s99_s5, [#allocation12]  }
  0x74   :  { %s19014_s7 = smov [#allocation16]   ;;  %s19015_s19 = smov [#allocation19]  }
  0x75   :  { %s120_s18 = sshll.u32 %s19014_s7, 4  ;;  %s142_s25 = sshll.u32 %s19015_s19, 4  ;;  %s121_s18 = int_to_ptr.vmem [resolvable:$true] %s120_s18  ;;  %s143_s25 = int_to_ptr.vmem [resolvable:$true] %s142_s25 }
  0x76   :  { %s18908_s26 = scalar_lea.vmem %s121_s18, 80  ;;  %s18912_s4 = scalar_lea.vmem %s121_s18, 96 }
  0x77   :  { %p18909_p8 = scmp.ne.s32.totalorder %s121_s18, %s18908_s26  ;;  %p18913_p9 = scmp.lt.s32.totalorder %s121_s18, %s121_s18 }
  0x78   :  { %p18914_p10 = scmp.lt.s32.totalorder %s18912_s4, %s18908_s26 }
  0x7a   :  { %p18915_p11 = por %p18914_p10, %p18913_p9 }
  0x7c   :  { %p18916_p12 = pnand %p18915_p11, %p18909_p8 }
  0x7e   :  { %18919 = shalt.err (!%p18916_p12)
}
  0x7f   :  { %123 = dma.hbm_to_vmem [thread:$0]  %s19650_s8, 80, %s121_s18, [#allocation15]  }
  0x80   :  { %s18928_s9 = scalar_lea.vmem %s143_s25, 128  ;;  %p18933_p0 = scmp.lt.s32.totalorder %s143_s25, %s143_s25 }
  0x81   :  { %p18929_p13 = scmp.ne.s32.totalorder %s143_s25, %s18928_s9  ;;  %p18934_p1 = scmp.lt.s32.totalorder %s18928_s9, %s18928_s9 }
  0x83   :  { %p18935_p2 = por %p18934_p1, %p18933_p0 }
  0x85   :  { %p18936_p3 = pnand %p18935_p2, %p18929_p13 }
  0x87   :  { %18939 = shalt.err (!%p18936_p3)
}
  0x88   :  { %145 = dma.hbm_to_vmem [thread:$0]  %s19652_s10, 128, %s143_s25, [#allocation18]  }
  0x89   :  { %s19016_s29 = smov [#allocation22]  }
  0x8a   :  { %s164_s14 = sshll.u32 %s19016_s29, 4  ;;  %s165_s14 = int_to_ptr.vmem [resolvable:$true] %s164_s14 }
  0x8b   :  { %s18948_s3 = scalar_lea.vmem %s165_s14, 112  ;;  %s18952_s11 = scalar_lea.vmem %s165_s14, 128 }
  0x8c   :  { %p18949_p4 = scmp.ne.s32.totalorder %s165_s14, %s18948_s3  ;;  %p18953_p5 = scmp.lt.s32.totalorder %s165_s14, %s165_s14 }
  0x8d   :  { %p18954_p6 = scmp.lt.s32.totalorder %s18952_s11, %s18948_s3 }
  0x8f   :  { %p18955_p7 = por %p18954_p6, %p18953_p5 }
  0x91   :  { %p18956_p8 = pnand %p18955_p7, %p18949_p4 }
  0x93   :  { %18959 = shalt.err (!%p18956_p8)
}
  0x94   :  { %167 = dma.hbm_to_vmem [thread:$0]  %s19654_s12, 112, %s165_s14, [#allocation21]  }
  0x95   :  { %18980 = dma.done.wait [#allocation3], 896  }
  0x96   :  { %18981 = vsyncadd [#allocation3], 4294966400 }
  0x97   :  { %18982 = dma.done.wait [#allocation6], 57472  }
  0x98   :  { %18983 = vsyncadd [#allocation6], 4294909824 }
  0x99   :  { %18984 = dma.done.wait [#allocation9], 41040  }
  0x9a   :  { %18985 = vsyncadd [#allocation9], 4294926256 }
  0x9b   :  { %18986 = dma.done.wait [#allocation12], 20544  }
  0x9c   :  { %18987 = vsyncadd [#allocation12], 4294946752 }
  0x9d   :  { %18988 = dma.done.wait [#allocation15], 20560  }
  0x9e   :  { %18989 = vsyncadd [#allocation15], 4294946736 }
  0x9f   :  { %18990 = dma.done.wait [#allocation18], 41088  }
  0xa0   :  { %18991 = vsyncadd [#allocation18], 4294926208 }
  0xa1   :  { %18992 = dma.done.wait [#allocation21], 57456  }
  0xa2   :  { %18993 = vsyncadd [#allocation21], 4294909840  ;;  %v278_v0 = vld [vmem:[#allocation5 + $0x1c0] sm:$0xff]  ;;  %v209_v53 = vld [vmem:[#allocation2 + $0x8] sm:$0xff]  ;;  %s19018_s10 = smov [#allocation23]  }
  0xa3   :  { %v282_v1 = vld [vmem:[#allocation5 + $0x1e0] sm:$0xff]  ;;  %v19140_v58 = vpack.c.bf16 %v209_v53, %v209_v53  ;;  %s14881_s12 = sshll.u32 %s19018_s10, 4  ;;  %s14882_s12 = int_to_ptr.vmem [resolvable:$true] %s14881_s12 }
  0xa4   :  { %v406_v2 = vld [vmem:[#allocation5 + $0x5c0] sm:$0xff]  ;;  %v14953_v3 = vcombine.high %v278_v0, %v282_v1  ;;  %v14952_v5 = vcombine.low %v278_v0, %v282_v1  ;;  %s18960_s16 = scalar_lea.vmem %s14882_s12, 896  ;;  %p18965_p10 = scmp.lt.s32.totalorder %s14882_s12, %s14882_s12 }
  0xa5   :  { %v410_v4 = vld [vmem:[#allocation5 + $0x5e0] sm:$0xff]  ;;  %2984 = vmatprep.mubr.bf16.mxu0 %v19140_v58  ;;  %p18961_p9 = scmp.ne.s32.totalorder %s14882_s12, %s18960_s16  ;;  %p18966_p11 = scmp.lt.s32.totalorder %s18960_s16, %s18960_s16 }
  0xa6   :  { %v270_v6 = vld [vmem:[#allocation5 + $0x180] sm:$0xff]  ;;  %v15081_v8 = vcombine.high %v406_v2, %v410_v4  ;;  %v15080_v9 = vcombine.low %v406_v2, %v410_v4  ;;  %2952 = vmatprep.subr.bf16.mxu0 %v14953_v3 }
  0xa7   :  { %v274_v7 = vld [vmem:[#allocation5 + $0x1a0] sm:$0xff]  ;;  %2953 = vmatpush1.bf16.msra.mxu0 %v14952_v5  ;;  %p18967_p12 = por %p18966_p11, %p18965_p10 }
  0xa8   :  { %v14945_v10 = vcombine.high %v270_v6, %v274_v7  ;;  %v398_v11 = vld [vmem:[#allocation5 + $0x580] sm:$0xff]  ;;  %2993 = vmatprep.subr.bf16.mxu1 %v15081_v8  ;;  %v14944_v18 = vcombine.low %v270_v6, %v274_v7 }
  0xa9   :  { %v402_v12 = vld [vmem:[#allocation5 + $0x5a0] sm:$0xff]  ;;  %2994 = vmatpush1.bf16.msra.mxu1 %v15080_v9  ;;  %p18968_p13 = pnand %p18967_p12, %p18961_p9 }
  0xaa   :  { %v262_v13 = vld [vmem:[#allocation5 + $0x140] sm:$0xff]  ;;  %v15073_v14 = vcombine.high %v398_v11, %v402_v12  ;;  %2954 = vmatprep.subr.bf16.mxu0 %v14945_v10  ;;  %v15072_v19 = vcombine.low %v398_v11, %v402_v12 }
  0xab   :  { %v266_v15 = vld [vmem:[#allocation5 + $0x160] sm:$0xff]  ;;  %2955 = vmatpush1.bf16.msra.mxu0 %v14944_v18 }
  0xac   :  { %v390_v16 = vld [vmem:[#allocation5 + $0x540] sm:$0xff]  ;;  %v14937_v20 = vcombine.high %v262_v13, %v266_v15  ;;  %2995 = vmatprep.subr.bf16.mxu1 %v15073_v14  ;;  %v14936_v26 = vcombine.low %v262_v13, %v266_v15 }
  0xad   :  { %v394_v17 = vld [vmem:[#allocation5 + $0x560] sm:$0xff]  ;;  %2996 = vmatpush1.bf16.msra.mxu1 %v15072_v19 }
  0xae   :  { %v15065_v21 = vcombine.high %v390_v16, %v394_v17  ;;  %v254_v22 = vld [vmem:[#allocation5 + $0x100] sm:$0xff]  ;;  %2956 = vmatprep.subr.bf16.mxu0 %v14937_v20  ;;  %v15064_v27 = vcombine.low %v390_v16, %v394_v17 }
  0xaf   :  { %v258_v23 = vld [vmem:[#allocation5 + $0x120] sm:$0xff]  ;;  %2957 = vmatpush1.bf16.msra.mxu0 %v14936_v26 }
  0xb0   :  { %v382_v24 = vld [vmem:[#allocation5 + $0x500] sm:$0xff]  ;;  %v14929_v28 = vcombine.high %v254_v22, %v258_v23  ;;  %2997 = vmatprep.subr.bf16.mxu1 %v15065_v21  ;;  %v14928_v34 = vcombine.low %v254_v22, %v258_v23 }
  0xb1   :  { %v386_v25 = vld [vmem:[#allocation5 + $0x520] sm:$0xff]  ;;  %2998 = vmatpush1.bf16.msra.mxu1 %v15064_v27 }
  0xb2   :  { %v15057_v29 = vcombine.high %v382_v24, %v386_v25  ;;  %v246_v30 = vld [vmem:[#allocation5 + $0xc0] sm:$0xff]  ;;  %2958 = vmatprep.subr.bf16.mxu0 %v14929_v28  ;;  %v15056_v35 = vcombine.low %v382_v24, %v386_v25 }
  0xb3   :  { %v250_v31 = vld [vmem:[#allocation5 + $0xe0] sm:$0xff]  ;;  %2959 = vmatpush1.bf16.msra.mxu0 %v14928_v34 }
  0xb4   :  { %v374_v32 = vld [vmem:[#allocation5 + $0x4c0] sm:$0xff]  ;;  %v14921_v36 = vcombine.high %v246_v30, %v250_v31  ;;  %2999 = vmatprep.subr.bf16.mxu1 %v15057_v29  ;;  %v14920_v42 = vcombine.low %v246_v30, %v250_v31 }
  0xb5   :  { %v378_v33 = vld [vmem:[#allocation5 + $0x4e0] sm:$0xff]  ;;  %3000 = vmatpush1.bf16.msra.mxu1 %v15056_v35 }
  0xb6   :  { %v15049_v37 = vcombine.high %v374_v32, %v378_v33  ;;  %v238_v38 = vld [vmem:[#allocation5 + $0x80] sm:$0xff]  ;;  %2960 = vmatprep.subr.bf16.mxu0 %v14921_v36  ;;  %v15048_v43 = vcombine.low %v374_v32, %v378_v33 }
  0xb7   :  { %v242_v39 = vld [vmem:[#allocation5 + $0xa0] sm:$0xff]  ;;  %2961 = vmatpush1.bf16.msra.mxu0 %v14920_v42 }
  0xb8   :  { %v366_v40 = vld [vmem:[#allocation5 + $0x480] sm:$0xff]  ;;  %v14913_v44 = vcombine.high %v238_v38, %v242_v39  ;;  %3001 = vmatprep.subr.bf16.mxu1 %v15049_v37  ;;  %v14912_v50 = vcombine.low %v238_v38, %v242_v39 }
  0xb9   :  { %v370_v41 = vld [vmem:[#allocation5 + $0x4a0] sm:$0xff]  ;;  %3002 = vmatpush1.bf16.msra.mxu1 %v15048_v43 }
  0xba   :  { %v15041_v45 = vcombine.high %v366_v40, %v370_v41  ;;  %v230_v46 = vld [vmem:[#allocation5 + $0x40] sm:$0xff]  ;;  %2962 = vmatprep.subr.bf16.mxu0 %v14913_v44  ;;  %v15040_v51 = vcombine.low %v366_v40, %v370_v41 }
  0xbb   :  { %v234_v47 = vld [vmem:[#allocation5 + $0x60] sm:$0xff]  ;;  %2963 = vmatpush1.bf16.msra.mxu0 %v14912_v50 }
  0xbc   :  { %v358_v48 = vld [vmem:[#allocation5 + $0x440] sm:$0xff]  ;;  %v14905_v52 = vcombine.high %v230_v46, %v234_v47  ;;  %3003 = vmatprep.subr.bf16.mxu1 %v15041_v45  ;;  %v14904_v62 = vcombine.low %v230_v46, %v234_v47 }
  0xbd   :  { %v362_v49 = vld [vmem:[#allocation5 + $0x460] sm:$0xff]  ;;  %3004 = vmatpush1.bf16.msra.mxu1 %v15040_v51 }
  0xbe   :  { %v211_v54 = vld [vmem:[#allocation2 + $0x18] sm:$0xff]  ;;  %v15033_v55 = vcombine.high %v358_v48, %v362_v49  ;;  %2964 = vmatprep.subr.bf16.mxu0 %v14905_v52  ;;  %v15032_v63 = vcombine.low %v358_v48, %v362_v49 }
  0xbf   :  { %v222_v56 = vld [vmem:[#allocation5] sm:$0xff]  ;;  %v19142_v59 = vpack.c.bf16 %v211_v54, %v211_v54  ;;  %2965 = vmatpush1.bf16.msra.mxu0 %v14904_v62 }
  0xc0   :  { %v226_v57 = vld [vmem:[#allocation5 + $0x20] sm:$0xff]  ;;  %3005 = vmatprep.subr.bf16.mxu1 %v15033_v55 }
  0xc1   :  { %v350_v60 = vld [vmem:[#allocation5 + $0x400] sm:$0xff]  ;;  %v14897_v0 = vcombine.high %v222_v56, %v226_v57  ;;  %3025 = vmatprep.mubr.bf16.mxu1 %v19142_v59  ;;  %v14896_v6 = vcombine.low %v222_v56, %v226_v57  ;;  %3006 = vmatpush1.bf16.msra.mxu1 %v15032_v63 }
  0xc2   :  { %v354_v61 = vld [vmem:[#allocation5 + $0x420] sm:$0xff] }
  0xc3   :  { %v15025_v1 = vcombine.high %v350_v60, %v354_v61  ;;  %v342_v2 = vld [vmem:[#allocation5 + $0x3c0] sm:$0xff]  ;;  %2966 = vmatprep.subr.bf16.mxu0 %v14897_v0  ;;  %v15024_v7 = vcombine.low %v350_v60, %v354_v61 }
  0xc4   :  { %v346_v3 = vld [vmem:[#allocation5 + $0x3e0] sm:$0xff]  ;;  %2967 = vmatpush1.bf16.msra.mxu0 %v14896_v6 }
  0xc5   :  { %v470_v4 = vld [vmem:[#allocation5 + $0x7c0] sm:$0xff]  ;;  %v15017_v8 = vcombine.high %v342_v2, %v346_v3  ;;  %3007 = vmatprep.subr.bf16.mxu1 %v15025_v1  ;;  %v15016_v14 = vcombine.low %v342_v2, %v346_v3 }
  0xc6   :  { %v474_v5 = vld [vmem:[#allocation5 + $0x7e0] sm:$0xff]  ;;  %3008 = vmatpush1.bf16.msra.mxu1 %v15024_v7 }
  0xc7   :  { %v15145_v9 = vcombine.high %v470_v4, %v474_v5  ;;  %v334_v10 = vld [vmem:[#allocation5 + $0x380] sm:$0xff]  ;;  %2968 = vmatprep.subr.bf16.mxu0 %v15017_v8  ;;  %v15144_v15 = vcombine.low %v470_v4, %v474_v5 }
  0xc8   :  { %v338_v11 = vld [vmem:[#allocation5 + $0x3a0] sm:$0xff]  ;;  %2969 = vmatpush2.bf16.msra.mxu0 %v15016_v14 }
  0xc9   :  { %v462_v12 = vld [vmem:[#allocation5 + $0x780] sm:$0xff]  ;;  %v15009_v16 = vcombine.high %v334_v10, %v338_v11  ;;  %3009 = vmatprep.subr.bf16.mxu1 %v15145_v9  ;;  %v15008_v22 = vcombine.low %v334_v10, %v338_v11  ;;  %v208_v9 = vld [vmem:[#allocation2] sm:$0xff]  ;;  %v210_v11 = vld [vmem:[#allocation2 + $0x10] sm:$0xff] }
  0xca   :  { %v466_v13 = vld [vmem:[#allocation5 + $0x7a0] sm:$0xff]  ;;  %3010 = vmatpush2.bf16.msra.mxu1 %v15144_v15 }
  0xcb   :  { %v15137_v17 = vcombine.high %v462_v12, %v466_v13  ;;  %v326_v18 = vld [vmem:[#allocation5 + $0x340] sm:$0xff]  ;;  %2970 = vmatprep.subr.bf16.mxu0 %v15009_v16  ;;  %v15136_v23 = vcombine.low %v462_v12, %v466_v13  ;;  %v19146_v16 = vpack.c.bf16 %v208_v9, %v208_v9 }
  0xcc   :  { %v330_v19 = vld [vmem:[#allocation5 + $0x360] sm:$0xff]  ;;  %2971 = vmatpush2.bf16.msra.mxu0 %v15008_v22 }
  0xcd   :  { %v454_v20 = vld [vmem:[#allocation5 + $0x740] sm:$0xff]  ;;  %v15001_v24 = vcombine.high %v326_v18, %v330_v19  ;;  %3011 = vmatprep.subr.bf16.mxu1 %v15137_v17  ;;  %v15000_v30 = vcombine.low %v326_v18, %v330_v19  ;;  %v19148_v19 = vpack.c.bf16 %v210_v11, %v210_v11 }
  0xce   :  { %v458_v21 = vld [vmem:[#allocation5 + $0x760] sm:$0xff]  ;;  %3012 = vmatpush2.bf16.msra.mxu1 %v15136_v23 }
  0xcf   :  { %v15129_v25 = vcombine.high %v454_v20, %v458_v21  ;;  %v318_v26 = vld [vmem:[#allocation5 + $0x300] sm:$0xff]  ;;  %2972 = vmatprep.subr.bf16.mxu0 %v15001_v24  ;;  %v15128_v31 = vcombine.low %v454_v20, %v458_v21  ;;  %v213_v21 = vld [vmem:[#allocation2 + $0x28] sm:$0xff] }
  0xd0   :  { %v322_v27 = vld [vmem:[#allocation5 + $0x320] sm:$0xff]  ;;  %2973 = vmatpush2.bf16.msra.mxu0 %v15000_v30 }
  0xd1   :  { %v446_v28 = vld [vmem:[#allocation5 + $0x700] sm:$0xff]  ;;  %v14993_v32 = vcombine.high %v318_v26, %v322_v27  ;;  %3013 = vmatprep.subr.bf16.mxu1 %v15129_v25  ;;  %v14992_v38 = vcombine.low %v318_v26, %v322_v27 }
  0xd2   :  { %v450_v29 = vld [vmem:[#allocation5 + $0x720] sm:$0xff]  ;;  %3014 = vmatpush2.bf16.msra.mxu1 %v15128_v31 }
  0xd3   :  { %v15121_v33 = vcombine.high %v446_v28, %v450_v29  ;;  %v310_v34 = vld [vmem:[#allocation5 + $0x2c0] sm:$0xff]  ;;  %2974 = vmatprep.subr.bf16.mxu0 %v14993_v32  ;;  %v15120_v39 = vcombine.low %v446_v28, %v450_v29  ;;  %v19151_v29 = vpack.c.bf16 %v213_v21, %v213_v21 }
  0xd4   :  { %v314_v35 = vld [vmem:[#allocation5 + $0x2e0] sm:$0xff]  ;;  %2975 = vmatpush2.bf16.msra.mxu0 %v14992_v38  ;;  %v19017_v38 = vmov 0  }
  0xd5   :  { %v438_v36 = vld [vmem:[#allocation5 + $0x6c0] sm:$0xff]  ;;  %v14985_v40 = vcombine.high %v310_v34, %v314_v35  ;;  %3015 = vmatprep.subr.bf16.mxu1 %v15121_v33  ;;  %v14984_v46 = vcombine.low %v310_v34, %v314_v35 }
  0xd6   :  { %v442_v37 = vld [vmem:[#allocation5 + $0x6e0] sm:$0xff]  ;;  %3016 = vmatpush2.bf16.msra.mxu1 %v15120_v39 }
  0xd7   :  { %v15113_v41 = vcombine.high %v438_v36, %v442_v37  ;;  %v302_v42 = vld [vmem:[#allocation5 + $0x280] sm:$0xff]  ;;  %2976 = vmatprep.subr.bf16.mxu0 %v14985_v40  ;;  %v15112_v47 = vcombine.low %v438_v36, %v442_v37 }
  0xd8   :  { %v306_v43 = vld [vmem:[#allocation5 + $0x2a0] sm:$0xff]  ;;  %2977 = vmatpush2.bf16.msra.mxu0 %v14984_v46 }
  0xd9   :  { %v430_v44 = vld [vmem:[#allocation5 + $0x680] sm:$0xff]  ;;  %v14977_v48 = vcombine.high %v302_v42, %v306_v43  ;;  %3017 = vmatprep.subr.bf16.mxu1 %v15113_v41  ;;  %v14976_v54 = vcombine.low %v302_v42, %v306_v43 }
  0xda   :  { %v434_v45 = vld [vmem:[#allocation5 + $0x6a0] sm:$0xff]  ;;  %3018 = vmatpush2.bf16.msra.mxu1 %v15112_v47 }
  0xdb   :  { %v15105_v49 = vcombine.high %v430_v44, %v434_v45  ;;  %v294_v50 = vld [vmem:[#allocation5 + $0x240] sm:$0xff]  ;;  %2978 = vmatprep.subr.bf16.mxu0 %v14977_v48  ;;  %v15104_v55 = vcombine.low %v430_v44, %v434_v45 }
  0xdc   :  { %v298_v51 = vld [vmem:[#allocation5 + $0x260] sm:$0xff]  ;;  %2979 = vmatpush2.bf16.msra.mxu0 %v14976_v54 }
  0xdd   :  { %v422_v52 = vld [vmem:[#allocation5 + $0x640] sm:$0xff]  ;;  %v14969_v56 = vcombine.high %v294_v50, %v298_v51  ;;  %3019 = vmatprep.subr.bf16.mxu1 %v15105_v49  ;;  %v14968_v0 = vcombine.low %v294_v50, %v298_v51 }
  0xde   :  { %v426_v53 = vld [vmem:[#allocation5 + $0x660] sm:$0xff]  ;;  %3020 = vmatpush2.bf16.msra.mxu1 %v15104_v55 }
  0xdf   :  { %v15097_v57 = vcombine.high %v422_v52, %v426_v53  ;;  %v286_v60 = vld [vmem:[#allocation5 + $0x200] sm:$0xff]  ;;  %2980 = vmatprep.subr.bf16.mxu0 %v14969_v56  ;;  %v15096_v1 = vcombine.low %v422_v52, %v426_v53 }
  0xe0   :  { %v290_v61 = vld [vmem:[#allocation5 + $0x220] sm:$0xff]  ;;  %2981 = vmatpush2.bf16.msra.mxu0 %v14968_v0 }
  0xe1   :  { %v414_v62 = vld [vmem:[#allocation5 + $0x600] sm:$0xff]  ;;  %v14961_v2 = vcombine.high %v286_v60, %v290_v61  ;;  %3021 = vmatprep.subr.bf16.mxu1 %v15097_v57  ;;  %v14960_v8 = vcombine.low %v286_v60, %v290_v61 }
  0xe2   :  { %v418_v63 = vld [vmem:[#allocation5 + $0x620] sm:$0xff]  ;;  %3022 = vmatpush2.bf16.msra.mxu1 %v15096_v1 }
  0xe3   :  { %v15089_v3 = vcombine.high %v414_v62, %v418_v63  ;;  %v534_v4 = vld [vmem:[#allocation5 + $0x9c0] sm:$0xff]  ;;  %2982 = vmatprep.subr.bf16.mxu0 %v14961_v2  ;;  %v15088_v10 = vcombine.low %v414_v62, %v418_v63 }
  0xe4   :  { %v538_v5 = vld [vmem:[#allocation5 + $0x9e0] sm:$0xff]  ;;  %2983 = vmatpush2.bf16.msra.mxu0 %v14960_v8 }
  0xe5   :  { %v662_v6 = vld [vmem:[#allocation5 + $0xdc0] sm:$0xff]  ;;  %v15209_v12 = vcombine.high %v534_v4, %v538_v5  ;;  %3023 = vmatprep.subr.bf16.mxu1 %v15089_v3  ;;  %v15208_v20 = vcombine.low %v534_v4, %v538_v5 }
  0xe6   :  { %v666_v7 = vld [vmem:[#allocation5 + $0xde0] sm:$0xff]  ;;  %3024 = vmatpush2.bf16.msra.mxu1 %v15088_v10 }
  0xe7   :  { %v15337_v13 = vcombine.high %v662_v6, %v666_v7  ;;  %v526_v14 = vld [vmem:[#allocation5 + $0x980] sm:$0xff]  ;;  %3034 = vmatprep.subr.bf16.mxu0 %v15209_v12  ;;  %v15336_v22 = vcombine.low %v662_v6, %v666_v7  ;;  %2985 = vmatmul.mubr.bf16.vlgmr.msra.gmra.mxu0 %v19146_v16 }
  0xe8   :  { %v530_v15 = vld [vmem:[#allocation5 + $0x9a0] sm:$0xff]  ;;  %3035 = vmatpush1.bf16.msra.mxu0 %v15208_v20  ;;  %3066 = vmatprep.mubr.bf16.mxu0 %v19151_v29 }
  0xe9   :  { %v654_v17 = vld [vmem:[#allocation5 + $0xd80] sm:$0xff]  ;;  %v15201_v23 = vcombine.high %v526_v14, %v530_v15  ;;  %3075 = vmatprep.subr.bf16.mxu1 %v15337_v13  ;;  %3026 = vmatmul.mubr.bf16.vlgmr.msra.gmra.mxu1 %v19148_v19  ;;  %v15200_v30 = vcombine.low %v526_v14, %v530_v15  ;;  %v279_v14 = vld [vmem:[#allocation5 + $0x1c8] sm:$0xff] }
  0xea   :  { %v658_v18 = vld [vmem:[#allocation5 + $0xda0] sm:$0xff]  ;;  %3076 = vmatpush1.bf16.msra.mxu1 %v15336_v22  ;;  %3107 = vmatprep.mubr.bf16.mxu1 %v19017_v38 }
  0xeb   :  { %v15329_v24 = vcombine.high %v654_v17, %v658_v18  ;;  %v518_v25 = vld [vmem:[#allocation5 + $0x940] sm:$0xff]  ;;  %3036 = vmatprep.subr.bf16.mxu0 %v15201_v23  ;;  %v15328_v31 = vcombine.low %v654_v17, %v658_v18  ;;  %v283_v17 = vld [vmem:[#allocation5 + $0x1e8] sm:$0xff]  ;;  %v214_v18 = vld [vmem:[#allocation2 + $0x30] sm:$0xff] }
  0xec   :  { %v522_v26 = vld [vmem:[#allocation5 + $0x960] sm:$0xff]  ;;  %3037 = vmatpush1.bf16.msra.mxu0 %v15200_v30  ;;  %v19156_v30 = vpack.c.bf16 %v214_v18, %v214_v18 }
  0xed   :  { %v646_v27 = vld [vmem:[#allocation5 + $0xd40] sm:$0xff]  ;;  %v15193_v32 = vcombine.high %v518_v25, %v522_v26  ;;  %3077 = vmatprep.subr.bf16.mxu1 %v15329_v24  ;;  %v15192_v39 = vcombine.low %v518_v25, %v522_v26  ;;  %v271_v25 = vld [vmem:[#allocation5 + $0x188] sm:$0xff]  ;;  %v14955_v26 = vcombine.high %v279_v14, %v283_v17 }
  0xee   :  { %v650_v28 = vld [vmem:[#allocation5 + $0xd60] sm:$0xff]  ;;  %3078 = vmatpush1.bf16.msra.mxu1 %v15328_v31  ;;  %v14954_v31 = vcombine.low %v279_v14, %v283_v17  ;;  %v223_v14 = vld [vmem:[#allocation5 + $0x8] sm:$0xff] }
  0xef   :  { %v510_v33 = vld [vmem:[#allocation5 + $0x900] sm:$0xff]  ;;  %v15321_v36 = vcombine.high %v646_v27, %v650_v28  ;;  %3038 = vmatprep.subr.bf16.mxu0 %v15193_v32  ;;  %v15320_v40 = vcombine.low %v646_v27, %v650_v28  ;;  %v275_v27 = vld [vmem:[#allocation5 + $0x1a8] sm:$0xff] }
  0xf0   :  { %v514_v34 = vld [vmem:[#allocation5 + $0x920] sm:$0xff]  ;;  %3039 = vmatpush1.bf16.msra.mxu0 %v15192_v39  ;;  %v227_v17 = vld [vmem:[#allocation5 + $0x28] sm:$0xff] }
  0xf1   :  { %v638_v35 = vld [vmem:[#allocation5 + $0xd00] sm:$0xff]  ;;  %v15185_v41 = vcombine.high %v510_v33, %v514_v34  ;;  %3079 = vmatprep.subr.bf16.mxu1 %v15321_v36  ;;  %v15184_v47 = vcombine.low %v510_v33, %v514_v34  ;;  %v14947_v36 = vcombine.high %v271_v25, %v275_v27 }
  0xf2   :  { %v642_v37 = vld [vmem:[#allocation5 + $0xd20] sm:$0xff]  ;;  %3080 = vmatpush1.bf16.msra.mxu1 %v15320_v40  ;;  %v14946_v40 = vcombine.low %v271_v25, %v275_v27  ;;  %v14899_v25 = vcombine.high %v223_v14, %v227_v17  ;;  %v411_v27 = vld [vmem:[#allocation5 + $0x5e8] sm:$0xff] }
  0xf3   :  { %v502_v42 = vld [vmem:[#allocation5 + $0x8c0] sm:$0xff]  ;;  %v15313_v45 = vcombine.high %v638_v35, %v642_v37  ;;  %3040 = vmatprep.subr.bf16.mxu0 %v15185_v41  ;;  %v15312_v48 = vcombine.low %v638_v35, %v642_v37  ;;  %v263_v35 = vld [vmem:[#allocation5 + $0x148] sm:$0xff] }
  0xf4   :  { %v506_v43 = vld [vmem:[#allocation5 + $0x8e0] sm:$0xff]  ;;  %3041 = vmatpush1.bf16.msra.mxu0 %v15184_v47  ;;  %v267_v37 = vld [vmem:[#allocation5 + $0x168] sm:$0xff] }
  0xf5   :  { %v630_v44 = vld [vmem:[#allocation5 + $0xcc0] sm:$0xff]  ;;  %v15177_v49 = vcombine.high %v502_v42, %v506_v43  ;;  %3081 = vmatprep.subr.bf16.mxu1 %v15313_v45  ;;  %v15176_v55 = vcombine.low %v502_v42, %v506_v43  ;;  %v14939_v45 = vcombine.high %v263_v35, %v267_v37 }
  0xf6   :  { %v634_v46 = vld [vmem:[#allocation5 + $0xce0] sm:$0xff]  ;;  %3082 = vmatpush1.bf16.msra.mxu1 %v15312_v48  ;;  %v14938_v48 = vcombine.low %v263_v35, %v267_v37  ;;  %v399_v35 = vld [vmem:[#allocation5 + $0x588] sm:$0xff] }
  0xf7   :  { %v494_v50 = vld [vmem:[#allocation5 + $0x880] sm:$0xff]  ;;  %v15305_v53 = vcombine.high %v630_v44, %v634_v46  ;;  %3042 = vmatprep.subr.bf16.mxu0 %v15177_v49  ;;  %v15304_v56 = vcombine.low %v630_v44, %v634_v46  ;;  %v255_v44 = vld [vmem:[#allocation5 + $0x108] sm:$0xff] }
  0xf8   :  { %v498_v51 = vld [vmem:[#allocation5 + $0x8a0] sm:$0xff]  ;;  %3043 = vmatpush1.bf16.msra.mxu0 %v15176_v55  ;;  %v259_v46 = vld [vmem:[#allocation5 + $0x128] sm:$0xff] }
  0xf9   :  { %v622_v52 = vld [vmem:[#allocation5 + $0xc80] sm:$0xff]  ;;  %v15169_v57 = vcombine.high %v494_v50, %v498_v51  ;;  %3083 = vmatprep.subr.bf16.mxu1 %v15305_v53  ;;  %v15168_v1 = vcombine.low %v494_v50, %v498_v51  ;;  %v14931_v53 = vcombine.high %v255_v44, %v259_v46  ;;  %v403_v37 = vld [vmem:[#allocation5 + $0x5a8] sm:$0xff] }
  0xfa   :  { %v626_v54 = vld [vmem:[#allocation5 + $0xca0] sm:$0xff]  ;;  %3084 = vmatpush1.bf16.msra.mxu1 %v15304_v56  ;;  %v14930_v56 = vcombine.low %v255_v44, %v259_v46  ;;  %v331_v44 = vld [vmem:[#allocation5 + $0x368] sm:$0xff] }
  0xfb   :  { %v486_v60 = vld [vmem:[#allocation5 + $0x840] sm:$0xff]  ;;  %v15297_v63 = vcombine.high %v622_v52, %v626_v54  ;;  %3044 = vmatprep.subr.bf16.mxu0 %v15169_v57  ;;  %v15296_v2 = vcombine.low %v622_v52, %v626_v54  ;;  %v247_v52 = vld [vmem:[#allocation5 + $0xc8] sm:$0xff] }
  0xfc   :  { %v490_v61 = vld [vmem:[#allocation5 + $0x860] sm:$0xff]  ;;  %3045 = vmatpush1.bf16.msra.mxu0 %v15168_v1  ;;  %v251_v54 = vld [vmem:[#allocation5 + $0xe8] sm:$0xff] }
  0xfd   :  { %v614_v62 = vld [vmem:[#allocation5 + $0xc40] sm:$0xff]  ;;  %v15161_v3 = vcombine.high %v486_v60, %v490_v61  ;;  %3085 = vmatprep.subr.bf16.mxu1 %v15297_v63  ;;  %v15160_v9 = vcombine.low %v486_v60, %v490_v61  ;;  %v14923_v63 = vcombine.high %v247_v52, %v251_v54  ;;  %v391_v46 = vld [vmem:[#allocation5 + $0x548] sm:$0xff] }
  0xfe   :  { %v618_v0 = vld [vmem:[#allocation5 + $0xc60] sm:$0xff]  ;;  %3086 = vmatpush1.bf16.msra.mxu1 %v15296_v2  ;;  %v14922_v2 = vcombine.low %v247_v52, %v251_v54  ;;  %v323_v52 = vld [vmem:[#allocation5 + $0x328] sm:$0xff] }
  0xff   :  { %v478_v4 = vld [vmem:[#allocation5 + $0x800] sm:$0xff]  ;;  %v15289_v7 = vcombine.high %v614_v62, %v618_v0  ;;  %3046 = vmatprep.subr.bf16.mxu0 %v15161_v3  ;;  %v15288_v10 = vcombine.low %v614_v62, %v618_v0  ;;  %v239_v62 = vld [vmem:[#allocation5 + $0x88] sm:$0xff] }
 0x100   :  { %v482_v5 = vld [vmem:[#allocation5 + $0x820] sm:$0xff]  ;;  %3047 = vmatpush1.bf16.msra.mxu0 %v15160_v9  ;;  %v243_v0 = vld [vmem:[#allocation5 + $0xa8] sm:$0xff] }
 0x101   :  { %v606_v6 = vld [vmem:[#allocation5 + $0xc00] sm:$0xff]  ;;  %v15153_v11 = vcombine.high %v478_v4, %v482_v5  ;;  %3087 = vmatprep.subr.bf16.mxu1 %v15289_v7  ;;  %v15152_v20 = vcombine.low %v478_v4, %v482_v5  ;;  %v14915_v7 = vcombine.high %v239_v62, %v243_v0 }
 0x102   :  { %v610_v8 = vld [vmem:[#allocation5 + $0xc20] sm:$0xff]  ;;  %3088 = vmatpush1.bf16.msra.mxu1 %v15288_v10  ;;  %v14914_v10 = vcombine.low %v239_v62, %v243_v0  ;;  %v315_v62 = vld [vmem:[#allocation5 + $0x2e8] sm:$0xff] }
 0x103   :  { %v598_v12 = vld [vmem:[#allocation5 + $0xbc0] sm:$0xff]  ;;  %v15281_v15 = vcombine.high %v606_v6, %v610_v8  ;;  %3048 = vmatprep.subr.bf16.mxu0 %v15153_v11  ;;  %v15280_v21 = vcombine.low %v606_v6, %v610_v8  ;;  %v231_v6 = vld [vmem:[#allocation5 + $0x48] sm:$0xff] }
 0x104   :  { %v602_v13 = vld [vmem:[#allocation5 + $0xbe0] sm:$0xff]  ;;  %3049 = vmatpush1.bf16.msra.mxu0 %v15152_v20  ;;  %v235_v8 = vld [vmem:[#allocation5 + $0x68] sm:$0xff] }
 0x105   :  { %v15273_v22 = vcombine.high %v598_v12, %v602_v13  ;;  %v590_v23 = vld [vmem:[#allocation5 + $0xb80] sm:$0xff]  ;;  %3089 = vmatprep.subr.bf16.mxu1 %v15281_v15  ;;  %v15272_v28 = vcombine.low %v598_v12, %v602_v13  ;;  %v14907_v15 = vcombine.high %v231_v6, %v235_v8  ;;  %v14906_v20 = vcombine.low %v231_v6, %v235_v8  ;;  %v307_v6 = vld [vmem:[#allocation5 + $0x2a8] sm:$0xff] }
 0x106   :  { %v594_v24 = vld [vmem:[#allocation5 + $0xba0] sm:$0xff]  ;;  %3090 = vmatpush1.bf16.msra.mxu1 %v15280_v21 }
 0x107   :  { %3050 = vmatprep.subr.bf16.mxu0 %v15273_v22  ;;  %v15265_v32 = vcombine.high %v590_v23, %v594_v24  ;;  %v582_v33 = vld [vmem:[#allocation5 + $0xb40] sm:$0xff]  ;;  %3116 = vmatprep.subr.bf16.mxu1 %v14955_v26  ;;  %v15264_v39 = vcombine.low %v590_v23, %v594_v24  ;;  %v343_v22 = vld [vmem:[#allocation5 + $0x3c8] sm:$0xff] }
 0x108   :  { %v586_v34 = vld [vmem:[#allocation5 + $0xb60] sm:$0xff]  ;;  %3051 = vmatpush2.bf16.msra.mxu0 %v15272_v28  ;;  %v347_v23 = vld [vmem:[#allocation5 + $0x3e8] sm:$0xff] }
 0x109   :  { %3108 = vmatmul.mubr.bf16.vlgmr.msra.gmra.mxu1 %v19156_v30  ;;  %3052 = vmatprep.subr.bf16.mxu0 %v15265_v32  ;;  %v15257_v41 = vcombine.high %v582_v33, %v586_v34  ;;  %v574_v42 = vld [vmem:[#allocation5 + $0xb00] sm:$0xff]  ;;  %v15256_v47 = vcombine.low %v582_v33, %v586_v34  ;;  %v407_v24 = vld [vmem:[#allocation5 + $0x5c8] sm:$0xff] }
 0x10a   :  { %3117 = vmatpush1.bf16.msra.mxu1 %v14954_v31  ;;  %v578_v43 = vld [vmem:[#allocation5 + $0xb20] sm:$0xff]  ;;  %3148 = vmatprep.mubr.bf16.mxu1 %v19140_v58  ;;  %v212_v26 = vld [vmem:[#allocation2 + $0x20] sm:$0xff]  ;;  %v14898_v31 = vcombine.low %v223_v14, %v227_v17  ;;  %v15083_v32 = vcombine.high %v407_v24, %v411_v27 }
 0x10b   :  { %3118 = vmatprep.subr.bf16.mxu1 %v14947_v36  ;;  %v15249_v49 = vcombine.high %v574_v42, %v578_v43  ;;  %v566_v50 = vld [vmem:[#allocation5 + $0xac0] sm:$0xff]  ;;  %v15248_v55 = vcombine.low %v574_v42, %v578_v43  ;;  %v335_v33 = vld [vmem:[#allocation5 + $0x388] sm:$0xff]  ;;  %v15019_v36 = vcombine.high %v343_v22, %v347_v23  ;;  %v15075_v42 = vcombine.high %v399_v35, %v403_v37 }
 0x10c   :  { %3053 = vmatpush2.bf16.msra.mxu0 %v15264_v39  ;;  %v570_v51 = vld [vmem:[#allocation5 + $0xae0] sm:$0xff]  ;;  %v339_v34 = vld [vmem:[#allocation5 + $0x3a8] sm:$0xff]  ;;  %v19160_v39 = vpack.c.bf16 %v212_v26, %v212_v26 }
 0x10d   :  { %3054 = vmatprep.subr.bf16.mxu0 %v15257_v41  ;;  %v15241_v57 = vcombine.high %v566_v50, %v570_v51  ;;  %v558_v60 = vld [vmem:[#allocation5 + $0xa80] sm:$0xff]  ;;  %v15240_v1 = vcombine.low %v566_v50, %v570_v51  ;;  %v15018_v41 = vcombine.low %v343_v22, %v347_v23  ;;  %v327_v43 = vld [vmem:[#allocation5 + $0x348] sm:$0xff] }
 0x10e   :  { %3119 = vmatpush1.bf16.msra.mxu1 %v14946_v40  ;;  %v562_v61 = vld [vmem:[#allocation5 + $0xaa0] sm:$0xff]  ;;  %v15082_v40 = vcombine.low %v407_v24, %v411_v27  ;;  %v319_v51 = vld [vmem:[#allocation5 + $0x308] sm:$0xff]  ;;  %v15003_v54 = vcombine.high %v327_v43, %v331_v44 }
 0x10f   :  { %3120 = vmatprep.subr.bf16.mxu1 %v14939_v45  ;;  %v15233_v3 = vcombine.high %v558_v60, %v562_v61  ;;  %v550_v4 = vld [vmem:[#allocation5 + $0xa40] sm:$0xff]  ;;  %v15232_v9 = vcombine.low %v558_v60, %v562_v61  ;;  %v15011_v45 = vcombine.high %v335_v33, %v339_v34  ;;  %v311_v61 = vld [vmem:[#allocation5 + $0x2c8] sm:$0xff]  ;;  %v14995_v0 = vcombine.high %v319_v51, %v323_v52 }
 0x110   :  { %3055 = vmatpush2.bf16.msra.mxu0 %v15256_v47  ;;  %v554_v5 = vld [vmem:[#allocation5 + $0xa60] sm:$0xff]  ;;  %v395_v47 = vld [vmem:[#allocation5 + $0x568] sm:$0xff]  ;;  %v14987_v8 = vcombine.high %v311_v61, %v315_v62 }
 0x111   :  { %3056 = vmatprep.subr.bf16.mxu0 %v15249_v49  ;;  %v15225_v11 = vcombine.high %v550_v4, %v554_v5  ;;  %v542_v12 = vld [vmem:[#allocation5 + $0xa00] sm:$0xff]  ;;  %v15224_v18 = vcombine.low %v550_v4, %v554_v5  ;;  %v15010_v49 = vcombine.low %v335_v33, %v339_v34  ;;  %v15067_v50 = vcombine.high %v391_v46, %v395_v47  ;;  %v303_v5 = vld [vmem:[#allocation5 + $0x288] sm:$0xff] }
 0x112   :  { %3121 = vmatpush1.bf16.msra.mxu1 %v14938_v48  ;;  %v546_v13 = vld [vmem:[#allocation5 + $0xa20] sm:$0xff]  ;;  %v15074_v48 = vcombine.low %v399_v35, %v403_v37  ;;  %v299_v14 = vld [vmem:[#allocation5 + $0x268] sm:$0xff]  ;;  %v14979_v17 = vcombine.high %v303_v5, %v307_v6 }
 0x113   :  { %3122 = vmatprep.subr.bf16.mxu1 %v14931_v53  ;;  %v15217_v21 = vcombine.high %v542_v12, %v546_v13  ;;  %v15216_v28 = vcombine.low %v542_v12, %v546_v13  ;;  %v383_v53 = vld [vmem:[#allocation5 + $0x508] sm:$0xff] }
 0x114   :  { %3057 = vmatpush2.bf16.msra.mxu0 %v15248_v55  ;;  %v387_v55 = vld [vmem:[#allocation5 + $0x528] sm:$0xff] }
 0x115   :  { %3058 = vmatprep.subr.bf16.mxu0 %v15241_v57  ;;  %v15002_v57 = vcombine.low %v327_v43, %v331_v44  ;;  %v15059_v60 = vcombine.high %v383_v53, %v387_v55  ;;  %v295_v13 = vld [vmem:[#allocation5 + $0x248] sm:$0xff] }
 0x116   :  { %3123 = vmatpush1.bf16.msra.mxu1 %v14930_v56  ;;  %v15066_v56 = vcombine.low %v391_v46, %v395_v47  ;;  %v287_v23 = vld [vmem:[#allocation5 + $0x208] sm:$0xff]  ;;  %v14971_v26 = vcombine.high %v295_v13, %v299_v14 }
 0x117   :  { %3124 = vmatprep.subr.bf16.mxu1 %v14923_v63  ;;  %v375_v63 = vld [vmem:[#allocation5 + $0x4c8] sm:$0xff] }
 0x118   :  { %3059 = vmatpush2.bf16.msra.mxu0 %v15240_v1  ;;  %v379_v1 = vld [vmem:[#allocation5 + $0x4e8] sm:$0xff] }
 0x119   :  { %3060 = vmatprep.subr.bf16.mxu0 %v15233_v3  ;;  %v14994_v3 = vcombine.low %v319_v51, %v323_v52  ;;  %v15051_v4 = vcombine.high %v375_v63, %v379_v1  ;;  %v291_v24 = vld [vmem:[#allocation5 + $0x228] sm:$0xff] }
 0x11a   :  { %3125 = vmatpush1.bf16.msra.mxu1 %v14922_v2  ;;  %v15058_v2 = vcombine.low %v383_v53, %v387_v55  ;;  %v355_v27 = vld [vmem:[#allocation5 + $0x428] sm:$0xff] }
 0x11b   :  { %3126 = vmatprep.subr.bf16.mxu1 %v14915_v7  ;;  %v367_v7 = vld [vmem:[#allocation5 + $0x488] sm:$0xff] }
 0x11c   :  { %3061 = vmatpush2.bf16.msra.mxu0 %v15232_v9  ;;  %v371_v9 = vld [vmem:[#allocation5 + $0x4a8] sm:$0xff] }
 0x11d   :  { %3062 = vmatprep.subr.bf16.mxu0 %v15225_v11  ;;  %v14986_v11 = vcombine.low %v311_v61, %v315_v62  ;;  %v15043_v12 = vcombine.high %v367_v7, %v371_v9  ;;  %v471_v33 = vld [vmem:[#allocation5 + $0x7c8] sm:$0xff] }
 0x11e   :  { %3127 = vmatpush1.bf16.msra.mxu1 %v14914_v10  ;;  %v15050_v10 = vcombine.low %v375_v63, %v379_v1  ;;  %v475_v34 = vld [vmem:[#allocation5 + $0x7e8] sm:$0xff] }
 0x11f   :  { %3128 = vmatprep.subr.bf16.mxu1 %v14907_v15  ;;  %v359_v15 = vld [vmem:[#allocation5 + $0x448] sm:$0xff] }
 0x120   :  { %3063 = vmatpush2.bf16.msra.mxu0 %v15224_v18  ;;  %v363_v18 = vld [vmem:[#allocation5 + $0x468] sm:$0xff] }
 0x121   :  { %3064 = vmatprep.subr.bf16.mxu0 %v15217_v21  ;;  %v14978_v21 = vcombine.low %v303_v5, %v307_v6  ;;  %v15035_v22 = vcombine.high %v359_v15, %v363_v18  ;;  %v535_v35 = vld [vmem:[#allocation5 + $0x9c8] sm:$0xff] }
 0x122   :  { %3129 = vmatpush1.bf16.msra.mxu1 %v14906_v20  ;;  %v15042_v20 = vcombine.low %v367_v7, %v371_v9  ;;  %v539_v37 = vld [vmem:[#allocation5 + $0x9e8] sm:$0xff] }
 0x123   :  { %3130 = vmatprep.subr.bf16.mxu1 %v14899_v25  ;;  %v351_v25 = vld [vmem:[#allocation5 + $0x408] sm:$0xff]  ;;  %v15211_v46 = vcombine.high %v535_v35, %v539_v37 }
 0x124   :  { %3065 = vmatpush2.bf16.msra.mxu0 %v15216_v28  ;;  %v15034_v28 = vcombine.low %v359_v15, %v363_v18  ;;  %v463_v43 = vld [vmem:[#allocation5 + $0x788] sm:$0xff] }
 0x125   :  { %3157 = vmatprep.subr.bf16.mxu0 %v15083_v32  ;;  %v15027_v32 = vcombine.high %v351_v25, %v355_v27  ;;  %v467_v44 = vld [vmem:[#allocation5 + $0x7a8] sm:$0xff] }
 0x126   :  { %3131 = vmatpush1.bf16.msra.mxu1 %v14898_v31  ;;  %v14970_v31 = vcombine.low %v295_v13, %v299_v14  ;;  %v531_v47 = vld [vmem:[#allocation5 + $0x9a8] sm:$0xff] }
 0x127   :  { %3132 = vmatprep.subr.bf16.mxu1 %v15019_v36  ;;  %3067 = vmatmul.mubr.bf16.vlgmr.msra.gmra.mxu0 %v19160_v39  ;;  %v14963_v36 = vcombine.high %v287_v23, %v291_v24  ;;  %v455_v51 = vld [vmem:[#allocation5 + $0x748] sm:$0xff] }
 0x128   :  { %3158 = vmatpush1.bf16.msra.mxu0 %v15082_v40  ;;  %3189 = vmatprep.mubr.bf16.mxu0 %v19142_v59  ;;  %v15026_v40 = vcombine.low %v351_v25, %v355_v27  ;;  %v459_v52 = vld [vmem:[#allocation5 + $0x768] sm:$0xff] }
 0x129   :  { %3159 = vmatprep.subr.bf16.mxu0 %v15075_v42  ;;  %v15147_v42 = vcombine.high %v471_v33, %v475_v34  ;;  %v519_v53 = vld [vmem:[#allocation5 + $0x948] sm:$0xff] }
 0x12a   :  { %3133 = vmatpush2.bf16.msra.mxu1 %v15018_v41  ;;  %v14962_v41 = vcombine.low %v287_v23, %v291_v24  ;;  %v523_v55 = vld [vmem:[#allocation5 + $0x968] sm:$0xff] }
 0x12b   :  { %3134 = vmatprep.subr.bf16.mxu1 %v15011_v45  ;;  %v527_v45 = vld [vmem:[#allocation5 + $0x988] sm:$0xff] }
 0x12c   :  { %3160 = vmatpush1.bf16.msra.mxu0 %v15074_v48  ;;  %v15146_v48 = vcombine.low %v471_v33, %v475_v34  ;;  %v447_v61 = vld [vmem:[#allocation5 + $0x708] sm:$0xff] }
 0x12d   :  { %3161 = vmatprep.subr.bf16.mxu0 %v15067_v50  ;;  %v15139_v50 = vcombine.high %v463_v43, %v467_v44  ;;  %v451_v62 = vld [vmem:[#allocation5 + $0x728] sm:$0xff] }
 0x12e   :  { %3135 = vmatpush2.bf16.msra.mxu1 %v15010_v49  ;;  %v15210_v49 = vcombine.low %v535_v35, %v539_v37  ;;  %v511_v63 = vld [vmem:[#allocation5 + $0x908] sm:$0xff] }
 0x12f   :  { %3136 = vmatprep.subr.bf16.mxu1 %v15003_v54  ;;  %v15203_v54 = vcombine.high %v527_v45, %v531_v47  ;;  %v515_v1 = vld [vmem:[#allocation5 + $0x928] sm:$0xff] }
 0x130   :  { %3162 = vmatpush1.bf16.msra.mxu0 %v15066_v56  ;;  %v15138_v56 = vcombine.low %v463_v43, %v467_v44  ;;  %v439_v5 = vld [vmem:[#allocation5 + $0x6c8] sm:$0xff] }
 0x131   :  { %3163 = vmatprep.subr.bf16.mxu0 %v15059_v60  ;;  %v15131_v60 = vcombine.high %v455_v51, %v459_v52  ;;  %v443_v6 = vld [vmem:[#allocation5 + $0x6e8] sm:$0xff] }
 0x132   :  { %3137 = vmatpush2.bf16.msra.mxu1 %v15002_v57  ;;  %v15202_v57 = vcombine.low %v527_v45, %v531_v47  ;;  %v503_v7 = vld [vmem:[#allocation5 + $0x8c8] sm:$0xff] }
 0x133   :  { %3138 = vmatprep.subr.bf16.mxu1 %v14995_v0  ;;  %v15195_v0 = vcombine.high %v519_v53, %v523_v55  ;;  %v507_v9 = vld [vmem:[#allocation5 + $0x8e8] sm:$0xff] }
 0x134   :  { %3164 = vmatpush1.bf16.msra.mxu0 %v15058_v2  ;;  %v15130_v2 = vcombine.low %v455_v51, %v459_v52  ;;  %v431_v13 = vld [vmem:[#allocation5 + $0x688] sm:$0xff] }
 0x135   :  { %3165 = vmatprep.subr.bf16.mxu0 %v15051_v4  ;;  %v15123_v4 = vcombine.high %v447_v61, %v451_v62  ;;  %v435_v14 = vld [vmem:[#allocation5 + $0x6a8] sm:$0xff] }
 0x136   :  { %3139 = vmatpush2.bf16.msra.mxu1 %v14994_v3  ;;  %v15194_v3 = vcombine.low %v519_v53, %v523_v55  ;;  %v495_v15 = vld [vmem:[#allocation5 + $0x888] sm:$0xff] }
 0x137   :  { %3140 = vmatprep.subr.bf16.mxu1 %v14987_v8  ;;  %v15187_v8 = vcombine.high %v511_v63, %v515_v1  ;;  %v499_v18 = vld [vmem:[#allocation5 + $0x8a8] sm:$0xff] }
 0x138   :  { %3166 = vmatpush1.bf16.msra.mxu0 %v15050_v10  ;;  %v15122_v10 = vcombine.low %v447_v61, %v451_v62  ;;  %v423_v23 = vld [vmem:[#allocation5 + $0x648] sm:$0xff] }
 0x139   :  { %3167 = vmatprep.subr.bf16.mxu0 %v15043_v12  ;;  %v15115_v12 = vcombine.high %v439_v5, %v443_v6  ;;  %v427_v24 = vld [vmem:[#allocation5 + $0x668] sm:$0xff] }
 0x13a   :  { %3141 = vmatpush2.bf16.msra.mxu1 %v14986_v11  ;;  %v15186_v11 = vcombine.low %v511_v63, %v515_v1  ;;  %v487_v25 = vld [vmem:[#allocation5 + $0x848] sm:$0xff] }
 0x13b   :  { %3142 = vmatprep.subr.bf16.mxu1 %v14979_v17  ;;  %v15179_v17 = vcombine.high %v503_v7, %v507_v9  ;;  %v491_v27 = vld [vmem:[#allocation5 + $0x868] sm:$0xff] }
 0x13c   :  { %3168 = vmatpush1.bf16.msra.mxu0 %v15042_v20  ;;  %v15114_v20 = vcombine.low %v439_v5, %v443_v6  ;;  %v415_v33 = vld [vmem:[#allocation5 + $0x608] sm:$0xff] }
 0x13d   :  { %3169 = vmatprep.subr.bf16.mxu0 %v15035_v22  ;;  %v15107_v22 = vcombine.high %v431_v13, %v435_v14  ;;  %v419_v34 = vld [vmem:[#allocation5 + $0x628] sm:$0xff] }
 0x13e   :  { %3143 = vmatpush2.bf16.msra.mxu1 %v14978_v21  ;;  %v15178_v21 = vcombine.low %v503_v7, %v507_v9  ;;  %v479_v35 = vld [vmem:[#allocation5 + $0x808] sm:$0xff] }
 0x13f   :  { %3144 = vmatprep.subr.bf16.mxu1 %v14971_v26  ;;  %v15171_v26 = vcombine.high %v495_v15, %v499_v18  ;;  %v483_v37 = vld [vmem:[#allocation5 + $0x828] sm:$0xff] }
 0x140   :  { %3170 = vmatpush1.bf16.msra.mxu0 %v15034_v28  ;;  %v15106_v28 = vcombine.low %v431_v13, %v435_v14  ;;  %v599_v43 = vld [vmem:[#allocation5 + $0xbc8] sm:$0xff] }
 0x141   :  { %3171 = vmatprep.subr.bf16.mxu0 %v15027_v32  ;;  %v15099_v32 = vcombine.high %v423_v23, %v427_v24  ;;  %v603_v44 = vld [vmem:[#allocation5 + $0xbe8] sm:$0xff] }
 0x142   :  { %3145 = vmatpush2.bf16.msra.mxu1 %v14970_v31  ;;  %v15170_v31 = vcombine.low %v495_v15, %v499_v18  ;;  %v663_v45 = vld [vmem:[#allocation5 + $0xdc8] sm:$0xff] }
 0x143   :  { %3146 = vmatprep.subr.bf16.mxu1 %v14963_v36  ;;  %v15163_v36 = vcombine.high %v487_v25, %v491_v27  ;;  %v667_v47 = vld [vmem:[#allocation5 + $0xde8] sm:$0xff] }
 0x144   :  { %3172 = vmatpush1.bf16.msra.mxu0 %v15026_v40  ;;  %v15098_v40 = vcombine.low %v423_v23, %v427_v24  ;;  %v591_v51 = vld [vmem:[#allocation5 + $0xb88] sm:$0xff] }
 0x145   :  { %3173 = vmatprep.subr.bf16.mxu0 %v15147_v42  ;;  %v15091_v42 = vcombine.high %v415_v33, %v419_v34  ;;  %v595_v52 = vld [vmem:[#allocation5 + $0xba8] sm:$0xff] }
 0x146   :  { %3147 = vmatpush2.bf16.msra.mxu1 %v14962_v41  ;;  %v15162_v41 = vcombine.low %v487_v25, %v491_v27  ;;  %v655_v53 = vld [vmem:[#allocation5 + $0xd88] sm:$0xff] }
 0x147   :  { %3198 = vmatprep.subr.bf16.mxu1 %v15211_v46  ;;  %v15155_v46 = vcombine.high %v479_v35, %v483_v37  ;;  %v659_v55 = vld [vmem:[#allocation5 + $0xda8] sm:$0xff] }
 0x148   :  { %3174 = vmatpush2.bf16.msra.mxu0 %v15146_v48  ;;  %v15090_v48 = vcombine.low %v415_v33, %v419_v34  ;;  %v583_v61 = vld [vmem:[#allocation5 + $0xb48] sm:$0xff] }
 0x149   :  { %3149 = vmatmul.mubr.bf16.vlgmr.msra.gmra.mxu1 %v19146_v16  ;;  %3175 = vmatprep.subr.bf16.mxu0 %v15139_v50  ;;  %v15339_v50 = vcombine.high %v663_v45, %v667_v47  ;;  %v587_v62 = vld [vmem:[#allocation5 + $0xb68] sm:$0xff] }
 0x14a   :  { %3199 = vmatpush1.bf16.msra.mxu1 %v15210_v49  ;;  %3230 = vmatprep.mubr.bf16.mxu1 %v19151_v29  ;;  %v15154_v49 = vcombine.low %v479_v35, %v483_v37  ;;  %v647_v63 = vld [vmem:[#allocation5 + $0xd48] sm:$0xff] }
 0x14b   :  { %3200 = vmatprep.subr.bf16.mxu1 %v15203_v54  ;;  %v15275_v54 = vcombine.high %v599_v43, %v603_v44  ;;  %v651_v1 = vld [vmem:[#allocation5 + $0xd68] sm:$0xff] }
 0x14c   :  { %3176 = vmatpush2.bf16.msra.mxu0 %v15138_v56  ;;  %v15338_v56 = vcombine.low %v663_v45, %v667_v47  ;;  %v575_v5 = vld [vmem:[#allocation5 + $0xb08] sm:$0xff] }
 0x14d   :  { %3177 = vmatprep.subr.bf16.mxu0 %v15131_v60  ;;  %v15331_v60 = vcombine.high %v655_v53, %v659_v55  ;;  %v579_v6 = vld [vmem:[#allocation5 + $0xb28] sm:$0xff] }
 0x14e   :  { %3201 = vmatpush1.bf16.msra.mxu1 %v15202_v57  ;;  %v15274_v57 = vcombine.low %v599_v43, %v603_v44  ;;  %v639_v7 = vld [vmem:[#allocation5 + $0xd08] sm:$0xff] }
 0x14f   :  { %3202 = vmatprep.subr.bf16.mxu1 %v15195_v0  ;;  %v15267_v0 = vcombine.high %v591_v51, %v595_v52  ;;  %v643_v9 = vld [vmem:[#allocation5 + $0xd28] sm:$0xff] }
 0x150   :  { %3178 = vmatpush2.bf16.msra.mxu0 %v15130_v2  ;;  %v15330_v2 = vcombine.low %v655_v53, %v659_v55  ;;  %v567_v13 = vld [vmem:[#allocation5 + $0xac8] sm:$0xff]  ;;  %v408_v53 = vld [vmem:[#allocation5 + $0x5d0] sm:$0xff] }
 0x151   :  { %3179 = vmatprep.subr.bf16.mxu0 %v15123_v4  ;;  %v15323_v4 = vcombine.high %v647_v63, %v651_v1  ;;  %v571_v14 = vld [vmem:[#allocation5 + $0xae8] sm:$0xff]  ;;  %v412_v55 = vld [vmem:[#allocation5 + $0x5f0] sm:$0xff] }
 0x152   :  { %3203 = vmatpush1.bf16.msra.mxu1 %v15194_v3  ;;  %v15266_v3 = vcombine.low %v591_v51, %v595_v52  ;;  %v631_v15 = vld [vmem:[#allocation5 + $0xcc8] sm:$0xff]  ;;  %v280_v51 = vld [vmem:[#allocation5 + $0x1d0] sm:$0xff] }
 0x153   :  { %3204 = vmatprep.subr.bf16.mxu1 %v15187_v8  ;;  %v15259_v8 = vcombine.high %v583_v61, %v587_v62  ;;  %v635_v18 = vld [vmem:[#allocation5 + $0xce8] sm:$0xff]  ;;  %v284_v52 = vld [vmem:[#allocation5 + $0x1f0] sm:$0xff] }
 0x154   :  { %3180 = vmatpush2.bf16.msra.mxu0 %v15122_v10  ;;  %v15322_v10 = vcombine.low %v647_v63, %v651_v1  ;;  %v559_v23 = vld [vmem:[#allocation5 + $0xa88] sm:$0xff]  ;;  %v400_v63 = vld [vmem:[#allocation5 + $0x590] sm:$0xff] }
 0x155   :  { %3181 = vmatprep.subr.bf16.mxu0 %v15115_v12  ;;  %v15315_v12 = vcombine.high %v639_v7, %v643_v9  ;;  %v563_v24 = vld [vmem:[#allocation5 + $0xaa8] sm:$0xff]  ;;  %v404_v1 = vld [vmem:[#allocation5 + $0x5b0] sm:$0xff] }
 0x156   :  { %3205 = vmatpush1.bf16.msra.mxu1 %v15186_v11  ;;  %v15258_v11 = vcombine.low %v583_v61, %v587_v62  ;;  %v623_v25 = vld [vmem:[#allocation5 + $0xc88] sm:$0xff]  ;;  %v272_v61 = vld [vmem:[#allocation5 + $0x190] sm:$0xff] }
 0x157   :  { %3206 = vmatprep.subr.bf16.mxu1 %v15179_v17  ;;  %v15251_v17 = vcombine.high %v575_v5, %v579_v6  ;;  %v627_v27 = vld [vmem:[#allocation5 + $0xca8] sm:$0xff]  ;;  %v276_v62 = vld [vmem:[#allocation5 + $0x1b0] sm:$0xff] }
 0x158   :  { %3182 = vmatpush2.bf16.msra.mxu0 %v15114_v20  ;;  %v15314_v20 = vcombine.low %v639_v7, %v643_v9  ;;  %v551_v33 = vld [vmem:[#allocation5 + $0xa48] sm:$0xff]  ;;  %v392_v7 = vld [vmem:[#allocation5 + $0x550] sm:$0xff] }
 0x159   :  { %3183 = vmatprep.subr.bf16.mxu0 %v15107_v22  ;;  %v15307_v22 = vcombine.high %v631_v15, %v635_v18  ;;  %v555_v34 = vld [vmem:[#allocation5 + $0xa68] sm:$0xff]  ;;  %v396_v9 = vld [vmem:[#allocation5 + $0x570] sm:$0xff] }
 0x15a   :  { %3207 = vmatpush1.bf16.msra.mxu1 %v15178_v21  ;;  %v15250_v21 = vcombine.low %v575_v5, %v579_v6  ;;  %v615_v35 = vld [vmem:[#allocation5 + $0xc48] sm:$0xff]  ;;  %v264_v5 = vld [vmem:[#allocation5 + $0x150] sm:$0xff] }
 0x15b   :  { %3208 = vmatprep.subr.bf16.mxu1 %v15171_v26  ;;  %v15243_v26 = vcombine.high %v567_v13, %v571_v14  ;;  %v619_v37 = vld [vmem:[#allocation5 + $0xc68] sm:$0xff]  ;;  %v268_v6 = vld [vmem:[#allocation5 + $0x170] sm:$0xff] }
 0x15c   :  { %3184 = vmatpush2.bf16.msra.mxu0 %v15106_v28  ;;  %v15306_v28 = vcombine.low %v631_v15, %v635_v18  ;;  %v543_v43 = vld [vmem:[#allocation5 + $0xa08] sm:$0xff]  ;;  %v384_v15 = vld [vmem:[#allocation5 + $0x510] sm:$0xff] }
 0x15d   :  { %3185 = vmatprep.subr.bf16.mxu0 %v15099_v32  ;;  %v15299_v32 = vcombine.high %v623_v25, %v627_v27  ;;  %v547_v44 = vld [vmem:[#allocation5 + $0xa28] sm:$0xff]  ;;  %v388_v18 = vld [vmem:[#allocation5 + $0x530] sm:$0xff] }
 0x15e   :  { %3209 = vmatpush1.bf16.msra.mxu1 %v15170_v31  ;;  %v15242_v31 = vcombine.low %v567_v13, %v571_v14  ;;  %v607_v45 = vld [vmem:[#allocation5 + $0xc08] sm:$0xff]  ;;  %v256_v13 = vld [vmem:[#allocation5 + $0x110] sm:$0xff] }
 0x15f   :  { %3210 = vmatprep.subr.bf16.mxu1 %v15163_v36  ;;  %v15235_v36 = vcombine.high %v559_v23, %v563_v24  ;;  %v611_v47 = vld [vmem:[#allocation5 + $0xc28] sm:$0xff]  ;;  %v260_v14 = vld [vmem:[#allocation5 + $0x130] sm:$0xff] }
 0x160   :  { %3186 = vmatpush2.bf16.msra.mxu0 %v15098_v40  ;;  %v15298_v40 = vcombine.low %v623_v25, %v627_v27  ;;  %v376_v25 = vld [vmem:[#allocation5 + $0x4d0] sm:$0xff] }
 0x161   :  { %3187 = vmatprep.subr.bf16.mxu0 %v15091_v42  ;;  %v15291_v42 = vcombine.high %v615_v35, %v619_v37  ;;  %v380_v27 = vld [vmem:[#allocation5 + $0x4f0] sm:$0xff] }
 0x162   :  { %3211 = vmatpush1.bf16.msra.mxu1 %v15162_v41  ;;  %v15234_v41 = vcombine.low %v559_v23, %v563_v24  ;;  %v248_v23 = vld [vmem:[#allocation5 + $0xd0] sm:$0xff] }
 0x163   :  { %3212 = vmatprep.subr.bf16.mxu1 %v15155_v46  ;;  %v15227_v46 = vcombine.high %v551_v33, %v555_v34  ;;  %v252_v24 = vld [vmem:[#allocation5 + $0xf0] sm:$0xff] }
 0x164   :  { %3188 = vmatpush2.bf16.msra.mxu0 %v15090_v48  ;;  %v15290_v48 = vcombine.low %v615_v35, %v619_v37  ;;  %v368_v35 = vld [vmem:[#allocation5 + $0x490] sm:$0xff] }
 0x165   :  { %3239 = vmatprep.subr.bf16.mxu0 %v15339_v50  ;;  %v15283_v50 = vcombine.high %v607_v45, %v611_v47  ;;  %v372_v37 = vld [vmem:[#allocation5 + $0x4b0] sm:$0xff] }
 0x166   :  { %3213 = vmatpush1.bf16.msra.mxu1 %v15154_v49  ;;  %v15226_v49 = vcombine.low %v551_v33, %v555_v34  ;;  %v240_v33 = vld [vmem:[#allocation5 + $0x90] sm:$0xff] }
 0x167   :  { %3214 = vmatprep.subr.bf16.mxu1 %v15275_v54  ;;  %3190 = vmatmul.mubr.bf16.vlgmr.msra.gmra.mxu0 %v19148_v19  ;;  %v15219_v54 = vcombine.high %v543_v43, %v547_v44  ;;  %v244_v34 = vld [vmem:[#allocation5 + $0xb0] sm:$0xff] }
 0x168   :  { %3240 = vmatpush1.bf16.msra.mxu0 %v15338_v56  ;;  %3271 = vmatprep.mubr.bf16.mxu0 %v19017_v38  ;;  %v15282_v56 = vcombine.low %v607_v45, %v611_v47  ;;  %v360_v45 = vld [vmem:[#allocation5 + $0x450] sm:$0xff] }
 0x169   :  { %3241 = vmatprep.subr.bf16.mxu0 %v15331_v60  ;;  %v14957_v60 = vcombine.high %v280_v51, %v284_v52  ;;  %v364_v47 = vld [vmem:[#allocation5 + $0x470] sm:$0xff] }
 0x16a   :  { %3215 = vmatpush2.bf16.msra.mxu1 %v15274_v57  ;;  %v15218_v57 = vcombine.low %v543_v43, %v547_v44  ;;  %v232_v43 = vld [vmem:[#allocation5 + $0x50] sm:$0xff] }
 0x16b   :  { %3216 = vmatprep.subr.bf16.mxu1 %v15267_v0  ;;  %v15085_v0 = vcombine.high %v408_v53, %v412_v55  ;;  %v236_v44 = vld [vmem:[#allocation5 + $0x70] sm:$0xff] }
 0x16c   :  { %3242 = vmatpush1.bf16.msra.mxu0 %v15330_v2  ;;  %v14956_v2 = vcombine.low %v280_v51, %v284_v52  ;;  %v14909_v51 = vcombine.high %v232_v43, %v236_v44  ;;  %v224_v52 = vld [vmem:[#allocation5 + $0x10] sm:$0xff] }
 0x16d   :  { %3243 = vmatprep.subr.bf16.mxu0 %v15323_v4  ;;  %v14949_v4 = vcombine.high %v272_v61, %v276_v62 }
 0x16e   :  { %3217 = vmatpush2.bf16.msra.mxu1 %v15266_v3  ;;  %v15084_v3 = vcombine.low %v408_v53, %v412_v55  ;;  %v228_v53 = vld [vmem:[#allocation5 + $0x30] sm:$0xff]  ;;  %v15037_v55 = vcombine.high %v360_v45, %v364_v47 }
 0x16f   :  { %3218 = vmatprep.subr.bf16.mxu1 %v15259_v8  ;;  %v15077_v8 = vcombine.high %v400_v63, %v404_v1 }
 0x170   :  { %3244 = vmatpush1.bf16.msra.mxu0 %v15322_v10  ;;  %v14948_v10 = vcombine.low %v272_v61, %v276_v62  ;;  %v15036_v61 = vcombine.low %v360_v45, %v364_v47  ;;  %v14901_v62 = vcombine.high %v224_v52, %v228_v53  ;;  %v452_v45 = vld [vmem:[#allocation5 + $0x730] sm:$0xff] }
 0x171   :  { %3245 = vmatprep.subr.bf16.mxu0 %v15315_v12  ;;  %v14941_v12 = vcombine.high %v264_v5, %v268_v6 }
 0x172   :  { %3219 = vmatpush2.bf16.msra.mxu1 %v15258_v11  ;;  %v15076_v11 = vcombine.low %v400_v63, %v404_v1  ;;  %v344_v63 = vld [vmem:[#allocation5 + $0x3d0] sm:$0xff] }
 0x173   :  { %3220 = vmatprep.subr.bf16.mxu1 %v15251_v17  ;;  %v15069_v17 = vcombine.high %v392_v7, %v396_v9  ;;  %v472_v1 = vld [vmem:[#allocation5 + $0x7d0] sm:$0xff] }
 0x174   :  { %3246 = vmatpush1.bf16.msra.mxu0 %v15314_v20  ;;  %v14940_v20 = vcombine.low %v264_v5, %v268_v6  ;;  %v14900_v5 = vcombine.low %v224_v52, %v228_v53  ;;  %v312_v53 = vld [vmem:[#allocation5 + $0x2d0] sm:$0xff] }
 0x175   :  { %3247 = vmatprep.subr.bf16.mxu0 %v15307_v22  ;;  %v14933_v22 = vcombine.high %v256_v13, %v260_v14 }
 0x176   :  { %3221 = vmatpush2.bf16.msra.mxu1 %v15250_v21  ;;  %v15068_v21 = vcombine.low %v392_v7, %v396_v9  ;;  %v336_v9 = vld [vmem:[#allocation5 + $0x390] sm:$0xff] }
 0x177   :  { %3222 = vmatprep.subr.bf16.mxu1 %v15243_v26  ;;  %v15061_v26 = vcombine.high %v384_v15, %v388_v18 }
 0x178   :  { %3248 = vmatpush1.bf16.msra.mxu0 %v15306_v28  ;;  %v14932_v28 = vcombine.low %v256_v13, %v260_v14  ;;  %v468_v14 = vld [vmem:[#allocation5 + $0x7b0] sm:$0xff] }
 0x179   :  { %3249 = vmatprep.subr.bf16.mxu0 %v15299_v32  ;;  %v14925_v32 = vcombine.high %v248_v23, %v252_v24 }
 0x17a   :  { %3223 = vmatpush2.bf16.msra.mxu1 %v15242_v31  ;;  %v15060_v31 = vcombine.low %v384_v15, %v388_v18 }
 0x17b   :  { %3224 = vmatprep.subr.bf16.mxu1 %v15235_v36  ;;  %v15053_v36 = vcombine.high %v376_v25, %v380_v27 }
 0x17c   :  { %3250 = vmatpush1.bf16.msra.mxu0 %v15298_v40  ;;  %v14924_v40 = vcombine.low %v248_v23, %v252_v24  ;;  %v456_v23 = vld [vmem:[#allocation5 + $0x750] sm:$0xff] }
 0x17d   :  { %3251 = vmatprep.subr.bf16.mxu0 %v15291_v42  ;;  %v14917_v42 = vcombine.high %v240_v33, %v244_v34 }
 0x17e   :  { %3225 = vmatpush2.bf16.msra.mxu1 %v15234_v41  ;;  %v15052_v41 = vcombine.low %v376_v25, %v380_v27 }
 0x17f   :  { %3226 = vmatprep.subr.bf16.mxu1 %v15227_v46  ;;  %v15045_v46 = vcombine.high %v368_v35, %v372_v37 }
 0x180   :  { %3252 = vmatpush1.bf16.msra.mxu0 %v15290_v48  ;;  %v672_v48 = vlaneseq }
 0x181   :  { %3253 = vmatprep.subr.bf16.mxu0 %v15283_v50  ;;  %v15044_v50 = vcombine.low %v368_v35, %v372_v37  ;;  %v324_v37 = vld [vmem:[#allocation5 + $0x330] sm:$0xff] }
 0x182   :  { %3227 = vmatpush2.bf16.msra.mxu1 %v15226_v49  ;;  %v14916_v49 = vcombine.low %v240_v33, %v244_v34 }
 0x183   :  { %3228 = vmatprep.subr.bf16.mxu1 %v15219_v54  ;;  %v352_v54 = vld [vmem:[#allocation5 + $0x410] sm:$0xff] }
 0x184   :  { %3254 = vmatpush1.bf16.msra.mxu0 %v15282_v56  ;;  %v356_v56 = vld [vmem:[#allocation5 + $0x430] sm:$0xff] }
 0x185   :  { %3280 = vmatprep.subr.bf16.mxu0 %v14957_v60  ;;  %v14908_v60 = vcombine.low %v232_v43, %v236_v44  ;;  %v15028_v7 = vcombine.low %v352_v54, %v356_v56 }
 0x186   :  { %3229 = vmatpush2.bf16.msra.mxu1 %v15218_v57  ;;  %v19172_v57 = vshrl.u32 %v672_v48, 7 }
 0x187   :  { %3321 = vmatprep.subr.bf16.mxu1 %v15085_v0  ;;  %3272 = vmatmul.mubr.bf16.vlgmr.msra.gmra.mxu0 %v19156_v30  ;;  %v348_v0 = vld [vmem:[#allocation5 + $0x3f0] sm:$0xff] }
 0x188   :  { %3281 = vmatpush1.bf16.msra.mxu0 %v14956_v2  ;;  %3312 = vmatprep.mubr.bf16.mxu0 %v19140_v58  ;;  %v15029_v2 = vcombine.high %v352_v54, %v356_v56  ;;  %v19175_v6 = vsub.s32 0, %v19172_v57  ;;  %v19178_v13 = vsub.s32 1, %v19172_v57  ;;  %v316_v54 = vld [vmem:[#allocation5 + $0x2f0] sm:$0xff] }
 0x189   :  { %3231 = vmatmul.mubr.bf16.vlgmr.msra.gmra.mxu1 %v19160_v39  ;;  %3282 = vmatprep.subr.bf16.mxu0 %v14949_v4  ;;  %v670_v4 = vld [vmem:[#allocation7] sm:$0xff] }
 0x18a   :  { %3322 = vmatpush1.bf16.msra.mxu1 %v15084_v3  ;;  %3353 = vmatprep.mubr.bf16.mxu1 %v19142_v59  ;;  %v476_v3 = vld [vmem:[#allocation5 + $0x7f0] sm:$0xff]  ;;  %v675_v15 = vrot.slane %v670_v4, %v19175_v6  ;;  %v679_v24 = vrot.slane %v670_v4, %v19178_v13 }
 0x18b   :  { %3323 = vmatprep.subr.bf16.mxu1 %v15077_v8  ;;  %v15021_v8 = vcombine.high %v344_v63, %v348_v0  ;;  %v15148_v18 = vcombine.low %v472_v1, %v476_v3 }
 0x18c   :  { %3283 = vmatpush1.bf16.msra.mxu0 %v14948_v10  ;;  %v340_v10 = vld [vmem:[#allocation5 + $0x3b0] sm:$0xff] }
 0x18d   :  { %3284 = vmatprep.subr.bf16.mxu0 %v14941_v12  ;;  %v15149_v12 = vcombine.high %v472_v1, %v476_v3  ;;  %v304_v1 = vld [vmem:[#allocation5 + $0x290] sm:$0xff] }
 0x18e   :  { %3324 = vmatpush1.bf16.msra.mxu1 %v15076_v11  ;;  %v464_v11 = vld [vmem:[#allocation5 + $0x790] sm:$0xff] }
 0x18f   :  { %3325 = vmatprep.subr.bf16.mxu1 %v15069_v17  ;;  %v15020_v17 = vcombine.low %v344_v63, %v348_v0  ;;  %v15141_v25 = vcombine.high %v464_v11, %v468_v14  ;;  %v15140_v34 = vcombine.low %v464_v11, %v468_v14  ;;  %v14989_v0 = vcombine.high %v312_v53, %v316_v54  ;;  %v432_v3 = vld [vmem:[#allocation5 + $0x690] sm:$0xff] }
 0x190   :  { %3285 = vmatpush1.bf16.msra.mxu0 %v14940_v20  ;;  %v15013_v20 = vcombine.high %v336_v9, %v340_v10  ;;  %v300_v11 = vld [vmem:[#allocation5 + $0x270] sm:$0xff] }
 0x191   :  { %3286 = vmatprep.subr.bf16.mxu0 %v14933_v22  ;;  %v332_v22 = vld [vmem:[#allocation5 + $0x370] sm:$0xff] }
 0x192   :  { %3326 = vmatpush1.bf16.msra.mxu1 %v15068_v21  ;;  %v328_v21 = vld [vmem:[#allocation5 + $0x350] sm:$0xff] }
 0x193   :  { %3327 = vmatprep.subr.bf16.mxu1 %v15061_v26  ;;  %v460_v26 = vld [vmem:[#allocation5 + $0x770] sm:$0xff]  ;;  %v15005_v35 = vcombine.high %v328_v21, %v332_v22 }
 0x194   :  { %3287 = vmatpush1.bf16.msra.mxu0 %v14932_v28  ;;  %v15133_v44 = vcombine.high %v456_v23, %v460_v26 }
 0x195   :  { %3288 = vmatprep.subr.bf16.mxu0 %v14925_v32  ;;  %v15012_v32 = vcombine.low %v336_v9, %v340_v10  ;;  %v296_v10 = vld [vmem:[#allocation5 + $0x250] sm:$0xff] }
 0x196   :  { %3328 = vmatpush1.bf16.msra.mxu1 %v15060_v31 }
 0x197   :  { %3329 = vmatprep.subr.bf16.mxu1 %v15053_v36  ;;  %v320_v36 = vld [vmem:[#allocation5 + $0x310] sm:$0xff] }
 0x198   :  { %3289 = vmatpush1.bf16.msra.mxu0 %v14924_v40  ;;  %v448_v40 = vld [vmem:[#allocation5 + $0x710] sm:$0xff]  ;;  %v14997_v52 = vcombine.high %v320_v36, %v324_v37 }
 0x199   :  { %3290 = vmatprep.subr.bf16.mxu0 %v14917_v42  ;;  %v15124_v63 = vcombine.low %v448_v40, %v452_v45 }
 0x19a   :  { %3330 = vmatpush1.bf16.msra.mxu1 %v15052_v41 }
 0x19b   :  { %3331 = vmatprep.subr.bf16.mxu1 %v15045_v46 }
 0x19c   :  { %3291 = vmatpush1.bf16.msra.mxu0 %v14916_v49  ;;  %v15004_v49 = vcombine.low %v328_v21, %v332_v22  ;;  %v288_v21 = vld [vmem:[#allocation5 + $0x210] sm:$0xff] }
 0x19d   :  { %3292 = vmatprep.subr.bf16.mxu0 %v14909_v51  ;;  %v15132_v51 = vcombine.low %v456_v23, %v460_v26  ;;  %v292_v22 = vld [vmem:[#allocation5 + $0x230] sm:$0xff]  ;;  %v14972_v26 = vcombine.low %v296_v10, %v300_v11 }
 0x19e   :  { %3332 = vmatpush1.bf16.msra.mxu1 %v15044_v50  ;;  %v416_v23 = vld [vmem:[#allocation5 + $0x610] sm:$0xff] }
 0x19f   :  { %3333 = vmatprep.subr.bf16.mxu1 %v15037_v55  ;;  %v440_v55 = vld [vmem:[#allocation5 + $0x6d0] sm:$0xff] }
 0x1a0   :  { %3293 = vmatpush1.bf16.msra.mxu0 %v14908_v60  ;;  %v15125_v60 = vcombine.high %v448_v40, %v452_v45 }
 0x1a1   :  { %3294 = vmatprep.subr.bf16.mxu0 %v14901_v62  ;;  %v14996_v62 = vcombine.low %v320_v36, %v324_v37  ;;  %v14964_v36 = vcombine.low %v288_v21, %v292_v22 }
 0x1a2   :  { %3334 = vmatpush1.bf16.msra.mxu1 %v15036_v61  ;;  %v444_v61 = vld [vmem:[#allocation5 + $0x6f0] sm:$0xff] }
 0x1a3   :  { %3335 = vmatprep.subr.bf16.mxu1 %v15029_v2  ;;  %v308_v2 = vld [vmem:[#allocation5 + $0x2b0] sm:$0xff]  ;;  %v15117_v4 = vcombine.high %v440_v55, %v444_v61 }
 0x1a4   :  { %3295 = vmatpush1.bf16.msra.mxu0 %v14900_v5  ;;  %v436_v5 = vld [vmem:[#allocation5 + $0x6b0] sm:$0xff]  ;;  %v14981_v9 = vcombine.high %v304_v1, %v308_v2 }
 0x1a5   :  { %3296 = vmatprep.subr.bf16.mxu0 %v15021_v8  ;;  %v15116_v8 = vcombine.low %v440_v55, %v444_v61  ;;  %v15109_v14 = vcombine.high %v432_v3, %v436_v5  ;;  %v652_v55 = vld [vmem:[#allocation5 + $0xd70] sm:$0xff] }
 0x1a6   :  { %3336 = vmatpush1.bf16.msra.mxu1 %v15028_v7  ;;  %v14988_v7 = vcombine.low %v312_v53, %v316_v54  ;;  %v648_v53 = vld [vmem:[#allocation5 + $0xd50] sm:$0xff] }
 0x1a7   :  { %3337 = vmatprep.subr.bf16.mxu1 %v15149_v12  ;;  %v2986_v27 = vpop.f32.mrf.mxu0  ;;  %v424_v12 = vld [vmem:[#allocation5 + $0x650] sm:$0xff] }
 0x1a8   :  { %v2987_v28 = vadd.f32 %v2986_v27, %v675_v15  ;;  %3297 = vmatpush2.bf16.msra.mxu0 %v15020_v17  ;;  %v428_v15 = vld [vmem:[#allocation5 + $0x670] sm:$0xff]  ;;  %v14980_v17 = vcombine.low %v304_v1, %v308_v2 }
 0x1a9   :  { %v3027_v31 = vpop.f32.mrf.mxu1  ;;  %v2988_v33 = vpop.f32.mrf.mxu0  ;;  %3298 = vmatprep.subr.bf16.mxu0 %v15013_v20  ;;  %v14973_v20 = vcombine.high %v296_v10, %v300_v11  ;;  %v15100_v27 = vcombine.low %v424_v12, %v428_v15  ;;  %v640_v1 = vld [vmem:[#allocation5 + $0xd10] sm:$0xff] }
 0x1aa   :  { %3338 = vmatpush2.bf16.msra.mxu1 %v15148_v18  ;;  %v19182_v41 = vadd.f32 %v3027_v31, %v2987_v28  ;;  %v2989_v42 = vadd.f32 %v2988_v33, %v679_v24  ;;  %v15108_v18 = vcombine.low %v432_v3, %v436_v5  ;;  %v15101_v24 = vcombine.high %v424_v12, %v428_v15  ;;  %v536_v31 = vld [vmem:[#allocation5 + $0x9d0] sm:$0xff] }
 0x1ab   :  { %v3029_v43 = vpop.f32.mrf.mxu1  ;;  %3339 = vmatprep.subr.bf16.mxu1 %v15141_v25  ;;  %v2990_v46 = vpop.f32.mrf.mxu0  ;;  %v420_v25 = vld [vmem:[#allocation5 + $0x630] sm:$0xff]  ;;  %v14965_v28 = vcombine.high %v288_v21, %v292_v22  ;;  %v15325_v3 = vcombine.high %v648_v53, %v652_v55 }
 0x1ac   :  { %v19184_v47 = vadd.f32 %v3029_v43, %v2989_v42  ;;  %3299 = vmatpush2.bf16.msra.mxu0 %v15012_v32  ;;  %v540_v32 = vld [vmem:[#allocation5 + $0x9f0] sm:$0xff]  ;;  %v15092_v37 = vcombine.low %v416_v23, %v420_v25 }
 0x1ad   :  { %v3031_v48 = vpop.f32.mrf.mxu1  ;;  %v2991_v50 = vpop.f32.mrf.mxu0  ;;  %3300 = vmatprep.subr.bf16.mxu0 %v15005_v35  ;;  %v664_v33 = vld [vmem:[#allocation5 + $0xdd0] sm:$0xff]  ;;  %v15213_v40 = vcombine.high %v536_v31, %v540_v32 }
 0x1ae   :  { %3340 = vmatpush2.bf16.msra.mxu1 %v15140_v34  ;;  %v15093_v34 = vcombine.high %v416_v23, %v420_v25  ;;  %v668_v35 = vld [vmem:[#allocation5 + $0xdf0] sm:$0xff]  ;;  %v15212_v48 = vcombine.low %v536_v31, %v540_v32 }
 0x1af   :  { %v3032_v56 = vpop.f32.mrf.mxu1  ;;  %3341 = vmatprep.subr.bf16.mxu1 %v15133_v44  ;;  %v528_v42 = vld [vmem:[#allocation5 + $0x990] sm:$0xff]  ;;  %v15341_v45 = vcombine.high %v664_v33, %v668_v35 }
 0x1b0   :  { %3301 = vmatpush2.bf16.msra.mxu0 %v15004_v49  ;;  %v532_v43 = vld [vmem:[#allocation5 + $0x9b0] sm:$0xff]  ;;  %v15340_v49 = vcombine.low %v664_v33, %v668_v35 }
 0x1b1   :  { %3302 = vmatprep.subr.bf16.mxu0 %v14997_v52  ;;  %v656_v44 = vld [vmem:[#allocation5 + $0xd90] sm:$0xff]  ;;  %v15205_v50 = vcombine.high %v528_v42, %v532_v43 }
 0x1b2   :  { %3342 = vmatpush2.bf16.msra.mxu1 %v15132_v51  ;;  %v660_v46 = vld [vmem:[#allocation5 + $0xdb0] sm:$0xff] }
 0x1b3   :  { %3343 = vmatprep.subr.bf16.mxu1 %v15125_v60  ;;  %v520_v51 = vld [vmem:[#allocation5 + $0x950] sm:$0xff]  ;;  %v15333_v54 = vcombine.high %v656_v44, %v660_v46  ;;  %v15204_v60 = vcombine.low %v528_v42, %v532_v43  ;;  %v15332_v61 = vcombine.low %v656_v44, %v660_v46 }
 0x1b4   :  { %3303 = vmatpush2.bf16.msra.mxu0 %v14996_v62  ;;  %v524_v52 = vld [vmem:[#allocation5 + $0x970] sm:$0xff] }
 0x1b5   :  { %3304 = vmatprep.subr.bf16.mxu0 %v14989_v0  ;;  %v15197_v62 = vcombine.high %v520_v51, %v524_v52  ;;  %v516_v0 = vld [vmem:[#allocation5 + $0x930] sm:$0xff] }
 0x1b6   :  { %3344 = vmatpush2.bf16.msra.mxu1 %v15124_v63  ;;  %v512_v63 = vld [vmem:[#allocation5 + $0x910] sm:$0xff] }
 0x1b7   :  { %3345 = vmatprep.subr.bf16.mxu1 %v15117_v4  ;;  %v644_v4 = vld [vmem:[#allocation5 + $0xd30] sm:$0xff] }
 0x1b8   :  { %3305 = vmatpush2.bf16.msra.mxu0 %v14988_v7  ;;  %v15196_v7 = vcombine.low %v520_v51, %v524_v52  ;;  %v504_v10 = vld [vmem:[#allocation5 + $0x8d0] sm:$0xff]  ;;  %v15317_v15 = vcombine.high %v640_v1, %v644_v4 }
 0x1b9   :  { %3306 = vmatprep.subr.bf16.mxu0 %v14981_v9  ;;  %v15189_v9 = vcombine.high %v512_v63, %v516_v0  ;;  %v508_v11 = vld [vmem:[#allocation5 + $0x8f0] sm:$0xff] }
 0x1ba   :  { %3346 = vmatpush2.bf16.msra.mxu1 %v15116_v8  ;;  %v15324_v8 = vcombine.low %v648_v53, %v652_v55  ;;  %v632_v12 = vld [vmem:[#allocation5 + $0xcd0] sm:$0xff]  ;;  %v15181_v21 = vcombine.high %v504_v10, %v508_v11 }
 0x1bb   :  { %3347 = vmatprep.subr.bf16.mxu1 %v15109_v14  ;;  %v496_v22 = vld [vmem:[#allocation5 + $0x890] sm:$0xff] }
 0x1bc   :  { %3307 = vmatpush2.bf16.msra.mxu0 %v14980_v17  ;;  %v636_v17 = vld [vmem:[#allocation5 + $0xcf0] sm:$0xff] }
 0x1bd   :  { %3308 = vmatprep.subr.bf16.mxu0 %v14973_v20  ;;  %v15316_v20 = vcombine.low %v640_v1, %v644_v4  ;;  %v500_v23 = vld [vmem:[#allocation5 + $0x8b0] sm:$0xff]  ;;  %v15309_v25 = vcombine.high %v632_v12, %v636_v17 }
 0x1be   :  { %3348 = vmatpush2.bf16.msra.mxu1 %v15108_v18  ;;  %v15188_v18 = vcombine.low %v512_v63, %v516_v0  ;;  %v15173_v31 = vcombine.high %v496_v22, %v500_v23  ;;  %v488_v32 = vld [vmem:[#allocation5 + $0x850] sm:$0xff] }
 0x1bf   :  { %3349 = vmatprep.subr.bf16.mxu1 %v15101_v24  ;;  %v624_v24 = vld [vmem:[#allocation5 + $0xc90] sm:$0xff] }
 0x1c0   :  { %3309 = vmatpush2.bf16.msra.mxu0 %v14972_v26  ;;  %v628_v26 = vld [vmem:[#allocation5 + $0xcb0] sm:$0xff] }
 0x1c1   :  { %3310 = vmatprep.subr.bf16.mxu0 %v14965_v28  ;;  %v15308_v28 = vcombine.low %v632_v12, %v636_v17  ;;  %v492_v33 = vld [vmem:[#allocation5 + $0x870] sm:$0xff]  ;;  %v15301_v35 = vcombine.high %v624_v24, %v628_v26  ;;  %v269_v17 = vld [vmem:[#allocation5 + $0x178] sm:$0xff] }
 0x1c2   :  { %3350 = vmatpush2.bf16.msra.mxu1 %v15100_v27  ;;  %v15180_v27 = vcombine.low %v504_v10, %v508_v11  ;;  %v15165_v42 = vcombine.high %v488_v32, %v492_v33  ;;  %v480_v43 = vld [vmem:[#allocation5 + $0x810] sm:$0xff] }
 0x1c3   :  { %3351 = vmatprep.subr.bf16.mxu1 %v15093_v34  ;;  %v616_v34 = vld [vmem:[#allocation5 + $0xc50] sm:$0xff] }
 0x1c4   :  { %3311 = vmatpush2.bf16.msra.mxu0 %v14964_v36  ;;  %v620_v36 = vld [vmem:[#allocation5 + $0xc70] sm:$0xff] }
 0x1c5   :  { %3362 = vmatprep.subr.bf16.mxu0 %v15213_v40  ;;  %v15300_v40 = vcombine.low %v624_v24, %v628_v26  ;;  %v484_v44 = vld [vmem:[#allocation5 + $0x830] sm:$0xff]  ;;  %v15293_v46 = vcombine.high %v616_v34, %v620_v36 }
 0x1c6   :  { %3352 = vmatpush2.bf16.msra.mxu1 %v15092_v37  ;;  %v15172_v37 = vcombine.low %v496_v22, %v500_v23  ;;  %v15157_v51 = vcombine.high %v480_v43, %v484_v44  ;;  %v600_v52 = vld [vmem:[#allocation5 + $0xbd0] sm:$0xff] }
 0x1c7   :  { %3403 = vmatprep.subr.bf16.mxu1 %v15341_v45  ;;  %3313 = vmatmul.mubr.bf16.vlgmr.msra.gmra.mxu0 %v19146_v16  ;;  %v608_v45 = vld [vmem:[#allocation5 + $0xc10] sm:$0xff] }
 0x1c8   :  { %3363 = vmatpush1.bf16.msra.mxu0 %v15212_v48  ;;  %3394 = vmatprep.mubr.bf16.mxu0 %v19151_v29  ;;  %v612_v48 = vld [vmem:[#allocation5 + $0xc30] sm:$0xff] }
 0x1c9   :  { %v19187_v56 = vpop.f32.mrf.mxu1  ;;  %3354 = vmatmul.mubr.bf16.vlgmr.msra.gmra.mxu1 %v19148_v19  ;;  %3364 = vmatprep.subr.bf16.mxu0 %v15205_v50  ;;  %v15292_v50 = vcombine.low %v616_v34, %v620_v36  ;;  %v604_v53 = vld [vmem:[#allocation5 + $0xbf0] sm:$0xff]  ;;  %v15285_v55 = vcombine.high %v608_v45, %v612_v48 }
 0x1ca   :  { %3404 = vmatpush1.bf16.msra.mxu1 %v15340_v49  ;;  %3435 = vmatprep.mubr.bf16.mxu1 %v19017_v38  ;;  %v15164_v49 = vcombine.low %v488_v32, %v492_v33  ;;  %v15277_v63 = vcombine.high %v600_v52, %v604_v53  ;;  %v592_v0 = vld [vmem:[#allocation5 + $0xb90] sm:$0xff] }
 0x1cb   :  { %v19190_v2 = vpop.f32.mrf.mxu1  ;;  %3405 = vmatprep.subr.bf16.mxu1 %v15333_v54  ;;  %v281_v54 = vld [vmem:[#allocation5 + $0x1d8] sm:$0xff]  ;;  %v596_v1 = vld [vmem:[#allocation5 + $0xbb0] sm:$0xff] }
 0x1cc   :  { %3365 = vmatpush1.bf16.msra.mxu0 %v15204_v60  ;;  %v285_v60 = vld [vmem:[#allocation5 + $0x1f8] sm:$0xff]  ;;  %v584_v11 = vld [vmem:[#allocation5 + $0xb50] sm:$0xff] }
 0x1cd   :  { %v3113_v5 = vpop.f32.mrf.mxu1  ;;  %3366 = vmatprep.subr.bf16.mxu0 %v15197_v62  ;;  %v15284_v62 = vcombine.low %v608_v45, %v612_v48  ;;  %v14959_v4 = vcombine.high %v281_v54, %v285_v60  ;;  %v588_v12 = vld [vmem:[#allocation5 + $0xb70] sm:$0xff] }
 0x1ce   :  { %3406 = vmatpush1.bf16.msra.mxu1 %v15332_v61  ;;  %v15156_v61 = vcombine.low %v480_v43, %v484_v44  ;;  %v277_v5 = vld [vmem:[#allocation5 + $0x1b8] sm:$0xff]  ;;  %v15261_v23 = vcombine.high %v584_v11, %v588_v12  ;;  %v576_v24 = vld [vmem:[#allocation5 + $0xb10] sm:$0xff]  ;;  %v15260_v34 = vcombine.low %v584_v11, %v588_v12 }
 0x1cf   :  { %v3114_v14 = vpop.f32.mrf.mxu1  ;;  %3407 = vmatprep.subr.bf16.mxu1 %v15325_v3  ;;  %v273_v3 = vld [vmem:[#allocation5 + $0x198] sm:$0xff]  ;;  %v564_v48 = vld [vmem:[#allocation5 + $0xab0] sm:$0xff] }
 0x1d0   :  { %3367 = vmatpush1.bf16.msra.mxu0 %v15196_v7  ;;  %v15276_v7 = vcombine.low %v600_v52, %v604_v53  ;;  %v14951_v10 = vcombine.high %v273_v3, %v277_v5  ;;  %v14950_v22 = vcombine.low %v273_v3, %v277_v5  ;;  %v253_v43 = vld [vmem:[#allocation5 + $0xf8] sm:$0xff]  ;;  %v544_v3 = vld [vmem:[#allocation5 + $0xa10] sm:$0xff] }
 0x1d1   :  { %3368 = vmatprep.subr.bf16.mxu0 %v15189_v9  ;;  %v15269_v9 = vcombine.high %v592_v0, %v596_v1  ;;  %v225_v5 = vld [vmem:[#allocation5 + $0x18] sm:$0xff] }
 0x1d2   :  { %3408 = vmatpush1.bf16.msra.mxu1 %v15324_v8  ;;  %v14958_v8 = vcombine.low %v281_v54, %v285_v60  ;;  %v552_v54 = vld [vmem:[#allocation5 + $0xa50] sm:$0xff]  ;;  %v233_v60 = vld [vmem:[#allocation5 + $0x58] sm:$0xff] }
 0x1d3   :  { %3409 = vmatprep.subr.bf16.mxu1 %v15317_v15  ;;  %v265_v15 = vld [vmem:[#allocation5 + $0x158] sm:$0xff] }
 0x1d4   :  { %3369 = vmatpush1.bf16.msra.mxu0 %v15188_v18  ;;  %v14942_v36 = vcombine.low %v265_v15, %v269_v17  ;;  %v345_v12 = vld [vmem:[#allocation5 + $0x3d8] sm:$0xff] }
 0x1d5   :  { %3370 = vmatprep.subr.bf16.mxu0 %v15181_v21 }
 0x1d6   :  { %3410 = vmatpush1.bf16.msra.mxu1 %v15316_v20  ;;  %v15268_v20 = vcombine.low %v592_v0, %v596_v1 }
 0x1d7   :  { %3411 = vmatprep.subr.bf16.mxu1 %v15309_v25  ;;  %v580_v25 = vld [vmem:[#allocation5 + $0xb30] sm:$0xff] }
 0x1d8   :  { %3371 = vmatpush1.bf16.msra.mxu0 %v15180_v27  ;;  %v15252_v44 = vcombine.low %v576_v24, %v580_v25 }
 0x1d9   :  { %3372 = vmatprep.subr.bf16.mxu0 %v15173_v31  ;;  %v257_v31 = vld [vmem:[#allocation5 + $0x118] sm:$0xff] }
 0x1da   :  { %3412 = vmatpush1.bf16.msra.mxu1 %v15308_v28  ;;  %v14943_v28 = vcombine.high %v265_v15, %v269_v17  ;;  %v409_v15 = vld [vmem:[#allocation5 + $0x5d8] sm:$0xff] }
 0x1db   :  { %3413 = vmatprep.subr.bf16.mxu1 %v15301_v35 }
 0x1dc   :  { %3373 = vmatpush1.bf16.msra.mxu0 %v15172_v37  ;;  %v568_v37 = vld [vmem:[#allocation5 + $0xad0] sm:$0xff] }
 0x1dd   :  { %3374 = vmatprep.subr.bf16.mxu0 %v15165_v42  ;;  %v249_v42 = vld [vmem:[#allocation5 + $0xd8] sm:$0xff] }
 0x1de   :  { %3414 = vmatpush1.bf16.msra.mxu1 %v15300_v40  ;;  %v572_v40 = vld [vmem:[#allocation5 + $0xaf0] sm:$0xff]  ;;  %v14927_v45 = vcombine.high %v249_v42, %v253_v43  ;;  %v14926_v52 = vcombine.low %v249_v42, %v253_v43 }
 0x1df   :  { %3415 = vmatprep.subr.bf16.mxu1 %v15293_v46  ;;  %v560_v46 = vld [vmem:[#allocation5 + $0xa90] sm:$0xff] }
 0x1e0   :  { %3375 = vmatpush1.bf16.msra.mxu0 %v15164_v49  ;;  %v241_v49 = vld [vmem:[#allocation5 + $0x98] sm:$0xff]  ;;  %v15237_v53 = vcombine.high %v560_v46, %v564_v48 }
 0x1e1   :  { %3376 = vmatprep.subr.bf16.mxu0 %v15157_v51  ;;  %v15244_v51 = vcombine.low %v568_v37, %v572_v40 }
 0x1e2   :  { %3416 = vmatpush1.bf16.msra.mxu1 %v15292_v50  ;;  %v245_v50 = vld [vmem:[#allocation5 + $0xb8] sm:$0xff] }
 0x1e3   :  { %3417 = vmatprep.subr.bf16.mxu1 %v15285_v55  ;;  %v556_v55 = vld [vmem:[#allocation5 + $0xa70] sm:$0xff]  ;;  %v14918_v0 = vcombine.low %v241_v49, %v245_v50 }
 0x1e4   :  { %3377 = vmatpush1.bf16.msra.mxu0 %v15156_v61  ;;  %v14919_v61 = vcombine.high %v241_v49, %v245_v50  ;;  %v15229_v1 = vcombine.high %v552_v54, %v556_v55 }
 0x1e5   :  { %3378 = vmatprep.subr.bf16.mxu0 %v15277_v63  ;;  %v15236_v63 = vcombine.low %v560_v46, %v564_v48  ;;  %v321_v46 = vld [vmem:[#allocation5 + $0x318] sm:$0xff] }
 0x1e6   :  { %3418 = vmatpush1.bf16.msra.mxu1 %v15284_v62  ;;  %v237_v62 = vld [vmem:[#allocation5 + $0x78] sm:$0xff] }
 0x1e7   :  { %3444 = vmatprep.subr.bf16.mxu1 %v14959_v4  ;;  %v3068_v14 = vpop.f32.mrf.mxu0  ;;  %v548_v4 = vld [vmem:[#allocation5 + $0xa30] sm:$0xff]  ;;  %v325_v48 = vld [vmem:[#allocation5 + $0x338] sm:$0xff] }
 0x1e8   :  { %v3069_v18 = vadd.f32 %v3068_v14, %v19182_v41  ;;  %3379 = vmatpush2.bf16.msra.mxu0 %v15276_v7  ;;  %v261_v41 = vld [vmem:[#allocation5 + $0x138] sm:$0xff]  ;;  %v14911_v7 = vcombine.high %v233_v60, %v237_v62  ;;  %v15221_v11 = vcombine.high %v544_v3, %v548_v4 }
 0x1e9   :  { %3436 = vmatmul.mubr.bf16.vlgmr.msra.gmra.mxu1 %v19156_v30  ;;  %v3070_v21 = vpop.f32.mrf.mxu0  ;;  %3380 = vmatprep.subr.bf16.mxu0 %v15269_v9  ;;  %v15228_v9 = vcombine.low %v552_v54, %v556_v55  ;;  %v349_v14 = vld [vmem:[#allocation5 + $0x3f8] sm:$0xff] }
 0x1ea   :  { %3445 = vmatpush1.bf16.msra.mxu1 %v14958_v8  ;;  %v19197_v26 = vadd.f32 %v19187_v56, %v3069_v18  ;;  %v3071_v27 = vadd.f32 %v3070_v21, %v19184_v47  ;;  %3476 = vmatprep.mubr.bf16.mxu1 %v19140_v58  ;;  %v15253_v56 = vcombine.high %v576_v24, %v580_v25  ;;  %v229_v8 = vld [vmem:[#allocation5 + $0x38] sm:$0xff] }
 0x1eb   :  { %3446 = vmatprep.subr.bf16.mxu1 %v14951_v10  ;;  %v3072_v32 = vpop.f32.mrf.mxu0  ;;  %v14935_v47 = vcombine.high %v257_v31, %v261_v41  ;;  %v14934_v58 = vcombine.low %v257_v31, %v261_v41  ;;  %v14910_v10 = vcombine.low %v233_v60, %v237_v62  ;;  %v14903_v17 = vcombine.high %v225_v5, %v229_v8  ;;  %v413_v18 = vld [vmem:[#allocation5 + $0x5f8] sm:$0xff] }
 0x1ec   :  { %v19202_v33 = vadd.f32 %v19190_v2, %v3071_v27  ;;  %3381 = vmatpush2.bf16.msra.mxu0 %v15268_v20  ;;  %v15245_v2 = vcombine.high %v568_v37, %v572_v40  ;;  %v15220_v20 = vcombine.low %v544_v3, %v548_v4  ;;  %v14902_v21 = vcombine.low %v225_v5, %v229_v8  ;;  %v341_v24 = vld [vmem:[#allocation5 + $0x3b8] sm:$0xff] }
 0x1ed   :  { %v3073_v35 = vpop.f32.mrf.mxu0  ;;  %3382 = vmatprep.subr.bf16.mxu0 %v15261_v23  ;;  %v337_v23 = vld [vmem:[#allocation5 + $0x398] sm:$0xff]  ;;  %v15023_v27 = vcombine.high %v345_v12, %v349_v14  ;;  %v15086_v31 = vcombine.low %v409_v15, %v413_v18  ;;  %v15022_v41 = vcombine.low %v345_v12, %v349_v14 }
 0x1ee   :  { %3447 = vmatpush1.bf16.msra.mxu1 %v14950_v22  ;;  %v15087_v22 = vcombine.high %v409_v15, %v413_v18  ;;  %v401_v25 = vld [vmem:[#allocation5 + $0x598] sm:$0xff]  ;;  %v15014_v42 = vcombine.low %v337_v23, %v341_v24 }
 0x1ef   :  { %3448 = vmatprep.subr.bf16.mxu1 %v14943_v28  ;;  %v405_v28 = vld [vmem:[#allocation5 + $0x5b8] sm:$0xff] }
 0x1f0   :  { %3383 = vmatpush2.bf16.msra.mxu0 %v15260_v34  ;;  %v15079_v32 = vcombine.high %v401_v25, %v405_v28  ;;  %v15015_v34 = vcombine.high %v337_v23, %v341_v24  ;;  %v393_v35 = vld [vmem:[#allocation5 + $0x558] sm:$0xff] }
 0x1f1   :  { %3384 = vmatprep.subr.bf16.mxu0 %v15253_v56  ;;  %v329_v56 = vld [vmem:[#allocation5 + $0x358] sm:$0xff] }
 0x1f2   :  { %3449 = vmatpush1.bf16.msra.mxu1 %v14942_v36  ;;  %v397_v36 = vld [vmem:[#allocation5 + $0x578] sm:$0xff] }
 0x1f3   :  { %3450 = vmatprep.subr.bf16.mxu1 %v14935_v47  ;;  %v333_v37 = vld [vmem:[#allocation5 + $0x378] sm:$0xff]  ;;  %v15078_v47 = vcombine.low %v401_v25, %v405_v28  ;;  %v15071_v43 = vcombine.high %v393_v35, %v397_v36  ;;  %v15070_v50 = vcombine.low %v393_v35, %v397_v36  ;;  %v19211_v36 = vsub.s32 2, %v19172_v57 }
 0x1f4   :  { %3385 = vmatpush2.bf16.msra.mxu0 %v15252_v44  ;;  %v313_v54 = vld [vmem:[#allocation5 + $0x2d8] sm:$0xff] }
 0x1f5   :  { %3386 = vmatprep.subr.bf16.mxu0 %v15245_v2  ;;  %v385_v2 = vld [vmem:[#allocation5 + $0x518] sm:$0xff] }
 0x1f6   :  { %3451 = vmatpush1.bf16.msra.mxu1 %v14934_v58  ;;  %v15007_v58 = vcombine.high %v329_v56, %v333_v37  ;;  %v377_v55 = vld [vmem:[#allocation5 + $0x4d8] sm:$0xff] }
 0x1f7   :  { %3452 = vmatprep.subr.bf16.mxu1 %v14927_v45  ;;  %v389_v45 = vld [vmem:[#allocation5 + $0x538] sm:$0xff] }
 0x1f8   :  { %3387 = vmatpush2.bf16.msra.mxu0 %v15244_v51  ;;  %v15006_v51 = vcombine.low %v329_v56, %v333_v37  ;;  %v381_v60 = vld [vmem:[#allocation5 + $0x4f8] sm:$0xff]  ;;  %v15062_v62 = vcombine.low %v385_v2, %v389_v45 }
 0x1f9   :  { %3388 = vmatprep.subr.bf16.mxu0 %v15237_v53  ;;  %v14999_v53 = vcombine.high %v321_v46, %v325_v48  ;;  %v309_v3 = vld [vmem:[#allocation5 + $0x2b8] sm:$0xff]  ;;  %v15054_v8 = vcombine.low %v377_v55, %v381_v60 }
 0x1fa   :  { %3453 = vmatpush1.bf16.msra.mxu1 %v14926_v52  ;;  %v15063_v52 = vcombine.high %v385_v2, %v389_v45  ;;  %v369_v4 = vld [vmem:[#allocation5 + $0x498] sm:$0xff] }
 0x1fb   :  { %3454 = vmatprep.subr.bf16.mxu1 %v14919_v61  ;;  %v317_v61 = vld [vmem:[#allocation5 + $0x2f8] sm:$0xff] }
 0x1fc   :  { %3389 = vmatpush2.bf16.msra.mxu0 %v15236_v63  ;;  %v14998_v63 = vcombine.low %v321_v46, %v325_v48  ;;  %v14991_v5 = vcombine.high %v313_v54, %v317_v61  ;;  %v301_v12 = vld [vmem:[#allocation5 + $0x278] sm:$0xff]  ;;  %v19213_v46 = vld [vmem:[#allocation7] sm:$0xff] }
 0x1fd   :  { %3390 = vmatprep.subr.bf16.mxu0 %v15229_v1  ;;  %v305_v1 = vld [vmem:[#allocation5 + $0x298] sm:$0xff]  ;;  %v683_v48 = vrot.slane %v19213_v46, %v19211_v36 }
 0x1fe   :  { %3455 = vmatpush1.bf16.msra.mxu1 %v14918_v0  ;;  %v15055_v0 = vcombine.high %v377_v55, %v381_v60  ;;  %v361_v14 = vld [vmem:[#allocation5 + $0x458] sm:$0xff]  ;;  %v14983_v15 = vcombine.high %v305_v1, %v309_v3 }
 0x1ff   :  { %3456 = vmatprep.subr.bf16.mxu1 %v14911_v7  ;;  %v373_v7 = vld [vmem:[#allocation5 + $0x4b8] sm:$0xff] }
 0x200   :  { %3391 = vmatpush2.bf16.msra.mxu0 %v15228_v9  ;;  %v14990_v9 = vcombine.low %v313_v54, %v317_v61  ;;  %v15046_v18 = vcombine.low %v369_v4, %v373_v7  ;;  %v293_v23 = vld [vmem:[#allocation5 + $0x238] sm:$0xff] }
 0x201   :  { %3392 = vmatprep.subr.bf16.mxu0 %v15221_v11  ;;  %v297_v11 = vld [vmem:[#allocation5 + $0x258] sm:$0xff] }
 0x202   :  { %3457 = vmatpush1.bf16.msra.mxu1 %v14910_v10  ;;  %v15047_v10 = vcombine.high %v369_v4, %v373_v7  ;;  %v353_v24 = vld [vmem:[#allocation5 + $0x418] sm:$0xff]  ;;  %v14975_v25 = vcombine.high %v297_v11, %v301_v12 }
 0x203   :  { %3458 = vmatprep.subr.bf16.mxu1 %v14903_v17  ;;  %v365_v17 = vld [vmem:[#allocation5 + $0x478] sm:$0xff] }
 0x204   :  { %3393 = vmatpush2.bf16.msra.mxu0 %v15220_v20  ;;  %v14982_v20 = vcombine.low %v305_v1, %v309_v3  ;;  %v15038_v28 = vcombine.low %v361_v14, %v365_v17  ;;  %v537_v35 = vld [vmem:[#allocation5 + $0x9d8] sm:$0xff] }
 0x205   :  { %3485 = vmatprep.subr.bf16.mxu0 %v15087_v22  ;;  %v289_v22 = vld [vmem:[#allocation5 + $0x218] sm:$0xff] }
 0x206   :  { %3459 = vmatpush1.bf16.msra.mxu1 %v14902_v21  ;;  %v15039_v21 = vcombine.high %v361_v14, %v365_v17  ;;  %v14967_v56 = vcombine.high %v289_v22, %v293_v23  ;;  %v541_v37 = vld [vmem:[#allocation5 + $0x9f8] sm:$0xff] }
 0x207   :  { %3460 = vmatprep.subr.bf16.mxu1 %v15023_v27  ;;  %3395 = vmatmul.mubr.bf16.vlgmr.msra.gmra.mxu0 %v19160_v39  ;;  %v357_v27 = vld [vmem:[#allocation5 + $0x438] sm:$0xff] }
 0x208   :  { %3486 = vmatpush1.bf16.msra.mxu0 %v15086_v31  ;;  %3517 = vmatprep.mubr.bf16.mxu0 %v19142_v59  ;;  %v14974_v31 = vcombine.low %v297_v11, %v301_v12  ;;  %v469_v2 = vld [vmem:[#allocation5 + $0x7b8] sm:$0xff] }
 0x209   :  { %v19205_v40 = vpop.f32.mrf.mxu1  ;;  %3487 = vmatprep.subr.bf16.mxu0 %v15079_v32  ;;  %v473_v32 = vld [vmem:[#allocation5 + $0x7d8] sm:$0xff] }
 0x20a   :  { %3461 = vmatpush2.bf16.msra.mxu1 %v15022_v41  ;;  %v15031_v41 = vcombine.high %v353_v24, %v357_v27  ;;  %v529_v45 = vld [vmem:[#allocation5 + $0x998] sm:$0xff]  ;;  %v3151_v61 = vadd.f32 %v19205_v40, %v683_v48 }
 0x20b   :  { %v19208_v44 = vpop.f32.mrf.mxu1  ;;  %3462 = vmatprep.subr.bf16.mxu1 %v15015_v34  ;;  %v477_v34 = vld [vmem:[#allocation5 + $0x7f8] sm:$0xff] }
 0x20c   :  { %3488 = vmatpush1.bf16.msra.mxu0 %v15078_v47  ;;  %v15030_v47 = vcombine.low %v353_v24, %v357_v27  ;;  %v521_v55 = vld [vmem:[#allocation5 + $0x958] sm:$0xff] }
 0x20d   :  { %v3154_v49 = vpop.f32.mrf.mxu1  ;;  %3489 = vmatprep.subr.bf16.mxu0 %v15071_v43  ;;  %v15151_v43 = vcombine.high %v473_v32, %v477_v34  ;;  %v525_v60 = vld [vmem:[#allocation5 + $0x978] sm:$0xff] }
 0x20e   :  { %3463 = vmatpush2.bf16.msra.mxu1 %v15014_v42  ;;  %v14966_v42 = vcombine.low %v289_v22, %v293_v23  ;;  %v15215_v49 = vcombine.high %v537_v35, %v541_v37  ;;  %v449_v3 = vld [vmem:[#allocation5 + $0x718] sm:$0xff]  ;;  %v15199_v40 = vcombine.high %v521_v55, %v525_v60  ;;  %v15198_v14 = vcombine.low %v521_v55, %v525_v60 }
 0x20f   :  { %v3155_v59 = vpop.f32.mrf.mxu1  ;;  %3464 = vmatprep.subr.bf16.mxu1 %v15007_v58  ;;  %v465_v58 = vld [vmem:[#allocation5 + $0x798] sm:$0xff] }
 0x210   :  { %3490 = vmatpush1.bf16.msra.mxu0 %v15070_v50  ;;  %v533_v50 = vld [vmem:[#allocation5 + $0x9b8] sm:$0xff]  ;;  %v15143_v54 = vcombine.high %v465_v58, %v469_v2  ;;  %v15142_v1 = vcombine.low %v465_v58, %v469_v2 }
 0x211   :  { %3491 = vmatprep.subr.bf16.mxu0 %v15063_v52  ;;  %v457_v52 = vld [vmem:[#allocation5 + $0x758] sm:$0xff]  ;;  %v15206_v7 = vcombine.low %v529_v45, %v533_v50 }
 0x212   :  { %3465 = vmatpush2.bf16.msra.mxu1 %v15006_v51  ;;  %v15150_v51 = vcombine.low %v473_v32, %v477_v34  ;;  %v461_v59 = vld [vmem:[#allocation5 + $0x778] sm:$0xff] }
 0x213   :  { %3466 = vmatprep.subr.bf16.mxu1 %v14999_v53  ;;  %v15214_v53 = vcombine.low %v537_v35, %v541_v37  ;;  %v453_v4 = vld [vmem:[#allocation5 + $0x738] sm:$0xff]  ;;  %v15134_v12 = vcombine.low %v457_v52, %v461_v59 }
 0x214   :  { %3492 = vmatpush1.bf16.msra.mxu0 %v15062_v62  ;;  %v15207_v62 = vcombine.high %v529_v45, %v533_v50  ;;  %v509_v22 = vld [vmem:[#allocation5 + $0x8f8] sm:$0xff]  ;;  %v15126_v23 = vcombine.low %v449_v3, %v453_v4 }
 0x215   :  { %3493 = vmatprep.subr.bf16.mxu0 %v15055_v0  ;;  %v433_v24 = vld [vmem:[#allocation5 + $0x698] sm:$0xff] }
 0x216   :  { %3467 = vmatpush2.bf16.msra.mxu1 %v14998_v63  ;;  %v425_v34 = vld [vmem:[#allocation5 + $0x658] sm:$0xff] }
 0x217   :  { %3468 = vmatprep.subr.bf16.mxu1 %v14991_v5  ;;  %v429_v35 = vld [vmem:[#allocation5 + $0x678] sm:$0xff] }
 0x218   :  { %3494 = vmatpush1.bf16.msra.mxu0 %v15054_v8  ;;  %v15135_v8 = vcombine.high %v457_v52, %v461_v59  ;;  %v417_v2 = vld [vmem:[#allocation5 + $0x618] sm:$0xff]  ;;  %v3609_v59 = vsub.f32 0.0, %v19202_v33 }
 0x219   :  { %3495 = vmatprep.subr.bf16.mxu0 %v15047_v10  ;;  %v517_v10 = vld [vmem:[#allocation5 + $0x938] sm:$0xff] }
 0x21a   :  { %3469 = vmatpush2.bf16.msra.mxu1 %v14990_v9  ;;  %v513_v9 = vld [vmem:[#allocation5 + $0x918] sm:$0xff] }
 0x21b   :  { %3470 = vmatprep.subr.bf16.mxu1 %v14983_v15  ;;  %v15127_v15 = vcombine.high %v449_v3, %v453_v4  ;;  %v15191_v17 = vcombine.high %v513_v9, %v517_v10  ;;  %v421_v45 = vld [vmem:[#allocation5 + $0x638] sm:$0xff]  ;;  %v3618_v3 = vmul.f32 1.442695, %v3609_v59  ;;  %v19226_v4 = vsub.s32 3, %v19172_v57 }
 0x21c   :  { %3496 = vmatpush1.bf16.msra.mxu0 %v15046_v18  ;;  %v441_v18 = vld [vmem:[#allocation5 + $0x6d8] sm:$0xff] }
 0x21d   :  { %3497 = vmatprep.subr.bf16.mxu0 %v15039_v21  ;;  %v505_v21 = vld [vmem:[#allocation5 + $0x8d8] sm:$0xff]  ;;  %18547 = vpow2.f32 %v3618_v3 }
 0x21e   :  { %3471 = vmatpush2.bf16.msra.mxu1 %v14982_v20  ;;  %v445_v20 = vld [vmem:[#allocation5 + $0x6f8] sm:$0xff] }
 0x21f   :  { %3472 = vmatprep.subr.bf16.mxu1 %v14975_v25  ;;  %v437_v25 = vld [vmem:[#allocation5 + $0x6b8] sm:$0xff]  ;;  %v15119_v27 = vcombine.high %v441_v18, %v445_v20  ;;  %v15118_v32 = vcombine.low %v441_v18, %v445_v20 }
 0x220   :  { %3498 = vmatpush1.bf16.msra.mxu0 %v15038_v28  ;;  %v497_v28 = vld [vmem:[#allocation5 + $0x898] sm:$0xff]  ;;  %v15111_v37 = vcombine.high %v433_v24, %v437_v25  ;;  %v15110_v58 = vcombine.low %v433_v24, %v437_v25 }
 0x221   :  { %3499 = vmatprep.subr.bf16.mxu0 %v15031_v41  ;;  %v15183_v41 = vcombine.high %v505_v21, %v509_v22  ;;  %v481_v50 = vld [vmem:[#allocation5 + $0x818] sm:$0xff] }
 0x222   :  { %3473 = vmatpush2.bf16.msra.mxu1 %v14974_v31  ;;  %v501_v31 = vld [vmem:[#allocation5 + $0x8b8] sm:$0xff] }
 0x223   :  { %3474 = vmatprep.subr.bf16.mxu1 %v14967_v56  ;;  %v15182_v56 = vcombine.low %v505_v21, %v509_v22  ;;  %v15174_v48 = vcombine.low %v497_v28, %v501_v31  ;;  %v669_v55 = vld [vmem:[#allocation5 + $0xdf8] sm:$0xff] }
 0x224   :  { %3500 = vmatpush1.bf16.msra.mxu0 %v15030_v47  ;;  %v489_v47 = vld [vmem:[#allocation5 + $0x858] sm:$0xff] }
 0x225   :  { %3501 = vmatprep.subr.bf16.mxu0 %v15151_v43  ;;  %v15175_v43 = vcombine.high %v497_v28, %v501_v31  ;;  %v661_v33 = vld [vmem:[#allocation5 + $0xdb8] sm:$0xff] }
 0x226   :  { %3475 = vmatpush2.bf16.msra.mxu1 %v14966_v42  ;;  %v493_v42 = vld [vmem:[#allocation5 + $0x878] sm:$0xff] }
 0x227   :  { %3526 = vmatprep.subr.bf16.mxu1 %v15215_v49  ;;  %v3191_v63 = vpop.f32.mrf.mxu0  ;;  %v15103_v49 = vcombine.high %v425_v34, %v429_v35  ;;  %v15167_v52 = vcombine.high %v489_v47, %v493_v42  ;;  %v15166_v60 = vcombine.low %v489_v47, %v493_v42  ;;  %v585_v21 = vld [vmem:[#allocation5 + $0xb58] sm:$0xff] }
 0x228   :  { %v19218_v0 = vadd.f32 %v3191_v63, %v3151_v61  ;;  %3502 = vmatpush2.bf16.msra.mxu0 %v15150_v51  ;;  %v485_v51 = vld [vmem:[#allocation5 + $0x838] sm:$0xff]  ;;  %v15095_v61 = vcombine.high %v417_v2, %v421_v45 }
 0x229   :  { %3477 = vmatmul.mubr.bf16.vlgmr.msra.gmra.mxu1 %v19146_v16  ;;  %v19221_v5 = vpop.f32.mrf.mxu0  ;;  %3503 = vmatprep.subr.bf16.mxu0 %v15143_v54  ;;  %v665_v54 = vld [vmem:[#allocation5 + $0xdd8] sm:$0xff] }
 0x22a   :  { %3527 = vmatpush1.bf16.msra.mxu1 %v15214_v53  ;;  %3558 = vmatprep.mubr.bf16.mxu1 %v19151_v29  ;;  %v15190_v29 = vcombine.low %v513_v9, %v517_v10  ;;  %v15102_v53 = vcombine.low %v425_v34, %v429_v35  ;;  %v605_v63 = vld [vmem:[#allocation5 + $0xbf8] sm:$0xff]  ;;  %v15158_v9 = vcombine.low %v481_v50, %v485_v51 }
 0x22b   :  { %3528 = vmatprep.subr.bf16.mxu1 %v15207_v62  ;;  %v3195_v11 = vpop.f32.mrf.mxu0  ;;  %v601_v62 = vld [vmem:[#allocation5 + $0xbd8] sm:$0xff]  ;;  %v15343_v10 = vcombine.high %v665_v54, %v669_v55 }
 0x22c   :  { %3504 = vmatpush2.bf16.msra.mxu0 %v15142_v1  ;;  %v15159_v1 = vcombine.high %v481_v50, %v485_v51  ;;  %v597_v11 = vld [vmem:[#allocation5 + $0xbb8] sm:$0xff]  ;;  %v15278_v18 = vcombine.low %v601_v62, %v605_v63 }
 0x22d   :  { %v3196_v16 = vpop.f32.mrf.mxu0  ;;  %3505 = vmatprep.subr.bf16.mxu0 %v15135_v8  ;;  %v657_v8 = vld [vmem:[#allocation5 + $0xd98] sm:$0xff] }
 0x22e   :  { %3529 = vmatpush1.bf16.msra.mxu1 %v15206_v7  ;;  %v15094_v7 = vcombine.low %v417_v2, %v421_v45  ;;  %v687_v16 = vrot.slane %v19213_v46, %v19226_v4  ;;  %v15335_v20 = vcombine.high %v657_v8, %v661_v33  ;;  %v589_v22 = vld [vmem:[#allocation5 + $0xb78] sm:$0xff]  ;;  %v15334_v46 = vcombine.low %v657_v8, %v661_v33 }
 0x22f   :  { %3530 = vmatprep.subr.bf16.mxu1 %v15199_v40  ;;  %v593_v40 = vld [vmem:[#allocation5 + $0xb98] sm:$0xff]  ;;  %v15262_v2 = vcombine.low %v585_v21, %v589_v22 }
 0x230   :  { %3506 = vmatpush2.bf16.msra.mxu0 %v15134_v12  ;;  %v15279_v12 = vcombine.high %v601_v62, %v605_v63  ;;  %v3153_v24 = vadd.f32 %v19208_v44, %v687_v16  ;;  %v15270_v31 = vcombine.low %v593_v40, %v597_v11  ;;  %v581_v34 = vld [vmem:[#allocation5 + $0xb38] sm:$0xff] }
 0x231   :  { %3507 = vmatprep.subr.bf16.mxu0 %v15127_v15  ;;  %v649_v15 = vld [vmem:[#allocation5 + $0xd58] sm:$0xff] }
 0x232   :  { %3531 = vmatpush1.bf16.msra.mxu1 %v15198_v14  ;;  %v15342_v14 = vcombine.low %v665_v54, %v669_v55  ;;  %v641_v44 = vld [vmem:[#allocation5 + $0xd18] sm:$0xff]  ;;  %v18548_v54 = vpop.eup %18547 }
 0x233   :  { %3532 = vmatprep.subr.bf16.mxu1 %v15191_v17  ;;  %v653_v17 = vld [vmem:[#allocation5 + $0xd78] sm:$0xff]  ;;  %v3633_v33 = vadd.f32 1.0, %v18548_v54 }
 0x234   :  { %3508 = vmatpush2.bf16.msra.mxu0 %v15126_v23  ;;  %v15271_v23 = vcombine.high %v593_v40, %v597_v11  ;;  %v633_v50 = vld [vmem:[#allocation5 + $0xcd8] sm:$0xff] }
 0x235   :  { %3509 = vmatprep.subr.bf16.mxu0 %v15119_v27  ;;  %v3194_v27 = vadd.f32 %v19221_v5, %v3153_v24  ;;  %v637_v59 = vld [vmem:[#allocation5 + $0xcf8] sm:$0xff] }
 0x236   :  { %3533 = vmatpush1.bf16.msra.mxu1 %v15190_v29  ;;  %v15311_v62 = vcombine.high %v633_v50, %v637_v59  ;;  %v561_v63 = vld [vmem:[#allocation5 + $0xa98] sm:$0xff] }
 0x237   :  { %3534 = vmatprep.subr.bf16.mxu1 %v15183_v41  ;;  %v15327_v41 = vcombine.high %v649_v15, %v653_v17  ;;  %v625_v3 = vld [vmem:[#allocation5 + $0xc98] sm:$0xff] }
 0x238   :  { %3510 = vmatpush2.bf16.msra.mxu0 %v15118_v32  ;;  %v577_v32 = vld [vmem:[#allocation5 + $0xb18] sm:$0xff] }
 0x239   :  { %3511 = vmatprep.subr.bf16.mxu0 %v15111_v37  ;;  %v629_v8 = vld [vmem:[#allocation5 + $0xcb8] sm:$0xff] }
 0x23a   :  { %3535 = vmatpush1.bf16.msra.mxu1 %v15182_v56  ;;  %v15263_v56 = vcombine.high %v585_v21, %v589_v22  ;;  %v15303_v40 = vcombine.high %v625_v3, %v629_v8  ;;  %v553_v11 = vld [vmem:[#allocation5 + $0xa58] sm:$0xff] }
 0x23b   :  { %3536 = vmatprep.subr.bf16.mxu1 %v15175_v43  ;;  %v15326_v43 = vcombine.low %v649_v15, %v653_v17  ;;  %v617_v16 = vld [vmem:[#allocation5 + $0xc58] sm:$0xff]  ;;  %v15302_v17 = vcombine.low %v625_v3, %v629_v8 }
 0x23c   :  { %3512 = vmatpush2.bf16.msra.mxu0 %v15110_v58  ;;  %v621_v15 = vld [vmem:[#allocation5 + $0xc78] sm:$0xff] }
 0x23d   :  { %3513 = vmatprep.subr.bf16.mxu0 %v15103_v49  ;;  %v573_v49 = vld [vmem:[#allocation5 + $0xaf8] sm:$0xff] }
 0x23e   :  { %3537 = vmatpush1.bf16.msra.mxu1 %v15174_v48  ;;  %v569_v48 = vld [vmem:[#allocation5 + $0xad8] sm:$0xff] }
 0x23f   :  { %3538 = vmatprep.subr.bf16.mxu1 %v15167_v52  ;;  %v15255_v52 = vcombine.high %v577_v32, %v581_v34  ;;  %v545_v21 = vld [vmem:[#allocation5 + $0xa18] sm:$0xff] }
 0x240   :  { %3514 = vmatpush2.bf16.msra.mxu0 %v15102_v53  ;;  %v549_v22 = vld [vmem:[#allocation5 + $0xa38] sm:$0xff] }
 0x241   :  { %3515 = vmatprep.subr.bf16.mxu0 %v15095_v61  ;;  %v15254_v61 = vcombine.low %v577_v32, %v581_v34  ;;  %v17030_v3 = vld [vmem:[#allocation8 + $0x2d4] ss:$20 sps:$4 sm:$0xff]   ;;  %v17025_v8 = vld [vmem:[#allocation8 + $0x50] ss:$20 sps:$4 sm:$0xff]  }
 0x242   :  { %3539 = vmatpush1.bf16.msra.mxu1 %v15166_v60 }
 0x243   :  { %3540 = vmatprep.subr.bf16.mxu1 %v15159_v1  ;;  %v565_v1 = vld [vmem:[#allocation5 + $0xab8] sm:$0xff] }
 0x244   :  { %3516 = vmatpush2.bf16.msra.mxu0 %v15094_v7  ;;  %v15247_v7 = vcombine.high %v569_v48, %v573_v49 }
 0x245   :  { %3567 = vmatprep.subr.bf16.mxu0 %v15343_v10  ;;  %v15246_v10 = vcombine.low %v569_v48, %v573_v49  ;;  %v17009_v48 = vld [vmem:[#allocation8 + $0xcc] ss:$20 sps:$4 sm:$0xff]   ;;  %v17007_v49 = vld [vmem:[#allocation8 + $0xc8] ss:$20 sps:$4 sm:$0xff]  }
 0x246   :  { %3541 = vmatpush1.bf16.msra.mxu1 %v15158_v9  ;;  %v15310_v9 = vcombine.low %v633_v50, %v637_v59  ;;  %v17012_v50 = vld [vmem:[#allocation8 + $0x34c] ss:$20 sps:$4 sm:$0xff]  }
 0x247   :  { %3542 = vmatprep.subr.bf16.mxu1 %v15279_v12  ;;  %v19231_v25 = vpop.f32.mrf.mxu0  ;;  %3518 = vmatmul.mubr.bf16.vlgmr.msra.gmra.mxu0 %v19148_v19  ;;  %v645_v19 = vld [vmem:[#allocation5 + $0xd38] sm:$0xff] }
 0x248   :  { %3568 = vmatpush1.bf16.msra.mxu0 %v15342_v14  ;;  %3599 = vmatprep.mubr.bf16.mxu0 %v19017_v38  ;;  %v15319_v45 = vcombine.high %v641_v44, %v645_v19  ;;  %v15318_v55 = vcombine.low %v641_v44, %v645_v19  ;;  %v557_v12 = vld [vmem:[#allocation5 + $0xa78] sm:$0xff]  ;;  %v15239_v14 = vcombine.high %v561_v63, %v565_v1 }
 0x249   :  { %v19234_v29 = vpop.f32.mrf.mxu1  ;;  %v3275_v28 = vpop.f32.mrf.mxu0  ;;  %3569 = vmatprep.subr.bf16.mxu0 %v15335_v20  ;;  %v15295_v20 = vcombine.high %v617_v16, %v621_v15  ;;  %v15231_v24 = vcombine.high %v553_v11, %v557_v12  ;;  %v16997_v44 = vld [vmem:[#allocation8 + $0x11c] ss:$20 sps:$4 sm:$0xff]   ;;  %v17013_v59 = vld [vmem:[#allocation8 + $0xa0] ss:$20 sps:$4 sm:$0xff]  }
 0x24a   :  { %3543 = vmatpush2.bf16.msra.mxu1 %v15278_v18  ;;  %v15238_v18 = vcombine.low %v561_v63, %v565_v1  ;;  %v17000_v19 = vld [vmem:[#allocation8 + $0x39c] ss:$20 sps:$4 sm:$0xff]   ;;  %v17022_v63 = vld [vmem:[#allocation8 + $0x2f8] ss:$20 sps:$4 sm:$0xff]   ;;  %v17027_v1 = vld [vmem:[#allocation8 + $0x54] ss:$20 sps:$4 sm:$0xff]  }
 0x24b   :  { %v3234_v35 = vpop.f32.mrf.mxu1  ;;  %3544 = vmatprep.subr.bf16.mxu1 %v15271_v23  ;;  %v3277_v47 = vpop.f32.mrf.mxu0  ;;  %v609_v23 = vld [vmem:[#allocation5 + $0xc18] sm:$0xff] }
 0x24c   :  { %v3235_v37 = vadd.f32 %v3234_v35, %v3194_v27  ;;  %3570 = vmatpush1.bf16.msra.mxu0 %v15334_v46  ;;  %v613_v46 = vld [vmem:[#allocation5 + $0xc38] sm:$0xff]  ;;  %v15294_v27 = vcombine.low %v617_v16, %v621_v15  ;;  %v16998_v47 = vld [vmem:[#allocation8 + $0x398] ss:$20 sps:$4 sm:$0xff]  }
 0x24d   :  { %v3236_v42 = vpop.f32.mrf.mxu1  ;;  %v3278_v5 = vpop.f32.mrf.mxu0  ;;  %3571 = vmatprep.subr.bf16.mxu0 %v15327_v41  ;;  %v15223_v41 = vcombine.high %v545_v21, %v549_v22  ;;  %v15286_v34 = vcombine.low %v609_v23, %v613_v46  ;;  %v17042_v16 = vld [vmem:[#allocation8 + $0x284] ss:$20 sps:$4 sm:$0xff]   ;;  %v17037_v15 = vld [vmem:[#allocation8] ss:$20 sps:$4 sm:$0xff]  }
 0x24e   :  { %v3276_v58 = vadd.f32 %v3275_v28, %v3235_v37  ;;  %3545 = vmatpush2.bf16.msra.mxu1 %v15270_v31  ;;  %v15230_v28 = vcombine.low %v553_v11, %v557_v12  ;;  %v15287_v31 = vcombine.high %v609_v23, %v613_v46  ;;  %v16995_v37 = vld [vmem:[#allocation8 + $0x118] ss:$20 sps:$4 sm:$0xff]   ;;  %v17001_v5 = vld [vmem:[#allocation8 + $0xf0] ss:$20 sps:$4 sm:$0xff]   ;;  %v17034_v11 = vld [vmem:[#allocation8 + $0x2a8] ss:$20 sps:$4 sm:$0xff]  }
 0x24f   :  { %v3237_v51 = vpop.f32.mrf.mxu1  ;;  %3546 = vmatprep.subr.bf16.mxu1 %v15263_v56  ;;  %v15222_v56 = vcombine.low %v545_v21, %v549_v22  ;;  %v17039_v12 = vld [vmem:[#allocation8 + $0x4] ss:$20 sps:$4 sm:$0xff]   ;;  %v17051_v22 = vld [vmem:[#allocation8 + $0x234] ss:$20 sps:$4 sm:$0xff]  }
 0x250   :  { %v3611_v53 = vsub.f32 0.0, %v3276_v58  ;;  %3572 = vmatpush1.bf16.msra.mxu0 %v15326_v43  ;;  %v17003_v43 = vld [vmem:[#allocation8 + $0xf4] ss:$20 sps:$4 sm:$0xff]   ;;  %v17046_v21 = vld [vmem:[#allocation8 + $0x4d8] ss:$20 sps:$4 sm:$0xff]  }
 0x251   :  { %3573 = vmatprep.subr.bf16.mxu0 %v15319_v45  ;;  %v17006_v58 = vld [vmem:[#allocation8 + $0x374] ss:$20 sps:$4 sm:$0xff]   ;;  %v17004_v45 = vld [vmem:[#allocation8 + $0x370] ss:$20 sps:$4 sm:$0xff]  }
 0x252   :  { %v3622_v60 = vmul.f32 1.442695, %v3611_v53  ;;  %3547 = vmatpush2.bf16.msra.mxu1 %v15262_v2  ;;  %v17010_v51 = vld [vmem:[#allocation8 + $0x348] ss:$20 sps:$4 sm:$0xff]   ;;  %v17016_v53 = vld [vmem:[#allocation8 + $0x320] ss:$20 sps:$4 sm:$0xff]  }
 0x253   :  { %3548 = vmatprep.subr.bf16.mxu1 %v15255_v52  ;;  %v17015_v52 = vld [vmem:[#allocation8 + $0xa4] ss:$20 sps:$4 sm:$0xff]   ;;  %v17054_v23 = vld [vmem:[#allocation8 + $0x4b4] ss:$20 sps:$4 sm:$0xff]  }
 0x254   :  { %18549 = vpow2.f32 %v3622_v60  ;;  %3574 = vmatpush1.bf16.msra.mxu0 %v15318_v55  ;;  %v17021_v55 = vld [vmem:[#allocation8 + $0x7c] ss:$20 sps:$4 sm:$0xff]   ;;  %v3233_v60 = vadd.f32 %v19234_v29, %v19218_v0  ;;  %v3608_v0 = vsub.f32 0.0, %v19197_v26  ;;  %v17043_v26 = vld [vmem:[#allocation8 + $0x258] ss:$20 sps:$4 sm:$0xff]  }
 0x255   :  { %3575 = vmatprep.subr.bf16.mxu0 %v15311_v62  ;;  %18551 = vrcp.f32 %v3633_v33  ;;  %v17024_v62 = vld [vmem:[#allocation8 + $0x2fc] ss:$20 sps:$4 sm:$0xff]  }
 0x256   :  { %3549 = vmatpush2.bf16.msra.mxu1 %v15254_v61  ;;  %v17019_v61 = vld [vmem:[#allocation8 + $0x78] ss:$20 sps:$4 sm:$0xff]   ;;  %v17028_v33 = vld [vmem:[#allocation8 + $0x2d0] ss:$20 sps:$4 sm:$0xff]  }
 0x257   :  { %3550 = vmatprep.subr.bf16.mxu1 %v15247_v7  ;;  %v3274_v7 = vadd.f32 %v19231_v25, %v3233_v60  ;;  %v17076_v60 = vld [vmem:[#allocation8 + $0x410] ss:$20 sps:$4 sm:$0xff]  }
 0x258   :  { %3576 = vmatpush1.bf16.msra.mxu0 %v15310_v9  ;;  %v17033_v9 = vld [vmem:[#allocation8 + $0x2c] ss:$20 sps:$4 sm:$0xff]  }
 0x259   :  { %3577 = vmatprep.subr.bf16.mxu0 %v15303_v40  ;;  %v3610_v29 = vsub.f32 0.0, %v3274_v7  ;;  %v17031_v40 = vld [vmem:[#allocation8 + $0x28] ss:$20 sps:$4 sm:$0xff]   ;;  %v17090_v7 = vld [vmem:[#allocation8 + $0x3c4] ss:$20 sps:$4 sm:$0xff]  }
 0x25a   :  { %3551 = vmatpush2.bf16.msra.mxu1 %v15246_v10  ;;  %v17036_v10 = vld [vmem:[#allocation8 + $0x2ac] ss:$20 sps:$4 sm:$0xff]  }
 0x25b   :  { %3552 = vmatprep.subr.bf16.mxu1 %v15239_v14  ;;  %v3616_v14 = vmul.f32 1.442695, %v3608_v0  ;;  %v3620_v25 = vmul.f32 1.442695, %v3610_v29 }
 0x25c   :  { %3578 = vmatpush1.bf16.msra.mxu0 %v15302_v17  ;;  %v17040_v17 = vld [vmem:[#allocation8 + $0x280] ss:$20 sps:$4 sm:$0xff]  }
 0x25d   :  { %3579 = vmatprep.subr.bf16.mxu0 %v15295_v20  ;;  %v17048_v20 = vld [vmem:[#allocation8 + $0x4dc] ss:$20 sps:$4 sm:$0xff]  }
 0x25e   :  { %3553 = vmatpush2.bf16.msra.mxu1 %v15238_v18  ;;  %v17045_v18 = vld [vmem:[#allocation8 + $0x25c] ss:$20 sps:$4 sm:$0xff]  }
 0x25f   :  { %3554 = vmatprep.subr.bf16.mxu1 %v15231_v24  ;;  %v17049_v24 = vld [vmem:[#allocation8 + $0x230] ss:$20 sps:$4 sm:$0xff]  }
 0x260   :  { %3580 = vmatpush1.bf16.msra.mxu0 %v15294_v27  ;;  %v17052_v27 = vld [vmem:[#allocation8 + $0x4b0] ss:$20 sps:$4 sm:$0xff]  }
 0x261   :  { %v18550_v32 = vpop.eup %18549  ;;  %3581 = vmatprep.subr.bf16.mxu0 %v15287_v31 }
 0x262   :  { %v3635_v35 = vadd.f32 1.0, %v18550_v32  ;;  %3555 = vmatpush2.bf16.msra.mxu1 %v15230_v28  ;;  %v18552_v42 = vpop.eup %18551 }
 0x263   :  { %3556 = vmatprep.subr.bf16.mxu1 %v15223_v41  ;;  %v19239_v2 = vpack.c.bf16 %v18552_v42, %v18552_v42  ;;  %v17057_v41 = vld [vmem:[#allocation8 + $0x20c] ss:$20 sps:$4 sm:$0xff]   ;;  %v17066_v42 = vld [vmem:[#allocation8 + $0x464] ss:$20 sps:$4 sm:$0xff]  }
 0x264   :  { %18553 = vrcp.f32 %v3635_v35  ;;  %3582 = vmatpush1.bf16.msra.mxu0 %v15286_v34  ;;  %v17055_v34 = vld [vmem:[#allocation8 + $0x208] ss:$20 sps:$4 sm:$0xff]  }
 0x265   :  { %5731 = vmatprep.subr.bf16.mxu0 %v16997_v44  ;;  %18555 = vpow2.f32 %v3616_v14  ;;  %v17060_v44 = vld [vmem:[#allocation8 + $0x48c] ss:$20 sps:$4 sm:$0xff]   ;;  %v17171_v14 = vld [vmem:[#allocation8 + $0x874] ss:$20 sps:$4 sm:$0xff]  }
 0x266   :  { %3557 = vmatpush2.bf16.msra.mxu1 %v15222_v56  ;;  %18557 = vpow2.f32 %v3620_v25  ;;  %v17058_v56 = vld [vmem:[#allocation8 + $0x488] ss:$20 sps:$4 sm:$0xff]  }
 0x267   :  { %5772 = vmatprep.subr.bf16.mxu1 %v17000_v19  ;;  %3600 = vmatmul.mubr.bf16.vlgmr.msra.gmra.mxu0 %v19156_v30  ;;  %v17018_v30 = vld [vmem:[#allocation8 + $0x324] ss:$20 sps:$4 sm:$0xff]  }
 0x268   :  { %5732 = vmatpush1.bf16.msra.mxu0 %v16995_v37  ;;  %5763 = vmatprep.mubr.bf16.mxu0 %v19239_v2 }
 0x269   :  { %3559 = vmatmul.mubr.bf16.vlgmr.msra.gmra.mxu1 %v19160_v39  ;;  %5733 = vmatprep.subr.bf16.mxu0 %v17003_v43 }
 0x26a   :  { %5773 = vmatpush1.bf16.msra.mxu1 %v16998_v47  ;;  %v17063_v47 = vld [vmem:[#allocation8 + $0x1e4] ss:$20 sps:$4 sm:$0xff]  }
 0x26b   :  { %5774 = vmatprep.subr.bf16.mxu1 %v17006_v58 }
 0x26c   :  { %5734 = vmatpush1.bf16.msra.mxu0 %v17001_v5 }
 0x26d   :  { %5735 = vmatprep.subr.bf16.mxu0 %v17009_v48  ;;  %v17064_v48 = vld [vmem:[#allocation8 + $0x460] ss:$20 sps:$4 sm:$0xff]  }
 0x26e   :  { %5775 = vmatpush1.bf16.msra.mxu1 %v17004_v45  ;;  %v17061_v45 = vld [vmem:[#allocation8 + $0x1e0] ss:$20 sps:$4 sm:$0xff]  }
 0x26f   :  { %5776 = vmatprep.subr.bf16.mxu1 %v17012_v50 }
 0x270   :  { %5736 = vmatpush1.bf16.msra.mxu0 %v17007_v49  ;;  %v17069_v49 = vld [vmem:[#allocation8 + $0x1bc] ss:$20 sps:$4 sm:$0xff]  }
 0x271   :  { %v18554_v54 = vpop.eup %18553  ;;  %5737 = vmatprep.subr.bf16.mxu0 %v17015_v52 }
 0x272   :  { %5777 = vmatpush1.bf16.msra.mxu1 %v17010_v51  ;;  %v19243_v39 = vpack.c.bf16 %v18554_v54, %v18554_v54  ;;  %v18556_v43 = vpop.eup %18555  ;;  %v17072_v51 = vld [vmem:[#allocation8 + $0x43c] ss:$20 sps:$4 sm:$0xff]   ;;  %v17078_v54 = vld [vmem:[#allocation8 + $0x414] ss:$20 sps:$4 sm:$0xff]  }
 0x273   :  { %5778 = vmatprep.subr.bf16.mxu1 %v17018_v30  ;;  %v18558_v5 = vpop.eup %18557  ;;  %v3632_v50 = vadd.f32 1.0, %v18556_v43  ;;  %v17067_v30 = vld [vmem:[#allocation8 + $0x1b8] ss:$20 sps:$4 sm:$0xff]   ;;  %v17106_v43 = vld [vmem:[#allocation8 + $0x550] ss:$20 sps:$4 sm:$0xff]  }
 0x274   :  { %5804 = vmatprep.mubr.bf16.mxu1 %v19243_v39  ;;  %5738 = vmatpush1.bf16.msra.mxu0 %v17013_v59  ;;  %v3634_v52 = vadd.f32 1.0, %v18558_v5  ;;  %v17070_v59 = vld [vmem:[#allocation8 + $0x438] ss:$20 sps:$4 sm:$0xff]  }
 0x275   :  { %5739 = vmatprep.subr.bf16.mxu0 %v17021_v55  ;;  %18559 = vrcp.f32 %v3632_v50  ;;  %v17073_v55 = vld [vmem:[#allocation8 + $0x190] ss:$20 sps:$4 sm:$0xff]   ;;  %v17111_v5 = vld [vmem:[#allocation8 + $0x52c] ss:$20 sps:$4 sm:$0xff]  }
 0x276   :  { %5779 = vmatpush1.bf16.msra.mxu1 %v17016_v53  ;;  %v17075_v53 = vld [vmem:[#allocation8 + $0x194] ss:$20 sps:$4 sm:$0xff]   ;;  %18561 = vrcp.f32 %v3634_v52  ;;  %v17201_v50 = vld [vmem:[#allocation8 + $0x7ac] ss:$20 sps:$4 sm:$0xff]   ;;  %v17114_v52 = vld [vmem:[#allocation8 + $0x504] ss:$20 sps:$4 sm:$0xff]  }
 0x277   :  { %5780 = vmatprep.subr.bf16.mxu1 %v17024_v62  ;;  %v17084_v62 = vld [vmem:[#allocation8 + $0x3ec] ss:$20 sps:$4 sm:$0xff]  }
 0x278   :  { %5740 = vmatpush1.bf16.msra.mxu0 %v17019_v61  ;;  %v17081_v61 = vld [vmem:[#allocation8 + $0x16c] ss:$20 sps:$4 sm:$0xff]  }
 0x279   :  { %5741 = vmatprep.subr.bf16.mxu0 %v17027_v1  ;;  %v17082_v1 = vld [vmem:[#allocation8 + $0x3e8] ss:$20 sps:$4 sm:$0xff]  }
 0x27a   :  { %5781 = vmatpush1.bf16.msra.mxu1 %v17022_v63  ;;  %v17079_v63 = vld [vmem:[#allocation8 + $0x168] ss:$20 sps:$4 sm:$0xff]  }
 0x27b   :  { %5782 = vmatprep.subr.bf16.mxu1 %v17030_v3  ;;  %v17087_v3 = vld [vmem:[#allocation8 + $0x144] ss:$20 sps:$4 sm:$0xff]  }
 0x27c   :  { %5742 = vmatpush1.bf16.msra.mxu0 %v17025_v8  ;;  %v17085_v8 = vld [vmem:[#allocation8 + $0x140] ss:$20 sps:$4 sm:$0xff]  }
 0x27d   :  { %5743 = vmatprep.subr.bf16.mxu0 %v17033_v9  ;;  %v17093_v9 = vld [vmem:[#allocation8 + $0x61c] ss:$20 sps:$4 sm:$0xff]  }
 0x27e   :  { %5783 = vmatpush1.bf16.msra.mxu1 %v17028_v33  ;;  %v17088_v33 = vld [vmem:[#allocation8 + $0x3c0] ss:$20 sps:$4 sm:$0xff]  }
 0x27f   :  { %5784 = vmatprep.subr.bf16.mxu1 %v17036_v10  ;;  %v17165_v10 = vld [vmem:[#allocation8 + $0x89c] ss:$20 sps:$4 sm:$0xff]  }
 0x280   :  { %5744 = vmatpush1.bf16.msra.mxu0 %v17031_v40  ;;  %v17091_v40 = vld [vmem:[#allocation8 + $0x618] ss:$20 sps:$4 sm:$0xff]  }
 0x281   :  { %5745 = vmatprep.subr.bf16.mxu0 %v17039_v12  ;;  %v17163_v12 = vld [vmem:[#allocation8 + $0x898] ss:$20 sps:$4 sm:$0xff]  }
 0x282   :  { %5785 = vmatpush1.bf16.msra.mxu1 %v17034_v11  ;;  %v18560_v0 = vpop.eup %18559  ;;  %v17096_v11 = vld [vmem:[#allocation8 + $0x5f4] ss:$20 sps:$4 sm:$0xff]  }
 0x283   :  { %5786 = vmatprep.subr.bf16.mxu1 %v17042_v16  ;;  %v18562_v29 = vpop.eup %18561  ;;  %v19258_v16 = vpack.c.bf16 %v18560_v0, %v18560_v0 }
 0x284   :  { %5746 = vmatpush1.bf16.msra.mxu0 %v17037_v15  ;;  %v19260_v25 = vpack.c.bf16 %v18562_v29, %v18562_v29  ;;  %v17094_v15 = vld [vmem:[#allocation8 + $0x5f0] ss:$20 sps:$4 sm:$0xff]  }
 0x285   :  { %5747 = vmatprep.subr.bf16.mxu0 %v17045_v18  ;;  %v17099_v18 = vld [vmem:[#allocation8 + $0x5cc] ss:$20 sps:$4 sm:$0xff]  }
 0x286   :  { %5787 = vmatpush1.bf16.msra.mxu1 %v17040_v17 }
 0x287   :  { %5788 = vmatprep.subr.bf16.mxu1 %v17048_v20  ;;  %v19250_v46 = vpop.f32.mrf.mxu0  ;;  %v17169_v20 = vld [vmem:[#allocation8 + $0x870] ss:$20 sps:$4 sm:$0xff]  }
 0x288   :  { %5748 = vmatpush2.bf16.msra.mxu0 %v17043_v26 }
 0x289   :  { %v19252_v28 = vpop.f32.mrf.mxu1  ;;  %v19254_v31 = vpop.f32.mrf.mxu0  ;;  %5749 = vmatprep.subr.bf16.mxu0 %v17051_v22  ;;  %v17177_v22 = vld [vmem:[#allocation8 + $0x84c] ss:$20 sps:$4 sm:$0xff]  }
 0x28a   :  { %5789 = vmatpush2.bf16.msra.mxu1 %v17046_v21  ;;  %v17097_v21 = vld [vmem:[#allocation8 + $0x5c8] ss:$20 sps:$4 sm:$0xff]  }
 0x28b   :  { %v19256_v32 = vpop.f32.mrf.mxu1  ;;  %5790 = vmatprep.subr.bf16.mxu1 %v17054_v23  ;;  %v3318_v35 = vpop.f32.mrf.mxu0 }
 0x28c   :  { %5750 = vmatpush2.bf16.msra.mxu0 %v17049_v24  ;;  %v17102_v24 = vld [vmem:[#allocation8 + $0x5a4] ss:$20 sps:$4 sm:$0xff]   ;;  %v17105_v35 = vld [vmem:[#allocation8 + $0x57c] ss:$20 sps:$4 sm:$0xff]  }
 0x28d   :  { %v3359_v19 = vpop.f32.mrf.mxu1  ;;  %v3319_v37 = vpop.f32.mrf.mxu0  ;;  %5751 = vmatprep.subr.bf16.mxu0 %v17057_v41 }
 0x28e   :  { %5791 = vmatpush2.bf16.msra.mxu1 %v17052_v27  ;;  %v17175_v27 = vld [vmem:[#allocation8 + $0x848] ss:$20 sps:$4 sm:$0xff]   ;;  %v17103_v19 = vld [vmem:[#allocation8 + $0x578] ss:$20 sps:$4 sm:$0xff]  }
 0x28f   :  { %v3360_v58 = vpop.f32.mrf.mxu1  ;;  %5792 = vmatprep.subr.bf16.mxu1 %v17060_v44  ;;  %v17183_v44 = vld [vmem:[#allocation8 + $0x824] ss:$20 sps:$4 sm:$0xff]   ;;  %v17189_v37 = vld [vmem:[#allocation8 + $0x7fc] ss:$20 sps:$4 sm:$0xff]  }
 0x290   :  { %5752 = vmatpush2.bf16.msra.mxu0 %v17055_v34  ;;  %v17100_v34 = vld [vmem:[#allocation8 + $0x5a0] ss:$20 sps:$4 sm:$0xff]  }
 0x291   :  { %5753 = vmatprep.subr.bf16.mxu0 %v17063_v47  ;;  %v17108_v47 = vld [vmem:[#allocation8 + $0x554] ss:$20 sps:$4 sm:$0xff]  }
 0x292   :  { %5793 = vmatpush2.bf16.msra.mxu1 %v17058_v56  ;;  %v17181_v56 = vld [vmem:[#allocation8 + $0x820] ss:$20 sps:$4 sm:$0xff]  }
 0x293   :  { %5794 = vmatprep.subr.bf16.mxu1 %v17066_v42  ;;  %v17187_v42 = vld [vmem:[#allocation8 + $0x7f8] ss:$20 sps:$4 sm:$0xff]   ;;  %v17195_v58 = vld [vmem:[#allocation8 + $0x7d4] ss:$20 sps:$4 sm:$0xff]  }
 0x294   :  { %5754 = vmatpush2.bf16.msra.mxu0 %v17061_v45  ;;  %v17193_v45 = vld [vmem:[#allocation8 + $0x7d0] ss:$20 sps:$4 sm:$0xff]  }
 0x295   :  { %5755 = vmatprep.subr.bf16.mxu0 %v17069_v49  ;;  %v17109_v49 = vld [vmem:[#allocation8 + $0x528] ss:$20 sps:$4 sm:$0xff]  }
 0x296   :  { %5795 = vmatpush2.bf16.msra.mxu1 %v17064_v48  ;;  %v19269_v48 = vsub.s32 4, %v19172_v57 }
 0x297   :  { %5796 = vmatprep.subr.bf16.mxu1 %v17072_v51  ;;  %v19272_v51 = vsub.s32 5, %v19172_v57 }
 0x298   :  { %5756 = vmatpush2.bf16.msra.mxu0 %v17067_v30  ;;  %v17199_v30 = vld [vmem:[#allocation8 + $0x7a8] ss:$20 sps:$4 sm:$0xff]  }
 0x299   :  { %5757 = vmatprep.subr.bf16.mxu0 %v17075_v53 }
 0x29a   :  { %5797 = vmatpush2.bf16.msra.mxu1 %v17070_v59  ;;  %v19274_v59 = vld [vmem:[#allocation7] sm:$0xff] }
 0x29b   :  { %5798 = vmatprep.subr.bf16.mxu1 %v17078_v54  ;;  %v691_v53 = vrot.slane %v19274_v59, %v19269_v48  ;;  %v17112_v54 = vld [vmem:[#allocation8 + $0x500] ss:$20 sps:$4 sm:$0xff]  }
 0x29c   :  { %5758 = vmatpush2.bf16.msra.mxu0 %v17073_v55  ;;  %v17207_v55 = vld [vmem:[#allocation8 + $0x784] ss:$20 sps:$4 sm:$0xff]  }
 0x29d   :  { %5759 = vmatprep.subr.bf16.mxu0 %v17081_v61  ;;  %v17117_v61 = vld [vmem:[#allocation8 + $0x75c] ss:$20 sps:$4 sm:$0xff]  }
 0x29e   :  { %5799 = vmatpush2.bf16.msra.mxu1 %v17076_v60  ;;  %v695_v60 = vrot.slane %v19274_v59, %v19272_v51 }
 0x29f   :  { %5800 = vmatprep.subr.bf16.mxu1 %v17084_v62  ;;  %v17205_v62 = vld [vmem:[#allocation8 + $0x780] ss:$20 sps:$4 sm:$0xff]  }
 0x2a0   :  { %5760 = vmatpush2.bf16.msra.mxu0 %v17079_v63  ;;  %v3315_v63 = vadd.f32 %v19250_v46, %v691_v53  ;;  %v17118_v46 = vld [vmem:[#allocation8 + $0x730] ss:$20 sps:$4 sm:$0xff]  }
 0x2a1   :  { %5761 = vmatprep.subr.bf16.mxu0 %v17087_v3  ;;  %v3317_v3 = vadd.f32 %v19254_v31, %v695_v60  ;;  %v17225_v31 = vld [vmem:[#allocation8 + $0x98c] ss:$20 sps:$4 sm:$0xff]  }
 0x2a2   :  { %5801 = vmatpush2.bf16.msra.mxu1 %v17082_v1  ;;  %v17213_v1 = vld [vmem:[#allocation8 + $0x9dc] ss:$20 sps:$4 sm:$0xff]  }
 0x2a3   :  { %5802 = vmatprep.subr.bf16.mxu1 %v17090_v7  ;;  %v17115_v7 = vld [vmem:[#allocation8 + $0x758] ss:$20 sps:$4 sm:$0xff]   ;;  %v3358_v29 = vadd.f32 %v19256_v32, %v3317_v3 }
 0x2a4   :  { %5762 = vmatpush2.bf16.msra.mxu0 %v17085_v8  ;;  %v17120_v8 = vld [vmem:[#allocation8 + $0x734] ss:$20 sps:$4 sm:$0xff]   ;;  %v17126_v32 = vld [vmem:[#allocation8 + $0x6e4] ss:$20 sps:$4 sm:$0xff]  }
 0x2a5   :  { %5813 = vmatprep.subr.bf16.mxu0 %v17093_v9  ;;  %v17219_v9 = vld [vmem:[#allocation8 + $0x9b4] ss:$20 sps:$4 sm:$0xff]  }
 0x2a6   :  { %5803 = vmatpush2.bf16.msra.mxu1 %v17088_v33  ;;  %v17211_v33 = vld [vmem:[#allocation8 + $0x9d8] ss:$20 sps:$4 sm:$0xff]  }
 0x2a7   :  { %5854 = vmatprep.subr.bf16.mxu1 %v17165_v10  ;;  %5764 = vmatmul.mubr.bf16.vlgmr.msra.gmra.mxu0 %v19258_v16  ;;  %v3356_v10 = vadd.f32 %v19252_v28, %v3315_v63  ;;  %v17253_v63 = vld [vmem:[#allocation8 + $0x8c0] ss:$20 sps:$4 sm:$0xff]  }
 0x2a8   :  { %5814 = vmatpush1.bf16.msra.mxu0 %v17091_v40 }
 0x2a9   :  { %v19263_v17 = vpop.f32.mrf.mxu1  ;;  %5805 = vmatmul.mubr.bf16.vlgmr.msra.gmra.mxu1 %v19260_v25  ;;  %5815 = vmatprep.subr.bf16.mxu0 %v17096_v11  ;;  %v17123_v11 = vld [vmem:[#allocation8 + $0x70c] ss:$20 sps:$4 sm:$0xff]  }
 0x2aa   :  { %5855 = vmatpush1.bf16.msra.mxu1 %v17163_v12  ;;  %v17217_v12 = vld [vmem:[#allocation8 + $0x9b0] ss:$20 sps:$4 sm:$0xff]  }
 0x2ab   :  { %v19266_v26 = vpop.f32.mrf.mxu1  ;;  %5856 = vmatprep.subr.bf16.mxu1 %v17171_v14 }
 0x2ac   :  { %5816 = vmatpush1.bf16.msra.mxu0 %v17094_v15 }
 0x2ad   :  { %v3441_v23 = vpop.f32.mrf.mxu1  ;;  %5817 = vmatprep.subr.bf16.mxu0 %v17099_v18 }
 0x2ae   :  { %5857 = vmatpush1.bf16.msra.mxu1 %v17169_v20 }
 0x2af   :  { %v3442_v41 = vpop.f32.mrf.mxu1  ;;  %5858 = vmatprep.subr.bf16.mxu1 %v17177_v22  ;;  %v17121_v22 = vld [vmem:[#allocation8 + $0x708] ss:$20 sps:$4 sm:$0xff]  }
 0x2b0   :  { %5818 = vmatpush1.bf16.msra.mxu0 %v17097_v21 }
 0x2b1   :  { %5819 = vmatprep.subr.bf16.mxu0 %v17102_v24  ;;  %v17223_v24 = vld [vmem:[#allocation8 + $0x988] ss:$20 sps:$4 sm:$0xff]  }
 0x2b2   :  { %5859 = vmatpush1.bf16.msra.mxu1 %v17175_v27  ;;  %v17231_v27 = vld [vmem:[#allocation8 + $0x964] ss:$20 sps:$4 sm:$0xff]  }
 0x2b3   :  { %5860 = vmatprep.subr.bf16.mxu1 %v17183_v44  ;;  %v17124_v44 = vld [vmem:[#allocation8 + $0x6e0] ss:$20 sps:$4 sm:$0xff]  }
 0x2b4   :  { %5820 = vmatpush1.bf16.msra.mxu0 %v17100_v34 }
 0x2b5   :  { %5821 = vmatprep.subr.bf16.mxu0 %v17105_v35  ;;  %v17129_v35 = vld [vmem:[#allocation8 + $0x6bc] ss:$20 sps:$4 sm:$0xff]  }
 0x2b6   :  { %5861 = vmatpush1.bf16.msra.mxu1 %v17181_v56  ;;  %v17229_v56 = vld [vmem:[#allocation8 + $0x960] ss:$20 sps:$4 sm:$0xff]  }
 0x2b7   :  { %5862 = vmatprep.subr.bf16.mxu1 %v17189_v37  ;;  %v17132_v37 = vld [vmem:[#allocation8 + $0x694] ss:$20 sps:$4 sm:$0xff]  }
 0x2b8   :  { %5822 = vmatpush1.bf16.msra.mxu0 %v17103_v19  ;;  %v17237_v19 = vld [vmem:[#allocation8 + $0x93c] ss:$20 sps:$4 sm:$0xff]  }
 0x2b9   :  { %5823 = vmatprep.subr.bf16.mxu0 %v17108_v47  ;;  %v17235_v47 = vld [vmem:[#allocation8 + $0x938] ss:$20 sps:$4 sm:$0xff]  }
 0x2ba   :  { %5863 = vmatpush1.bf16.msra.mxu1 %v17187_v42  ;;  %v17130_v42 = vld [vmem:[#allocation8 + $0x690] ss:$20 sps:$4 sm:$0xff]  }
 0x2bb   :  { %5864 = vmatprep.subr.bf16.mxu1 %v17195_v58  ;;  %v17135_v58 = vld [vmem:[#allocation8 + $0x66c] ss:$20 sps:$4 sm:$0xff]  }
 0x2bc   :  { %5824 = vmatpush1.bf16.msra.mxu0 %v17106_v43  ;;  %v17243_v43 = vld [vmem:[#allocation8 + $0x914] ss:$20 sps:$4 sm:$0xff]  }
 0x2bd   :  { %5825 = vmatprep.subr.bf16.mxu0 %v17111_v5  ;;  %v17241_v5 = vld [vmem:[#allocation8 + $0x910] ss:$20 sps:$4 sm:$0xff]  }
 0x2be   :  { %5865 = vmatpush1.bf16.msra.mxu1 %v17193_v45  ;;  %v17133_v45 = vld [vmem:[#allocation8 + $0x668] ss:$20 sps:$4 sm:$0xff]  }
 0x2bf   :  { %5866 = vmatprep.subr.bf16.mxu1 %v17201_v50 }
 0x2c0   :  { %5826 = vmatpush1.bf16.msra.mxu0 %v17109_v49  ;;  %v17249_v49 = vld [vmem:[#allocation8 + $0x8ec] ss:$20 sps:$4 sm:$0xff]  }
 0x2c1   :  { %5827 = vmatprep.subr.bf16.mxu0 %v17114_v52  ;;  %v17138_v52 = vld [vmem:[#allocation8 + $0x644] ss:$20 sps:$4 sm:$0xff]  }
 0x2c2   :  { %5867 = vmatpush1.bf16.msra.mxu1 %v17199_v30  ;;  %v17247_v30 = vld [vmem:[#allocation8 + $0x8e8] ss:$20 sps:$4 sm:$0xff]  }
 0x2c3   :  { %5868 = vmatprep.subr.bf16.mxu1 %v17207_v55  ;;  %v17255_v55 = vld [vmem:[#allocation8 + $0x8c4] ss:$20 sps:$4 sm:$0xff]  }
 0x2c4   :  { %5828 = vmatpush1.bf16.msra.mxu0 %v17112_v54  ;;  %v17136_v54 = vld [vmem:[#allocation8 + $0x640] ss:$20 sps:$4 sm:$0xff]  }
 0x2c5   :  { %5829 = vmatprep.subr.bf16.mxu0 %v17117_v61 }
 0x2c6   :  { %5869 = vmatpush1.bf16.msra.mxu1 %v17205_v62  ;;  %v17141_v62 = vld [vmem:[#allocation8 + $0x124] ss:$20 sps:$4 sm:$0xff]  }
 0x2c7   :  { %5870 = vmatprep.subr.bf16.mxu1 %v17213_v1  ;;  %v3396_v0 = vpop.f32.mrf.mxu0  ;;  %v17261_v1 = vld [vmem:[#allocation8 + $0x3a4] ss:$20 sps:$4 sm:$0xff]  }
 0x2c8   :  { %v3397_v40 = vadd.f32 %v3396_v0, %v3356_v10  ;;  %5830 = vmatpush2.bf16.msra.mxu0 %v17115_v7  ;;  %v17139_v0 = vld [vmem:[#allocation8 + $0x120] ss:$20 sps:$4 sm:$0xff]  }
 0x2c9   :  { %v3398_v14 = vpop.f32.mrf.mxu0  ;;  %5831 = vmatprep.subr.bf16.mxu0 %v17120_v8 }
 0x2ca   :  { %5871 = vmatpush2.bf16.msra.mxu1 %v17211_v33  ;;  %v3438_v15 = vadd.f32 %v19263_v17, %v3397_v40  ;;  %v3399_v18 = vadd.f32 %v3398_v14, %v3358_v29  ;;  %v17145_v14 = vld [vmem:[#allocation8 + $0xd0] ss:$20 sps:$4 sm:$0xff]  }
 0x2cb   :  { %5872 = vmatprep.subr.bf16.mxu1 %v17219_v9  ;;  %v3400_v20 = vpop.f32.mrf.mxu0 }
 0x2cc   :  { %v3612_v21 = vsub.f32 0.0, %v3438_v15  ;;  %v3440_v28 = vadd.f32 %v19266_v26, %v3399_v18  ;;  %5832 = vmatpush2.bf16.msra.mxu0 %v17118_v46  ;;  %v17127_v26 = vld [vmem:[#allocation8 + $0x6b8] ss:$20 sps:$4 sm:$0xff]   ;;  %v17144_v46 = vld [vmem:[#allocation8 + $0xfc] ss:$20 sps:$4 sm:$0xff]  }
 0x2cd   :  { %v3401_v23 = vpop.f32.mrf.mxu0  ;;  %5833 = vmatprep.subr.bf16.mxu0 %v17123_v11  ;;  %v17142_v11 = vld [vmem:[#allocation8 + $0xf8] ss:$20 sps:$4 sm:$0xff]   ;;  %v17148_v15 = vld [vmem:[#allocation8 + $0xa8] ss:$20 sps:$4 sm:$0xff]   ;;  %v17151_v20 = vld [vmem:[#allocation8 + $0x80] ss:$20 sps:$4 sm:$0xff]  }
 0x2ce   :  { %5873 = vmatpush2.bf16.msra.mxu1 %v17217_v12  ;;  %v3624_v41 = vmul.f32 1.442695, %v3612_v21  ;;  %v3613_v34 = vsub.f32 0.0, %v3440_v28  ;;  %v17147_v12 = vld [vmem:[#allocation8 + $0xd4] ss:$20 sps:$4 sm:$0xff]  }
 0x2cf   :  { %5874 = vmatprep.subr.bf16.mxu1 %v17225_v31  ;;  %v17150_v31 = vld [vmem:[#allocation8 + $0xac] ss:$20 sps:$4 sm:$0xff]   ;;  %v17153_v18 = vld [vmem:[#allocation8 + $0x84] ss:$20 sps:$4 sm:$0xff]   ;;  %v17156_v21 = vld [vmem:[#allocation8 + $0x5c] ss:$20 sps:$4 sm:$0xff]  }
 0x2d0   :  { %18563 = vpow2.f32 %v3624_v41  ;;  %v3626_v17 = vmul.f32 1.442695, %v3613_v34  ;;  %5834 = vmatpush2.bf16.msra.mxu0 %v17121_v22  ;;  %v17154_v28 = vld [vmem:[#allocation8 + $0x58] ss:$20 sps:$4 sm:$0xff]   ;;  %v17159_v22 = vld [vmem:[#allocation8 + $0x34] ss:$20 sps:$4 sm:$0xff]  }
 0x2d1   :  { %5835 = vmatprep.subr.bf16.mxu0 %v17126_v32  ;;  %v17157_v23 = vld [vmem:[#allocation8 + $0x30] ss:$20 sps:$4 sm:$0xff]   ;;  %v17160_v34 = vld [vmem:[#allocation8 + $0x8] ss:$20 sps:$4 sm:$0xff]  }
 0x2d2   :  { %5875 = vmatpush2.bf16.msra.mxu1 %v17223_v24  ;;  %18565 = vpow2.f32 %v3626_v17  ;;  %v17168_v17 = vld [vmem:[#allocation8 + $0x264] ss:$20 sps:$4 sm:$0xff]  }
 0x2d3   :  { %5876 = vmatprep.subr.bf16.mxu1 %v17231_v27  ;;  %v17162_v27 = vld [vmem:[#allocation8 + $0xc] ss:$20 sps:$4 sm:$0xff]  }
 0x2d4   :  { %5836 = vmatpush2.bf16.msra.mxu0 %v17124_v44 }
 0x2d5   :  { %5837 = vmatprep.subr.bf16.mxu0 %v17129_v35  ;;  %v17166_v35 = vld [vmem:[#allocation8 + $0x260] ss:$20 sps:$4 sm:$0xff]  }
 0x2d6   :  { %5877 = vmatpush2.bf16.msra.mxu1 %v17229_v56  ;;  %v17174_v56 = vld [vmem:[#allocation8 + $0x23c] ss:$20 sps:$4 sm:$0xff]  }
 0x2d7   :  { %5878 = vmatprep.subr.bf16.mxu1 %v17237_v19  ;;  %v17180_v19 = vld [vmem:[#allocation8 + $0x214] ss:$20 sps:$4 sm:$0xff]  }
 0x2d8   :  { %5838 = vmatpush2.bf16.msra.mxu0 %v17127_v26  ;;  %v17172_v26 = vld [vmem:[#allocation8 + $0x238] ss:$20 sps:$4 sm:$0xff]  }
 0x2d9   :  { %5839 = vmatprep.subr.bf16.mxu0 %v17132_v37  ;;  %v17178_v37 = vld [vmem:[#allocation8 + $0x210] ss:$20 sps:$4 sm:$0xff]  }
 0x2da   :  { %5879 = vmatpush2.bf16.msra.mxu1 %v17235_v47  ;;  %v17186_v47 = vld [vmem:[#allocation8 + $0x1ec] ss:$20 sps:$4 sm:$0xff]  }
 0x2db   :  { %5880 = vmatprep.subr.bf16.mxu1 %v17243_v43  ;;  %v19298_v43 = vsub.s32 6, %v19172_v57 }
 0x2dc   :  { %5840 = vmatpush2.bf16.msra.mxu0 %v17130_v42  ;;  %v17184_v42 = vld [vmem:[#allocation8 + $0x1e8] ss:$20 sps:$4 sm:$0xff]  }
 0x2dd   :  { %v18564_v50 = vpop.eup %18563  ;;  %5841 = vmatprep.subr.bf16.mxu0 %v17135_v58  ;;  %v17192_v58 = vld [vmem:[#allocation8 + $0x1c4] ss:$20 sps:$4 sm:$0xff]  }
 0x2de   :  { %5881 = vmatpush2.bf16.msra.mxu1 %v17241_v5  ;;  %v3636_v53 = vadd.f32 1.0, %v18564_v50  ;;  %v702_v5 = vsub.s32 7, %v19172_v57  ;;  %v17198_v50 = vld [vmem:[#allocation8 + $0x19c] ss:$20 sps:$4 sm:$0xff]   ;;  %v18101_v57 = vld [vmem:[#allocation20 + $0x354] ss:$28 sps:$4 sm:$0xff]  }
 0x2df   :  { %5882 = vmatprep.subr.bf16.mxu1 %v17249_v49  ;;  %v18566_v60 = vpop.eup %18565  ;;  %v699_v49 = vrot.slane %v19274_v59, %v19298_v43 }
 0x2e0   :  { %v3637_v61 = vadd.f32 1.0, %v18566_v60  ;;  %5842 = vmatpush2.bf16.msra.mxu0 %v17133_v45  ;;  %18567 = vrcp.f32 %v3636_v53  ;;  %v17190_v45 = vld [vmem:[#allocation8 + $0x1c0] ss:$20 sps:$4 sm:$0xff]  }
 0x2e1   :  { %5843 = vmatprep.subr.bf16.mxu0 %v17138_v52  ;;  %v703_v52 = vrot.slane %v19274_v59, %v702_v5 }
 0x2e2   :  { %5883 = vmatpush2.bf16.msra.mxu1 %v17247_v30  ;;  %18569 = vrcp.f32 %v3637_v61  ;;  %v17196_v30 = vld [vmem:[#allocation8 + $0x198] ss:$20 sps:$4 sm:$0xff]  }
 0x2e3   :  { %5884 = vmatprep.subr.bf16.mxu1 %v17255_v55 }
 0x2e4   :  { %5844 = vmatpush2.bf16.msra.mxu0 %v17136_v54  ;;  %v17204_v54 = vld [vmem:[#allocation8 + $0x174] ss:$20 sps:$4 sm:$0xff]  }
 0x2e5   :  { %5895 = vmatprep.subr.bf16.mxu0 %v17141_v62 }
 0x2e6   :  { %5885 = vmatpush2.bf16.msra.mxu1 %v17253_v63  ;;  %v17202_v63 = vld [vmem:[#allocation8 + $0x170] ss:$20 sps:$4 sm:$0xff]  }
 0x2e7   :  { %5936 = vmatprep.subr.bf16.mxu1 %v17261_v1 }
 0x2e9   :  { %v19286_v3 = vpop.f32.mrf.mxu1 }
 0x2ea   :  { %v3479_v53 = vadd.f32 %v19286_v3, %v699_v49  ;;  %v17208_v3 = vld [vmem:[#allocation8 + $0x148] ss:$20 sps:$4 sm:$0xff]   ;;  %v17264_v49 = vld [vmem:[#allocation8 + $0x764] ss:$20 sps:$4 sm:$0xff]  }
 0x2eb   :  { %v19288_v7 = vpop.f32.mrf.mxu1 }
 0x2ec   :  { %v3481_v55 = vadd.f32 %v19288_v7, %v703_v52 }
 0x2ed   :  { %v3482_v8 = vpop.f32.mrf.mxu1  ;;  %v18568_v33 = vpop.eup %18567 }
 0x2ee   :  { %v19292_v40 = vpack.c.bf16 %v18568_v33, %v18568_v33 }
 0x2ef   :  { %v3483_v9 = vpop.f32.mrf.mxu1  ;;  %v18570_v10 = vpop.eup %18569 }
 0x2f0   :  { %v19290_v29 = vpack.c.bf16 %v18570_v10, %v18570_v10  ;;  %v17210_v9 = vld [vmem:[#allocation8 + $0x14c] ss:$20 sps:$4 sm:$0xff]  }
 0x2f2   :  { %5845 = vmatprep.mubr.bf16.mxu0 %v19290_v29 }
 0x2f3   :  { %5846 = vmatmul.mubr.bf16.vlgmr.msra.gmra.mxu0 %v19292_v40 }
 0x2f4   :  { %5896 = vmatpush1.bf16.msra.mxu0 %v17139_v0  ;;  %5927 = vmatprep.mubr.bf16.mxu0 %v19239_v2 }
 0x2f5   :  { %5897 = vmatprep.subr.bf16.mxu0 %v17144_v46 }
 0x2f8   :  { %5898 = vmatpush1.bf16.msra.mxu0 %v17142_v11 }
 0x2f9   :  { %5899 = vmatprep.subr.bf16.mxu0 %v17147_v12 }
 0x2fc   :  { %5900 = vmatpush1.bf16.msra.mxu0 %v17145_v14 }
 0x2fd   :  { %5901 = vmatprep.subr.bf16.mxu0 %v17150_v31  ;;  %v17216_v31 = vld [vmem:[#allocation8 + $0x624] ss:$20 sps:$4 sm:$0xff]  }
 0x300   :  { %5902 = vmatpush1.bf16.msra.mxu0 %v17148_v15 }
 0x301   :  { %5903 = vmatprep.subr.bf16.mxu0 %v17153_v18 }
 0x304   :  { %5904 = vmatpush1.bf16.msra.mxu0 %v17151_v20 }
 0x305   :  { %5905 = vmatprep.subr.bf16.mxu0 %v17156_v21  ;;  %v17214_v21 = vld [vmem:[#allocation8 + $0x620] ss:$20 sps:$4 sm:$0xff]  }
 0x307   :  { %v3519_v32 = vpop.f32.mrf.mxu0 }
 0x308   :  { %5906 = vmatpush1.bf16.msra.mxu0 %v17154_v28  ;;  %v3520_v60 = vadd.f32 %v3519_v32, %v3479_v53  ;;  %v17220_v32 = vld [vmem:[#allocation8 + $0x5f8] ss:$20 sps:$4 sm:$0xff]  }
 0x309   :  { %v3521_v24 = vpop.f32.mrf.mxu0  ;;  %5907 = vmatprep.subr.bf16.mxu0 %v17159_v22  ;;  %v17222_v22 = vld [vmem:[#allocation8 + $0x5fc] ss:$20 sps:$4 sm:$0xff]  }
 0x30a   :  { %v3522_v1 = vadd.f32 %v3521_v24, %v3481_v55  ;;  %v17226_v24 = vld [vmem:[#allocation8 + $0x5d0] ss:$20 sps:$4 sm:$0xff]  }
 0x30b   :  { %v3523_v41 = vpop.f32.mrf.mxu0 }
 0x30c   :  { %5908 = vmatpush1.bf16.msra.mxu0 %v17157_v23  ;;  %v17228_v23 = vld [vmem:[#allocation8 + $0x5d4] ss:$20 sps:$4 sm:$0xff]  }
 0x30d   :  { %v3524_v44 = vpop.f32.mrf.mxu0  ;;  %5909 = vmatprep.subr.bf16.mxu0 %v17162_v27  ;;  %v17234_v27 = vld [vmem:[#allocation8 + $0x5ac] ss:$20 sps:$4 sm:$0xff]   ;;  %v17232_v41 = vld [vmem:[#allocation8 + $0x5a8] ss:$20 sps:$4 sm:$0xff]  }
 0x310   :  { %5910 = vmatpush1.bf16.msra.mxu0 %v17160_v34  ;;  %v17240_v34 = vld [vmem:[#allocation8 + $0x584] ss:$20 sps:$4 sm:$0xff]  }
 0x311   :  { %5911 = vmatprep.subr.bf16.mxu0 %v17168_v17 }
 0x314   :  { %5912 = vmatpush2.bf16.msra.mxu0 %v17166_v35 }
 0x315   :  { %5913 = vmatprep.subr.bf16.mxu0 %v17174_v56  ;;  %v17238_v56 = vld [vmem:[#allocation8 + $0x580] ss:$20 sps:$4 sm:$0xff]  }
 0x318   :  { %5914 = vmatpush2.bf16.msra.mxu0 %v17172_v26 }
 0x319   :  { %5915 = vmatprep.subr.bf16.mxu0 %v17180_v19  ;;  %v17246_v19 = vld [vmem:[#allocation8 + $0x55c] ss:$20 sps:$4 sm:$0xff]  }
 0x31c   :  { %5916 = vmatpush2.bf16.msra.mxu0 %v17178_v37  ;;  %v17244_v37 = vld [vmem:[#allocation8 + $0x558] ss:$20 sps:$4 sm:$0xff]  }
 0x31d   :  { %5917 = vmatprep.subr.bf16.mxu0 %v17186_v47  ;;  %v17252_v47 = vld [vmem:[#allocation8 + $0x534] ss:$20 sps:$4 sm:$0xff]  }
 0x320   :  { %5918 = vmatpush2.bf16.msra.mxu0 %v17184_v42  ;;  %v17250_v42 = vld [vmem:[#allocation8 + $0x530] ss:$20 sps:$4 sm:$0xff]  }
 0x321   :  { %5919 = vmatprep.subr.bf16.mxu0 %v17192_v58  ;;  %v17258_v58 = vld [vmem:[#allocation8 + $0x50c] ss:$20 sps:$4 sm:$0xff]  }
 0x324   :  { %5920 = vmatpush2.bf16.msra.mxu0 %v17190_v45  ;;  %v17256_v45 = vld [vmem:[#allocation8 + $0x508] ss:$20 sps:$4 sm:$0xff]  }
 0x325   :  { %5921 = vmatprep.subr.bf16.mxu0 %v17198_v50 }
 0x327   :  { %v3601_v61 = vpop.f32.mrf.mxu0 }
 0x328   :  { %5922 = vmatpush2.bf16.msra.mxu0 %v17196_v30  ;;  %v17262_v30 = vld [vmem:[#allocation8 + $0x760] ss:$20 sps:$4 sm:$0xff]  }
 0x329   :  { %v3560_v62 = vpop.f32.mrf.mxu1  ;;  %v3603_v33 = vpop.f32.mrf.mxu0  ;;  %5923 = vmatprep.subr.bf16.mxu0 %v17204_v54  ;;  %v17259_v54 = vld [vmem:[#allocation8 + $0x3a0] ss:$20 sps:$4 sm:$0xff]  }
 0x32a   :  { %v3561_v8 = vadd.f32 %v3560_v62, %v3520_v60  ;;  %v17267_v60 = vld [vmem:[#allocation8 + $0x37c] ss:$20 sps:$4 sm:$0xff]   ;;  %v17268_v62 = vld [vmem:[#allocation8 + $0x738] ss:$20 sps:$4 sm:$0xff]  }
 0x32b   :  { %v3562_v10 = vpop.f32.mrf.mxu1  ;;  %v3605_v46 = vpop.f32.mrf.mxu0 }
 0x32c   :  { %v3602_v59 = vadd.f32 %v3601_v61, %v3561_v8  ;;  %v3563_v0 = vadd.f32 %v3562_v10, %v3522_v1  ;;  %5924 = vmatpush2.bf16.msra.mxu0 %v17202_v63  ;;  %v17270_v61 = vld [vmem:[#allocation8 + $0x73c] ss:$20 sps:$4 sm:$0xff]   ;;  %v17265_v63 = vld [vmem:[#allocation8 + $0x378] ss:$20 sps:$4 sm:$0xff]   ;;  %v17276_v1 = vld [vmem:[#allocation8 + $0x714] ss:$20 sps:$4 sm:$0xff]  }
 0x32d   :  { %v3564_v11 = vpop.f32.mrf.mxu1  ;;  %v3606_v7 = vpop.f32.mrf.mxu0  ;;  %5925 = vmatprep.subr.bf16.mxu0 %v17210_v9  ;;  %v17273_v8 = vld [vmem:[#allocation8 + $0x354] ss:$20 sps:$4 sm:$0xff]   ;;  %v17271_v9 = vld [vmem:[#allocation8 + $0x350] ss:$20 sps:$4 sm:$0xff]   ;;  %v17282_v10 = vld [vmem:[#allocation8 + $0x6ec] ss:$20 sps:$4 sm:$0xff]  }
 0x32e   :  { %v3614_v12 = vsub.f32 0.0, %v3602_v59  ;;  %v3604_v14 = vadd.f32 %v3603_v33, %v3563_v0  ;;  %v17274_v33 = vld [vmem:[#allocation8 + $0x710] ss:$20 sps:$4 sm:$0xff]   ;;  %v17279_v59 = vld [vmem:[#allocation8 + $0x32c] ss:$20 sps:$4 sm:$0xff]  }
 0x32f   :  { %v3565_v15 = vpop.f32.mrf.mxu1  ;;  %v17280_v0 = vld [vmem:[#allocation8 + $0x6e8] ss:$20 sps:$4 sm:$0xff]   ;;  %v17288_v11 = vld [vmem:[#allocation8 + $0x6c4] ss:$20 sps:$4 sm:$0xff]  }
 0x330   :  { %v3628_v18 = vmul.f32 1.442695, %v3614_v12  ;;  %v3615_v20 = vsub.f32 0.0, %v3604_v14  ;;  %5926 = vmatpush2.bf16.msra.mxu0 %v17208_v3  ;;  %v17277_v46 = vld [vmem:[#allocation8 + $0x328] ss:$20 sps:$4 sm:$0xff]  }
 0x331   :  { %5977 = vmatprep.subr.bf16.mxu0 %v17216_v31  ;;  %v17285_v3 = vld [vmem:[#allocation8 + $0x304] ss:$20 sps:$4 sm:$0xff]   ;;  %v17286_v12 = vld [vmem:[#allocation8 + $0x6c0] ss:$20 sps:$4 sm:$0xff]   ;;  %v17294_v7 = vld [vmem:[#allocation8 + $0x69c] ss:$20 sps:$4 sm:$0xff]  }
 0x332   :  { %18571 = vpow2.f32 %v3628_v18  ;;  %v3630_v28 = vmul.f32 1.442695, %v3615_v20  ;;  %v17283_v14 = vld [vmem:[#allocation8 + $0x300] ss:$20 sps:$4 sm:$0xff]   ;;  %v17291_v15 = vld [vmem:[#allocation8 + $0x2dc] ss:$20 sps:$4 sm:$0xff]  }
 0x333   :  { %5928 = vmatmul.mubr.bf16.vlgmr.msra.gmra.mxu0 %v19258_v16  ;;  %v19317_v31 = vld [vmem:[#allocation10] sm:$0x1f]  ;;  %v17292_v18 = vld [vmem:[#allocation8 + $0x698] ss:$20 sps:$4 sm:$0xff]  }
 0x334   :  { %18573 = vpow2.f32 %v3630_v28  ;;  %5978 = vmatpush1.bf16.msra.mxu0 %v17214_v21  ;;  %6009 = vmatprep.mubr.bf16.mxu0 %v19290_v29  ;;  %v4045_v20 = vrot.slane %v19317_v31, %v19175_v6  ;;  %v17289_v21 = vld [vmem:[#allocation8 + $0x2d8] ss:$20 sps:$4 sm:$0xff]   ;;  %v17300_v28 = vld [vmem:[#allocation8 + $0x674] ss:$20 sps:$4 sm:$0xff]  }
 0x335   :  { %5979 = vmatprep.subr.bf16.mxu0 %v17222_v22  ;;  %v4049_v22 = vrot.slane %v19317_v31, %v19178_v13 }
 0x338   :  { %5980 = vmatpush1.bf16.msra.mxu0 %v17220_v32  ;;  %v17297_v32 = vld [vmem:[#allocation8 + $0x2b4] ss:$20 sps:$4 sm:$0xff]  }
 0x339   :  { %5981 = vmatprep.subr.bf16.mxu0 %v17228_v23 }
 0x33c   :  { %5982 = vmatpush1.bf16.msra.mxu0 %v17226_v24 }
 0x33d   :  { %5983 = vmatprep.subr.bf16.mxu0 %v17234_v27 }
 0x33f   :  { %v18572_v44 = vpop.eup %18571 }
 0x340   :  { %v3638_v17 = vadd.f32 1.0, %v18572_v44  ;;  %5984 = vmatpush1.bf16.msra.mxu0 %v17232_v41  ;;  %v17298_v41 = vld [vmem:[#allocation8 + $0x670] ss:$20 sps:$4 sm:$0xff]  }
 0x341   :  { %v18574_v35 = vpop.eup %18573  ;;  %5985 = vmatprep.subr.bf16.mxu0 %v17240_v34  ;;  %v17295_v44 = vld [vmem:[#allocation8 + $0x2b0] ss:$20 sps:$4 sm:$0xff]  }
 0x342   :  { %v3639_v26 = vadd.f32 1.0, %v18574_v35  ;;  %18575 = vrcp.f32 %v3638_v17  ;;  %v17306_v17 = vld [vmem:[#allocation8 + $0x64c] ss:$20 sps:$4 sm:$0xff]  }
 0x344   :  { %18577 = vrcp.f32 %v3639_v26  ;;  %5986 = vmatpush1.bf16.msra.mxu0 %v17238_v56 }
 0x345   :  { %5987 = vmatprep.subr.bf16.mxu0 %v17246_v19  ;;  %v17303_v19 = vld [vmem:[#allocation8 + $0x28c] ss:$20 sps:$4 sm:$0xff]  }
 0x348   :  { %5988 = vmatpush1.bf16.msra.mxu0 %v17244_v37 }
 0x349   :  { %5989 = vmatprep.subr.bf16.mxu0 %v17252_v47 }
 0x34c   :  { %5990 = vmatpush1.bf16.msra.mxu0 %v17250_v42 }
 0x34d   :  { %5991 = vmatprep.subr.bf16.mxu0 %v17258_v58  ;;  %v17304_v58 = vld [vmem:[#allocation8 + $0x648] ss:$20 sps:$4 sm:$0xff]  }
 0x34f   :  { %v18576_v50 = vpop.eup %18575 }
 0x350   :  { %5992 = vmatpush1.bf16.msra.mxu0 %v17256_v45  ;;  %v19312_v55 = vpack.c.bf16 %v18576_v50, %v18576_v50  ;;  %v17310_v50 = vld [vmem:[#allocation8 + $0x268] ss:$20 sps:$4 sm:$0xff]  }
 0x351   :  { %v18578_v52 = vpop.eup %18577  ;;  %5993 = vmatprep.subr.bf16.mxu0 %v17264_v49  ;;  %v17301_v49 = vld [vmem:[#allocation8 + $0x288] ss:$20 sps:$4 sm:$0xff]  }
 0x352   :  { %v19310_v53 = vpack.c.bf16 %v18578_v52, %v18578_v52 }
 0x354   :  { %5886 = vmatprep.mubr.bf16.mxu1 %v19310_v53  ;;  %5994 = vmatpush2.bf16.msra.mxu0 %v17262_v30  ;;  %v17309_v30 = vld [vmem:[#allocation8 + $0x4e4] ss:$20 sps:$4 sm:$0xff]  }
 0x355   :  { %5887 = vmatmul.mubr.bf16.vlgmr.msra.gmra.mxu1 %v19312_v55  ;;  %5995 = vmatprep.subr.bf16.mxu0 %v17270_v61  ;;  %v17315_v61 = vld [vmem:[#allocation8 + $0x240] ss:$20 sps:$4 sm:$0xff]  }
 0x356   :  { %5937 = vmatpush1.bf16.msra.mxu1 %v17259_v54  ;;  %5968 = vmatprep.mubr.bf16.mxu1 %v19243_v39  ;;  %v17311_v54 = vld [vmem:[#allocation8 + $0x128] ss:$20 sps:$4 sm:$0xff]  }
 0x357   :  { %5938 = vmatprep.subr.bf16.mxu1 %v17267_v60  ;;  %v17307_v60 = vld [vmem:[#allocation8 + $0x4e0] ss:$20 sps:$4 sm:$0xff]  }
 0x358   :  { %5996 = vmatpush2.bf16.msra.mxu0 %v17268_v62  ;;  %v17314_v62 = vld [vmem:[#allocation8 + $0x4bc] ss:$20 sps:$4 sm:$0xff]  }
 0x359   :  { %5997 = vmatprep.subr.bf16.mxu0 %v17276_v1  ;;  %v17312_v1 = vld [vmem:[#allocation8 + $0x4b8] ss:$20 sps:$4 sm:$0xff]  }
 0x35a   :  { %5939 = vmatpush1.bf16.msra.mxu1 %v17265_v63  ;;  %v17316_v63 = vld [vmem:[#allocation8 + $0x100] ss:$20 sps:$4 sm:$0xff]  }
 0x35b   :  { %5940 = vmatprep.subr.bf16.mxu1 %v17273_v8  ;;  %v17320_v8 = vld [vmem:[#allocation8 + $0x218] ss:$20 sps:$4 sm:$0xff]  }
 0x35c   :  { %5998 = vmatpush2.bf16.msra.mxu0 %v17274_v33  ;;  %v17319_v33 = vld [vmem:[#allocation8 + $0x494] ss:$20 sps:$4 sm:$0xff]  }
 0x35d   :  { %5999 = vmatprep.subr.bf16.mxu0 %v17282_v10  ;;  %v17317_v10 = vld [vmem:[#allocation8 + $0x490] ss:$20 sps:$4 sm:$0xff]  }
 0x35e   :  { %5941 = vmatpush1.bf16.msra.mxu1 %v17271_v9  ;;  %v17321_v9 = vld [vmem:[#allocation8 + $0xd8] ss:$20 sps:$4 sm:$0xff]  }
 0x35f   :  { %5942 = vmatprep.subr.bf16.mxu1 %v17279_v59  ;;  %v17325_v59 = vld [vmem:[#allocation8 + $0x1f0] ss:$20 sps:$4 sm:$0xff]  }
 0x360   :  { %6000 = vmatpush2.bf16.msra.mxu0 %v17280_v0  ;;  %v17324_v0 = vld [vmem:[#allocation8 + $0x46c] ss:$20 sps:$4 sm:$0xff]  }
 0x361   :  { %6001 = vmatprep.subr.bf16.mxu0 %v17288_v11  ;;  %v17322_v11 = vld [vmem:[#allocation8 + $0x468] ss:$20 sps:$4 sm:$0xff]  }
 0x362   :  { %5943 = vmatpush1.bf16.msra.mxu1 %v17277_v46  ;;  %v17326_v46 = vld [vmem:[#allocation8 + $0xb0] ss:$20 sps:$4 sm:$0xff]  }
 0x363   :  { %5944 = vmatprep.subr.bf16.mxu1 %v17285_v3  ;;  %v17329_v3 = vld [vmem:[#allocation8 + $0x444] ss:$20 sps:$4 sm:$0xff]  }
 0x364   :  { %6002 = vmatpush2.bf16.msra.mxu0 %v17286_v12  ;;  %v17331_v12 = vld [vmem:[#allocation8 + $0x88] ss:$20 sps:$4 sm:$0xff]  }
 0x365   :  { %6003 = vmatprep.subr.bf16.mxu0 %v17294_v7  ;;  %v17335_v7 = vld [vmem:[#allocation8 + $0x1a0] ss:$20 sps:$4 sm:$0xff]  }
 0x366   :  { %5945 = vmatpush1.bf16.msra.mxu1 %v17283_v14  ;;  %v17327_v14 = vld [vmem:[#allocation8 + $0x440] ss:$20 sps:$4 sm:$0xff]  }
 0x367   :  { %5946 = vmatprep.subr.bf16.mxu1 %v17291_v15  ;;  %v5765_v23 = vpop.f32.mrf.mxu0  ;;  %v17334_v15 = vld [vmem:[#allocation8 + $0x41c] ss:$20 sps:$4 sm:$0xff]  }
 0x368   :  { %v5766_v24 = vadd.f32 %v5765_v23, %v4045_v20  ;;  %6004 = vmatpush2.bf16.msra.mxu0 %v17292_v18  ;;  %v17336_v18 = vld [vmem:[#allocation8 + $0x60] ss:$20 sps:$4 sm:$0xff]   ;;  %v17332_v20 = vld [vmem:[#allocation8 + $0x418] ss:$20 sps:$4 sm:$0xff]   ;;  %v17345_v23 = vld [vmem:[#allocation8 + $0x150] ss:$20 sps:$4 sm:$0xff]  }
 0x369   :  { %v5806_v27 = vpop.f32.mrf.mxu1  ;;  %v5767_v34 = vpop.f32.mrf.mxu0  ;;  %6005 = vmatprep.subr.bf16.mxu0 %v17300_v28  ;;  %v17339_v28 = vld [vmem:[#allocation8 + $0x3f4] ss:$20 sps:$4 sm:$0xff]  }
 0x36a   :  { %5947 = vmatpush1.bf16.msra.mxu1 %v17289_v21  ;;  %v19323_v35 = vadd.f32 %v5806_v27, %v5766_v24  ;;  %v5768_v56 = vadd.f32 %v5767_v34, %v4049_v22  ;;  %v17340_v21 = vld [vmem:[#allocation8 + $0x178] ss:$20 sps:$4 sm:$0xff]   ;;  %v17346_v27 = vld [vmem:[#allocation8 + $0x10] ss:$20 sps:$4 sm:$0xff]   ;;  %v17350_v34 = vld [vmem:[#allocation8 + $0x768] ss:$20 sps:$4 sm:$0xff]  }
 0x36b   :  { %v5808_v26 = vpop.f32.mrf.mxu1  ;;  %5948 = vmatprep.subr.bf16.mxu1 %v17297_v32  ;;  %v5769_v37 = vpop.f32.mrf.mxu0  ;;  %v17341_v22 = vld [vmem:[#allocation8 + $0x38] ss:$20 sps:$4 sm:$0xff]   ;;  %v17337_v32 = vld [vmem:[#allocation8 + $0x3f0] ss:$20 sps:$4 sm:$0xff]  }
 0x36c   :  { %v19325_v47 = vadd.f32 %v5808_v26, %v5768_v56  ;;  %6006 = vmatpush2.bf16.msra.mxu0 %v17298_v41  ;;  %v17344_v24 = vld [vmem:[#allocation8 + $0x3cc] ss:$20 sps:$4 sm:$0xff]   ;;  %v17342_v41 = vld [vmem:[#allocation8 + $0x3c8] ss:$20 sps:$4 sm:$0xff]  }
 0x36d   :  { %v5810_v42 = vpop.f32.mrf.mxu1  ;;  %v5770_v45 = vpop.f32.mrf.mxu0  ;;  %6007 = vmatprep.subr.bf16.mxu0 %v17306_v17  ;;  %v17351_v17 = vld [vmem:[#allocation8 + $0x628] ss:$20 sps:$4 sm:$0xff]   ;;  %v17347_v56 = vld [vmem:[#allocation8 + $0x8a0] ss:$20 sps:$4 sm:$0xff]  }
 0x36e   :  { %5949 = vmatpush1.bf16.msra.mxu1 %v17295_v44  ;;  %v17349_v44 = vld [vmem:[#allocation8 + $0x8a4] ss:$20 sps:$4 sm:$0xff]   ;;  %v17354_v26 = vld [vmem:[#allocation8 + $0x87c] ss:$20 sps:$4 sm:$0xff]   ;;  %v17356_v37 = vld [vmem:[#allocation8 + $0x600] ss:$20 sps:$4 sm:$0xff]  }
 0x36f   :  { %v5811_v52 = vpop.f32.mrf.mxu1  ;;  %5950 = vmatprep.subr.bf16.mxu1 %v17303_v19  ;;  %v17355_v19 = vld [vmem:[#allocation8 + $0x740] ss:$20 sps:$4 sm:$0xff]   ;;  %v17352_v42 = vld [vmem:[#allocation8 + $0x878] ss:$20 sps:$4 sm:$0xff]  }
 0x370   :  { %6008 = vmatpush2.bf16.msra.mxu0 %v17304_v58  ;;  %v17360_v58 = vld [vmem:[#allocation8 + $0x718] ss:$20 sps:$4 sm:$0xff]   ;;  %v17359_v45 = vld [vmem:[#allocation8 + $0x854] ss:$20 sps:$4 sm:$0xff]  }
 0x371   :  { %16752 = vmatprep.subr.bf16.mxu0 %v17310_v50  ;;  %v17357_v50 = vld [vmem:[#allocation8 + $0x850] ss:$20 sps:$4 sm:$0xff]   ;;  %v17364_v52 = vld [vmem:[#allocation8 + $0x82c] ss:$20 sps:$4 sm:$0xff]  }
 0x372   :  { %5951 = vmatpush1.bf16.msra.mxu1 %v17301_v49  ;;  %v17361_v49 = vld [vmem:[#allocation8 + $0x5d8] ss:$20 sps:$4 sm:$0xff]  }
 0x373   :  { %5952 = vmatprep.subr.bf16.mxu1 %v17309_v30  ;;  %6010 = vmatmul.mubr.bf16.vlgmr.msra.gmra.mxu0 %v19292_v40  ;;  %v17366_v30 = vld [vmem:[#allocation8 + $0x5b0] ss:$20 sps:$4 sm:$0xff]  }
 0x374   :  { %16753 = vmatpush3.bf16.msra.mxu0 %v17311_v54  ;;  %6091 = vmatprep.mubr.bf16.mxu0 %v19239_v2  ;;  %v17330_v2 = vld [vmem:[#allocation8 + $0x1c8] ss:$20 sps:$4 sm:$0xff]  }
 0x375   :  { %16754 = vmatprep.subr.bf16.mxu0 %v17315_v61  ;;  %v17362_v54 = vld [vmem:[#allocation8 + $0x828] ss:$20 sps:$4 sm:$0xff]   ;;  %v17369_v61 = vld [vmem:[#allocation8 + $0x804] ss:$20 sps:$4 sm:$0xff]  }
 0x376   :  { %5953 = vmatpush2.bf16.msra.mxu1 %v17307_v60  ;;  %v17370_v60 = vld [vmem:[#allocation8 + $0x6c8] ss:$20 sps:$4 sm:$0xff]  }
 0x377   :  { %5954 = vmatprep.subr.bf16.mxu1 %v17314_v62  ;;  %v17367_v62 = vld [vmem:[#allocation8 + $0x800] ss:$20 sps:$4 sm:$0xff]  }
 0x378   :  { %16755 = vmatpush3.bf16.msra.mxu0 %v17316_v63  ;;  %v17375_v63 = vld [vmem:[#allocation8 + $0x6a0] ss:$20 sps:$4 sm:$0xff]  }
 0x379   :  { %16756 = vmatprep.subr.bf16.mxu0 %v17320_v8  ;;  %v17376_v8 = vld [vmem:[#allocation8 + $0x560] ss:$20 sps:$4 sm:$0xff]  }
 0x37a   :  { %5955 = vmatpush2.bf16.msra.mxu1 %v17312_v1  ;;  %v17374_v1 = vld [vmem:[#allocation8 + $0x7dc] ss:$20 sps:$4 sm:$0xff]  }
 0x37b   :  { %5956 = vmatprep.subr.bf16.mxu1 %v17319_v33  ;;  %v17372_v33 = vld [vmem:[#allocation8 + $0x7d8] ss:$20 sps:$4 sm:$0xff]  }
 0x37c   :  { %16757 = vmatpush3.bf16.msra.mxu0 %v17321_v9  ;;  %v17380_v9 = vld [vmem:[#allocation8 + $0x678] ss:$20 sps:$4 sm:$0xff]  }
 0x37d   :  { %16758 = vmatprep.subr.bf16.mxu0 %v17325_v59  ;;  %v17381_v59 = vld [vmem:[#allocation8 + $0x538] ss:$20 sps:$4 sm:$0xff]  }
 0x37e   :  { %5957 = vmatpush2.bf16.msra.mxu1 %v17317_v10  ;;  %v17379_v10 = vld [vmem:[#allocation8 + $0x7b4] ss:$20 sps:$4 sm:$0xff]  }
 0x37f   :  { %5958 = vmatprep.subr.bf16.mxu1 %v17324_v0  ;;  %v17377_v0 = vld [vmem:[#allocation8 + $0x7b0] ss:$20 sps:$4 sm:$0xff]  }
 0x380   :  { %16759 = vmatpush3.bf16.msra.mxu0 %v17326_v46  ;;  %v17385_v46 = vld [vmem:[#allocation8 + $0x650] ss:$20 sps:$4 sm:$0xff]  }
 0x381   :  { %16760 = vmatprep.subr.bf16.mxu0 %v17330_v2  ;;  %v17386_v2 = vld [vmem:[#allocation8 + $0x510] ss:$20 sps:$4 sm:$0xff]  }
 0x382   :  { %5959 = vmatpush2.bf16.msra.mxu1 %v17322_v11  ;;  %v17384_v11 = vld [vmem:[#allocation8 + $0x78c] ss:$20 sps:$4 sm:$0xff]  }
 0x383   :  { %5960 = vmatprep.subr.bf16.mxu1 %v17329_v3  ;;  %v17382_v3 = vld [vmem:[#allocation8 + $0x788] ss:$20 sps:$4 sm:$0xff]  }
 0x384   :  { %16761 = vmatpush3.bf16.msra.mxu0 %v17331_v12  ;;  %v17435_v12 = vld [vmem:[#allocation11 + $0xe4] ss:$16 sps:$4 sm:$0xff]  }
 0x385   :  { %16762 = vmatprep.subr.bf16.mxu0 %v17335_v7  ;;  %v17433_v7 = vld [vmem:[#allocation11 + $0xe0] ss:$16 sps:$4 sm:$0xff]  }
 0x386   :  { %5961 = vmatpush2.bf16.msra.mxu1 %v17327_v14  ;;  %v17389_v14 = vld [vmem:[#allocation8 + $0x9e4] ss:$20 sps:$4 sm:$0xff]  }
 0x387   :  { %5962 = vmatprep.subr.bf16.mxu1 %v17334_v15  ;;  %v17387_v15 = vld [vmem:[#allocation8 + $0x9e0] ss:$20 sps:$4 sm:$0xff]  }
 0x388   :  { %16763 = vmatpush3.bf16.msra.mxu0 %v17336_v18  ;;  %v17440_v18 = vld [vmem:[#allocation11 + $0xc4] ss:$16 sps:$4 sm:$0xff]  }
 0x389   :  { %16764 = vmatprep.subr.bf16.mxu0 %v17340_v21 }
 0x38a   :  { %5963 = vmatpush2.bf16.msra.mxu1 %v17332_v20  ;;  %v17392_v20 = vld [vmem:[#allocation8 + $0x9bc] ss:$20 sps:$4 sm:$0xff]  }
 0x38b   :  { %5964 = vmatprep.subr.bf16.mxu1 %v17339_v28 }
 0x38c   :  { %16765 = vmatpush3.bf16.msra.mxu0 %v17341_v22  ;;  %v17438_v22 = vld [vmem:[#allocation11 + $0xc0] ss:$16 sps:$4 sm:$0xff]  }
 0x38d   :  { %16766 = vmatprep.subr.bf16.mxu0 %v17345_v23  ;;  %v17390_v23 = vld [vmem:[#allocation8 + $0x9b8] ss:$20 sps:$4 sm:$0xff]  }
 0x38e   :  { %5965 = vmatpush2.bf16.msra.mxu1 %v17337_v32 }
 0x38f   :  { %5966 = vmatprep.subr.bf16.mxu1 %v17344_v24  ;;  %v17445_v24 = vld [vmem:[#allocation11 + $0xa4] ss:$16 sps:$4 sm:$0xff]  }
 0x390   :  { %16767 = vmatpush3.bf16.msra.mxu0 %v17346_v27 }
 0x391   :  { %16796 = vmatprep.subr.bf16.mxu0 %v17350_v34 }
 0x392   :  { %5967 = vmatpush2.bf16.msra.mxu1 %v17342_v41  ;;  %v17395_v41 = vld [vmem:[#allocation8 + $0x994] ss:$20 sps:$4 sm:$0xff]  }
 0x393   :  { %6018 = vmatprep.subr.bf16.mxu1 %v17349_v44  ;;  %6092 = vmatmul.mubr.bf16.vlgmr.msra.gmra.mxu0 %v19258_v16  ;;  %v17365_v16 = vld [vmem:[#allocation8 + $0x6f0] ss:$20 sps:$4 sm:$0xff]  }
 0x394   :  { %16797 = vmatpush3.bf16.msra.mxu0 %v17351_v17  ;;  %6171 = vmatprep.mubr.bf16.mxu0 %v19290_v29  ;;  %v17371_v29 = vld [vmem:[#allocation8 + $0x588] ss:$20 sps:$4 sm:$0xff]   ;;  %v17393_v17 = vld [vmem:[#allocation8 + $0x990] ss:$20 sps:$4 sm:$0xff]  }
 0x395   :  { %5969 = vmatmul.mubr.bf16.vlgmr.msra.gmra.mxu1 %v19260_v25  ;;  %16798 = vmatprep.subr.bf16.mxu0 %v17355_v19  ;;  %v17443_v44 = vld [vmem:[#allocation11 + $0xa0] ss:$16 sps:$4 sm:$0xff]  }
 0x396   :  { %6019 = vmatpush1.bf16.msra.mxu1 %v17347_v56  ;;  %6050 = vmatprep.mubr.bf16.mxu1 %v19310_v53  ;;  %v17398_v56 = vld [vmem:[#allocation8 + $0x96c] ss:$20 sps:$4 sm:$0xff]   ;;  %v17396_v19 = vld [vmem:[#allocation8 + $0x968] ss:$20 sps:$4 sm:$0xff]  }
 0x397   :  { %6020 = vmatprep.subr.bf16.mxu1 %v17354_v26  ;;  %v17448_v26 = vld [vmem:[#allocation11 + $0x80] ss:$16 sps:$4 sm:$0xff]  }
 0x398   :  { %16799 = vmatpush3.bf16.msra.mxu0 %v17356_v37  ;;  %v17455_v37 = vld [vmem:[#allocation11 + $0x64] ss:$16 sps:$4 sm:$0xff]  }
 0x399   :  { %16800 = vmatprep.subr.bf16.mxu0 %v17360_v58  ;;  %v17399_v58 = vld [vmem:[#allocation8 + $0x940] ss:$20 sps:$4 sm:$0xff]  }
 0x39a   :  { %6021 = vmatpush1.bf16.msra.mxu1 %v17352_v42  ;;  %v17453_v42 = vld [vmem:[#allocation11 + $0x60] ss:$16 sps:$4 sm:$0xff]  }
 0x39b   :  { %6022 = vmatprep.subr.bf16.mxu1 %v17359_v45  ;;  %v17460_v45 = vld [vmem:[#allocation11 + $0x44] ss:$16 sps:$4 sm:$0xff]  }
 0x39c   :  { %16801 = vmatpush3.bf16.msra.mxu0 %v17361_v49  ;;  %v17404_v49 = vld [vmem:[#allocation8 + $0x91c] ss:$20 sps:$4 sm:$0xff]  }
 0x39d   :  { %16802 = vmatprep.subr.bf16.mxu0 %v17365_v16  ;;  %v17402_v16 = vld [vmem:[#allocation8 + $0x918] ss:$20 sps:$4 sm:$0xff]  }
 0x39e   :  { %6023 = vmatpush1.bf16.msra.mxu1 %v17357_v50  ;;  %v17458_v50 = vld [vmem:[#allocation11 + $0x40] ss:$16 sps:$4 sm:$0xff]  }
 0x39f   :  { %6024 = vmatprep.subr.bf16.mxu1 %v17364_v52  ;;  %v17463_v52 = vld [vmem:[#allocation11 + $0x24] ss:$16 sps:$4 sm:$0xff]  }
 0x3a0   :  { %16803 = vmatpush3.bf16.msra.mxu0 %v17366_v30  ;;  %v17407_v30 = vld [vmem:[#allocation8 + $0x8f4] ss:$20 sps:$4 sm:$0xff]  }
 0x3a1   :  { %16804 = vmatprep.subr.bf16.mxu0 %v17370_v60  ;;  %v17405_v60 = vld [vmem:[#allocation8 + $0x8f0] ss:$20 sps:$4 sm:$0xff]  }
 0x3a2   :  { %6025 = vmatpush1.bf16.msra.mxu1 %v17362_v54  ;;  %v17461_v54 = vld [vmem:[#allocation11 + $0x20] ss:$16 sps:$4 sm:$0xff]  }
 0x3a3   :  { %6026 = vmatprep.subr.bf16.mxu1 %v17369_v61  ;;  %v17466_v61 = vld [vmem:[#allocation11 + $0x4] ss:$16 sps:$4 sm:$0xff]  }
 0x3a4   :  { %16805 = vmatpush3.bf16.msra.mxu0 %v17371_v29  ;;  %v17410_v29 = vld [vmem:[#allocation8 + $0x8cc] ss:$20 sps:$4 sm:$0xff]  }
 0x3a5   :  { %16806 = vmatprep.subr.bf16.mxu0 %v17375_v63  ;;  %v17408_v63 = vld [vmem:[#allocation8 + $0x8c8] ss:$20 sps:$4 sm:$0xff]  }
 0x3a6   :  { %6027 = vmatpush1.bf16.msra.mxu1 %v17367_v62  ;;  %v17464_v62 = vld [vmem:[#allocation11] ss:$16 sps:$4 sm:$0xff]  }
 0x3a7   :  { %6028 = vmatprep.subr.bf16.mxu1 %v17374_v1  ;;  %v17469_v1 = vld [vmem:[#allocation11 + $0x1e4] ss:$16 sps:$4 sm:$0xff]  }
 0x3a8   :  { %16807 = vmatpush3.bf16.msra.mxu0 %v17376_v8  ;;  %v17411_v8 = vld [vmem:[#allocation8 + $0x4e8] ss:$20 sps:$4 sm:$0xff]  }
 0x3a9   :  { %16808 = vmatprep.subr.bf16.mxu0 %v17380_v9  ;;  %v17412_v9 = vld [vmem:[#allocation8 + $0x3a8] ss:$20 sps:$4 sm:$0xff]  }
 0x3aa   :  { %6029 = vmatpush1.bf16.msra.mxu1 %v17372_v33  ;;  %v17467_v33 = vld [vmem:[#allocation11 + $0x1e0] ss:$16 sps:$4 sm:$0xff]  }
 0x3ab   :  { %6030 = vmatprep.subr.bf16.mxu1 %v17379_v10  ;;  %v17413_v10 = vld [vmem:[#allocation8 + $0x4c0] ss:$20 sps:$4 sm:$0xff]  }
 0x3ac   :  { %16809 = vmatpush3.bf16.msra.mxu0 %v17381_v59  ;;  %v17472_v59 = vld [vmem:[#allocation11 + $0x1c4] ss:$16 sps:$4 sm:$0xff]  }
 0x3ad   :  { %16810 = vmatprep.subr.bf16.mxu0 %v17385_v46  ;;  %v17414_v46 = vld [vmem:[#allocation8 + $0x380] ss:$20 sps:$4 sm:$0xff]  }
 0x3ae   :  { %6031 = vmatpush1.bf16.msra.mxu1 %v17377_v0  ;;  %v17470_v0 = vld [vmem:[#allocation11 + $0x1c0] ss:$16 sps:$4 sm:$0xff]  }
 0x3af   :  { %6032 = vmatprep.subr.bf16.mxu1 %v17384_v11  ;;  %v17475_v11 = vld [vmem:[#allocation11 + $0x1a4] ss:$16 sps:$4 sm:$0xff]  }
 0x3b0   :  { %16811 = vmatpush3.bf16.msra.mxu0 %v17386_v2  ;;  %v17415_v2 = vld [vmem:[#allocation8 + $0x498] ss:$20 sps:$4 sm:$0xff]  }
 0x3b1   :  { %7231 = vmatprep.subr.bf16.mxu0 %v17435_v12  ;;  %v17416_v12 = vld [vmem:[#allocation8 + $0x358] ss:$20 sps:$4 sm:$0xff]  }
 0x3b2   :  { %6033 = vmatpush1.bf16.msra.mxu1 %v17382_v3  ;;  %v17473_v3 = vld [vmem:[#allocation11 + $0x1a0] ss:$16 sps:$4 sm:$0xff]  }
 0x3b3   :  { %6034 = vmatprep.subr.bf16.mxu1 %v17389_v14  ;;  %6172 = vmatmul.mubr.bf16.vlgmr.msra.gmra.mxu0 %v19292_v40  ;;  %v5847_v21 = vpop.f32.mrf.mxu0  ;;  %v17478_v14 = vld [vmem:[#allocation11 + $0x184] ss:$16 sps:$4 sm:$0xff]  }
 0x3b4   :  { %v19335_v28 = vadd.f32 %v5847_v21, %v19323_v35  ;;  %7232 = vmatpush1.bf16.msra.mxu0 %v17433_v7  ;;  %v17450_v35 = vld [vmem:[#allocation11 + $0x84] ss:$16 sps:$4 sm:$0xff]   ;;  %v17417_v7 = vld [vmem:[#allocation8 + $0x470] ss:$20 sps:$4 sm:$0xff]  }
 0x3b5   :  { %v5849_v32 = vpop.f32.mrf.mxu0  ;;  %7233 = vmatprep.subr.bf16.mxu0 %v17440_v18  ;;  %v17418_v18 = vld [vmem:[#allocation8 + $0x330] ss:$20 sps:$4 sm:$0xff]  }
 0x3b6   :  { %6035 = vmatpush2.bf16.msra.mxu1 %v17387_v15  ;;  %v19338_v27 = vadd.f32 %v5849_v32, %v19325_v47  ;;  %v17401_v47 = vld [vmem:[#allocation8 + $0x944] ss:$20 sps:$4 sm:$0xff]  }
 0x3b7   :  { %6036 = vmatprep.subr.bf16.mxu1 %v17392_v20  ;;  %v5851_v34 = vpop.f32.mrf.mxu0  ;;  %v17476_v15 = vld [vmem:[#allocation11 + $0x180] ss:$16 sps:$4 sm:$0xff]   ;;  %v17481_v20 = vld [vmem:[#allocation11 + $0x164] ss:$16 sps:$4 sm:$0xff]  }
 0x3b8   :  { %7234 = vmatpush1.bf16.msra.mxu0 %v17438_v22  ;;  %v17479_v21 = vld [vmem:[#allocation11 + $0x160] ss:$16 sps:$4 sm:$0xff]   ;;  %v17484_v32 = vld [vmem:[#allocation11 + $0x144] ss:$16 sps:$4 sm:$0xff]  }
 0x3b9   :  { %v5852_v40 = vpop.f32.mrf.mxu0  ;;  %7235 = vmatprep.subr.bf16.mxu0 %v17445_v24  ;;  %v17420_v22 = vld [vmem:[#allocation8 + $0x308] ss:$20 sps:$4 sm:$0xff]  }
 0x3ba   :  { %6037 = vmatpush2.bf16.msra.mxu1 %v17390_v23  ;;  %v17421_v23 = vld [vmem:[#allocation8 + $0x420] ss:$20 sps:$4 sm:$0xff]   ;;  %v17487_v34 = vld [vmem:[#allocation11 + $0x124] ss:$16 sps:$4 sm:$0xff]  }
 0x3bb   :  { %6038 = vmatprep.subr.bf16.mxu1 %v17395_v41  ;;  %v17482_v24 = vld [vmem:[#allocation11 + $0x140] ss:$16 sps:$4 sm:$0xff]  }
 0x3bc   :  { %7236 = vmatpush1.bf16.msra.mxu0 %v17443_v44  ;;  %v17422_v41 = vld [vmem:[#allocation8 + $0x2e0] ss:$20 sps:$4 sm:$0xff]   ;;  %v17423_v44 = vld [vmem:[#allocation8 + $0x3f8] ss:$20 sps:$4 sm:$0xff]  }
 0x3bd   :  { %7237 = vmatprep.subr.bf16.mxu0 %v17450_v35  ;;  %v17485_v40 = vld [vmem:[#allocation11 + $0x120] ss:$16 sps:$4 sm:$0xff]   ;;  %v17490_v35 = vld [vmem:[#allocation11 + $0x104] ss:$16 sps:$4 sm:$0xff]  }
 0x3be   :  { %6039 = vmatpush2.bf16.msra.mxu1 %v17393_v17  ;;  %v17424_v17 = vld [vmem:[#allocation8 + $0x2b8] ss:$20 sps:$4 sm:$0xff]  }
 0x3bf   :  { %6040 = vmatprep.subr.bf16.mxu1 %v17398_v56  ;;  %v17425_v56 = vld [vmem:[#allocation8 + $0x3d0] ss:$20 sps:$4 sm:$0xff]  }
 0x3c0   :  { %7238 = vmatpush1.bf16.msra.mxu0 %v17448_v26  ;;  %v17488_v26 = vld [vmem:[#allocation11 + $0x100] ss:$16 sps:$4 sm:$0xff]  }
 0x3c1   :  { %7239 = vmatprep.subr.bf16.mxu0 %v17455_v37  ;;  %v17427_v37 = vld [vmem:[#allocation8 + $0x9e8] ss:$20 sps:$4 sm:$0xff]  }
 0x3c2   :  { %6041 = vmatpush2.bf16.msra.mxu1 %v17396_v19  ;;  %v17426_v19 = vld [vmem:[#allocation8 + $0x290] ss:$20 sps:$4 sm:$0xff]  }
 0x3c3   :  { %6042 = vmatprep.subr.bf16.mxu1 %v17401_v47  ;;  %v17428_v47 = vld [vmem:[#allocation8 + $0x8a8] ss:$20 sps:$4 sm:$0xff]  }
 0x3c4   :  { %7240 = vmatpush1.bf16.msra.mxu0 %v17453_v42  ;;  %v17429_v42 = vld [vmem:[#allocation8 + $0x9c0] ss:$20 sps:$4 sm:$0xff]  }
 0x3c5   :  { %7241 = vmatprep.subr.bf16.mxu0 %v17460_v45 }
 0x3c6   :  { %6043 = vmatpush2.bf16.msra.mxu1 %v17399_v58 }
 0x3c7   :  { %6044 = vmatprep.subr.bf16.mxu1 %v17404_v49  ;;  %v17430_v49 = vld [vmem:[#allocation8 + $0x880] ss:$20 sps:$4 sm:$0xff]  }
 0x3c8   :  { %7242 = vmatpush1.bf16.msra.mxu0 %v17458_v50  ;;  %v17431_v50 = vld [vmem:[#allocation8 + $0x998] ss:$20 sps:$4 sm:$0xff]  }
 0x3c9   :  { %7243 = vmatprep.subr.bf16.mxu0 %v17463_v52 }
 0x3ca   :  { %6045 = vmatpush2.bf16.msra.mxu1 %v17402_v16 }
 0x3cb   :  { %6046 = vmatprep.subr.bf16.mxu1 %v17407_v30  ;;  %v17432_v30 = vld [vmem:[#allocation8 + $0x858] ss:$20 sps:$4 sm:$0xff]  }
 0x3cc   :  { %7244 = vmatpush1.bf16.msra.mxu0 %v17461_v54  ;;  %v17436_v54 = vld [vmem:[#allocation8 + $0x970] ss:$20 sps:$4 sm:$0xff]  }
 0x3cd   :  { %7245 = vmatprep.subr.bf16.mxu0 %v17466_v61  ;;  %v17441_v61 = vld [vmem:[#allocation8 + $0x948] ss:$20 sps:$4 sm:$0xff]  }
 0x3ce   :  { %6047 = vmatpush2.bf16.msra.mxu1 %v17405_v60  ;;  %v17437_v60 = vld [vmem:[#allocation8 + $0x830] ss:$20 sps:$4 sm:$0xff]  }
 0x3cf   :  { %6048 = vmatprep.subr.bf16.mxu1 %v17410_v29  ;;  %v17446_v29 = vld [vmem:[#allocation8 + $0x920] ss:$20 sps:$4 sm:$0xff]  }
 0x3d0   :  { %7246 = vmatpush1.bf16.msra.mxu0 %v17464_v62  ;;  %v17451_v62 = vld [vmem:[#allocation8 + $0x8f8] ss:$20 sps:$4 sm:$0xff]  }
 0x3d1   :  { %7247 = vmatprep.subr.bf16.mxu0 %v17469_v1  ;;  %v17456_v1 = vld [vmem:[#allocation8 + $0x8d0] ss:$20 sps:$4 sm:$0xff]  }
 0x3d2   :  { %6049 = vmatpush2.bf16.msra.mxu1 %v17408_v63  ;;  %v17452_v63 = vld [vmem:[#allocation8 + $0x7b8] ss:$20 sps:$4 sm:$0xff]  }
 0x3d3   :  { %16774 = vmatprep.subr.bf16.mxu1 %v17411_v8  ;;  %v17457_v8 = vld [vmem:[#allocation8 + $0x790] ss:$20 sps:$4 sm:$0xff]  }
 0x3d4   :  { %7248 = vmatpush2.bf16.msra.mxu0 %v17467_v33  ;;  %v17493_v33 = vld [vmem:[#allocation11 + $0x2e4] ss:$16 sps:$4 sm:$0xff]  }
 0x3d5   :  { %6051 = vmatmul.mubr.bf16.vlgmr.msra.gmra.mxu1 %v19312_v55  ;;  %7249 = vmatprep.subr.bf16.mxu0 %v17472_v59 }
 0x3d6   :  { %16775 = vmatpush3.bf16.msra.mxu1 %v17412_v9  ;;  %6131 = vmatprep.mubr.bf16.mxu1 %v19243_v39  ;;  %v17419_v39 = vld [vmem:[#allocation8 + $0x448] ss:$20 sps:$4 sm:$0xff]  }
 0x3d7   :  { %16776 = vmatprep.subr.bf16.mxu1 %v17413_v10  ;;  %v17491_v9 = vld [vmem:[#allocation11 + $0x2e0] ss:$16 sps:$4 sm:$0xff]   ;;  %v17496_v10 = vld [vmem:[#allocation11 + $0x2c4] ss:$16 sps:$4 sm:$0xff]  }
 0x3d8   :  { %7250 = vmatpush2.bf16.msra.mxu0 %v17470_v0 }
 0x3d9   :  { %7251 = vmatprep.subr.bf16.mxu0 %v17475_v11 }
 0x3da   :  { %16777 = vmatpush3.bf16.msra.mxu1 %v17414_v46  ;;  %v17494_v46 = vld [vmem:[#allocation11 + $0x2c0] ss:$16 sps:$4 sm:$0xff]  }
 0x3db   :  { %16778 = vmatprep.subr.bf16.mxu1 %v17415_v2  ;;  %v17499_v2 = vld [vmem:[#allocation11 + $0x2a4] ss:$16 sps:$4 sm:$0xff]  }
 0x3dc   :  { %7252 = vmatpush2.bf16.msra.mxu0 %v17473_v3 }
 0x3dd   :  { %7253 = vmatprep.subr.bf16.mxu0 %v17478_v14 }
 0x3de   :  { %16779 = vmatpush3.bf16.msra.mxu1 %v17416_v12 }
 0x3df   :  { %16780 = vmatprep.subr.bf16.mxu1 %v17417_v7 }
 0x3e0   :  { %7254 = vmatpush2.bf16.msra.mxu0 %v17476_v15 }
 0x3e1   :  { %7255 = vmatprep.subr.bf16.mxu0 %v17481_v20 }
 0x3e2   :  { %16781 = vmatpush3.bf16.msra.mxu1 %v17418_v18  ;;  %v17497_v18 = vld [vmem:[#allocation11 + $0x2a0] ss:$16 sps:$4 sm:$0xff]  }
 0x3e3   :  { %16782 = vmatprep.subr.bf16.mxu1 %v17419_v39  ;;  %v17502_v39 = vld [vmem:[#allocation11 + $0x284] ss:$16 sps:$4 sm:$0xff]  }
 0x3e4   :  { %7256 = vmatpush2.bf16.msra.mxu0 %v17479_v21  ;;  %v17505_v21 = vld [vmem:[#allocation11 + $0x264] ss:$16 sps:$4 sm:$0xff]  }
 0x3e5   :  { %7257 = vmatprep.subr.bf16.mxu0 %v17484_v32  ;;  %v17508_v32 = vld [vmem:[#allocation11 + $0x244] ss:$16 sps:$4 sm:$0xff]  }
 0x3e6   :  { %16783 = vmatpush3.bf16.msra.mxu1 %v17420_v22  ;;  %v17503_v22 = vld [vmem:[#allocation11 + $0x260] ss:$16 sps:$4 sm:$0xff]  }
 0x3e7   :  { %16784 = vmatprep.subr.bf16.mxu1 %v17421_v23  ;;  %v17511_v23 = vld [vmem:[#allocation11 + $0x224] ss:$16 sps:$4 sm:$0xff]  }
 0x3e8   :  { %7258 = vmatpush2.bf16.msra.mxu0 %v17482_v24 }
 0x3e9   :  { %7259 = vmatprep.subr.bf16.mxu0 %v17487_v34  ;;  %v17509_v34 = vld [vmem:[#allocation11 + $0x220] ss:$16 sps:$4 sm:$0xff]  }
 0x3ea   :  { %16785 = vmatpush3.bf16.msra.mxu1 %v17422_v41 }
 0x3eb   :  { %16786 = vmatprep.subr.bf16.mxu1 %v17423_v44 }
 0x3ec   :  { %7260 = vmatpush2.bf16.msra.mxu0 %v17485_v40  ;;  %v17514_v40 = vld [vmem:[#allocation11 + $0x204] ss:$16 sps:$4 sm:$0xff]  }
 0x3ed   :  { %7261 = vmatprep.subr.bf16.mxu0 %v17490_v35  ;;  %v17512_v35 = vld [vmem:[#allocation11 + $0x200] ss:$16 sps:$4 sm:$0xff]  }
 0x3ee   :  { %16787 = vmatpush3.bf16.msra.mxu1 %v17424_v17 }
 0x3ef   :  { %16788 = vmatprep.subr.bf16.mxu1 %v17425_v56  ;;  %v17517_v56 = vld [vmem:[#allocation11 + $0x3e4] ss:$16 sps:$4 sm:$0xff]  }
 0x3f0   :  { %7262 = vmatpush2.bf16.msra.mxu0 %v17488_v26  ;;  %v17515_v26 = vld [vmem:[#allocation11 + $0x3e0] ss:$16 sps:$4 sm:$0xff]  }
 0x3f2   :  { %16789 = vmatpush3.bf16.msra.mxu1 %v17426_v19  ;;  %v17520_v19 = vld [vmem:[#allocation11 + $0x3c4] ss:$16 sps:$4 sm:$0xff]  }
 0x3f3   :  { %16818 = vmatprep.subr.bf16.mxu1 %v17427_v37  ;;  %v19342_v58 = vpop.f32.mrf.mxu0 }
 0x3f5   :  { %6132 = vmatmul.mubr.bf16.vlgmr.msra.gmra.mxu1 %v19260_v25  ;;  %v19346_v45 = vpop.f32.mrf.mxu0  ;;  %v17442_v25 = vld [vmem:[#allocation8 + $0x808] ss:$20 sps:$4 sm:$0xff]  }
 0x3f6   :  { %16819 = vmatpush3.bf16.msra.mxu1 %v17428_v47  ;;  %6211 = vmatprep.mubr.bf16.mxu1 %v19310_v53  ;;  %v17447_v53 = vld [vmem:[#allocation8 + $0x7e0] ss:$20 sps:$4 sm:$0xff]  }
 0x3f7   :  { %16820 = vmatprep.subr.bf16.mxu1 %v17429_v42  ;;  %v5933_v16 = vpop.f32.mrf.mxu0  ;;  %v17518_v42 = vld [vmem:[#allocation11 + $0x3c0] ss:$16 sps:$4 sm:$0xff]  }
 0x3f9   :  { %v5934_v52 = vpop.f32.mrf.mxu0 }
 0x3fa   :  { %16821 = vmatpush3.bf16.msra.mxu1 %v17430_v49  ;;  %v17523_v49 = vld [vmem:[#allocation11 + $0x3a4] ss:$16 sps:$4 sm:$0xff]  }
 0x3fb   :  { %16822 = vmatprep.subr.bf16.mxu1 %v17431_v50 }
 0x3fe   :  { %16823 = vmatpush3.bf16.msra.mxu1 %v17432_v30  ;;  %v17521_v30 = vld [vmem:[#allocation11 + $0x3a0] ss:$16 sps:$4 sm:$0xff]  }
 0x3ff   :  { %16824 = vmatprep.subr.bf16.mxu1 %v17436_v54 }
 0x402   :  { %16825 = vmatpush3.bf16.msra.mxu1 %v17437_v60  ;;  %v17526_v60 = vld [vmem:[#allocation11 + $0x384] ss:$16 sps:$4 sm:$0xff]  }
 0x403   :  { %16826 = vmatprep.subr.bf16.mxu1 %v17441_v61 }
 0x406   :  { %16827 = vmatpush3.bf16.msra.mxu1 %v17442_v25 }
 0x407   :  { %16828 = vmatprep.subr.bf16.mxu1 %v17446_v29  ;;  %v17524_v29 = vld [vmem:[#allocation11 + $0x380] ss:$16 sps:$4 sm:$0xff]  }
 0x40a   :  { %16829 = vmatpush3.bf16.msra.mxu1 %v17447_v53  ;;  %v17529_v53 = vld [vmem:[#allocation11 + $0x364] ss:$16 sps:$4 sm:$0xff]  }
 0x40b   :  { %16830 = vmatprep.subr.bf16.mxu1 %v17451_v62  ;;  %v17527_v62 = vld [vmem:[#allocation11 + $0x360] ss:$16 sps:$4 sm:$0xff]  }
 0x40e   :  { %16831 = vmatpush3.bf16.msra.mxu1 %v17452_v63  ;;  %v17532_v63 = vld [vmem:[#allocation11 + $0x344] ss:$16 sps:$4 sm:$0xff]  }
 0x40f   :  { %16832 = vmatprep.subr.bf16.mxu1 %v17456_v1  ;;  %v17530_v1 = vld [vmem:[#allocation11 + $0x340] ss:$16 sps:$4 sm:$0xff]  }
 0x412   :  { %16833 = vmatpush3.bf16.msra.mxu1 %v17457_v8  ;;  %v17535_v8 = vld [vmem:[#allocation11 + $0x324] ss:$16 sps:$4 sm:$0xff]  }
 0x413   :  { %7272 = vmatprep.subr.bf16.mxu1 %v17493_v33  ;;  %v17533_v33 = vld [vmem:[#allocation11 + $0x320] ss:$16 sps:$4 sm:$0xff]  }
 0x415   :  { %6212 = vmatmul.mubr.bf16.vlgmr.msra.gmra.mxu1 %v19312_v55  ;;  %v5888_v59 = vpop.f32.mrf.mxu1 }
 0x416   :  { %v5889_v0 = vadd.f32 %v5888_v59, %v19335_v28  ;;  %7273 = vmatpush1.bf16.msra.mxu1 %v17491_v9  ;;  %v17500_v28 = vld [vmem:[#allocation11 + $0x280] ss:$16 sps:$4 sm:$0xff]   ;;  %v17538_v9 = vld [vmem:[#allocation11 + $0x304] ss:$16 sps:$4 sm:$0xff]   ;;  %v17541_v59 = vld [vmem:[#allocation11 + $0xec] ss:$16 sps:$4 sm:$0xff]  }
 0x417   :  { %v5890_v11 = vpop.f32.mrf.mxu1  ;;  %7274 = vmatprep.subr.bf16.mxu1 %v17496_v10  ;;  %v17536_v10 = vld [vmem:[#allocation11 + $0x300] ss:$16 sps:$4 sm:$0xff]  }
 0x418   :  { %v6219_v3 = vsub.f32 0.0, %v5889_v0  ;;  %v5891_v12 = vadd.f32 %v5890_v11, %v19338_v27  ;;  %v17506_v27 = vld [vmem:[#allocation11 + $0x240] ss:$16 sps:$4 sm:$0xff]   ;;  %v4053_v0 = vrot.slane %v19317_v31, %v19211_v36 }
 0x419   :  { %v5892_v14 = vpop.f32.mrf.mxu1 }
 0x41a   :  { %v6224_v7 = vmul.f32 1.442695, %v6219_v3  ;;  %v6220_v15 = vsub.f32 0.0, %v5891_v12  ;;  %7275 = vmatpush1.bf16.msra.mxu1 %v17494_v46  ;;  %v4057_v46 = vrot.slane %v19317_v31, %v19226_v4  ;;  %v5930_v11 = vadd.f32 %v19342_v58, %v4053_v0  ;;  %v17574_v58 = vld [vmem:[#allocation11 + $0x4c4] ss:$16 sps:$4 sm:$0xff]  }
 0x41b   :  { %v5893_v20 = vpop.f32.mrf.mxu1  ;;  %7276 = vmatprep.subr.bf16.mxu1 %v17499_v2 }
 0x41c   :  { %18579 = vpow2.f32 %v6224_v7  ;;  %v6226_v55 = vmul.f32 1.442695, %v6220_v15  ;;  %v5932_v12 = vadd.f32 %v19346_v45, %v4057_v46  ;;  %v17580_v45 = vld [vmem:[#allocation11 + $0x4a4] ss:$16 sps:$4 sm:$0xff]   ;;  %v18697_v46 = vld [vmem:[#allocation10] sm:$0x1f] }
 0x41e   :  { %18581 = vpow2.f32 %v6226_v55  ;;  %7277 = vmatpush1.bf16.msra.mxu1 %v17497_v18 }
 0x41f   :  { %7278 = vmatprep.subr.bf16.mxu1 %v17502_v39 }
 0x422   :  { %7279 = vmatpush1.bf16.msra.mxu1 %v17500_v28 }
 0x423   :  { %7280 = vmatprep.subr.bf16.mxu1 %v17505_v21 }
 0x426   :  { %7281 = vmatpush1.bf16.msra.mxu1 %v17503_v22 }
 0x427   :  { %7282 = vmatprep.subr.bf16.mxu1 %v17508_v32  ;;  %v17568_v32 = vld [vmem:[#allocation11 + $0x4e4] ss:$16 sps:$4 sm:$0xff]  }
 0x428   :  { %7313 = vmatprep.subr.bf16.mxu0 %v17568_v32  ;;  %v17544_v32 = vld [vmem:[#allocation11 + $0xcc] ss:$16 sps:$4 sm:$0xff]  }
 0x429   :  { %v18580_v24 = vpop.eup %18579 }
 0x42a   :  { %v6234_v41 = vadd.f32 1.0, %v18580_v24  ;;  %7283 = vmatpush1.bf16.msra.mxu1 %v17506_v27  ;;  %v17566_v27 = vld [vmem:[#allocation11 + $0x4e0] ss:$16 sps:$4 sm:$0xff]  }
 0x42b   :  { %v18582_v44 = vpop.eup %18581  ;;  %7284 = vmatprep.subr.bf16.mxu1 %v17511_v23  ;;  %v17572_v23 = vld [vmem:[#allocation11 + $0x4c0] ss:$16 sps:$4 sm:$0xff]  }
 0x42c   :  { %v6235_v17 = vadd.f32 1.0, %v18582_v44  ;;  %18583 = vrcp.f32 %v6234_v41  ;;  %v17578_v24 = vld [vmem:[#allocation11 + $0x4a0] ss:$16 sps:$4 sm:$0xff]   ;;  %v17586_v41 = vld [vmem:[#allocation11 + $0x484] ss:$16 sps:$4 sm:$0xff]  }
 0x42d   :  { %v17592_v44 = vld [vmem:[#allocation11 + $0x464] ss:$16 sps:$4 sm:$0xff]  }
 0x42e   :  { %18585 = vrcp.f32 %v6235_v17  ;;  %7285 = vmatpush1.bf16.msra.mxu1 %v17509_v34  ;;  %v17584_v34 = vld [vmem:[#allocation11 + $0x480] ss:$16 sps:$4 sm:$0xff]  }
 0x42f   :  { %7286 = vmatprep.subr.bf16.mxu1 %v17514_v40  ;;  %v17590_v40 = vld [vmem:[#allocation11 + $0x460] ss:$16 sps:$4 sm:$0xff]  }
 0x430   :  { %v17596_v17 = vld [vmem:[#allocation11 + $0x440] ss:$16 sps:$4 sm:$0xff]  }
 0x432   :  { %7287 = vmatpush1.bf16.msra.mxu1 %v17512_v35  ;;  %v17598_v35 = vld [vmem:[#allocation11 + $0x444] ss:$16 sps:$4 sm:$0xff]  }
 0x433   :  { %7288 = vmatprep.subr.bf16.mxu1 %v17517_v56  ;;  %v6011_v37 = vpop.f32.mrf.mxu0 }
 0x435   :  { %v6013_v47 = vpop.f32.mrf.mxu0 }
 0x436   :  { %7289 = vmatpush2.bf16.msra.mxu1 %v17515_v26  ;;  %v17602_v26 = vld [vmem:[#allocation11 + $0x420] ss:$16 sps:$4 sm:$0xff]  }
 0x437   :  { %7290 = vmatprep.subr.bf16.mxu1 %v17520_v19  ;;  %v6015_v50 = vpop.f32.mrf.mxu0  ;;  %v17604_v19 = vld [vmem:[#allocation11 + $0x424] ss:$16 sps:$4 sm:$0xff]  }
 0x438   :  { %v17610_v50 = vld [vmem:[#allocation11 + $0x404] ss:$16 sps:$4 sm:$0xff]  }
 0x439   :  { %v18584_v16 = vpop.eup %18583  ;;  %v6016_v52 = vpop.f32.mrf.mxu0 }
 0x43a   :  { %7291 = vmatpush2.bf16.msra.mxu1 %v17518_v42  ;;  %v19353_v25 = vpack.c.bf16 %v18584_v16, %v18584_v16  ;;  %v17616_v52 = vld [vmem:[#allocation11 + $0x2ec] ss:$16 sps:$4 sm:$0xff]  }
 0x43b   :  { %v18586_v54 = vpop.eup %18585  ;;  %7292 = vmatprep.subr.bf16.mxu1 %v17523_v49  ;;  %v17608_v49 = vld [vmem:[#allocation11 + $0x400] ss:$16 sps:$4 sm:$0xff]  }
 0x43c   :  { %v19351_v61 = vpack.c.bf16 %v18586_v54, %v18586_v54 }
 0x43e   :  { %7263 = vmatprep.mubr.bf16.mxu0 %v19351_v61  ;;  %7293 = vmatpush2.bf16.msra.mxu1 %v17521_v30 }
 0x43f   :  { %7264 = vmatmul.mubr.bf16.vlgmr.msra.gmra.mxu0 %v19353_v25  ;;  %7294 = vmatprep.subr.bf16.mxu1 %v17526_v60 }
 0x440   :  { %7345 = vmatprep.mubr.bf16.mxu0 %v19017_v38  ;;  %7314 = vmatpush1.bf16.msra.mxu0 %v17566_v27  ;;  %v17547_v27 = vld [vmem:[#allocation11 + $0xac] ss:$16 sps:$4 sm:$0xff]  }
 0x441   :  { %7315 = vmatprep.subr.bf16.mxu0 %v17574_v58  ;;  %v17545_v58 = vld [vmem:[#allocation11 + $0xa8] ss:$16 sps:$4 sm:$0xff]  }
 0x442   :  { %7295 = vmatpush2.bf16.msra.mxu1 %v17524_v29 }
 0x443   :  { %7296 = vmatprep.subr.bf16.mxu1 %v17529_v53 }
 0x444   :  { %7316 = vmatpush1.bf16.msra.mxu0 %v17572_v23  ;;  %v17550_v23 = vld [vmem:[#allocation11 + $0x8c] ss:$16 sps:$4 sm:$0xff]  }
 0x445   :  { %7317 = vmatprep.subr.bf16.mxu0 %v17580_v45  ;;  %v17548_v45 = vld [vmem:[#allocation11 + $0x88] ss:$16 sps:$4 sm:$0xff]  }
 0x446   :  { %7297 = vmatpush2.bf16.msra.mxu1 %v17527_v62 }
 0x447   :  { %7298 = vmatprep.subr.bf16.mxu1 %v17532_v63 }
 0x448   :  { %7318 = vmatpush1.bf16.msra.mxu0 %v17578_v24  ;;  %v17553_v24 = vld [vmem:[#allocation11 + $0x6c] ss:$16 sps:$4 sm:$0xff]  }
 0x449   :  { %7319 = vmatprep.subr.bf16.mxu0 %v17586_v41  ;;  %v17551_v41 = vld [vmem:[#allocation11 + $0x68] ss:$16 sps:$4 sm:$0xff]  }
 0x44a   :  { %7299 = vmatpush2.bf16.msra.mxu1 %v17530_v1 }
 0x44b   :  { %7300 = vmatprep.subr.bf16.mxu1 %v17535_v8 }
 0x44c   :  { %7320 = vmatpush1.bf16.msra.mxu0 %v17584_v34  ;;  %v17556_v34 = vld [vmem:[#allocation11 + $0x4c] ss:$16 sps:$4 sm:$0xff]  }
 0x44d   :  { %7321 = vmatprep.subr.bf16.mxu0 %v17592_v44  ;;  %v17554_v44 = vld [vmem:[#allocation11 + $0x48] ss:$16 sps:$4 sm:$0xff]  }
 0x44e   :  { %7301 = vmatpush2.bf16.msra.mxu1 %v17533_v33 }
 0x44f   :  { %7302 = vmatprep.subr.bf16.mxu1 %v17538_v9 }
 0x450   :  { %7322 = vmatpush1.bf16.msra.mxu0 %v17590_v40  ;;  %v17559_v40 = vld [vmem:[#allocation11 + $0x2c] ss:$16 sps:$4 sm:$0xff]  }
 0x451   :  { %7323 = vmatprep.subr.bf16.mxu0 %v17598_v35  ;;  %v17562_v35 = vld [vmem:[#allocation11 + $0xc] ss:$16 sps:$4 sm:$0xff]  }
 0x452   :  { %7303 = vmatpush2.bf16.msra.mxu1 %v17536_v10 }
 0x453   :  { %7354 = vmatprep.subr.bf16.mxu1 %v17541_v59  ;;  %v16768_v2 = vpop.f32.mrf.mxu0 }
 0x454   :  { %7324 = vmatpush1.bf16.msra.mxu0 %v17596_v17 }
 0x455   :  { %v5970_v3 = vpop.f32.mrf.mxu1  ;;  %v16769_v7 = vpop.f32.mrf.mxu0  ;;  %7325 = vmatprep.subr.bf16.mxu0 %v17604_v19  ;;  %v17560_v19 = vld [vmem:[#allocation11 + $0x8] ss:$16 sps:$4 sm:$0xff]  }
 0x456   :  { %v5971_v14 = vadd.f32 %v5970_v3, %v5930_v11  ;;  %v19364_v18 = vadd.f32 %v16769_v7, %v16768_v2  ;;  %v4061_v11 = vrot.slane %v18697_v46, %v19269_v48  ;;  %v17607_v46 = vld [vmem:[#allocation11 + $0x10c] ss:$16 sps:$4 sm:$0xff]  }
 0x457   :  { %v5972_v15 = vpop.f32.mrf.mxu1  ;;  %v16771_v39 = vpop.f32.mrf.mxu0 }
 0x458   :  { %v5973_v20 = vadd.f32 %v5972_v15, %v5932_v12  ;;  %v6012_v55 = vadd.f32 %v6011_v37, %v5971_v14  ;;  %7326 = vmatpush1.bf16.msra.mxu0 %v17602_v26  ;;  %v6094_v12 = vadd.f32 %v19364_v18, %v4061_v11  ;;  %v17542_v18 = vld [vmem:[#allocation11 + $0xc8] ss:$16 sps:$4 sm:$0xff]  }
 0x459   :  { %v5974_v28 = vpop.f32.mrf.mxu1  ;;  %v16772_v21 = vpop.f32.mrf.mxu0  ;;  %7327 = vmatprep.subr.bf16.mxu0 %v17610_v50  ;;  %v17605_v11 = vld [vmem:[#allocation11 + $0x108] ss:$16 sps:$4 sm:$0xff]  }
 0x45a   :  { %v6014_v22 = vadd.f32 %v6013_v47, %v5973_v20  ;;  %v17539_v21 = vld [vmem:[#allocation11 + $0xe8] ss:$16 sps:$4 sm:$0xff]  }
 0x45b   :  { %v5975_v31 = vpop.f32.mrf.mxu1 }
 0x45c   :  { %7328 = vmatpush1.bf16.msra.mxu0 %v17608_v49 }
 0x45d   :  { %7395 = vmatprep.subr.bf16.mxu0 %v17616_v52  ;;  %v17571_v52 = vld [vmem:[#allocation11 + $0x1cc] ss:$16 sps:$4 sm:$0xff]  }
 0x473   :  { %v16812_v56 = vpop.f32.mrf.mxu0 }
 0x475   :  { %v16813_v37 = vpop.f32.mrf.mxu0 }
 0x476   :  { %v16814_v47 = vadd.f32 %v16813_v37, %v16812_v56 }
 0x477   :  { %v16815_v42 = vpop.f32.mrf.mxu0 }
 0x479   :  { %v16816_v16 = vpop.f32.mrf.mxu0 }
 0x47a   :  { %v17563_v16 = vld [vmem:[#allocation11 + $0x1e8] ss:$16 sps:$4 sm:$0xff]  }
 0x495   :  { %v6052_v30 = vpop.f32.mrf.mxu1 }
 0x496   :  { %v6053_v54 = vadd.f32 %v6052_v30, %v6012_v55 }
 0x497   :  { %v6054_v60 = vpop.f32.mrf.mxu1 }
 0x498   :  { %v6221_v29 = vsub.f32 0.0, %v6053_v54  ;;  %v6055_v53 = vadd.f32 %v6054_v60, %v6014_v22  ;;  %v17569_v54 = vld [vmem:[#allocation11 + $0x1c8] ss:$16 sps:$4 sm:$0xff]   ;;  %v17577_v60 = vld [vmem:[#allocation11 + $0x1ac] ss:$16 sps:$4 sm:$0xff]  }
 0x499   :  { %v6056_v62 = vpop.f32.mrf.mxu1 }
 0x49a   :  { %v6228_v63 = vmul.f32 1.442695, %v6221_v29  ;;  %v6222_v1 = vsub.f32 0.0, %v6055_v53  ;;  %v17575_v29 = vld [vmem:[#allocation11 + $0x1a8] ss:$16 sps:$4 sm:$0xff]  }
 0x49b   :  { %v6057_v8 = vpop.f32.mrf.mxu1  ;;  %v17583_v53 = vld [vmem:[#allocation11 + $0x18c] ss:$16 sps:$4 sm:$0xff]   ;;  %v17581_v62 = vld [vmem:[#allocation11 + $0x188] ss:$16 sps:$4 sm:$0xff]  }
 0x49c   :  { %18587 = vpow2.f32 %v6228_v63  ;;  %v6230_v33 = vmul.f32 1.442695, %v6222_v1  ;;  %v17589_v63 = vld [vmem:[#allocation11 + $0x16c] ss:$16 sps:$4 sm:$0xff]   ;;  %v17587_v1 = vld [vmem:[#allocation11 + $0x168] ss:$16 sps:$4 sm:$0xff]  }
 0x49e   :  { %18589 = vpow2.f32 %v6230_v33  ;;  %v17595_v33 = vld [vmem:[#allocation11 + $0x14c] ss:$16 sps:$4 sm:$0xff]  }
 0x4a9   :  { %v18588_v9 = vpop.eup %18587 }
 0x4aa   :  { %v6236_v10 = vadd.f32 1.0, %v18588_v9 }
 0x4ab   :  { %v18590_v59 = vpop.eup %18589 }
 0x4ac   :  { %v6237_v0 = vadd.f32 1.0, %v18590_v59  ;;  %18591 = vrcp.f32 %v6236_v10  ;;  %v17593_v10 = vld [vmem:[#allocation11 + $0x148] ss:$16 sps:$4 sm:$0xff]   ;;  %v17601_v59 = vld [vmem:[#allocation11 + $0x12c] ss:$16 sps:$4 sm:$0xff]  }
 0x4ae   :  { %18593 = vrcp.f32 %v6237_v0  ;;  %v17599_v0 = vld [vmem:[#allocation11 + $0x128] ss:$16 sps:$4 sm:$0xff]  }
 0x4b5   :  { %v16790_v2 = vpop.f32.mrf.mxu1 }
 0x4b7   :  { %v16791_v3 = vpop.f32.mrf.mxu1 }
 0x4b8   :  { %v16792_v14 = vadd.f32 %v16791_v3, %v16790_v2  ;;  %v17613_v2 = vld [vmem:[#allocation11 + $0x4ec] ss:$16 sps:$4 sm:$0xff]   ;;  %v17611_v3 = vld [vmem:[#allocation11 + $0x4e8] ss:$16 sps:$4 sm:$0xff]  }
 0x4b9   :  { %v16793_v7 = vpop.f32.mrf.mxu1  ;;  %v18592_v15 = vpop.eup %18591 }
 0x4ba   :  { %v6134_v20 = vadd.f32 %v16792_v14, %v6094_v12  ;;  %v19370_v31 = vpack.c.bf16 %v18592_v15, %v18592_v15  ;;  %v17614_v14 = vld [vmem:[#allocation11 + $0x2e8] ss:$16 sps:$4 sm:$0xff]   ;;  %v17619_v15 = vld [vmem:[#allocation11 + $0x4cc] ss:$16 sps:$4 sm:$0xff]  }
 0x4bb   :  { %v18594_v39 = vpop.eup %18593  ;;  %v16794_v55 = vpop.f32.mrf.mxu1 }
 0x4bc   :  { %v19368_v28 = vpack.c.bf16 %v18594_v39, %v18594_v39  ;;  %v6174_v22 = vadd.f32 %v16814_v47, %v6134_v20  ;;  %v17565_v47 = vld [vmem:[#allocation11 + $0x1ec] ss:$16 sps:$4 sm:$0xff]   ;;  %v17617_v55 = vld [vmem:[#allocation11 + $0x4c8] ss:$16 sps:$4 sm:$0xff]  }
 0x4bd   :  { %v17622_v20 = vld [vmem:[#allocation11 + $0x2cc] ss:$16 sps:$4 sm:$0xff]  }
 0x4be   :  { %7304 = vmatprep.mubr.bf16.mxu1 %v19368_v28 }
 0x4bf   :  { %7305 = vmatmul.mubr.bf16.vlgmr.msra.gmra.mxu1 %v19370_v31 }
 0x4c0   :  { %7355 = vmatpush1.bf16.msra.mxu1 %v17539_v21  ;;  %7386 = vmatprep.mubr.bf16.mxu1 %v19351_v61  ;;  %v17557_v61 = vld [vmem:[#allocation11 + $0x28] ss:$16 sps:$4 sm:$0xff]  }
 0x4c1   :  { %7356 = vmatprep.subr.bf16.mxu1 %v17544_v32  ;;  %v17625_v32 = vld [vmem:[#allocation11 + $0x4ac] ss:$16 sps:$4 sm:$0xff]  }
 0x4c4   :  { %7357 = vmatpush1.bf16.msra.mxu1 %v17542_v18  ;;  %v17628_v18 = vld [vmem:[#allocation11 + $0x2ac] ss:$16 sps:$4 sm:$0xff]  }
 0x4c5   :  { %7358 = vmatprep.subr.bf16.mxu1 %v17547_v27 }
 0x4c8   :  { %7359 = vmatpush1.bf16.msra.mxu1 %v17545_v58 }
 0x4c9   :  { %7360 = vmatprep.subr.bf16.mxu1 %v17550_v23  ;;  %v17626_v23 = vld [vmem:[#allocation11 + $0x2a8] ss:$16 sps:$4 sm:$0xff]  }
 0x4cc   :  { %7361 = vmatpush1.bf16.msra.mxu1 %v17548_v45  ;;  %v17631_v45 = vld [vmem:[#allocation11 + $0x48c] ss:$16 sps:$4 sm:$0xff]  }
 0x4cd   :  { %7362 = vmatprep.subr.bf16.mxu1 %v17553_v24  ;;  %v17634_v24 = vld [vmem:[#allocation11 + $0x28c] ss:$16 sps:$4 sm:$0xff]  }
 0x4d0   :  { %7363 = vmatpush1.bf16.msra.mxu1 %v17551_v41  ;;  %v17632_v41 = vld [vmem:[#allocation11 + $0x288] ss:$16 sps:$4 sm:$0xff]  }
 0x4d1   :  { %7364 = vmatprep.subr.bf16.mxu1 %v17556_v34  ;;  %v17637_v34 = vld [vmem:[#allocation11 + $0x46c] ss:$16 sps:$4 sm:$0xff]  }
 0x4d4   :  { %7365 = vmatpush1.bf16.msra.mxu1 %v17554_v44  ;;  %v17640_v44 = vld [vmem:[#allocation11 + $0x26c] ss:$16 sps:$4 sm:$0xff]  }
 0x4d5   :  { %v16834_v17 = vpop.f32.mrf.mxu1  ;;  %7366 = vmatprep.subr.bf16.mxu1 %v17559_v40  ;;  %v17635_v40 = vld [vmem:[#allocation11 + $0x468] ss:$16 sps:$4 sm:$0xff]  }
 0x4d7   :  { %v16835_v56 = vpop.f32.mrf.mxu1 }
 0x4d8   :  { %v16836_v26 = vadd.f32 %v16835_v56, %v16834_v17  ;;  %7367 = vmatpush1.bf16.msra.mxu1 %v17557_v61  ;;  %v17638_v61 = vld [vmem:[#allocation11 + $0x268] ss:$16 sps:$4 sm:$0xff]   ;;  %v17643_v17 = vld [vmem:[#allocation11 + $0x44c] ss:$16 sps:$4 sm:$0xff]  }
 0x4d9   :  { %v16837_v37 = vpop.f32.mrf.mxu1  ;;  %7368 = vmatprep.subr.bf16.mxu1 %v17562_v35  ;;  %v17646_v35 = vld [vmem:[#allocation11 + $0x24c] ss:$16 sps:$4 sm:$0xff]   ;;  %v17641_v56 = vld [vmem:[#allocation11 + $0x448] ss:$16 sps:$4 sm:$0xff]  }
 0x4da   :  { %v6214_v42 = vadd.f32 %v16836_v26, %v6174_v22  ;;  %v17620_v22 = vld [vmem:[#allocation11 + $0x2c8] ss:$16 sps:$4 sm:$0xff]   ;;  %v17652_v37 = vld [vmem:[#allocation11 + $0x22c] ss:$16 sps:$4 sm:$0xff]  }
 0x4db   :  { %v16838_v49 = vpop.f32.mrf.mxu1  ;;  %v17644_v26 = vld [vmem:[#allocation11 + $0x248] ss:$16 sps:$4 sm:$0xff]  }
 0x4dc   :  { %v6223_v50 = vsub.f32 0.0, %v6214_v42  ;;  %7369 = vmatpush1.bf16.msra.mxu1 %v17560_v19  ;;  %v17649_v19 = vld [vmem:[#allocation11 + $0x42c] ss:$16 sps:$4 sm:$0xff]   ;;  %v17650_v42 = vld [vmem:[#allocation11 + $0x228] ss:$16 sps:$4 sm:$0xff]  }
 0x4dd   :  { %7370 = vmatprep.subr.bf16.mxu1 %v17565_v47  ;;  %v17647_v47 = vld [vmem:[#allocation11 + $0x428] ss:$16 sps:$4 sm:$0xff]   ;;  %v17655_v49 = vld [vmem:[#allocation11 + $0x40c] ss:$16 sps:$4 sm:$0xff]  }
 0x4de   :  { %v6232_v30 = vmul.f32 1.442695, %v6223_v50  ;;  %v17658_v50 = vld [vmem:[#allocation11 + $0x20c] ss:$16 sps:$4 sm:$0xff]  }
 0x4e0   :  { %18595 = vpow2.f32 %v6232_v30  ;;  %7371 = vmatpush2.bf16.msra.mxu1 %v17563_v16  ;;  %v17653_v16 = vld [vmem:[#allocation11 + $0x408] ss:$16 sps:$4 sm:$0xff]   ;;  %v17661_v30 = vld [vmem:[#allocation11 + $0x3ec] ss:$16 sps:$4 sm:$0xff]  }
 0x4e1   :  { %7372 = vmatprep.subr.bf16.mxu1 %v17571_v52  ;;  %v17656_v52 = vld [vmem:[#allocation11 + $0x208] ss:$16 sps:$4 sm:$0xff]  }
 0x4e4   :  { %7373 = vmatpush2.bf16.msra.mxu1 %v17569_v54  ;;  %v17659_v54 = vld [vmem:[#allocation11 + $0x3e8] ss:$16 sps:$4 sm:$0xff]  }
 0x4e5   :  { %7374 = vmatprep.subr.bf16.mxu1 %v17577_v60  ;;  %v17664_v60 = vld [vmem:[#allocation11 + $0x3cc] ss:$16 sps:$4 sm:$0xff]  }
 0x4e8   :  { %7375 = vmatpush2.bf16.msra.mxu1 %v17575_v29  ;;  %v17662_v29 = vld [vmem:[#allocation11 + $0x3c8] ss:$16 sps:$4 sm:$0xff]  }
 0x4e9   :  { %7376 = vmatprep.subr.bf16.mxu1 %v17583_v53  ;;  %v17667_v53 = vld [vmem:[#allocation11 + $0x3ac] ss:$16 sps:$4 sm:$0xff]  }
 0x4ec   :  { %7377 = vmatpush2.bf16.msra.mxu1 %v17581_v62  ;;  %v17665_v62 = vld [vmem:[#allocation11 + $0x3a8] ss:$16 sps:$4 sm:$0xff]  }
 0x4ed   :  { %v18596_v8 = vpop.eup %18595  ;;  %7378 = vmatprep.subr.bf16.mxu1 %v17589_v63  ;;  %v17670_v63 = vld [vmem:[#allocation11 + $0x38c] ss:$16 sps:$4 sm:$0xff]  }
 0x4ee   :  { %v6238_v9 = vadd.f32 1.0, %v18596_v8  ;;  %v17673_v8 = vld [vmem:[#allocation11 + $0x36c] ss:$16 sps:$4 sm:$0xff]  }
 0x4f0   :  { %18597 = vrcp.f32 %v6238_v9  ;;  %7379 = vmatpush2.bf16.msra.mxu1 %v17587_v1  ;;  %v17668_v1 = vld [vmem:[#allocation11 + $0x388] ss:$16 sps:$4 sm:$0xff]   ;;  %v17676_v9 = vld [vmem:[#allocation11 + $0x34c] ss:$16 sps:$4 sm:$0xff]  }
 0x4f1   :  { %7380 = vmatprep.subr.bf16.mxu1 %v17595_v33  ;;  %v17671_v33 = vld [vmem:[#allocation11 + $0x368] ss:$16 sps:$4 sm:$0xff]  }
 0x4f4   :  { %7381 = vmatpush2.bf16.msra.mxu1 %v17593_v10  ;;  %v17674_v10 = vld [vmem:[#allocation11 + $0x348] ss:$16 sps:$4 sm:$0xff]  }
 0x4f5   :  { %7382 = vmatprep.subr.bf16.mxu1 %v17601_v59  ;;  %v17679_v59 = vld [vmem:[#allocation11 + $0x32c] ss:$16 sps:$4 sm:$0xff]  }
 0x4f8   :  { %7383 = vmatpush2.bf16.msra.mxu1 %v17599_v0  ;;  %v17677_v0 = vld [vmem:[#allocation11 + $0x328] ss:$16 sps:$4 sm:$0xff]  }
 0x4f9   :  { %7384 = vmatprep.subr.bf16.mxu1 %v17607_v46  ;;  %v17682_v46 = vld [vmem:[#allocation11 + $0x30c] ss:$16 sps:$4 sm:$0xff]  }
 0x4fc   :  { %7385 = vmatpush2.bf16.msra.mxu1 %v17605_v11  ;;  %v17680_v11 = vld [vmem:[#allocation11 + $0x308] ss:$16 sps:$4 sm:$0xff]  }
 0x4fd   :  { %v18598_v12 = vpop.eup %18597  ;;  %7436 = vmatprep.subr.bf16.mxu1 %v17613_v2  ;;  %v17685_v2 = vld [vmem:[#allocation14 + $0x11c] ss:$20 sps:$4 sm:$0xff]  }
 0x4fe   :  { %v19375_v7 = vpack.c.bf16 %v18598_v12, %v18598_v12  ;;  %v17688_v12 = vld [vmem:[#allocation14 + $0xf4] ss:$20 sps:$4 sm:$0xff]  }
 0x4ff   :  { %7387 = vmatmul.mubr.bf16.vlgmr.msra.gmra.mxu1 %v19353_v25  ;;  %v19378_v39 = vpop.f32.mrf.mxu0  ;;  %v17623_v25 = vld [vmem:[#allocation11 + $0x4a8] ss:$16 sps:$4 sm:$0xff]  }
 0x500   :  { %7437 = vmatpush1.bf16.msra.mxu1 %v17611_v3  ;;  %7346 = vmatmul.mubr.bf16.vlgmr.msra.gmra.mxu0 %v19375_v7  ;;  %v17683_v3 = vld [vmem:[#allocation14 + $0x118] ss:$20 sps:$4 sm:$0xff]  }
 0x501   :  { %7396 = vmatpush1.bf16.msra.mxu0 %v17614_v14  ;;  %7427 = vmatprep.mubr.bf16.mxu0 %v19368_v28  ;;  %v19382_v21 = vpop.f32.mrf.mxu0  ;;  %v17629_v28 = vld [vmem:[#allocation11 + $0x488] ss:$16 sps:$4 sm:$0xff]  }
 0x502   :  { %7438 = vmatprep.subr.bf16.mxu1 %v17619_v15  ;;  %7397 = vmatprep.subr.bf16.mxu0 %v17622_v20  ;;  %v17686_v14 = vld [vmem:[#allocation14 + $0xf0] ss:$20 sps:$4 sm:$0xff]   ;;  %v17689_v15 = vld [vmem:[#allocation14 + $0xc8] ss:$20 sps:$4 sm:$0xff]  }
 0x503   :  { %v7269_v27 = vpop.f32.mrf.mxu0  ;;  %7468 = vmatprep.mubr.bf16.mxu1 %v19017_v38  ;;  %v17694_v20 = vld [vmem:[#allocation14 + $0xa4] ss:$20 sps:$4 sm:$0xff]  }
 0x504   :  { %7439 = vmatpush1.bf16.msra.mxu1 %v17617_v55  ;;  %v17692_v55 = vld [vmem:[#allocation14 + $0xa0] ss:$20 sps:$4 sm:$0xff]   ;;  %v17698_v27 = vld [vmem:[#allocation14 + $0x50] ss:$20 sps:$4 sm:$0xff]  }
 0x505   :  { %7398 = vmatpush1.bf16.msra.mxu0 %v17620_v22  ;;  %v7270_v58 = vpop.f32.mrf.mxu0  ;;  %7440 = vmatprep.subr.bf16.mxu1 %v17625_v32  ;;  %v17697_v22 = vld [vmem:[#allocation14 + $0x7c] ss:$20 sps:$4 sm:$0xff]   ;;  %v17695_v32 = vld [vmem:[#allocation14 + $0x78] ss:$20 sps:$4 sm:$0xff]  }
 0x506   :  { %7399 = vmatprep.subr.bf16.mxu0 %v17628_v18  ;;  %v17700_v18 = vld [vmem:[#allocation14 + $0x54] ss:$20 sps:$4 sm:$0xff]   ;;  %v17706_v58 = vld [vmem:[#allocation14 + $0x4] ss:$20 sps:$4 sm:$0xff]  }
 0x508   :  { %7441 = vmatpush1.bf16.msra.mxu1 %v17623_v25  ;;  %v17701_v25 = vld [vmem:[#allocation14 + $0x28] ss:$20 sps:$4 sm:$0xff]  }
 0x509   :  { %7400 = vmatpush1.bf16.msra.mxu0 %v17626_v23  ;;  %7442 = vmatprep.subr.bf16.mxu1 %v17631_v45  ;;  %v17704_v23 = vld [vmem:[#allocation14] ss:$20 sps:$4 sm:$0xff]   ;;  %v17709_v45 = vld [vmem:[#allocation14 + $0x25c] ss:$20 sps:$4 sm:$0xff]  }
 0x50a   :  { %7401 = vmatprep.subr.bf16.mxu0 %v17634_v24  ;;  %v17707_v24 = vld [vmem:[#allocation14 + $0x258] ss:$20 sps:$4 sm:$0xff]  }
 0x50c   :  { %7443 = vmatpush1.bf16.msra.mxu1 %v17629_v28  ;;  %v17712_v28 = vld [vmem:[#allocation14 + $0x234] ss:$20 sps:$4 sm:$0xff]  }
 0x50d   :  { %7402 = vmatpush1.bf16.msra.mxu0 %v17632_v41  ;;  %7444 = vmatprep.subr.bf16.mxu1 %v17637_v34  ;;  %v17710_v41 = vld [vmem:[#allocation14 + $0x230] ss:$20 sps:$4 sm:$0xff]   ;;  %v17715_v34 = vld [vmem:[#allocation14 + $0x20c] ss:$20 sps:$4 sm:$0xff]  }
 0x50e   :  { %7403 = vmatprep.subr.bf16.mxu0 %v17640_v44  ;;  %v17713_v44 = vld [vmem:[#allocation14 + $0x208] ss:$20 sps:$4 sm:$0xff]  }
 0x510   :  { %7445 = vmatpush1.bf16.msra.mxu1 %v17635_v40  ;;  %v17718_v40 = vld [vmem:[#allocation14 + $0x1e4] ss:$20 sps:$4 sm:$0xff]  }
 0x511   :  { %7404 = vmatpush1.bf16.msra.mxu0 %v17638_v61  ;;  %7446 = vmatprep.subr.bf16.mxu1 %v17643_v17  ;;  %v17716_v61 = vld [vmem:[#allocation14 + $0x1e0] ss:$20 sps:$4 sm:$0xff]   ;;  %v17736_v17 = vld [vmem:[#allocation14 + $0x39c] ss:$20 sps:$4 sm:$0xff]  }
 0x512   :  { %7405 = vmatprep.subr.bf16.mxu0 %v17646_v35  ;;  %v17721_v35 = vld [vmem:[#allocation14 + $0x1bc] ss:$20 sps:$4 sm:$0xff]  }
 0x514   :  { %7447 = vmatpush1.bf16.msra.mxu1 %v17641_v56  ;;  %v17734_v56 = vld [vmem:[#allocation14 + $0x398] ss:$20 sps:$4 sm:$0xff]  }
 0x515   :  { %7406 = vmatpush1.bf16.msra.mxu0 %v17644_v26  ;;  %7448 = vmatprep.subr.bf16.mxu1 %v17649_v19  ;;  %v17740_v26 = vld [vmem:[#allocation14 + $0x370] ss:$20 sps:$4 sm:$0xff]   ;;  %v17742_v19 = vld [vmem:[#allocation14 + $0x374] ss:$20 sps:$4 sm:$0xff]  }
 0x516   :  { %7407 = vmatprep.subr.bf16.mxu0 %v17652_v37  ;;  %v17719_v37 = vld [vmem:[#allocation14 + $0x1b8] ss:$20 sps:$4 sm:$0xff]  }
 0x518   :  { %7449 = vmatpush1.bf16.msra.mxu1 %v17647_v47  ;;  %v17724_v47 = vld [vmem:[#allocation14 + $0x194] ss:$20 sps:$4 sm:$0xff]  }
 0x519   :  { %7408 = vmatpush1.bf16.msra.mxu0 %v17650_v42  ;;  %7450 = vmatprep.subr.bf16.mxu1 %v17655_v49  ;;  %v17746_v42 = vld [vmem:[#allocation14 + $0x348] ss:$20 sps:$4 sm:$0xff]   ;;  %v17748_v49 = vld [vmem:[#allocation14 + $0x34c] ss:$20 sps:$4 sm:$0xff]  }
 0x51a   :  { %7409 = vmatprep.subr.bf16.mxu0 %v17658_v50  ;;  %v17722_v50 = vld [vmem:[#allocation14 + $0x190] ss:$20 sps:$4 sm:$0xff]  }
 0x51c   :  { %7451 = vmatpush1.bf16.msra.mxu1 %v17653_v16  ;;  %v17727_v16 = vld [vmem:[#allocation14 + $0x16c] ss:$20 sps:$4 sm:$0xff]  }
 0x51d   :  { %7410 = vmatpush1.bf16.msra.mxu0 %v17656_v52  ;;  %8593 = vmatprep.subr.bf16.mxu1 %v17736_v17  ;;  %v17752_v52 = vld [vmem:[#allocation14 + $0x320] ss:$20 sps:$4 sm:$0xff]  }
 0x51e   :  { %7411 = vmatprep.subr.bf16.mxu0 %v17661_v30  ;;  %v17754_v30 = vld [vmem:[#allocation14 + $0x324] ss:$20 sps:$4 sm:$0xff]  }
 0x51f   :  { %7469 = vmatmul.mubr.bf16.vlgmr.msra.gmra.mxu1 %v19375_v7  ;;  %v17691_v7 = vld [vmem:[#allocation14 + $0xcc] ss:$20 sps:$4 sm:$0xff]  }
 0x520   :  { %8594 = vmatpush1.bf16.msra.mxu1 %v17734_v56 }
 0x521   :  { %7412 = vmatpush2.bf16.msra.mxu0 %v17659_v54  ;;  %8595 = vmatprep.subr.bf16.mxu1 %v17742_v19  ;;  %v17725_v54 = vld [vmem:[#allocation14 + $0x168] ss:$20 sps:$4 sm:$0xff]  }
 0x522   :  { %7413 = vmatprep.subr.bf16.mxu0 %v17664_v60  ;;  %v17730_v60 = vld [vmem:[#allocation14 + $0x144] ss:$20 sps:$4 sm:$0xff]  }
 0x524   :  { %8596 = vmatpush1.bf16.msra.mxu1 %v17740_v26 }
 0x525   :  { %7414 = vmatpush2.bf16.msra.mxu0 %v17662_v29  ;;  %8597 = vmatprep.subr.bf16.mxu1 %v17748_v49  ;;  %v19387_v29 = vld [vmem:[#allocation13] sm:$0xf] }
 0x526   :  { %7415 = vmatprep.subr.bf16.mxu0 %v17667_v53  ;;  %v17758_v53 = vld [vmem:[#allocation14 + $0x2f8] ss:$20 sps:$4 sm:$0xff]  }
 0x528   :  { %8598 = vmatpush1.bf16.msra.mxu1 %v17746_v42 }
 0x529   :  { %7416 = vmatpush2.bf16.msra.mxu0 %v17665_v62  ;;  %8599 = vmatprep.subr.bf16.mxu1 %v17754_v30  ;;  %v17760_v62 = vld [vmem:[#allocation14 + $0x2fc] ss:$20 sps:$4 sm:$0xff]  }
 0x52a   :  { %7417 = vmatprep.subr.bf16.mxu0 %v17670_v63  ;;  %v17728_v63 = vld [vmem:[#allocation14 + $0x140] ss:$20 sps:$4 sm:$0xff]  }
 0x52c   :  { %8600 = vmatpush1.bf16.msra.mxu1 %v17752_v52 }
 0x52d   :  { %7418 = vmatpush2.bf16.msra.mxu0 %v17668_v1  ;;  %v6414_v1 = vrot.slane %v19387_v29, %v19175_v6  ;;  %8601 = vmatprep.subr.bf16.mxu1 %v17760_v62 }
 0x52e   :  { %7419 = vmatprep.subr.bf16.mxu0 %v17673_v8  ;;  %v17733_v8 = vld [vmem:[#allocation14 + $0x124] ss:$20 sps:$4 sm:$0xff]  }
 0x530   :  { %8602 = vmatpush1.bf16.msra.mxu1 %v17758_v53 }
 0x531   :  { %7420 = vmatpush2.bf16.msra.mxu0 %v17671_v33  ;;  %v17764_v33 = vld [vmem:[#allocation14 + $0x2d0] ss:$20 sps:$4 sm:$0xff]  }
 0x532   :  { %7421 = vmatprep.subr.bf16.mxu0 %v17676_v9  ;;  %v17766_v9 = vld [vmem:[#allocation14 + $0x2d4] ss:$20 sps:$4 sm:$0xff]  }
 0x533   :  { %8603 = vmatprep.subr.bf16.mxu1 %v17766_v9 }
 0x534   :  { %8604 = vmatpush1.bf16.msra.mxu1 %v17764_v33 }
 0x535   :  { %7422 = vmatpush2.bf16.msra.mxu0 %v17674_v10  ;;  %v7266_v10 = vadd.f32 %v19378_v39, %v6414_v1  ;;  %v17790_v39 = vld [vmem:[#allocation14 + $0x4b4] ss:$20 sps:$4 sm:$0xff]  }
 0x536   :  { %7423 = vmatprep.subr.bf16.mxu0 %v17679_v59 }
 0x539   :  { %7424 = vmatpush2.bf16.msra.mxu0 %v17677_v0 }
 0x53a   :  { %7425 = vmatprep.subr.bf16.mxu0 %v17682_v46 }
 0x53d   :  { %7426 = vmatpush2.bf16.msra.mxu0 %v17680_v11  ;;  %v17772_v11 = vld [vmem:[#allocation14 + $0x2ac] ss:$20 sps:$4 sm:$0xff]  }
 0x53e   :  { %8552 = vmatprep.subr.bf16.mxu0 %v17685_v2  ;;  %v17770_v2 = vld [vmem:[#allocation14 + $0x2a8] ss:$20 sps:$4 sm:$0xff]   ;;  %8605 = vmatprep.subr.bf16.mxu1 %v17772_v11 }
 0x53f   :  { %8606 = vmatpush1.bf16.msra.mxu1 %v17770_v2  ;;  %v17739_v11 = vld [vmem:[#allocation14 + $0xfc] ss:$20 sps:$4 sm:$0xff]   ;;  %v17737_v2 = vld [vmem:[#allocation14 + $0xf8] ss:$20 sps:$4 sm:$0xff]  }
 0x540   :  { %7428 = vmatmul.mubr.bf16.vlgmr.msra.gmra.mxu0 %v19370_v31  ;;  %v17703_v31 = vld [vmem:[#allocation14 + $0x2c] ss:$20 sps:$4 sm:$0xff]  }
 0x541   :  { %8553 = vmatpush1.bf16.msra.mxu0 %v17683_v3 }
 0x542   :  { %8554 = vmatprep.subr.bf16.mxu0 %v17688_v12 }
 0x545   :  { %8555 = vmatpush1.bf16.msra.mxu0 %v17686_v14  ;;  %v17778_v14 = vld [vmem:[#allocation14 + $0x284] ss:$20 sps:$4 sm:$0xff]  }
 0x546   :  { %8556 = vmatprep.subr.bf16.mxu0 %v17691_v7  ;;  %v17776_v7 = vld [vmem:[#allocation14 + $0x280] ss:$20 sps:$4 sm:$0xff]   ;;  %8607 = vmatprep.subr.bf16.mxu1 %v17778_v14 }
 0x547   :  { %8608 = vmatpush1.bf16.msra.mxu1 %v17776_v7  ;;  %v17751_v14 = vld [vmem:[#allocation14 + $0xac] ss:$20 sps:$4 sm:$0xff]   ;;  %v17749_v7 = vld [vmem:[#allocation14 + $0xa8] ss:$20 sps:$4 sm:$0xff]  }
 0x549   :  { %8557 = vmatpush1.bf16.msra.mxu0 %v17689_v15  ;;  %v17784_v15 = vld [vmem:[#allocation14 + $0x4dc] ss:$20 sps:$4 sm:$0xff]  }
 0x54a   :  { %8558 = vmatprep.subr.bf16.mxu0 %v17694_v20  ;;  %v17782_v20 = vld [vmem:[#allocation14 + $0x4d8] ss:$20 sps:$4 sm:$0xff]   ;;  %8609 = vmatprep.subr.bf16.mxu1 %v17784_v15 }
 0x54b   :  { %8610 = vmatpush2.bf16.msra.mxu1 %v17782_v20  ;;  %v17757_v15 = vld [vmem:[#allocation14 + $0x84] ss:$20 sps:$4 sm:$0xff]   ;;  %v17755_v20 = vld [vmem:[#allocation14 + $0x80] ss:$20 sps:$4 sm:$0xff]  }
 0x54c   :  { %8611 = vmatprep.subr.bf16.mxu1 %v17790_v39  ;;  %v17763_v39 = vld [vmem:[#allocation14 + $0x5c] ss:$20 sps:$4 sm:$0xff]  }
 0x54d   :  { %8559 = vmatpush1.bf16.msra.mxu0 %v17692_v55  ;;  %v17788_v55 = vld [vmem:[#allocation14 + $0x4b0] ss:$20 sps:$4 sm:$0xff]  }
 0x54e   :  { %8560 = vmatprep.subr.bf16.mxu0 %v17697_v22  ;;  %v17796_v22 = vld [vmem:[#allocation14 + $0x48c] ss:$20 sps:$4 sm:$0xff]  }
 0x54f   :  { %8612 = vmatpush2.bf16.msra.mxu1 %v17788_v55  ;;  %v6422_v55 = vrot.slane %v19387_v29, %v19211_v36 }
 0x550   :  { %8613 = vmatprep.subr.bf16.mxu1 %v17796_v22  ;;  %v17761_v22 = vld [vmem:[#allocation14 + $0x58] ss:$20 sps:$4 sm:$0xff]  }
 0x551   :  { %8561 = vmatpush1.bf16.msra.mxu0 %v17695_v32  ;;  %v17794_v32 = vld [vmem:[#allocation14 + $0x488] ss:$20 sps:$4 sm:$0xff]  }
 0x552   :  { %8562 = vmatprep.subr.bf16.mxu0 %v17700_v18  ;;  %v17802_v18 = vld [vmem:[#allocation14 + $0x464] ss:$20 sps:$4 sm:$0xff]  }
 0x553   :  { %8614 = vmatpush2.bf16.msra.mxu1 %v17794_v32  ;;  %v17769_v32 = vld [vmem:[#allocation14 + $0x34] ss:$20 sps:$4 sm:$0xff]  }
 0x554   :  { %8615 = vmatprep.subr.bf16.mxu1 %v17802_v18  ;;  %v6426_v18 = vrot.slane %v19387_v29, %v19226_v4 }
 0x555   :  { %8563 = vmatpush1.bf16.msra.mxu0 %v17698_v27  ;;  %v17800_v27 = vld [vmem:[#allocation14 + $0x460] ss:$20 sps:$4 sm:$0xff]  }
 0x556   :  { %8564 = vmatprep.subr.bf16.mxu0 %v17703_v31  ;;  %v17806_v31 = vld [vmem:[#allocation14 + $0x438] ss:$20 sps:$4 sm:$0xff]  }
 0x557   :  { %8616 = vmatpush2.bf16.msra.mxu1 %v17800_v27 }
 0x559   :  { %8565 = vmatpush1.bf16.msra.mxu0 %v17701_v25  ;;  %v17808_v25 = vld [vmem:[#allocation14 + $0x43c] ss:$20 sps:$4 sm:$0xff]  }
 0x55a   :  { %8566 = vmatprep.subr.bf16.mxu0 %v17706_v58  ;;  %8617 = vmatprep.subr.bf16.mxu1 %v17808_v25  ;;  %v17812_v58 = vld [vmem:[#allocation14 + $0x410] ss:$20 sps:$4 sm:$0xff]  }
 0x55b   :  { %8618 = vmatpush2.bf16.msra.mxu1 %v17806_v31  ;;  %v17767_v31 = vld [vmem:[#allocation14 + $0x30] ss:$20 sps:$4 sm:$0xff]  }
 0x55d   :  { %8567 = vmatpush1.bf16.msra.mxu0 %v17704_v23  ;;  %v17814_v23 = vld [vmem:[#allocation14 + $0x414] ss:$20 sps:$4 sm:$0xff]  }
 0x55e   :  { %8568 = vmatprep.subr.bf16.mxu0 %v17709_v45  ;;  %8619 = vmatprep.subr.bf16.mxu1 %v17814_v23  ;;  %v17818_v45 = vld [vmem:[#allocation14 + $0x3e8] ss:$20 sps:$4 sm:$0xff]  }
 0x55f   :  { %8620 = vmatpush2.bf16.msra.mxu1 %v17812_v58  ;;  %v17775_v58 = vld [vmem:[#allocation14 + $0xc] ss:$20 sps:$4 sm:$0xff]  }
 0x561   :  { %8569 = vmatpush2.bf16.msra.mxu0 %v17707_v24  ;;  %v17820_v24 = vld [vmem:[#allocation14 + $0x3ec] ss:$20 sps:$4 sm:$0xff]  }
 0x562   :  { %8570 = vmatprep.subr.bf16.mxu0 %v17712_v28  ;;  %8621 = vmatprep.subr.bf16.mxu1 %v17820_v24  ;;  %v17824_v28 = vld [vmem:[#allocation14 + $0x3c0] ss:$20 sps:$4 sm:$0xff]  }
 0x563   :  { %8622 = vmatpush2.bf16.msra.mxu1 %v17818_v45 }
 0x565   :  { %8571 = vmatpush2.bf16.msra.mxu0 %v17710_v41  ;;  %v17826_v41 = vld [vmem:[#allocation14 + $0x3c4] ss:$20 sps:$4 sm:$0xff]  }
 0x566   :  { %8572 = vmatprep.subr.bf16.mxu0 %v17715_v34  ;;  %8623 = vmatprep.subr.bf16.mxu1 %v17826_v41  ;;  %v17830_v34 = vld [vmem:[#allocation14 + $0x3a4] ss:$20 sps:$4 sm:$0xff]  }
 0x567   :  { %8624 = vmatpush2.bf16.msra.mxu1 %v17824_v28 }
 0x568   :  { %8675 = vmatprep.subr.bf16.mxu1 %v17830_v34  ;;  %v17773_v34 = vld [vmem:[#allocation14 + $0x8] ss:$20 sps:$4 sm:$0xff]  }
 0x569   :  { %8573 = vmatpush2.bf16.msra.mxu0 %v17713_v44  ;;  %v6418_v44 = vrot.slane %v19387_v29, %v19178_v13 }
 0x56a   :  { %8574 = vmatprep.subr.bf16.mxu0 %v17718_v40 }
 0x56b   :  { %v7268_v40 = vadd.f32 %v19382_v21, %v6418_v44 }
 0x56d   :  { %8575 = vmatpush2.bf16.msra.mxu0 %v17716_v61 }
 0x56e   :  { %8576 = vmatprep.subr.bf16.mxu0 %v17721_v35 }
 0x571   :  { %8577 = vmatpush2.bf16.msra.mxu0 %v17719_v37 }
 0x572   :  { %8578 = vmatprep.subr.bf16.mxu0 %v17724_v47 }
 0x575   :  { %8579 = vmatpush2.bf16.msra.mxu0 %v17722_v50 }
 0x576   :  { %8580 = vmatprep.subr.bf16.mxu0 %v17727_v16 }
 0x579   :  { %8581 = vmatpush2.bf16.msra.mxu0 %v17725_v54 }
 0x57a   :  { %8582 = vmatprep.subr.bf16.mxu0 %v17730_v60 }
 0x57d   :  { %8583 = vmatpush2.bf16.msra.mxu0 %v17728_v63 }
 0x57e   :  { %8634 = vmatprep.subr.bf16.mxu0 %v17733_v8 }
 0x57f   :  { %v7306_v59 = vpop.f32.mrf.mxu1 }
 0x580   :  { %v7307_v0 = vadd.f32 %v7306_v59, %v7266_v10 }
 0x581   :  { %v7308_v46 = vpop.f32.mrf.mxu1 }
 0x582   :  { %v7309_v35 = vadd.f32 %v7308_v46, %v7268_v40  ;;  %v17781_v40 = vld [vmem:[#allocation14 + $0x264] ss:$20 sps:$4 sm:$0xff]  }
 0x583   :  { %v7310_v3 = vpop.f32.mrf.mxu1 }
 0x584   :  { %v17745_v3 = vld [vmem:[#allocation14 + $0xd4] ss:$20 sps:$4 sm:$0xff]  }
 0x585   :  { %v7311_v12 = vpop.f32.mrf.mxu1 }
 0x586   :  { %v17743_v12 = vld [vmem:[#allocation14 + $0xd0] ss:$20 sps:$4 sm:$0xff]  }
 0x5bf   :  { %v7388_v61 = vpop.f32.mrf.mxu1 }
 0x5c0   :  { %v7347_v17 = vpop.f32.mrf.mxu0  ;;  %v7389_v27 = vadd.f32 %v7388_v61, %v6422_v55  ;;  %v17833_v55 = vld [vmem:[#allocation14 + $0x378] ss:$20 sps:$4 sm:$0xff]  }
 0x5c1   :  { %v7348_v56 = vadd.f32 %v7347_v17, %v7307_v0  ;;  %v7390_v26 = vpop.f32.mrf.mxu1  ;;  %v17731_v0 = vld [vmem:[#allocation14 + $0x120] ss:$20 sps:$4 sm:$0xff]  }
 0x5c2   :  { %v7349_v19 = vpop.f32.mrf.mxu0  ;;  %v7391_v23 = vadd.f32 %v7390_v26, %v6426_v18  ;;  %v17842_v18 = vld [vmem:[#allocation14 + $0x1f0] ss:$20 sps:$4 sm:$0xff]  }
 0x5c3   :  { %v7477_v37 = vsub.f32 0.0, %v7348_v56  ;;  %v7350_v47 = vadd.f32 %v7349_v19, %v7309_v35  ;;  %v7392_v42 = vpop.f32.mrf.mxu1  ;;  %v17779_v19 = vld [vmem:[#allocation14 + $0x260] ss:$20 sps:$4 sm:$0xff]  }
 0x5c4   :  { %v7351_v49 = vpop.f32.mrf.mxu0  ;;  %v17793_v42 = vld [vmem:[#allocation14 + $0x214] ss:$20 sps:$4 sm:$0xff]  }
 0x5c5   :  { %v7481_v50 = vmul.f32 1.442695, %v7477_v37  ;;  %v7478_v16 = vsub.f32 0.0, %v7350_v47  ;;  %v7393_v52 = vpop.f32.mrf.mxu1  ;;  %v17787_v37 = vld [vmem:[#allocation14 + $0x23c] ss:$20 sps:$4 sm:$0xff]  }
 0x5c6   :  { %v7352_v30 = vpop.f32.mrf.mxu0  ;;  %v17785_v47 = vld [vmem:[#allocation14 + $0x238] ss:$20 sps:$4 sm:$0xff]   ;;  %v17791_v49 = vld [vmem:[#allocation14 + $0x210] ss:$20 sps:$4 sm:$0xff]  }
 0x5c7   :  { %18599 = vpow2.f32 %v7481_v50  ;;  %v7483_v54 = vmul.f32 1.442695, %v7478_v16  ;;  %v17799_v50 = vld [vmem:[#allocation14 + $0x1ec] ss:$20 sps:$4 sm:$0xff]   ;;  %v17797_v16 = vld [vmem:[#allocation14 + $0x1e8] ss:$20 sps:$4 sm:$0xff]  }
 0x5c8   :  { %v17805_v52 = vld [vmem:[#allocation14 + $0x1c4] ss:$20 sps:$4 sm:$0xff]  }
 0x5c9   :  { %18601 = vpow2.f32 %v7483_v54 }
 0x5d4   :  { %v18600_v60 = vpop.eup %18599 }
 0x5d5   :  { %v7489_v53 = vadd.f32 1.0, %v18600_v60  ;;  %v17803_v60 = vld [vmem:[#allocation14 + $0x1c0] ss:$20 sps:$4 sm:$0xff]  }
 0x5d6   :  { %v18602_v21 = vpop.eup %18601 }
 0x5d7   :  { %v7490_v62 = vadd.f32 1.0, %v18602_v21  ;;  %18603 = vrcp.f32 %v7489_v53  ;;  %v17811_v21 = vld [vmem:[#allocation14 + $0x19c] ss:$20 sps:$4 sm:$0xff]  }
 0x5d9   :  { %18605 = vrcp.f32 %v7490_v62 }
 0x5df   :  { %v7470_v63 = vpop.f32.mrf.mxu1 }
 0x5e1   :  { %v7472_v1 = vpop.f32.mrf.mxu1 }
 0x5e3   :  { %v7474_v8 = vpop.f32.mrf.mxu1 }
 0x5e4   :  { %v18604_v33 = vpop.eup %18603  ;;  %v17815_v8 = vld [vmem:[#allocation14 + $0x170] ss:$20 sps:$4 sm:$0xff]  }
 0x5e5   :  { %v7475_v9 = vpop.f32.mrf.mxu1  ;;  %v19397_v46 = vpack.c.bf16 %v18604_v33, %v18604_v33  ;;  %v17823_v33 = vld [vmem:[#allocation14 + $0x14c] ss:$20 sps:$4 sm:$0xff]  }
 0x5e6   :  { %v18606_v10 = vpop.eup %18605  ;;  %v17821_v9 = vld [vmem:[#allocation14 + $0x148] ss:$20 sps:$4 sm:$0xff]  }
 0x5e7   :  { %v19395_v59 = vpack.c.bf16 %v18606_v10, %v18606_v10  ;;  %v17827_v10 = vld [vmem:[#allocation14 + $0x268] ss:$20 sps:$4 sm:$0xff]  }
 0x5e9   :  { %8584 = vmatprep.mubr.bf16.mxu0 %v19395_v59 }
 0x5ea   :  { %8585 = vmatmul.mubr.bf16.vlgmr.msra.gmra.mxu0 %v19397_v46 }
 0x5eb   :  { %8635 = vmatpush1.bf16.msra.mxu0 %v17731_v0  ;;  %8666 = vmatprep.mubr.bf16.mxu0 %v19395_v59 }
 0x5ec   :  { %8636 = vmatprep.subr.bf16.mxu0 %v17739_v11  ;;  %v17831_v11 = vld [vmem:[#allocation14 + $0x128] ss:$20 sps:$4 sm:$0xff]  }
 0x5ef   :  { %8637 = vmatpush1.bf16.msra.mxu0 %v17737_v2 }
 0x5f0   :  { %8638 = vmatprep.subr.bf16.mxu0 %v17745_v3 }
 0x5f3   :  { %8639 = vmatpush1.bf16.msra.mxu0 %v17743_v12  ;;  %v17828_v12 = vld [vmem:[#allocation14 + $0x3a0] ss:$20 sps:$4 sm:$0xff]  }
 0x5f4   :  { %8640 = vmatprep.subr.bf16.mxu0 %v17751_v14 }
 0x5f7   :  { %8641 = vmatpush1.bf16.msra.mxu0 %v17749_v7  ;;  %v17832_v7 = vld [vmem:[#allocation14 + $0x240] ss:$20 sps:$4 sm:$0xff]  }
 0x5f8   :  { %8642 = vmatprep.subr.bf16.mxu0 %v17757_v15  ;;  %v17835_v15 = vld [vmem:[#allocation14 + $0x37c] ss:$20 sps:$4 sm:$0xff]  }
 0x5fb   :  { %8643 = vmatpush1.bf16.msra.mxu0 %v17755_v20  ;;  %v17836_v20 = vld [vmem:[#allocation14 + $0x100] ss:$20 sps:$4 sm:$0xff]  }
 0x5fc   :  { %8644 = vmatprep.subr.bf16.mxu0 %v17763_v39  ;;  %v17837_v39 = vld [vmem:[#allocation14 + $0x218] ss:$20 sps:$4 sm:$0xff]  }
 0x5ff   :  { %8645 = vmatpush1.bf16.msra.mxu0 %v17761_v22  ;;  %v17840_v22 = vld [vmem:[#allocation14 + $0x354] ss:$20 sps:$4 sm:$0xff]  }
 0x600   :  { %v7429_v25 = vpop.f32.mrf.mxu0  ;;  %8646 = vmatprep.subr.bf16.mxu0 %v17769_v32  ;;  %v17841_v32 = vld [vmem:[#allocation14 + $0xd8] ss:$20 sps:$4 sm:$0xff]  }
 0x601   :  { %v7430_v45 = vadd.f32 %v7429_v25, %v7389_v27  ;;  %v17838_v27 = vld [vmem:[#allocation14 + $0x350] ss:$20 sps:$4 sm:$0xff]   ;;  %v17847_v25 = vld [vmem:[#allocation14 + $0x1c8] ss:$20 sps:$4 sm:$0xff]  }
 0x602   :  { %v7431_v24 = vpop.f32.mrf.mxu0 }
 0x603   :  { %v7471_v28 = vadd.f32 %v7470_v63, %v7430_v45  ;;  %v7432_v41 = vadd.f32 %v7431_v24, %v7391_v23  ;;  %8647 = vmatpush1.bf16.msra.mxu0 %v17767_v31  ;;  %v17809_v63 = vld [vmem:[#allocation14 + $0x198] ss:$20 sps:$4 sm:$0xff]   ;;  %v17851_v45 = vld [vmem:[#allocation14 + $0x88] ss:$20 sps:$4 sm:$0xff]   ;;  %v17852_v24 = vld [vmem:[#allocation14 + $0x1a0] ss:$20 sps:$4 sm:$0xff]  }
 0x604   :  { %v7433_v44 = vpop.f32.mrf.mxu0  ;;  %8648 = vmatprep.subr.bf16.mxu0 %v17775_v58  ;;  %v17845_v31 = vld [vmem:[#allocation14 + $0x32c] ss:$20 sps:$4 sm:$0xff]   ;;  %v17843_v58 = vld [vmem:[#allocation14 + $0x328] ss:$20 sps:$4 sm:$0xff]   ;;  %v17850_v23 = vld [vmem:[#allocation14 + $0x304] ss:$20 sps:$4 sm:$0xff]  }
 0x605   :  { %v7479_v17 = vsub.f32 0.0, %v7471_v28  ;;  %v7473_v35 = vadd.f32 %v7472_v1, %v7432_v41  ;;  %v17817_v1 = vld [vmem:[#allocation14 + $0x174] ss:$20 sps:$4 sm:$0xff]   ;;  %v17855_v41 = vld [vmem:[#allocation14 + $0x2dc] ss:$20 sps:$4 sm:$0xff]  }
 0x606   :  { %v7434_v56 = vpop.f32.mrf.mxu0  ;;  %v17848_v28 = vld [vmem:[#allocation14 + $0x300] ss:$20 sps:$4 sm:$0xff]   ;;  %v17857_v44 = vld [vmem:[#allocation14 + $0x178] ss:$20 sps:$4 sm:$0xff]  }
 0x607   :  { %v7485_v29 = vmul.f32 1.442695, %v7479_v17  ;;  %v7480_v61 = vsub.f32 0.0, %v7473_v35  ;;  %8649 = vmatpush1.bf16.msra.mxu0 %v17773_v34  ;;  %v17856_v34 = vld [vmem:[#allocation14 + $0x60] ss:$20 sps:$4 sm:$0xff]  }
 0x608   :  { %8650 = vmatprep.subr.bf16.mxu0 %v17781_v40  ;;  %v17853_v40 = vld [vmem:[#allocation14 + $0x2d8] ss:$20 sps:$4 sm:$0xff]   ;;  %v17860_v17 = vld [vmem:[#allocation14 + $0x2b4] ss:$20 sps:$4 sm:$0xff]   ;;  %v17862_v56 = vld [vmem:[#allocation14 + $0x150] ss:$20 sps:$4 sm:$0xff]  }
 0x609   :  { %18607 = vpow2.f32 %v7485_v29  ;;  %v7487_v26 = vmul.f32 1.442695, %v7480_v61  ;;  %v17861_v35 = vld [vmem:[#allocation14 + $0x38] ss:$20 sps:$4 sm:$0xff]   ;;  %v17858_v29 = vld [vmem:[#allocation14 + $0x2b0] ss:$20 sps:$4 sm:$0xff]  }
 0x60a   :  { %v8882_v61 = vld [vmem:[#allocation17 + $0x1c0] sm:$0xff] }
 0x60b   :  { %18609 = vpow2.f32 %v7487_v26  ;;  %8651 = vmatpush2.bf16.msra.mxu0 %v17779_v19  ;;  %v8886_v19 = vld [vmem:[#allocation17 + $0x1e0] sm:$0xff] }
 0x60c   :  { %8652 = vmatprep.subr.bf16.mxu0 %v17787_v37  ;;  %v17865_v37 = vld [vmem:[#allocation14 + $0x28c] ss:$20 sps:$4 sm:$0xff]   ;;  %v17866_v26 = vld [vmem:[#allocation14 + $0x10] ss:$20 sps:$4 sm:$0xff]  }
 0x60f   :  { %8653 = vmatpush2.bf16.msra.mxu0 %v17785_v47  ;;  %v16041_v47 = vcombine.high %v8882_v61, %v8886_v19 }
 0x610   :  { %8654 = vmatprep.subr.bf16.mxu0 %v17793_v42  ;;  %v17863_v42 = vld [vmem:[#allocation14 + $0x288] ss:$20 sps:$4 sm:$0xff]  }
 0x613   :  { %8655 = vmatpush2.bf16.msra.mxu0 %v17791_v49  ;;  %v8874_v49 = vld [vmem:[#allocation17 + $0x180] sm:$0xff] }
 0x614   :  { %8656 = vmatprep.subr.bf16.mxu0 %v17799_v50  ;;  %v8878_v50 = vld [vmem:[#allocation17 + $0x1a0] sm:$0xff] }
 0x616   :  { %v18608_v30 = vpop.eup %18607 }
 0x617   :  { %v7491_v54 = vadd.f32 1.0, %v18608_v30  ;;  %8657 = vmatpush2.bf16.msra.mxu0 %v17797_v16  ;;  %v17869_v16 = vld [vmem:[#allocation14 + $0x4e4] ss:$20 sps:$4 sm:$0xff]   ;;  %v16033_v30 = vcombine.high %v8874_v49, %v8878_v50 }
 0x618   :  { %v18610_v53 = vpop.eup %18609  ;;  %8658 = vmatprep.subr.bf16.mxu0 %v17805_v52  ;;  %v16040_v52 = vcombine.low %v8882_v61, %v8886_v19  ;;  %v8826_v61 = vld [vmem:[#allocation17] sm:$0xff] }
 0x619   :  { %v7492_v62 = vadd.f32 1.0, %v18610_v53  ;;  %18611 = vrcp.f32 %v7491_v54  ;;  %v17867_v54 = vld [vmem:[#allocation14 + $0x4e0] ss:$20 sps:$4 sm:$0xff]   ;;  %v8870_v53 = vld [vmem:[#allocation17 + $0x160] sm:$0xff] }
 0x61a   :  { %v8830_v19 = vld [vmem:[#allocation17 + $0x20] sm:$0xff] }
 0x61b   :  { %8659 = vmatpush2.bf16.msra.mxu0 %v17803_v60  ;;  %18613 = vrcp.f32 %v7492_v62  ;;  %v8866_v60 = vld [vmem:[#allocation17 + $0x140] sm:$0xff]  ;;  %v16032_v62 = vcombine.low %v8874_v49, %v8878_v50 }
 0x61c   :  { %8660 = vmatprep.subr.bf16.mxu0 %v17811_v21  ;;  %v17872_v21 = vld [vmem:[#allocation14 + $0x4bc] ss:$20 sps:$4 sm:$0xff]   ;;  %v8946_v49 = vld [vmem:[#allocation17 + $0x3c0] sm:$0xff] }
 0x61d   :  { %v8950_v50 = vld [vmem:[#allocation17 + $0x3e0] sm:$0xff] }
 0x61f   :  { %8661 = vmatpush2.bf16.msra.mxu0 %v17809_v63  ;;  %v16025_v63 = vcombine.high %v8866_v60, %v8870_v53 }
 0x620   :  { %8662 = vmatprep.subr.bf16.mxu0 %v17817_v1  ;;  %v17870_v1 = vld [vmem:[#allocation14 + $0x4b8] ss:$20 sps:$4 sm:$0xff]  }
 0x623   :  { %8663 = vmatpush2.bf16.msra.mxu0 %v17815_v8  ;;  %v8858_v8 = vld [vmem:[#allocation17 + $0x100] sm:$0xff] }
 0x624   :  { %8664 = vmatprep.subr.bf16.mxu0 %v17823_v33  ;;  %v8862_v33 = vld [vmem:[#allocation17 + $0x120] sm:$0xff] }
 0x626   :  { %v18612_v0 = vpop.eup %18611 }
 0x627   :  { %8665 = vmatpush2.bf16.msra.mxu0 %v17821_v9  ;;  %v19409_v14 = vpack.c.bf16 %v18612_v0, %v18612_v0  ;;  %v17875_v9 = vld [vmem:[#allocation14 + $0x494] ss:$20 sps:$4 sm:$0xff]   ;;  %v16017_v0 = vcombine.high %v8858_v8, %v8862_v33 }
 0x628   :  { %v18614_v2 = vpop.eup %18613  ;;  %16840 = vmatprep.subr.bf16.mxu0 %v17827_v10  ;;  %v16024_v10 = vcombine.low %v8866_v60, %v8870_v53  ;;  %v8942_v60 = vld [vmem:[#allocation17 + $0x3a0] sm:$0xff] }
 0x629   :  { %v19406_v3 = vpack.c.bf16 %v18614_v2, %v18614_v2  ;;  %v8850_v2 = vld [vmem:[#allocation17 + $0xc0] sm:$0xff] }
 0x62a   :  { %8667 = vmatmul.mubr.bf16.vlgmr.msra.gmra.mxu0 %v19397_v46  ;;  %v17900_v53 = vld [vmem:[#allocation14 + $0x308] ss:$20 sps:$4 sm:$0xff]  }
 0x62b   :  { %8625 = vmatprep.mubr.bf16.mxu1 %v19406_v3  ;;  %16841 = vmatpush3.bf16.msra.mxu0 %v17831_v11  ;;  %v17873_v11 = vld [vmem:[#allocation14 + $0x490] ss:$20 sps:$4 sm:$0xff]  }
 0x62c   :  { %8748 = vmatprep.mubr.bf16.mxu0 %v19395_v59  ;;  %8626 = vmatmul.mubr.bf16.vlgmr.msra.gmra.mxu1 %v19409_v14  ;;  %v17846_v59 = vld [vmem:[#allocation14 + $0xb0] ss:$20 sps:$4 sm:$0xff]  }
 0x62d   :  { %8676 = vmatpush1.bf16.msra.mxu1 %v17828_v12  ;;  %8707 = vmatprep.mubr.bf16.mxu1 %v19406_v3  ;;  %v17878_v12 = vld [vmem:[#allocation14 + $0x46c] ss:$20 sps:$4 sm:$0xff]  }
 0x62e   :  { %16842 = vmatprep.subr.bf16.mxu0 %v17832_v7  ;;  %8677 = vmatprep.subr.bf16.mxu1 %v17835_v15  ;;  %v16016_v7 = vcombine.low %v8858_v8, %v8862_v33  ;;  %v8934_v8 = vld [vmem:[#allocation17 + $0x360] sm:$0xff]  ;;  %v17902_v33 = vld [vmem:[#allocation14 + $0x2e0] ss:$20 sps:$4 sm:$0xff]  }
 0x62f   :  { %16843 = vmatpush3.bf16.msra.mxu0 %v17836_v20  ;;  %v17876_v20 = vld [vmem:[#allocation14 + $0x468] ss:$20 sps:$4 sm:$0xff]  }
 0x630   :  { %16844 = vmatprep.subr.bf16.mxu0 %v17837_v39  ;;  %v17881_v39 = vld [vmem:[#allocation14 + $0x444] ss:$20 sps:$4 sm:$0xff]  }
 0x631   :  { %8678 = vmatpush1.bf16.msra.mxu1 %v17833_v55 }
 0x632   :  { %8679 = vmatprep.subr.bf16.mxu1 %v17840_v22  ;;  %v17879_v22 = vld [vmem:[#allocation14 + $0x440] ss:$20 sps:$4 sm:$0xff]  }
 0x633   :  { %16845 = vmatpush3.bf16.msra.mxu0 %v17841_v32  ;;  %v17884_v32 = vld [vmem:[#allocation14 + $0x41c] ss:$20 sps:$4 sm:$0xff]  }
 0x634   :  { %16846 = vmatprep.subr.bf16.mxu0 %v17842_v18  ;;  %v17882_v18 = vld [vmem:[#allocation14 + $0x418] ss:$20 sps:$4 sm:$0xff]  }
 0x635   :  { %8680 = vmatpush1.bf16.msra.mxu1 %v17838_v27  ;;  %v17887_v27 = vld [vmem:[#allocation14 + $0x3f4] ss:$20 sps:$4 sm:$0xff]  }
 0x636   :  { %8681 = vmatprep.subr.bf16.mxu1 %v17845_v31  ;;  %v17885_v31 = vld [vmem:[#allocation14 + $0x3f0] ss:$20 sps:$4 sm:$0xff]  }
 0x637   :  { %16847 = vmatpush3.bf16.msra.mxu0 %v17846_v59  ;;  %v17890_v59 = vld [vmem:[#allocation14 + $0x3cc] ss:$20 sps:$4 sm:$0xff]  }
 0x638   :  { %16848 = vmatprep.subr.bf16.mxu0 %v17847_v25  ;;  %v17888_v25 = vld [vmem:[#allocation14 + $0x3c8] ss:$20 sps:$4 sm:$0xff]  }
 0x639   :  { %8682 = vmatpush1.bf16.msra.mxu1 %v17843_v58  ;;  %v17891_v58 = vld [vmem:[#allocation14 + $0x4e8] ss:$20 sps:$4 sm:$0xff]  }
 0x63a   :  { %8683 = vmatprep.subr.bf16.mxu1 %v17850_v23  ;;  %v8842_v23 = vld [vmem:[#allocation17 + $0x80] sm:$0xff] }
 0x63b   :  { %16849 = vmatpush3.bf16.msra.mxu0 %v17851_v45  ;;  %v8846_v45 = vld [vmem:[#allocation17 + $0xa0] sm:$0xff] }
 0x63c   :  { %16850 = vmatprep.subr.bf16.mxu0 %v17852_v24  ;;  %v17892_v24 = vld [vmem:[#allocation14 + $0x3a8] ss:$20 sps:$4 sm:$0xff]  }
 0x63d   :  { %8684 = vmatpush1.bf16.msra.mxu1 %v17848_v28  ;;  %v16001_v28 = vcombine.high %v8842_v23, %v8846_v45 }
 0x63e   :  { %8685 = vmatprep.subr.bf16.mxu1 %v17855_v41  ;;  %v17893_v41 = vld [vmem:[#allocation14 + $0x4c0] ss:$20 sps:$4 sm:$0xff]  }
 0x63f   :  { %16851 = vmatpush3.bf16.msra.mxu0 %v17856_v34  ;;  %v16000_v34 = vcombine.low %v8842_v23, %v8846_v45 }
 0x640   :  { %16852 = vmatprep.subr.bf16.mxu0 %v17857_v44  ;;  %v8834_v44 = vld [vmem:[#allocation17 + $0x40] sm:$0xff] }
 0x641   :  { %8686 = vmatpush1.bf16.msra.mxu1 %v17853_v40  ;;  %v8838_v40 = vld [vmem:[#allocation17 + $0x60] sm:$0xff] }
 0x642   :  { %8687 = vmatprep.subr.bf16.mxu1 %v17860_v17  ;;  %v17894_v17 = vld [vmem:[#allocation14 + $0x380] ss:$20 sps:$4 sm:$0xff]  }
 0x643   :  { %16853 = vmatpush3.bf16.msra.mxu0 %v17861_v35  ;;  %v15993_v35 = vcombine.high %v8834_v44, %v8838_v40 }
 0x644   :  { %16854 = vmatprep.subr.bf16.mxu0 %v17862_v56  ;;  %v17895_v56 = vld [vmem:[#allocation14 + $0x498] ss:$20 sps:$4 sm:$0xff]  }
 0x645   :  { %8688 = vmatpush1.bf16.msra.mxu1 %v17858_v29  ;;  %v15992_v29 = vcombine.low %v8834_v44, %v8838_v40  ;;  %v9014_v40 = vld [vmem:[#allocation17 + $0x5e0] sm:$0xff] }
 0x646   :  { %8689 = vmatprep.subr.bf16.mxu1 %v17865_v37  ;;  %v17896_v37 = vld [vmem:[#allocation14 + $0x358] ss:$20 sps:$4 sm:$0xff]  }
 0x647   :  { %16855 = vmatpush3.bf16.msra.mxu0 %v17866_v26  ;;  %v15985_v26 = vcombine.high %v8826_v61, %v8830_v19 }
 0x648   :  { %10788 = vmatprep.subr.bf16.mxu0 %v16041_v47  ;;  %v17897_v47 = vld [vmem:[#allocation14 + $0x470] ss:$20 sps:$4 sm:$0xff]  }
 0x649   :  { %8690 = vmatpush1.bf16.msra.mxu1 %v17863_v42  ;;  %v15984_v42 = vcombine.low %v8826_v61, %v8830_v19 }
 0x64a   :  { %8749 = vmatmul.mubr.bf16.vlgmr.msra.gmra.mxu0 %v19397_v46  ;;  %8691 = vmatprep.subr.bf16.mxu1 %v17869_v16  ;;  %v8854_v46 = vld [vmem:[#allocation17 + $0xe0] sm:$0xff]  ;;  %v16105_v16 = vcombine.high %v8946_v49, %v8950_v50 }
 0x64b   :  { %10789 = vmatpush1.bf16.msra.mxu0 %v16040_v52  ;;  %v16009_v15 = vcombine.high %v8850_v2, %v8854_v46  ;;  %v16008_v55 = vcombine.low %v8850_v2, %v8854_v46  ;;  %v17899_v52 = vld [vmem:[#allocation14 + $0x448] ss:$20 sps:$4 sm:$0xff]   ;;  %v17904_v46 = vld [vmem:[#allocation14 + $0x2b8] ss:$20 sps:$4 sm:$0xff]  }
 0x64c   :  { %10790 = vmatprep.subr.bf16.mxu0 %v16033_v30  ;;  %v16104_v30 = vcombine.low %v8946_v49, %v8950_v50  ;;  %v8926_v2 = vld [vmem:[#allocation17 + $0x320] sm:$0xff] }
 0x64d   :  { %8692 = vmatpush2.bf16.msra.mxu1 %v17867_v54  ;;  %v8938_v54 = vld [vmem:[#allocation17 + $0x380] sm:$0xff] }
 0x64e   :  { %8693 = vmatprep.subr.bf16.mxu1 %v17872_v21  ;;  %v16097_v21 = vcombine.high %v8938_v54, %v8942_v60 }
 0x64f   :  { %10791 = vmatpush1.bf16.msra.mxu0 %v16032_v62  ;;  %v17901_v62 = vld [vmem:[#allocation14 + $0x420] ss:$20 sps:$4 sm:$0xff]  }
 0x650   :  { %10792 = vmatprep.subr.bf16.mxu0 %v16025_v63  ;;  %v16096_v63 = vcombine.low %v8938_v54, %v8942_v60  ;;  %v8970_v54 = vld [vmem:[#allocation17 + $0x480] sm:$0xff] }
 0x651   :  { %8694 = vmatpush2.bf16.msra.mxu1 %v17870_v1  ;;  %v8930_v1 = vld [vmem:[#allocation17 + $0x340] sm:$0xff] }
 0x652   :  { %8695 = vmatprep.subr.bf16.mxu1 %v17875_v9  ;;  %v16089_v9 = vcombine.high %v8930_v1, %v8934_v8  ;;  %v8974_v60 = vld [vmem:[#allocation17 + $0x4a0] sm:$0xff] }
 0x653   :  { %10793 = vmatpush1.bf16.msra.mxu0 %v16024_v10  ;;  %v17903_v10 = vld [vmem:[#allocation14 + $0x3f8] ss:$20 sps:$4 sm:$0xff]  }
 0x654   :  { %10794 = vmatprep.subr.bf16.mxu0 %v16017_v0  ;;  %v16088_v0 = vcombine.low %v8930_v1, %v8934_v8  ;;  %v8962_v1 = vld [vmem:[#allocation17 + $0x440] sm:$0xff] }
 0x655   :  { %8696 = vmatpush2.bf16.msra.mxu1 %v17873_v11  ;;  %v8922_v11 = vld [vmem:[#allocation17 + $0x300] sm:$0xff] }
 0x656   :  { %8697 = vmatprep.subr.bf16.mxu1 %v17878_v12  ;;  %v16081_v12 = vcombine.high %v8922_v11, %v8926_v2  ;;  %v8966_v8 = vld [vmem:[#allocation17 + $0x460] sm:$0xff] }
 0x657   :  { %10795 = vmatpush1.bf16.msra.mxu0 %v16016_v7  ;;  %v17905_v7 = vld [vmem:[#allocation14 + $0x3d0] ss:$20 sps:$4 sm:$0xff]  }
 0x658   :  { %10796 = vmatprep.subr.bf16.mxu0 %v16009_v15  ;;  %v16080_v15 = vcombine.low %v8922_v11, %v8926_v2  ;;  %v8954_v11 = vld [vmem:[#allocation17 + $0x400] sm:$0xff] }
 0x659   :  { %8698 = vmatpush2.bf16.msra.mxu1 %v17876_v20  ;;  %v8914_v20 = vld [vmem:[#allocation17 + $0x2c0] sm:$0xff] }
 0x65a   :  { %8699 = vmatprep.subr.bf16.mxu1 %v17881_v39  ;;  %v8918_v39 = vld [vmem:[#allocation17 + $0x2e0] sm:$0xff] }
 0x65b   :  { %10797 = vmatpush1.bf16.msra.mxu0 %v16008_v55  ;;  %v17906_v55 = vld [vmem:[#allocation14 + $0x290] ss:$20 sps:$4 sm:$0xff]  }
 0x65c   :  { %10798 = vmatprep.subr.bf16.mxu0 %v16001_v28  ;;  %v8894_v28 = vld [vmem:[#allocation17 + $0x220] sm:$0xff] }
 0x65d   :  { %8700 = vmatpush2.bf16.msra.mxu1 %v17879_v22  ;;  %v16072_v22 = vcombine.low %v8914_v20, %v8918_v39  ;;  %v8958_v2 = vld [vmem:[#allocation17 + $0x420] sm:$0xff] }
 0x65e   :  { %8701 = vmatprep.subr.bf16.mxu1 %v17884_v32  ;;  %v16073_v32 = vcombine.high %v8914_v20, %v8918_v39  ;;  %v9078_v20 = vld [vmem:[#allocation17 + $0x7e0] sm:$0xff] }
 0x65f   :  { %10799 = vmatpush1.bf16.msra.mxu0 %v16000_v34 }
 0x660   :  { %10800 = vmatprep.subr.bf16.mxu0 %v15993_v35 }
 0x661   :  { %8702 = vmatpush2.bf16.msra.mxu1 %v17882_v18  ;;  %v8906_v18 = vld [vmem:[#allocation17 + $0x280] sm:$0xff] }
 0x662   :  { %8703 = vmatprep.subr.bf16.mxu1 %v17887_v27  ;;  %v8910_v27 = vld [vmem:[#allocation17 + $0x2a0] sm:$0xff] }
 0x663   :  { %10801 = vmatpush1.bf16.msra.mxu0 %v15992_v29  ;;  %v8994_v29 = vld [vmem:[#allocation17 + $0x540] sm:$0xff] }
 0x664   :  { %10802 = vmatprep.subr.bf16.mxu0 %v15985_v26 }
 0x665   :  { %8704 = vmatpush2.bf16.msra.mxu1 %v17885_v31  ;;  %v16065_v31 = vcombine.high %v8906_v18, %v8910_v27 }
 0x666   :  { %8705 = vmatprep.subr.bf16.mxu1 %v17890_v59  ;;  %v16064_v59 = vcombine.low %v8906_v18, %v8910_v27 }
 0x667   :  { %10803 = vmatpush1.bf16.msra.mxu0 %v15984_v42  ;;  %v8990_v42 = vld [vmem:[#allocation17 + $0x520] sm:$0xff] }
 0x668   :  { %10804 = vmatprep.subr.bf16.mxu0 %v16105_v16  ;;  %v8982_v16 = vld [vmem:[#allocation17 + $0x4e0] sm:$0xff] }
 0x669   :  { %8706 = vmatpush2.bf16.msra.mxu1 %v17888_v25  ;;  %v8898_v25 = vld [vmem:[#allocation17 + $0x240] sm:$0xff] }
 0x66a   :  { %16862 = vmatprep.subr.bf16.mxu1 %v17891_v58  ;;  %v8902_v58 = vld [vmem:[#allocation17 + $0x260] sm:$0xff] }
 0x66b   :  { %10805 = vmatpush2.bf16.msra.mxu0 %v16104_v30  ;;  %v16057_v23 = vcombine.high %v8898_v25, %v8902_v58  ;;  %v16056_v45 = vcombine.low %v8898_v25, %v8902_v58 }
 0x66c   :  { %8708 = vmatmul.mubr.bf16.vlgmr.msra.gmra.mxu1 %v19409_v14  ;;  %10806 = vmatprep.subr.bf16.mxu0 %v16097_v21  ;;  %v16129_v21 = vcombine.high %v8970_v54, %v8974_v60 }
 0x66d   :  { %16863 = vmatpush3.bf16.msra.mxu1 %v17892_v24  ;;  %8788 = vmatprep.mubr.bf16.mxu1 %v19406_v3  ;;  %v17898_v3 = vld [vmem:[#allocation14 + $0x330] ss:$20 sps:$4 sm:$0xff]  }
 0x66e   :  { %16864 = vmatprep.subr.bf16.mxu1 %v17893_v41  ;;  %v8890_v24 = vld [vmem:[#allocation17 + $0x200] sm:$0xff] }
 0x66f   :  { %10807 = vmatpush2.bf16.msra.mxu0 %v16096_v63  ;;  %v9010_v41 = vld [vmem:[#allocation17 + $0x5c0] sm:$0xff]  ;;  %v16048_v34 = vcombine.low %v8890_v24, %v8894_v28  ;;  %v16049_v44 = vcombine.high %v8890_v24, %v8894_v28 }
 0x670   :  { %10808 = vmatprep.subr.bf16.mxu0 %v16089_v9  ;;  %v16169_v35 = vcombine.high %v9010_v41, %v9014_v40 }
 0x671   :  { %16865 = vmatpush3.bf16.msra.mxu1 %v17894_v17  ;;  %v16168_v17 = vcombine.low %v9010_v41, %v9014_v40  ;;  %v9042_v41 = vld [vmem:[#allocation17 + $0x6c0] sm:$0xff] }
 0x672   :  { %16866 = vmatprep.subr.bf16.mxu1 %v17895_v56  ;;  %v9006_v56 = vld [vmem:[#allocation17 + $0x5a0] sm:$0xff] }
 0x673   :  { %10809 = vmatpush2.bf16.msra.mxu0 %v16088_v0 }
 0x674   :  { %10810 = vmatprep.subr.bf16.mxu0 %v16081_v12 }
 0x675   :  { %16867 = vmatpush3.bf16.msra.mxu1 %v17896_v37  ;;  %v8998_v37 = vld [vmem:[#allocation17 + $0x560] sm:$0xff] }
 0x676   :  { %16868 = vmatprep.subr.bf16.mxu1 %v17897_v47  ;;  %v16153_v26 = vcombine.high %v8994_v29, %v8998_v37  ;;  %v8986_v47 = vld [vmem:[#allocation17 + $0x500] sm:$0xff]  ;;  %v16152_v49 = vcombine.low %v8994_v29, %v8998_v37 }
 0x677   :  { %10811 = vmatpush2.bf16.msra.mxu0 %v16080_v15  ;;  %v16145_v50 = vcombine.high %v8986_v47, %v8990_v42  ;;  %v9074_v15 = vld [vmem:[#allocation17 + $0x7c0] sm:$0xff] }
 0x678   :  { %10812 = vmatprep.subr.bf16.mxu0 %v16073_v32  ;;  %v16233_v39 = vcombine.high %v9074_v15, %v9078_v20  ;;  %v9070_v32 = vld [vmem:[#allocation17 + $0x7a0] sm:$0xff] }
 0x679   :  { %16869 = vmatpush3.bf16.msra.mxu1 %v17898_v3  ;;  %v8978_v3 = vld [vmem:[#allocation17 + $0x4c0] sm:$0xff] }
 0x67a   :  { %16870 = vmatprep.subr.bf16.mxu1 %v17899_v52  ;;  %v16144_v52 = vcombine.low %v8986_v47, %v8990_v42  ;;  %v16137_v30 = vcombine.high %v8978_v3, %v8982_v16  ;;  %v9026_v29 = vld [vmem:[#allocation17 + $0x640] sm:$0xff] }
 0x67b   :  { %10813 = vmatpush2.bf16.msra.mxu0 %v16072_v22  ;;  %v9066_v22 = vld [vmem:[#allocation17 + $0x780] sm:$0xff] }
 0x67c   :  { %10814 = vmatprep.subr.bf16.mxu0 %v16065_v31  ;;  %v16225_v18 = vcombine.high %v9066_v22, %v9070_v32  ;;  %v16224_v27 = vcombine.low %v9066_v22, %v9070_v32  ;;  %v9058_v31 = vld [vmem:[#allocation17 + $0x740] sm:$0xff] }
 0x67d   :  { %16871 = vmatpush3.bf16.msra.mxu1 %v17900_v53  ;;  %v16136_v53 = vcombine.low %v8978_v3, %v8982_v16  ;;  %v9022_v47 = vld [vmem:[#allocation17 + $0x620] sm:$0xff]  ;;  %v19425_v3 = vld [vmem:[#allocation17 + $0x1e8] sm:$0xff] }
 0x67e   :  { %16872 = vmatprep.subr.bf16.mxu1 %v17901_v62  ;;  %v16128_v62 = vcombine.low %v8970_v54, %v8974_v60 }
 0x67f   :  { %10815 = vmatpush2.bf16.msra.mxu0 %v16064_v59  ;;  %v9062_v59 = vld [vmem:[#allocation17 + $0x760] sm:$0xff] }
 0x680   :  { %10816 = vmatprep.subr.bf16.mxu0 %v16057_v23  ;;  %v16217_v25 = vcombine.high %v9058_v31, %v9062_v59  ;;  %v16216_v58 = vcombine.low %v9058_v31, %v9062_v59  ;;  %v9050_v23 = vld [vmem:[#allocation17 + $0x700] sm:$0xff] }
 0x681   :  { %16873 = vmatpush3.bf16.msra.mxu1 %v17902_v33  ;;  %v16121_v33 = vcombine.high %v8962_v1, %v8966_v8 }
 0x682   :  { %16874 = vmatprep.subr.bf16.mxu1 %v17903_v10  ;;  %v16120_v10 = vcombine.low %v8962_v1, %v8966_v8 }
 0x683   :  { %10817 = vmatpush2.bf16.msra.mxu0 %v16056_v45  ;;  %v9054_v45 = vld [vmem:[#allocation17 + $0x720] sm:$0xff] }
 0x684   :  { %10818 = vmatprep.subr.bf16.mxu0 %v16049_v44  ;;  %v16209_v24 = vcombine.high %v9050_v23, %v9054_v45  ;;  %v16208_v28 = vcombine.low %v9050_v23, %v9054_v45 }
 0x685   :  { %16875 = vmatpush3.bf16.msra.mxu1 %v17904_v46  ;;  %v16113_v46 = vcombine.high %v8954_v11, %v8958_v2 }
 0x686   :  { %16876 = vmatprep.subr.bf16.mxu1 %v17905_v7  ;;  %v16112_v7 = vcombine.low %v8954_v11, %v8958_v2 }
 0x687   :  { %10819 = vmatpush2.bf16.msra.mxu0 %v16048_v34  ;;  %v9046_v34 = vld [vmem:[#allocation17 + $0x6e0] sm:$0xff] }
 0x688   :  { %v16201_v44 = vcombine.high %v9042_v41, %v9046_v34  ;;  %v16200_v40 = vcombine.low %v9042_v41, %v9046_v34 }
 0x689   :  { %16877 = vmatpush3.bf16.msra.mxu1 %v17906_v55  ;;  %v16232_v55 = vcombine.low %v9074_v15, %v9078_v20 }
 0x68a   :  { %10829 = vmatprep.subr.bf16.mxu1 %v16169_v35  ;;  %v9038_v35 = vld [vmem:[#allocation17 + $0x6a0] sm:$0xff] }
 0x68c   :  { %8789 = vmatmul.mubr.bf16.vlgmr.msra.gmra.mxu1 %v19409_v14  ;;  %v9002_v14 = vld [vmem:[#allocation17 + $0x580] sm:$0xff] }
 0x68d   :  { %10830 = vmatpush1.bf16.msra.mxu1 %v16168_v17  ;;  %v16160_v61 = vcombine.low %v9002_v14, %v9006_v56  ;;  %v16161_v19 = vcombine.high %v9002_v14, %v9006_v56  ;;  %v9034_v17 = vld [vmem:[#allocation17 + $0x680] sm:$0xff] }
 0x68e   :  { %v16192_v14 = vcombine.low %v9034_v17, %v9038_v35  ;;  %v16193_v56 = vcombine.high %v9034_v17, %v9038_v35 }
 0x68f   :  { %10831 = vmatprep.subr.bf16.mxu1 %v16161_v19 }
 0x691   :  { %10832 = vmatpush1.bf16.msra.mxu1 %v16160_v61  ;;  %v9030_v61 = vld [vmem:[#allocation17 + $0x660] sm:$0xff] }
 0x692   :  { %10833 = vmatprep.subr.bf16.mxu1 %v16153_v26  ;;  %v16185_v19 = vcombine.high %v9026_v29, %v9030_v61  ;;  %v16184_v37 = vcombine.low %v9026_v29, %v9030_v61  ;;  %v9018_v26 = vld [vmem:[#allocation17 + $0x600] sm:$0xff] }
 0x693   :  { %v16177_v42 = vcombine.high %v9018_v26, %v9022_v47  ;;  %v9122_v29 = vld [vmem:[#allocation17 + $0x940] sm:$0xff] }
 0x694   :  { %v9126_v61 = vld [vmem:[#allocation17 + $0x960] sm:$0xff] }
 0x695   :  { %10834 = vmatpush1.bf16.msra.mxu1 %v16152_v49  ;;  %v16176_v49 = vcombine.low %v9018_v26, %v9022_v47  ;;  %v9114_v26 = vld [vmem:[#allocation17 + $0x900] sm:$0xff] }
 0x696   :  { %10835 = vmatprep.subr.bf16.mxu1 %v16145_v50  ;;  %v19423_v50 = vld [vmem:[#allocation17 + $0x1c8] sm:$0xff]  ;;  %v9118_v47 = vld [vmem:[#allocation17 + $0x920] sm:$0xff] }
 0x697   :  { %v16043_v16 = vcombine.high %v19423_v50, %v19425_v3  ;;  %v16042_v54 = vcombine.low %v19423_v50, %v19425_v3  ;;  %v8847_v50 = vld [vmem:[#allocation17 + $0xa8] sm:$0xff] }
 0x699   :  { %10836 = vmatpush1.bf16.msra.mxu1 %v16144_v52  ;;  %v9138_v52 = vld [vmem:[#allocation17 + $0x9c0] sm:$0xff] }
 0x69a   :  { %10837 = vmatprep.subr.bf16.mxu1 %v16137_v30  ;;  %v9142_v30 = vld [vmem:[#allocation17 + $0x9e0] sm:$0xff] }
 0x69b   :  { %v16297_v60 = vcombine.high %v9138_v52, %v9142_v30 }
 0x69d   :  { %10838 = vmatpush1.bf16.msra.mxu1 %v16136_v53  ;;  %v16296_v53 = vcombine.low %v9138_v52, %v9142_v30  ;;  %10870 = vmatprep.subr.bf16.mxu0 %v16297_v60  ;;  %v9110_v52 = vld [vmem:[#allocation17 + $0x8e0] sm:$0xff]  ;;  %v16272_v30 = vcombine.low %v9114_v26, %v9118_v47 }
 0x69e   :  { %10839 = vmatprep.subr.bf16.mxu1 %v16129_v21  ;;  %v19431_v21 = vld [vmem:[#allocation16] sm:$0x1f] }
 0x69f   :  { %v7702_v1 = vrot.slane %v19431_v21, %v19178_v13 }
 0x6a1   :  { %10840 = vmatpush1.bf16.msra.mxu1 %v16128_v62  ;;  %v7698_v62 = vrot.slane %v19431_v21, %v19175_v6 }
 0x6a2   :  { %10841 = vmatprep.subr.bf16.mxu1 %v16121_v33 }
 0x6a5   :  { %10842 = vmatpush1.bf16.msra.mxu1 %v16120_v10 }
 0x6a6   :  { %10843 = vmatprep.subr.bf16.mxu1 %v16113_v46 }
 0x6a9   :  { %10844 = vmatpush1.bf16.msra.mxu1 %v16112_v7 }
 0x6aa   :  { %v19419_v63 = vpop.f32.mrf.mxu0  ;;  %10845 = vmatprep.subr.bf16.mxu1 %v16233_v39 }
 0x6ab   :  { %v8587_v33 = vadd.f32 %v19419_v63, %v7698_v62  ;;  %v19445_v63 = vld [vmem:[#allocation17 + $0x5e8] sm:$0xff]  ;;  %v9098_v62 = vld [vmem:[#allocation17 + $0x880] sm:$0xff] }
 0x6ac   :  { %v19421_v9 = vpop.f32.mrf.mxu0 }
 0x6ad   :  { %10846 = vmatpush2.bf16.msra.mxu1 %v16232_v55  ;;  %v8589_v11 = vadd.f32 %v19421_v9, %v7702_v1  ;;  %v9102_v1 = vld [vmem:[#allocation17 + $0x8a0] sm:$0xff] }
 0x6ae   :  { %v8590_v0 = vpop.f32.mrf.mxu0  ;;  %10847 = vmatprep.subr.bf16.mxu1 %v16225_v18 }
 0x6b0   :  { %v8591_v12 = vpop.f32.mrf.mxu0 }
 0x6b1   :  { %10848 = vmatpush2.bf16.msra.mxu1 %v16224_v27  ;;  %v19443_v27 = vld [vmem:[#allocation17 + $0x5c8] sm:$0xff] }
 0x6b2   :  { %10849 = vmatprep.subr.bf16.mxu1 %v16217_v25  ;;  %v16170_v9 = vcombine.low %v19443_v27, %v19445_v63 }
 0x6b5   :  { %10850 = vmatpush2.bf16.msra.mxu1 %v16216_v58 }
 0x6b6   :  { %10851 = vmatprep.subr.bf16.mxu1 %v16209_v24 }
 0x6b9   :  { %10852 = vmatpush2.bf16.msra.mxu1 %v16208_v28 }
 0x6ba   :  { %10853 = vmatprep.subr.bf16.mxu1 %v16201_v44  ;;  %v9130_v44 = vld [vmem:[#allocation17 + $0x980] sm:$0xff] }
 0x6bd   :  { %10854 = vmatpush2.bf16.msra.mxu1 %v16200_v40  ;;  %v9134_v40 = vld [vmem:[#allocation17 + $0x9a0] sm:$0xff] }
 0x6be   :  { %10855 = vmatprep.subr.bf16.mxu1 %v16193_v56  ;;  %v16289_v56 = vcombine.high %v9130_v44, %v9134_v40 }
 0x6c1   :  { %10856 = vmatpush2.bf16.msra.mxu1 %v16192_v14 }
 0x6c2   :  { %10857 = vmatprep.subr.bf16.mxu1 %v16185_v19  ;;  %v16288_v19 = vcombine.low %v9130_v44, %v9134_v40 }
 0x6c5   :  { %10858 = vmatpush2.bf16.msra.mxu1 %v16184_v37  ;;  %v16281_v37 = vcombine.high %v9122_v29, %v9126_v61 }
 0x6c6   :  { %10859 = vmatprep.subr.bf16.mxu1 %v16177_v42  ;;  %v16280_v42 = vcombine.low %v9122_v29, %v9126_v61  ;;  %v7714_v29 = vrot.slane %v19431_v21, %v19269_v48 }
 0x6c9   :  { %10860 = vmatpush2.bf16.msra.mxu1 %v16176_v49  ;;  %v16273_v49 = vcombine.high %v9114_v26, %v9118_v47 }
 0x6ca   :  { %10911 = vmatprep.subr.bf16.mxu1 %v16043_v16  ;;  %v9106_v16 = vld [vmem:[#allocation17 + $0x8c0] sm:$0xff] }
 0x6cb   :  { %v16265_v60 = vcombine.high %v9106_v16, %v9110_v52 }
 0x6ea   :  { %v19437_v8 = vpop.f32.mrf.mxu0 }
 0x6ec   :  { %v8627_v10 = vpop.f32.mrf.mxu1  ;;  %v19440_v0 = vpop.f32.mrf.mxu0 }
 0x6ed   :  { %v8628_v2 = vadd.f32 %v8627_v10, %v8587_v33  ;;  %v16257_v33 = vcombine.high %v9098_v62, %v9102_v1  ;;  %v9090_v10 = vld [vmem:[#allocation17 + $0x840] sm:$0xff] }
 0x6ee   :  { %v8629_v46 = vpop.f32.mrf.mxu1  ;;  %v8672_v12 = vpop.f32.mrf.mxu0 }
 0x6ef   :  { %v8796_v7 = vsub.f32 0.0, %v8628_v2  ;;  %v8630_v15 = vadd.f32 %v8629_v46, %v8589_v11  ;;  %v9094_v11 = vld [vmem:[#allocation17 + $0x860] sm:$0xff]  ;;  %v7706_v2 = vrot.slane %v19431_v21, %v19211_v36  ;;  %v16256_v46 = vcombine.low %v9098_v62, %v9102_v1 }
 0x6f0   :  { %v8631_v20 = vpop.f32.mrf.mxu1  ;;  %v8673_v39 = vpop.f32.mrf.mxu0  ;;  %v16249_v12 = vcombine.high %v9090_v10, %v9094_v11 }
 0x6f1   :  { %v8801_v55 = vmul.f32 1.442695, %v8796_v7  ;;  %v8797_v22 = vsub.f32 0.0, %v8630_v15  ;;  %v7710_v7 = vrot.slane %v19431_v21, %v19226_v4  ;;  %v9082_v15 = vld [vmem:[#allocation17 + $0x800] sm:$0xff]  ;;  %v8669_v39 = vadd.f32 %v19437_v8, %v7706_v2  ;;  %v8867_v21 = vld [vmem:[#allocation17 + $0x148] sm:$0xff] }
 0x6f2   :  { %v8632_v32 = vpop.f32.mrf.mxu1  ;;  %v9086_v20 = vld [vmem:[#allocation17 + $0x820] sm:$0xff] }
 0x6f3   :  { %18615 = vpow2.f32 %v8801_v55  ;;  %v8803_v18 = vmul.f32 1.442695, %v8797_v22  ;;  %v16248_v55 = vcombine.low %v9090_v10, %v9094_v11  ;;  %v16241_v32 = vcombine.high %v9082_v15, %v9086_v20  ;;  %v8871_v11 = vld [vmem:[#allocation17 + $0x168] sm:$0xff] }
 0x6f4   :  { %v16027_v2 = vcombine.high %v8867_v21, %v8871_v11 }
 0x6f5   :  { %18617 = vpow2.f32 %v8803_v18  ;;  %v8671_v18 = vadd.f32 %v19440_v0, %v7710_v7  ;;  %v16026_v7 = vcombine.low %v8867_v21, %v8871_v11  ;;  %v8923_v21 = vld [vmem:[#allocation17 + $0x308] sm:$0xff] }
 0x6f6   :  { %v8927_v11 = vld [vmem:[#allocation17 + $0x328] sm:$0xff] }
 0x700   :  { %v18616_v31 = vpop.eup %18615 }
 0x701   :  { %v8811_v59 = vadd.f32 1.0, %v18616_v31 }
 0x702   :  { %v18618_v25 = vpop.eup %18617 }
 0x703   :  { %v8812_v58 = vadd.f32 1.0, %v18618_v25  ;;  %18619 = vrcp.f32 %v8811_v59 }
 0x705   :  { %18621 = vrcp.f32 %v8812_v58 }
 0x70a   :  { %v16856_v23 = vpop.f32.mrf.mxu0 }
 0x70c   :  { %v16857_v45 = vpop.f32.mrf.mxu0 }
 0x70d   :  { %v19449_v24 = vadd.f32 %v16857_v45, %v16856_v23  ;;  %v16240_v23 = vcombine.low %v9082_v15, %v9086_v20  ;;  %v8851_v20 = vld [vmem:[#allocation17 + $0xc8] sm:$0xff] }
 0x70e   :  { %v16859_v28 = vpop.f32.mrf.mxu0 }
 0x70f   :  { %v16171_v28 = vcombine.high %v19443_v27, %v19445_v63  ;;  %v8915_v63 = vld [vmem:[#allocation17 + $0x2c8] sm:$0xff] }
 0x710   :  { %v16860_v41 = vpop.f32.mrf.mxu0  ;;  %v18620_v34 = vpop.eup %18619 }
 0x711   :  { %v19453_v14 = vpack.c.bf16 %v18620_v34, %v18620_v34 }
 0x712   :  { %v18622_v17 = vpop.eup %18621 }
 0x713   :  { %v19451_v35 = vpack.c.bf16 %v18622_v17, %v18622_v17 }
 0x715   :  { %10820 = vmatprep.mubr.bf16.mxu0 %v19451_v35 }
 0x716   :  { %10821 = vmatmul.mubr.bf16.vlgmr.msra.gmra.mxu0 %v19453_v14 }
 0x717   :  { %10871 = vmatpush1.bf16.msra.mxu0 %v16296_v53  ;;  %10902 = vmatprep.mubr.bf16.mxu0 %v19017_v38  ;;  %v16264_v53 = vcombine.low %v9106_v16, %v9110_v52  ;;  %v8875_v16 = vld [vmem:[#allocation17 + $0x188] sm:$0xff] }
 0x718   :  { %10872 = vmatprep.subr.bf16.mxu0 %v16289_v56  ;;  %v8879_v52 = vld [vmem:[#allocation17 + $0x1a8] sm:$0xff] }
 0x71b   :  { %10873 = vmatpush1.bf16.msra.mxu0 %v16288_v19 }
 0x71c   :  { %10874 = vmatprep.subr.bf16.mxu0 %v16281_v37  ;;  %v8751_v37 = vadd.f32 %v19449_v24, %v7714_v29  ;;  %v16034_v24 = vcombine.low %v8875_v16, %v8879_v52  ;;  %v9003_v29 = vld [vmem:[#allocation17 + $0x588] sm:$0xff] }
 0x71f   :  { %10875 = vmatpush1.bf16.msra.mxu0 %v16280_v42 }
 0x720   :  { %10876 = vmatprep.subr.bf16.mxu0 %v16273_v49 }
 0x723   :  { %10877 = vmatpush1.bf16.msra.mxu0 %v16272_v30 }
 0x724   :  { %10878 = vmatprep.subr.bf16.mxu0 %v16265_v60 }
 0x727   :  { %10879 = vmatpush1.bf16.msra.mxu0 %v16264_v53 }
 0x728   :  { %10880 = vmatprep.subr.bf16.mxu0 %v16257_v33  ;;  %v16035_v33 = vcombine.high %v8875_v16, %v8879_v52  ;;  %v8935_v16 = vld [vmem:[#allocation17 + $0x368] sm:$0xff] }
 0x729   :  { %v8995_v52 = vld [vmem:[#allocation17 + $0x548] sm:$0xff] }
 0x72b   :  { %10881 = vmatpush1.bf16.msra.mxu0 %v16256_v46  ;;  %v8859_v46 = vld [vmem:[#allocation17 + $0x108] sm:$0xff] }
 0x72c   :  { %v8709_v22 = vpop.f32.mrf.mxu1  ;;  %10882 = vmatprep.subr.bf16.mxu0 %v16249_v12  ;;  %v8863_v12 = vld [vmem:[#allocation17 + $0x128] sm:$0xff] }
 0x72d   :  { %v8710_v31 = vadd.f32 %v8709_v22, %v8669_v39  ;;  %v16019_v15 = vcombine.high %v8859_v46, %v8863_v12  ;;  %v8855_v39 = vld [vmem:[#allocation17 + $0xe8] sm:$0xff] }
 0x72e   :  { %v8711_v59 = vpop.f32.mrf.mxu1  ;;  %v16011_v22 = vcombine.high %v8851_v20, %v8855_v39  ;;  %v16010_v3 = vcombine.low %v8851_v20, %v8855_v39  ;;  %v8983_v20 = vld [vmem:[#allocation17 + $0x4e8] sm:$0xff]  ;;  %v16082_v39 = vcombine.low %v8923_v21, %v8927_v11 }
 0x72f   :  { %v8798_v25 = vsub.f32 0.0, %v8710_v31  ;;  %v8712_v58 = vadd.f32 %v8711_v59, %v8671_v18  ;;  %10883 = vmatpush1.bf16.msra.mxu0 %v16248_v55  ;;  %v16018_v55 = vcombine.low %v8859_v46, %v8863_v12  ;;  %v8835_v59 = vld [vmem:[#allocation17 + $0x48] sm:$0xff] }
 0x730   :  { %v8713_v45 = vpop.f32.mrf.mxu1  ;;  %10884 = vmatprep.subr.bf16.mxu0 %v16241_v32  ;;  %v8843_v32 = vld [vmem:[#allocation17 + $0x88] sm:$0xff] }
 0x731   :  { %v8805_v41 = vmul.f32 1.442695, %v8798_v25  ;;  %v8799_v8 = vsub.f32 0.0, %v8712_v58  ;;  %v16003_v18 = vcombine.high %v8843_v32, %v8847_v50  ;;  %v8839_v25 = vld [vmem:[#allocation17 + $0x68] sm:$0xff]  ;;  %v16002_v58 = vcombine.low %v8843_v32, %v8847_v50 }
 0x732   :  { %v8714_v34 = vpop.f32.mrf.mxu1  ;;  %v8827_v45 = vld [vmem:[#allocation17 + $0x8] sm:$0xff] }
 0x733   :  { %18623 = vpow2.f32 %v8805_v41  ;;  %v8807_v44 = vmul.f32 1.442695, %v8799_v8  ;;  %10885 = vmatpush1.bf16.msra.mxu0 %v16240_v23  ;;  %v15995_v23 = vcombine.high %v8835_v59, %v8839_v25  ;;  %v15994_v41 = vcombine.low %v8835_v59, %v8839_v25  ;;  %v8947_v34 = vld [vmem:[#allocation17 + $0x3c8] sm:$0xff] }
 0x734   :  { %10952 = vmatprep.subr.bf16.mxu0 %v16171_v28  ;;  %v8831_v28 = vld [vmem:[#allocation17 + $0x28] sm:$0xff] }
 0x735   :  { %18625 = vpow2.f32 %v8807_v44  ;;  %v15987_v8 = vcombine.high %v8827_v45, %v8831_v28  ;;  %v8951_v44 = vld [vmem:[#allocation17 + $0x3e8] sm:$0xff] }
 0x736   :  { %v8907_v50 = vld [vmem:[#allocation17 + $0x288] sm:$0xff] }
 0x740   :  { %v18624_v0 = vpop.eup %18623 }
 0x741   :  { %v8813_v40 = vadd.f32 1.0, %v18624_v0  ;;  %v15986_v0 = vcombine.low %v8827_v45, %v8831_v28  ;;  %v8903_v45 = vld [vmem:[#allocation17 + $0x268] sm:$0xff] }
 0x742   :  { %v18626_v17 = vpop.eup %18625  ;;  %v8963_v28 = vld [vmem:[#allocation17 + $0x448] sm:$0xff] }
 0x743   :  { %v8814_v56 = vadd.f32 1.0, %v18626_v17  ;;  %18627 = vrcp.f32 %v8813_v40  ;;  %v16107_v40 = vcombine.high %v8947_v34, %v8951_v44  ;;  %v8939_v17 = vld [vmem:[#allocation17 + $0x388] sm:$0xff] }
 0x745   :  { %18629 = vrcp.f32 %v8814_v56  ;;  %v8943_v56 = vld [vmem:[#allocation17 + $0x3a8] sm:$0xff] }
 0x74c   :  { %v16878_v61 = vpop.f32.mrf.mxu1 }
 0x74e   :  { %v16879_v19 = vpop.f32.mrf.mxu1 }
 0x74f   :  { %v16880_v26 = vadd.f32 %v16879_v19, %v16878_v61  ;;  %v9007_v61 = vld [vmem:[#allocation17 + $0x5a8] sm:$0xff]  ;;  %v16106_v19 = vcombine.low %v8947_v34, %v8951_v44 }
 0x750   :  { %v16881_v47 = vpop.f32.mrf.mxu1  ;;  %v18628_v42 = vpop.eup %18627 }
 0x751   :  { %v8791_v49 = vadd.f32 %v16880_v26, %v8751_v37  ;;  %v19471_v53 = vpack.c.bf16 %v18628_v42, %v18628_v42  ;;  %v16099_v47 = vcombine.high %v8939_v17, %v8943_v56  ;;  %v16163_v42 = vcombine.high %v9003_v29, %v9007_v61 }
 0x752   :  { %v18630_v30 = vpop.eup %18629  ;;  %v16882_v60 = vpop.f32.mrf.mxu1 }
 0x753   :  { %v8800_v62 = vsub.f32 0.0, %v8791_v49  ;;  %v19469_v1 = vpack.c.bf16 %v18630_v30, %v18630_v30  ;;  %v8931_v49 = vld [vmem:[#allocation17 + $0x348] sm:$0xff]  ;;  %v16098_v60 = vcombine.low %v8939_v17, %v8943_v56 }
 0x754   :  { %v8999_v30 = vld [vmem:[#allocation17 + $0x568] sm:$0xff]  ;;  %v16090_v46 = vcombine.low %v8931_v49, %v8935_v16 }
 0x755   :  { %v8809_v10 = vmul.f32 1.442695, %v8800_v62  ;;  %10861 = vmatprep.mubr.bf16.mxu1 %v19469_v1  ;;  %v16162_v62 = vcombine.low %v9003_v29, %v9007_v61  ;;  %v16154_v12 = vcombine.low %v8995_v52, %v8999_v30  ;;  %v8895_v17 = vld [vmem:[#allocation17 + $0x228] sm:$0xff] }
 0x756   :  { %10862 = vmatmul.mubr.bf16.vlgmr.msra.gmra.mxu1 %v19471_v53  ;;  %v8955_v56 = vld [vmem:[#allocation17 + $0x408] sm:$0xff] }
 0x757   :  { %18631 = vpow2.f32 %v8809_v10  ;;  %10912 = vmatpush1.bf16.msra.mxu1 %v16042_v54  ;;  %10943 = vmatprep.mubr.bf16.mxu1 %v19451_v35  ;;  %v16155_v10 = vcombine.high %v8995_v52, %v8999_v30  ;;  %v8959_v29 = vld [vmem:[#allocation17 + $0x428] sm:$0xff] }
 0x758   :  { %10913 = vmatprep.subr.bf16.mxu1 %v16035_v33  ;;  %v16091_v33 = vcombine.high %v8931_v49, %v8935_v16  ;;  %v9143_v49 = vld [vmem:[#allocation17 + $0x9e8] sm:$0xff] }
 0x759   :  { %v9075_v16 = vld [vmem:[#allocation17 + $0x7c8] sm:$0xff] }
 0x75a   :  { %v9079_v52 = vld [vmem:[#allocation17 + $0x7e8] sm:$0xff] }
 0x75b   :  { %10914 = vmatpush1.bf16.msra.mxu1 %v16034_v24  ;;  %v8987_v24 = vld [vmem:[#allocation17 + $0x508] sm:$0xff] }
 0x75c   :  { %10915 = vmatprep.subr.bf16.mxu1 %v16027_v2  ;;  %v8991_v2 = vld [vmem:[#allocation17 + $0x528] sm:$0xff] }
 0x75d   :  { %v16147_v27 = vcombine.high %v8987_v24, %v8991_v2 }
 0x75f   :  { %10916 = vmatpush1.bf16.msra.mxu1 %v16026_v7  ;;  %v16083_v7 = vcombine.high %v8923_v21, %v8927_v11  ;;  %v9135_v21 = vld [vmem:[#allocation17 + $0x9a8] sm:$0xff] }
 0x760   :  { %10917 = vmatprep.subr.bf16.mxu1 %v16019_v15  ;;  %v8979_v15 = vld [vmem:[#allocation17 + $0x4c8] sm:$0xff] }
 0x761   :  { %v16139_v32 = vcombine.high %v8979_v15, %v8983_v20  ;;  %v16138_v59 = vcombine.low %v8979_v15, %v8983_v20  ;;  %v9067_v11 = vld [vmem:[#allocation17 + $0x788] sm:$0xff] }
 0x762   :  { %v9063_v15 = vld [vmem:[#allocation17 + $0x768] sm:$0xff] }
 0x763   :  { %10918 = vmatpush1.bf16.msra.mxu1 %v16018_v55  ;;  %v16146_v55 = vcombine.low %v8987_v24, %v8991_v2  ;;  %v9071_v24 = vld [vmem:[#allocation17 + $0x7a8] sm:$0xff] }
 0x764   :  { %v18632_v54 = vpop.eup %18631  ;;  %10919 = vmatprep.subr.bf16.mxu1 %v16011_v22 }
 0x765   :  { %v8815_v31 = vadd.f32 1.0, %v18632_v54  ;;  %v8971_v54 = vld [vmem:[#allocation17 + $0x488] sm:$0xff] }
 0x767   :  { %18633 = vrcp.f32 %v8815_v31  ;;  %10920 = vmatpush1.bf16.msra.mxu1 %v16010_v3  ;;  %v8911_v3 = vld [vmem:[#allocation17 + $0x2a8] sm:$0xff] }
 0x768   :  { %10921 = vmatprep.subr.bf16.mxu1 %v16003_v18  ;;  %v8975_v18 = vld [vmem:[#allocation17 + $0x4a8] sm:$0xff]  ;;  %v16067_v25 = vcombine.high %v8907_v50, %v8911_v3 }
 0x769   :  { %v16130_v34 = vcombine.low %v8971_v54, %v8975_v18 }
 0x76b   :  { %10922 = vmatpush1.bf16.msra.mxu1 %v16002_v58  ;;  %v16131_v58 = vcombine.high %v8971_v54, %v8975_v18  ;;  %v9055_v54 = vld [vmem:[#allocation17 + $0x728] sm:$0xff] }
 0x76c   :  { %10923 = vmatprep.subr.bf16.mxu1 %v15995_v23  ;;  %v8899_v23 = vld [vmem:[#allocation17 + $0x248] sm:$0xff] }
 0x76d   :  { %v16059_v44 = vcombine.high %v8899_v23, %v8903_v45  ;;  %v16058_v61 = vcombine.low %v8899_v23, %v8903_v45  ;;  %v9111_v23 = vld [vmem:[#allocation17 + $0x8e8] sm:$0xff] }
 0x76e   :  { %v9043_v45 = vld [vmem:[#allocation17 + $0x6c8] sm:$0xff] }
 0x76f   :  { %10924 = vmatpush1.bf16.msra.mxu1 %v15994_v41  ;;  %v8967_v41 = vld [vmem:[#allocation17 + $0x468] sm:$0xff] }
 0x770   :  { %10925 = vmatprep.subr.bf16.mxu1 %v15987_v8  ;;  %v16066_v8 = vcombine.low %v8907_v50, %v8911_v3  ;;  %v9119_v50 = vld [vmem:[#allocation17 + $0x928] sm:$0xff] }
 0x771   :  { %v9051_v3 = vld [vmem:[#allocation17 + $0x708] sm:$0xff] }
 0x773   :  { %10926 = vmatpush1.bf16.msra.mxu1 %v15986_v0  ;;  %v16123_v0 = vcombine.high %v8963_v28, %v8967_v41 }
 0x774   :  { %v18634_v37 = vpop.eup %18633  ;;  %10927 = vmatprep.subr.bf16.mxu1 %v16107_v40  ;;  %v8891_v40 = vld [vmem:[#allocation17 + $0x208] sm:$0xff] }
 0x775   :  { %v19479_v26 = vpack.c.bf16 %v18634_v37, %v18634_v37  ;;  %v16051_v37 = vcombine.high %v8891_v40, %v8895_v17  ;;  %v16050_v30 = vcombine.low %v8891_v40, %v8895_v17  ;;  %v9103_v40 = vld [vmem:[#allocation17 + $0x8a8] sm:$0xff] }
 0x776   :  { %v9035_v17 = vld [vmem:[#allocation17 + $0x688] sm:$0xff] }
 0x777   :  { %10928 = vmatpush2.bf16.msra.mxu1 %v16106_v19  ;;  %10903 = vmatmul.mubr.bf16.vlgmr.msra.gmra.mxu0 %v19479_v26  ;;  %v16122_v19 = vcombine.low %v8963_v28, %v8967_v41  ;;  %v9047_v28 = vld [vmem:[#allocation17 + $0x6e8] sm:$0xff] }
 0x778   :  { %10953 = vmatpush1.bf16.msra.mxu0 %v16170_v9  ;;  %10984 = vmatprep.mubr.bf16.mxu0 %v19469_v1  ;;  %v8919_v9 = vld [vmem:[#allocation17 + $0x2e8] sm:$0xff] }
 0x779   :  { %10929 = vmatprep.subr.bf16.mxu1 %v16099_v47  ;;  %10954 = vmatprep.subr.bf16.mxu0 %v16163_v42  ;;  %v16075_v22 = vcombine.high %v8915_v63, %v8919_v9  ;;  %v16074_v31 = vcombine.low %v8915_v63, %v8919_v9  ;;  %v16115_v47 = vcombine.high %v8955_v56, %v8959_v29  ;;  %v9139_v42 = vld [vmem:[#allocation17 + $0x9c8] sm:$0xff] }
 0x77a   :  { %v16298_v2 = vcombine.low %v9139_v42, %v9143_v49  ;;  %v9127_v63 = vld [vmem:[#allocation17 + $0x968] sm:$0xff] }
 0x77b   :  { %10930 = vmatpush2.bf16.msra.mxu1 %v16098_v60  ;;  %v16114_v60 = vcombine.low %v8955_v56, %v8959_v29  ;;  %v9059_v9 = vld [vmem:[#allocation17 + $0x748] sm:$0xff] }
 0x77c   :  { %10955 = vmatpush1.bf16.msra.mxu0 %v16162_v62  ;;  %10931 = vmatprep.subr.bf16.mxu1 %v16091_v33  ;;  %v16299_v62 = vcombine.high %v9139_v42, %v9143_v49  ;;  %v16235_v33 = vcombine.high %v9075_v16, %v9079_v52  ;;  %v9039_v56 = vld [vmem:[#allocation17 + $0x6a8] sm:$0xff] }
 0x77d   :  { %10956 = vmatprep.subr.bf16.mxu0 %v16155_v10  ;;  %v9131_v10 = vld [vmem:[#allocation17 + $0x988] sm:$0xff] }
 0x77e   :  { %v16290_v20 = vcombine.low %v9131_v10, %v9135_v21  ;;  %v9095_v42 = vld [vmem:[#allocation17 + $0x868] sm:$0xff] }
 0x77f   :  { %10932 = vmatpush2.bf16.msra.mxu1 %v16090_v46  ;;  %v16234_v46 = vcombine.low %v9075_v16, %v9079_v52  ;;  %v9027_v49 = vld [vmem:[#allocation17 + $0x648] sm:$0xff] }
 0x780   :  { %10957 = vmatpush1.bf16.msra.mxu0 %v16154_v12  ;;  %10933 = vmatprep.subr.bf16.mxu1 %v16083_v7  ;;  %v16291_v12 = vcombine.high %v9131_v10, %v9135_v21  ;;  %v16227_v7 = vcombine.high %v9067_v11, %v9071_v24  ;;  %v9031_v16 = vld [vmem:[#allocation17 + $0x668] sm:$0xff] }
 0x781   :  { %10958 = vmatprep.subr.bf16.mxu0 %v16147_v27  ;;  %v9123_v27 = vld [vmem:[#allocation17 + $0x948] sm:$0xff] }
 0x782   :  { %v16282_v18 = vcombine.low %v9123_v27, %v9127_v63  ;;  %v9087_v10 = vld [vmem:[#allocation17 + $0x828] sm:$0xff] }
 0x783   :  { %10934 = vmatpush2.bf16.msra.mxu1 %v16082_v39  ;;  %v16226_v39 = vcombine.low %v9067_v11, %v9071_v24  ;;  %v9019_v21 = vld [vmem:[#allocation17 + $0x608] sm:$0xff] }
 0x784   :  { %10959 = vmatpush1.bf16.msra.mxu0 %v16146_v55  ;;  %10935 = vmatprep.subr.bf16.mxu1 %v16075_v22  ;;  %v16283_v55 = vcombine.high %v9123_v27, %v9127_v63  ;;  %v16219_v22 = vcombine.high %v9059_v9, %v9063_v15  ;;  %v9023_v11 = vld [vmem:[#allocation17 + $0x628] sm:$0xff]  ;;  %v9016_v27 = vld [vmem:[#allocation17 + $0x5f0] sm:$0xff] }
 0x785   :  { %10960 = vmatprep.subr.bf16.mxu0 %v16139_v32  ;;  %v9115_v32 = vld [vmem:[#allocation17 + $0x908] sm:$0xff]  ;;  %v8884_v63 = vld [vmem:[#allocation17 + $0x1d0] sm:$0xff] }
 0x786   :  { %v16274_v41 = vcombine.low %v9115_v32, %v9119_v50 }
 0x787   :  { %10936 = vmatpush2.bf16.msra.mxu1 %v16074_v31  ;;  %v16218_v31 = vcombine.low %v9059_v9, %v9063_v15  ;;  %v8888_v9 = vld [vmem:[#allocation17 + $0x1f0] sm:$0xff] }
 0x788   :  { %10961 = vmatpush1.bf16.msra.mxu0 %v16138_v59  ;;  %10937 = vmatprep.subr.bf16.mxu1 %v16067_v25  ;;  %v16275_v59 = vcombine.high %v9115_v32, %v9119_v50  ;;  %v16211_v25 = vcombine.high %v9051_v3, %v9055_v54  ;;  %v9008_v32 = vld [vmem:[#allocation17 + $0x5b0] sm:$0xff] }
 0x789   :  { %10962 = vmatprep.subr.bf16.mxu0 %v16131_v58  ;;  %v9107_v58 = vld [vmem:[#allocation17 + $0x8c8] sm:$0xff] }
 0x78a   :  { %v16266_v29 = vcombine.low %v9107_v58, %v9111_v23 }
 0x78b   :  { %10938 = vmatpush2.bf16.msra.mxu1 %v16066_v8  ;;  %v16210_v8 = vcombine.low %v9051_v3, %v9055_v54  ;;  %v8876_v3 = vld [vmem:[#allocation17 + $0x190] sm:$0xff] }
 0x78c   :  { %10963 = vmatpush1.bf16.msra.mxu0 %v16130_v34  ;;  %10939 = vmatprep.subr.bf16.mxu1 %v16059_v44  ;;  %v16267_v34 = vcombine.high %v9107_v58, %v9111_v23  ;;  %v16203_v44 = vcombine.high %v9043_v45, %v9047_v28  ;;  %v8880_v54 = vld [vmem:[#allocation17 + $0x1b0] sm:$0xff] }
 0x78d   :  { %10964 = vmatprep.subr.bf16.mxu0 %v16123_v0  ;;  %v9099_v0 = vld [vmem:[#allocation17 + $0x888] sm:$0xff]  ;;  %v16037_v58 = vcombine.high %v8876_v3, %v8880_v54  ;;  %v8868_v23 = vld [vmem:[#allocation17 + $0x150] sm:$0xff] }
 0x78e   :  { %v16258_v52 = vcombine.low %v9099_v0, %v9103_v40 }
 0x78f   :  { %10940 = vmatpush2.bf16.msra.mxu1 %v16058_v61  ;;  %v16202_v61 = vcombine.low %v9043_v45, %v9047_v28  ;;  %v8872_v45 = vld [vmem:[#allocation17 + $0x170] sm:$0xff] }
 0x790   :  { %10965 = vmatpush1.bf16.msra.mxu0 %v16122_v19  ;;  %10941 = vmatprep.subr.bf16.mxu1 %v16051_v37  ;;  %v16259_v19 = vcombine.high %v9099_v0, %v9103_v40  ;;  %v16195_v37 = vcombine.high %v9035_v17, %v9039_v56  ;;  %v8992_v0 = vld [vmem:[#allocation17 + $0x530] sm:$0xff] }
 0x791   :  { %10966 = vmatprep.subr.bf16.mxu0 %v16115_v47  ;;  %v9091_v47 = vld [vmem:[#allocation17 + $0x848] sm:$0xff]  ;;  %v8860_v40 = vld [vmem:[#allocation17 + $0x110] sm:$0xff] }
 0x792   :  { %v16250_v24 = vcombine.low %v9091_v47, %v9095_v42 }
 0x793   :  { %10942 = vmatpush2.bf16.msra.mxu1 %v16050_v30  ;;  %v16194_v30 = vcombine.low %v9035_v17, %v9039_v56  ;;  %v8864_v17 = vld [vmem:[#allocation17 + $0x130] sm:$0xff] }
 0x794   :  { %10967 = vmatpush1.bf16.msra.mxu0 %v16114_v60  ;;  %10993 = vmatprep.subr.bf16.mxu1 %v16299_v62  ;;  %v16251_v60 = vcombine.high %v9091_v47, %v9095_v42  ;;  %v16187_v62 = vcombine.high %v9027_v49, %v9031_v16  ;;  %v8984_v47 = vld [vmem:[#allocation17 + $0x4f0] sm:$0xff] }
 0x795   :  { %10968 = vmatprep.subr.bf16.mxu0 %v16235_v33  ;;  %v9083_v33 = vld [vmem:[#allocation17 + $0x808] sm:$0xff]  ;;  %v8852_v42 = vld [vmem:[#allocation17 + $0xd0] sm:$0xff] }
 0x796   :  { %10944 = vmatmul.mubr.bf16.vlgmr.msra.gmra.mxu1 %v19453_v14  ;;  %v16242_v15 = vcombine.low %v9083_v33, %v9087_v10 }
 0x797   :  { %10994 = vmatpush1.bf16.msra.mxu1 %v16298_v2  ;;  %11025 = vmatprep.mubr.bf16.mxu1 %v19017_v38  ;;  %v16186_v2 = vcombine.low %v9027_v49, %v9031_v16  ;;  %v8856_v49 = vld [vmem:[#allocation17 + $0xf0] sm:$0xff] }
 0x798   :  { %10969 = vmatpush2.bf16.msra.mxu0 %v16234_v46  ;;  %10995 = vmatprep.subr.bf16.mxu1 %v16291_v12  ;;  %v16243_v46 = vcombine.high %v9083_v33, %v9087_v10  ;;  %v16179_v12 = vcombine.high %v9019_v21, %v9023_v11  ;;  %v8976_v33 = vld [vmem:[#allocation17 + $0x4b0] sm:$0xff] }
 0x799   :  { %10970 = vmatprep.subr.bf16.mxu0 %v16227_v7  ;;  %v9012_v7 = vld [vmem:[#allocation17 + $0x5d0] sm:$0xff] }
 0x79a   :  { %v16172_v50 = vcombine.low %v9012_v7, %v9016_v27  ;;  %v8844_v10 = vld [vmem:[#allocation17 + $0x90] sm:$0xff] }
 0x79b   :  { %10996 = vmatpush1.bf16.msra.mxu1 %v16290_v20  ;;  %v16178_v20 = vcombine.low %v9019_v21, %v9023_v11  ;;  %v8848_v21 = vld [vmem:[#allocation17 + $0xb0] sm:$0xff] }
 0x79c   :  { %10971 = vmatpush2.bf16.msra.mxu0 %v16226_v39  ;;  %10997 = vmatprep.subr.bf16.mxu1 %v16283_v55  ;;  %v16173_v39 = vcombine.high %v9012_v7, %v9016_v27  ;;  %v16045_v55 = vcombine.high %v8884_v63, %v8888_v9  ;;  %v8968_v7 = vld [vmem:[#allocation17 + $0x470] sm:$0xff] }
 0x79d   :  { %10972 = vmatprep.subr.bf16.mxu0 %v16219_v22  ;;  %v9004_v22 = vld [vmem:[#allocation17 + $0x590] sm:$0xff] }
 0x79e   :  { %v16164_v28 = vcombine.low %v9004_v22, %v9008_v32  ;;  %v8836_v27 = vld [vmem:[#allocation17 + $0x50] sm:$0xff] }
 0x79f   :  { %10998 = vmatpush1.bf16.msra.mxu1 %v16282_v18  ;;  %v16044_v18 = vcombine.low %v8884_v63, %v8888_v9  ;;  %v8840_v63 = vld [vmem:[#allocation17 + $0x70] sm:$0xff] }
 0x7a0   :  { %10973 = vmatpush2.bf16.msra.mxu0 %v16218_v31  ;;  %10999 = vmatprep.subr.bf16.mxu1 %v16275_v59  ;;  %v16165_v31 = vcombine.high %v9004_v22, %v9008_v32  ;;  %v8996_v59 = vld [vmem:[#allocation17 + $0x550] sm:$0xff] }
 0x7a1   :  { %10974 = vmatprep.subr.bf16.mxu0 %v16211_v25  ;;  %v9000_v25 = vld [vmem:[#allocation17 + $0x570] sm:$0xff] }
 0x7a2   :  { %v16156_v56 = vcombine.low %v8996_v59, %v9000_v25  ;;  %v8960_v22 = vld [vmem:[#allocation17 + $0x430] sm:$0xff] }
 0x7a3   :  { %11000 = vmatpush1.bf16.msra.mxu1 %v16274_v41  ;;  %v16036_v41 = vcombine.low %v8876_v3, %v8880_v54  ;;  %v8828_v32 = vld [vmem:[#allocation17 + $0x10] sm:$0xff]  ;;  %v15996_v54 = vcombine.low %v8836_v27, %v8840_v63 }
 0x7a4   :  { %10975 = vmatpush2.bf16.msra.mxu0 %v16210_v8  ;;  %11001 = vmatprep.subr.bf16.mxu1 %v16267_v34  ;;  %v16157_v8 = vcombine.high %v8996_v59, %v9000_v25  ;;  %v16029_v34 = vcombine.high %v8868_v23, %v8872_v45  ;;  %v9076_v59 = vld [vmem:[#allocation17 + $0x7d0] sm:$0xff] }
 0x7a5   :  { %10976 = vmatprep.subr.bf16.mxu0 %v16203_v44  ;;  %v8988_v44 = vld [vmem:[#allocation17 + $0x510] sm:$0xff] }
 0x7a6   :  { %v16148_v16 = vcombine.low %v8988_v44, %v8992_v0  ;;  %v9080_v25 = vld [vmem:[#allocation17 + $0x7f0] sm:$0xff] }
 0x7a7   :  { %11002 = vmatpush1.bf16.msra.mxu1 %v16266_v29  ;;  %v16028_v29 = vcombine.low %v8868_v23, %v8872_v45  ;;  %v8952_v23 = vld [vmem:[#allocation17 + $0x3f0] sm:$0xff] }
 0x7a8   :  { %10977 = vmatpush2.bf16.msra.mxu0 %v16202_v61  ;;  %11003 = vmatprep.subr.bf16.mxu1 %v16259_v19  ;;  %v16149_v61 = vcombine.high %v8988_v44, %v8992_v0  ;;  %v16021_v19 = vcombine.high %v8860_v40, %v8864_v17  ;;  %v9072_v44 = vld [vmem:[#allocation17 + $0x7b0] sm:$0xff] }
 0x7a9   :  { %10978 = vmatprep.subr.bf16.mxu0 %v16195_v37  ;;  %v8980_v37 = vld [vmem:[#allocation17 + $0x4d0] sm:$0xff] }
 0x7aa   :  { %v16140_v11 = vcombine.low %v8980_v37, %v8984_v47  ;;  %v8940_v0 = vld [vmem:[#allocation17 + $0x390] sm:$0xff] }
 0x7ab   :  { %11004 = vmatpush1.bf16.msra.mxu1 %v16258_v52  ;;  %v16020_v52 = vcombine.low %v8860_v40, %v8864_v17  ;;  %v8944_v40 = vld [vmem:[#allocation17 + $0x3b0] sm:$0xff]  ;;  %v16236_v17 = vcombine.low %v9076_v59, %v9080_v25 }
 0x7ac   :  { %10979 = vmatpush2.bf16.msra.mxu0 %v16194_v30  ;;  %11005 = vmatprep.subr.bf16.mxu1 %v16251_v60  ;;  %v16141_v30 = vcombine.high %v8980_v37, %v8984_v47  ;;  %v16013_v60 = vcombine.high %v8852_v42, %v8856_v49  ;;  %v9064_v37 = vld [vmem:[#allocation17 + $0x770] sm:$0xff] }
 0x7ad   :  { %10980 = vmatprep.subr.bf16.mxu0 %v16187_v62  ;;  %v8972_v62 = vld [vmem:[#allocation17 + $0x490] sm:$0xff] }
 0x7ae   :  { %v16132_v9 = vcombine.low %v8972_v62, %v8976_v33 }
 0x7af   :  { %11006 = vmatpush1.bf16.msra.mxu1 %v16250_v24  ;;  %v16012_v24 = vcombine.low %v8852_v42, %v8856_v49  ;;  %v8932_v42 = vld [vmem:[#allocation17 + $0x350] sm:$0xff] }
 0x7b0   :  { %10981 = vmatpush2.bf16.msra.mxu0 %v16186_v2  ;;  %11007 = vmatprep.subr.bf16.mxu1 %v16243_v46  ;;  %v16133_v2 = vcombine.high %v8972_v62, %v8976_v33  ;;  %v16005_v46 = vcombine.high %v8844_v10, %v8848_v21  ;;  %v8936_v49 = vld [vmem:[#allocation17 + $0x370] sm:$0xff] }
 0x7b1   :  { %10982 = vmatprep.subr.bf16.mxu0 %v16179_v12  ;;  %v8964_v12 = vld [vmem:[#allocation17 + $0x450] sm:$0xff]  ;;  %v16093_v62 = vcombine.high %v8932_v42, %v8936_v49 }
 0x7b2   :  { %v16124_v3 = vcombine.low %v8964_v12, %v8968_v7  ;;  %v9052_v33 = vld [vmem:[#allocation17 + $0x710] sm:$0xff] }
 0x7b3   :  { %11008 = vmatpush1.bf16.msra.mxu1 %v16242_v15  ;;  %v16004_v15 = vcombine.low %v8844_v10, %v8848_v21  ;;  %v9056_v10 = vld [vmem:[#allocation17 + $0x730] sm:$0xff] }
 0x7b4   :  { %10983 = vmatpush2.bf16.msra.mxu0 %v16178_v20  ;;  %11075 = vmatprep.subr.bf16.mxu1 %v16173_v39  ;;  %v16125_v20 = vcombine.high %v8964_v12, %v8968_v7  ;;  %v15997_v39 = vcombine.high %v8836_v27, %v8840_v63  ;;  %v16092_v12 = vcombine.low %v8932_v42, %v8936_v49  ;;  %v9044_v63 = vld [vmem:[#allocation17 + $0x6d0] sm:$0xff]  ;;  %v8885_v49 = vld [vmem:[#allocation17 + $0x1d8] sm:$0xff] }
 0x7b5   :  { %11034 = vmatprep.subr.bf16.mxu0 %v16045_v55  ;;  %v8956_v55 = vld [vmem:[#allocation17 + $0x410] sm:$0xff]  ;;  %v16213_v7 = vcombine.high %v9052_v33, %v9056_v10 }
 0x7b6   :  { %11026 = vmatmul.mubr.bf16.vlgmr.msra.gmra.mxu1 %v19479_v26  ;;  %v16116_v45 = vcombine.low %v8956_v55, %v8960_v22 }
 0x7b7   :  { %10985 = vmatmul.mubr.bf16.vlgmr.msra.gmra.mxu0 %v19471_v53  ;;  %11076 = vmatpush1.bf16.msra.mxu1 %v16172_v50  ;;  %v8832_v50 = vld [vmem:[#allocation17 + $0x30] sm:$0xff] }
 0x7b8   :  { %11107 = vmatprep.mubr.bf16.mxu1 %v19469_v1  ;;  %11035 = vmatpush1.bf16.msra.mxu0 %v16044_v18  ;;  %v16117_v18 = vcombine.high %v8956_v55, %v8960_v22 }
 0x7b9   :  { %11066 = vmatprep.mubr.bf16.mxu0 %v19451_v35  ;;  %11077 = vmatprep.subr.bf16.mxu1 %v16165_v31  ;;  %v15989_v31 = vcombine.high %v8828_v32, %v8832_v50 }
 0x7ba   :  { %11036 = vmatprep.subr.bf16.mxu0 %v16037_v58  ;;  %v8948_v58 = vld [vmem:[#allocation17 + $0x3d0] sm:$0xff] }
 0x7bb   :  { %11078 = vmatpush1.bf16.msra.mxu1 %v16164_v28  ;;  %v15988_v28 = vcombine.low %v8828_v32, %v8832_v50  ;;  %v9036_v50 = vld [vmem:[#allocation17 + $0x690] sm:$0xff] }
 0x7bc   :  { %11037 = vmatpush1.bf16.msra.mxu0 %v16036_v41  ;;  %11079 = vmatprep.subr.bf16.mxu1 %v16157_v8  ;;  %v16237_v41 = vcombine.high %v9076_v59, %v9080_v25  ;;  %v16109_v8 = vcombine.high %v8948_v58, %v8952_v23 }
 0x7bd   :  { %11038 = vmatprep.subr.bf16.mxu0 %v16029_v34  ;;  %v9068_v34 = vld [vmem:[#allocation17 + $0x790] sm:$0xff] }
 0x7bf   :  { %11080 = vmatpush1.bf16.msra.mxu1 %v16156_v56  ;;  %v16108_v56 = vcombine.low %v8948_v58, %v8952_v23  ;;  %v9028_v23 = vld [vmem:[#allocation17 + $0x650] sm:$0xff] }
 0x7c0   :  { %11039 = vmatpush1.bf16.msra.mxu0 %v16028_v29  ;;  %11081 = vmatprep.subr.bf16.mxu1 %v16149_v61  ;;  %v16229_v29 = vcombine.high %v9068_v34, %v9072_v44  ;;  %v16101_v61 = vcombine.high %v8940_v0, %v8944_v40 }
 0x7c1   :  { %11040 = vmatprep.subr.bf16.mxu0 %v16021_v19  ;;  %v9060_v19 = vld [vmem:[#allocation17 + $0x750] sm:$0xff] }
 0x7c3   :  { %11082 = vmatpush1.bf16.msra.mxu1 %v16148_v16  ;;  %v16228_v16 = vcombine.low %v9068_v34, %v9072_v44 }
 0x7c4   :  { %11041 = vmatpush1.bf16.msra.mxu0 %v16020_v52  ;;  %11083 = vmatprep.subr.bf16.mxu1 %v16141_v30  ;;  %v16100_v30 = vcombine.low %v8940_v0, %v8944_v40  ;;  %v9020_v40 = vld [vmem:[#allocation17 + $0x610] sm:$0xff] }
 0x7c5   :  { %11042 = vmatprep.subr.bf16.mxu0 %v16013_v60  ;;  %v16221_v60 = vcombine.high %v9060_v19, %v9064_v37 }
 0x7c7   :  { %11084 = vmatpush1.bf16.msra.mxu1 %v16140_v11  ;;  %v8924_v11 = vld [vmem:[#allocation17 + $0x310] sm:$0xff] }
 0x7c8   :  { %11043 = vmatpush1.bf16.msra.mxu0 %v16012_v24  ;;  %11085 = vmatprep.subr.bf16.mxu1 %v16133_v2  ;;  %v8928_v24 = vld [vmem:[#allocation17 + $0x330] sm:$0xff]  ;;  %v16220_v2 = vcombine.low %v9060_v19, %v9064_v37 }
 0x7c9   :  { %11044 = vmatprep.subr.bf16.mxu0 %v16005_v46  ;;  %v16085_v27 = vcombine.high %v8924_v11, %v8928_v24  ;;  %v16084_v55 = vcombine.low %v8924_v11, %v8928_v24  ;;  %v8877_v11 = vld [vmem:[#allocation17 + $0x198] sm:$0xff] }
 0x7ca   :  { %v8881_v24 = vld [vmem:[#allocation17 + $0x1b8] sm:$0xff] }
 0x7cb   :  { %11086 = vmatpush1.bf16.msra.mxu1 %v16132_v9  ;;  %v9048_v9 = vld [vmem:[#allocation17 + $0x6f0] sm:$0xff] }
 0x7cc   :  { %11045 = vmatpush1.bf16.msra.mxu0 %v16004_v15  ;;  %11087 = vmatprep.subr.bf16.mxu1 %v16125_v20  ;;  %v8916_v15 = vld [vmem:[#allocation17 + $0x2d0] sm:$0xff]  ;;  %v16205_v22 = vcombine.high %v9044_v63, %v9048_v9 }
 0x7cd   :  { %11046 = vmatprep.subr.bf16.mxu0 %v15997_v39  ;;  %v8920_v20 = vld [vmem:[#allocation17 + $0x2f0] sm:$0xff]  ;;  %v16212_v39 = vcombine.low %v9052_v33, %v9056_v10 }
 0x7ce   :  { %v16077_v32 = vcombine.high %v8916_v15, %v8920_v20  ;;  %v16076_v59 = vcombine.low %v8916_v15, %v8920_v20  ;;  %v8873_v15 = vld [vmem:[#allocation17 + $0x178] sm:$0xff]  ;;  %v9124_v20 = vld [vmem:[#allocation17 + $0x950] sm:$0xff] }
 0x7cf   :  { %11088 = vmatpush1.bf16.msra.mxu1 %v16124_v3  ;;  %v9040_v3 = vld [vmem:[#allocation17 + $0x6b0] sm:$0xff] }
 0x7d0   :  { %11047 = vmatpush1.bf16.msra.mxu0 %v15996_v54  ;;  %11089 = vmatprep.subr.bf16.mxu1 %v16117_v18  ;;  %v8908_v54 = vld [vmem:[#allocation17 + $0x290] sm:$0xff]  ;;  %v16197_v25 = vcombine.high %v9036_v50, %v9040_v3 }
 0x7d1   :  { %11048 = vmatprep.subr.bf16.mxu0 %v15989_v31  ;;  %v8912_v18 = vld [vmem:[#allocation17 + $0x2b0] sm:$0xff]  ;;  %v16204_v31 = vcombine.low %v9044_v63, %v9048_v9  ;;  %v8869_v9 = vld [vmem:[#allocation17 + $0x158] sm:$0xff] }
 0x7d2   :  { %v16069_v58 = vcombine.high %v8908_v54, %v8912_v18  ;;  %v16068_v34 = vcombine.low %v8908_v54, %v8912_v18  ;;  %v8865_v54 = vld [vmem:[#allocation17 + $0x138] sm:$0xff]  ;;  %v9116_v18 = vld [vmem:[#allocation17 + $0x910] sm:$0xff] }
 0x7d3   :  { %11090 = vmatpush1.bf16.msra.mxu1 %v16116_v45  ;;  %v9032_v45 = vld [vmem:[#allocation17 + $0x670] sm:$0xff] }
 0x7d4   :  { %11049 = vmatpush1.bf16.msra.mxu0 %v15988_v28  ;;  %11091 = vmatprep.subr.bf16.mxu1 %v16237_v41  ;;  %v8900_v28 = vld [vmem:[#allocation17 + $0x250] sm:$0xff]  ;;  %v16189_v44 = vcombine.high %v9028_v23, %v9032_v45 }
 0x7d5   :  { %11050 = vmatprep.subr.bf16.mxu0 %v16109_v8  ;;  %v8904_v41 = vld [vmem:[#allocation17 + $0x270] sm:$0xff]  ;;  %v16196_v8 = vcombine.low %v9036_v50, %v9040_v3  ;;  %v8861_v3 = vld [vmem:[#allocation17 + $0x118] sm:$0xff] }
 0x7d6   :  { %v19492_v47 = vpop.f32.mrf.mxu0  ;;  %v16061_v0 = vcombine.high %v8900_v28, %v8904_v41  ;;  %v16060_v19 = vcombine.low %v8900_v28, %v8904_v41  ;;  %v9108_v28 = vld [vmem:[#allocation17 + $0x8d0] sm:$0xff] }
 0x7d7   :  { %11092 = vmatpush2.bf16.msra.mxu1 %v16236_v17  ;;  %v9024_v17 = vld [vmem:[#allocation17 + $0x630] sm:$0xff] }
 0x7d8   :  { %11051 = vmatpush2.bf16.msra.mxu0 %v16108_v56  ;;  %v19494_v52 = vpop.f32.mrf.mxu0  ;;  %11093 = vmatprep.subr.bf16.mxu1 %v16229_v29  ;;  %v8892_v56 = vld [vmem:[#allocation17 + $0x210] sm:$0xff]  ;;  %v16181_v37 = vcombine.high %v9020_v40, %v9024_v17 }
 0x7d9   :  { %11052 = vmatprep.subr.bf16.mxu0 %v16101_v61  ;;  %v8896_v29 = vld [vmem:[#allocation17 + $0x230] sm:$0xff]  ;;  %v16188_v61 = vcombine.low %v9028_v23, %v9032_v45  ;;  %v8853_v23 = vld [vmem:[#allocation17 + $0xd8] sm:$0xff] }
 0x7da   :  { %v10826_v21 = vpop.f32.mrf.mxu0  ;;  %v16053_v42 = vcombine.high %v8892_v56, %v8896_v29  ;;  %v16052_v33 = vcombine.low %v8892_v56, %v8896_v29  ;;  %v8857_v45 = vld [vmem:[#allocation17 + $0xf8] sm:$0xff]  ;;  %v9112_v41 = vld [vmem:[#allocation17 + $0x8f0] sm:$0xff] }
 0x7db   :  { %11094 = vmatpush2.bf16.msra.mxu1 %v16228_v16  ;;  %v8889_v16 = vld [vmem:[#allocation17 + $0x1f8] sm:$0xff]  ;;  %v9100_v56 = vld [vmem:[#allocation17 + $0x890] sm:$0xff] }
 0x7dc   :  { %11053 = vmatpush2.bf16.msra.mxu0 %v16100_v30  ;;  %v10827_v46 = vpop.f32.mrf.mxu0  ;;  %11095 = vmatprep.subr.bf16.mxu1 %v16221_v60  ;;  %v9140_v30 = vld [vmem:[#allocation17 + $0x9d0] sm:$0xff]  ;;  %v16047_v10 = vcombine.high %v8885_v49, %v8889_v16 }
 0x7dd   :  { %11054 = vmatprep.subr.bf16.mxu0 %v16093_v62  ;;  %v9144_v60 = vld [vmem:[#allocation17 + $0x9f0] sm:$0xff]  ;;  %v16180_v62 = vcombine.low %v9020_v40, %v9024_v17  ;;  %v8845_v40 = vld [vmem:[#allocation17 + $0x98] sm:$0xff] }
 0x7de   :  { %v16301_v21 = vcombine.high %v9140_v30, %v9144_v60  ;;  %v9136_v46 = vld [vmem:[#allocation17 + $0x9b0] sm:$0xff]  ;;  %v8849_v17 = vld [vmem:[#allocation17 + $0xb8] sm:$0xff] }
 0x7df   :  { %11096 = vmatpush2.bf16.msra.mxu1 %v16220_v2  ;;  %v9132_v2 = vld [vmem:[#allocation17 + $0x990] sm:$0xff] }
 0x7e0   :  { %11055 = vmatpush2.bf16.msra.mxu0 %v16092_v12  ;;  %11097 = vmatprep.subr.bf16.mxu1 %v16213_v7  ;;  %v16046_v12 = vcombine.low %v8885_v49, %v8889_v16  ;;  %v16300_v7 = vcombine.low %v9140_v30, %v9144_v60  ;;  %v16293_v63 = vcombine.high %v9132_v2, %v9136_v46  ;;  %v9104_v29 = vld [vmem:[#allocation17 + $0x8b0] sm:$0xff]  ;;  %v8837_v49 = vld [vmem:[#allocation17 + $0x58] sm:$0xff] }
 0x7e1   :  { %11056 = vmatprep.subr.bf16.mxu0 %v16085_v27  ;;  %v16039_v27 = vcombine.high %v8877_v11, %v8881_v24  ;;  %v8841_v16 = vld [vmem:[#allocation17 + $0x78] sm:$0xff]  ;;  %v9092_v30 = vld [vmem:[#allocation17 + $0x850] sm:$0xff] }
 0x7e2   :  { %v9096_v60 = vld [vmem:[#allocation17 + $0x870] sm:$0xff] }
 0x7e3   :  { %11098 = vmatpush2.bf16.msra.mxu1 %v16212_v39  ;;  %v9128_v39 = vld [vmem:[#allocation17 + $0x970] sm:$0xff] }
 0x7e4   :  { %11057 = vmatpush2.bf16.msra.mxu0 %v16084_v55  ;;  %11099 = vmatprep.subr.bf16.mxu1 %v16205_v22  ;;  %v16038_v55 = vcombine.low %v8877_v11, %v8881_v24  ;;  %v16292_v22 = vcombine.low %v9132_v2, %v9136_v46  ;;  %v16285_v50 = vcombine.high %v9124_v20, %v9128_v39  ;;  %v8829_v11 = vld [vmem:[#allocation17 + $0x18] sm:$0xff]  ;;  %v9084_v2 = vld [vmem:[#allocation17 + $0x810] sm:$0xff] }
 0x7e5   :  { %11058 = vmatprep.subr.bf16.mxu0 %v16077_v32  ;;  %v16031_v32 = vcombine.high %v8869_v9, %v8873_v15  ;;  %v8833_v24 = vld [vmem:[#allocation17 + $0x38] sm:$0xff]  ;;  %v9088_v46 = vld [vmem:[#allocation17 + $0x830] sm:$0xff] }
 0x7e7   :  { %11100 = vmatpush2.bf16.msra.mxu1 %v16204_v31  ;;  %v9120_v31 = vld [vmem:[#allocation17 + $0x930] sm:$0xff] }
 0x7e8   :  { %11059 = vmatpush2.bf16.msra.mxu0 %v16076_v59  ;;  %11101 = vmatprep.subr.bf16.mxu1 %v16197_v25  ;;  %v16030_v59 = vcombine.low %v8869_v9, %v8873_v15  ;;  %v16284_v25 = vcombine.low %v9124_v20, %v9128_v39  ;;  %v8949_v9 = vld [vmem:[#allocation17 + $0x3d8] sm:$0xff]  ;;  %v19500_v20 = vld [vmem:[#allocation19] sm:$0xff] }
 0x7e9   :  { %11060 = vmatprep.subr.bf16.mxu0 %v16069_v58  ;;  %v16023_v58 = vcombine.high %v8861_v3, %v8865_v54  ;;  %v8953_v15 = vld [vmem:[#allocation17 + $0x3f8] sm:$0xff] }
 0x7ea   :  { %v9013_v39 = vld [vmem:[#allocation17 + $0x5d8] sm:$0xff] }
 0x7eb   :  { %11102 = vmatpush2.bf16.msra.mxu1 %v16196_v8  ;;  %v16022_v8 = vcombine.low %v8861_v3, %v8865_v54  ;;  %v9151_v3 = vrot.slane %v19500_v20, %v19175_v6 }
 0x7ec   :  { %11061 = vmatpush2.bf16.msra.mxu0 %v16068_v34  ;;  %11103 = vmatprep.subr.bf16.mxu1 %v16189_v44  ;;  %v16276_v34 = vcombine.low %v9116_v18, %v9120_v31  ;;  %v16015_v44 = vcombine.high %v8853_v23, %v8857_v45 }
 0x7ed   :  { %11062 = vmatprep.subr.bf16.mxu0 %v16061_v0  ;;  %v16269_v0 = vcombine.high %v9108_v28, %v9112_v41 }
 0x7ef   :  { %11104 = vmatpush2.bf16.msra.mxu1 %v16188_v61  ;;  %v16014_v61 = vcombine.low %v8853_v23, %v8857_v45  ;;  %v10823_v23 = vadd.f32 %v19492_v47, %v9151_v3  ;;  %v8905_v3 = vld [vmem:[#allocation17 + $0x278] sm:$0xff] }
 0x7f0   :  { %11063 = vmatpush2.bf16.msra.mxu0 %v16060_v19  ;;  %11105 = vmatprep.subr.bf16.mxu1 %v16181_v37  ;;  %v16268_v19 = vcombine.low %v9108_v28, %v9112_v41  ;;  %v16007_v37 = vcombine.high %v8845_v40, %v8849_v17  ;;  %v8933_v41 = vld [vmem:[#allocation17 + $0x358] sm:$0xff] }
 0x7f1   :  { %11064 = vmatprep.subr.bf16.mxu0 %v16053_v42  ;;  %v16261_v42 = vcombine.high %v9100_v56, %v9104_v29 }
 0x7f3   :  { %11106 = vmatpush2.bf16.msra.mxu1 %v16180_v62  ;;  %v16006_v62 = vcombine.low %v8845_v40, %v8849_v17 }
 0x7f4   :  { %11065 = vmatpush2.bf16.msra.mxu0 %v16052_v33  ;;  %11157 = vmatprep.subr.bf16.mxu1 %v16047_v10  ;;  %v16260_v33 = vcombine.low %v9100_v56, %v9104_v29  ;;  %v15999_v10 = vcombine.high %v8837_v49, %v8841_v16 }
 0x7f5   :  { %11116 = vmatprep.subr.bf16.mxu0 %v16301_v21  ;;  %v16253_v21 = vcombine.high %v9092_v30, %v9096_v60 }
 0x7f6   :  { %11108 = vmatmul.mubr.bf16.vlgmr.msra.gmra.mxu1 %v19471_v53 }
 0x7f7   :  { %11067 = vmatmul.mubr.bf16.vlgmr.msra.gmra.mxu0 %v19453_v14  ;;  %11158 = vmatpush1.bf16.msra.mxu1 %v16046_v12  ;;  %v15998_v12 = vcombine.low %v8837_v49, %v8841_v16  ;;  %v8989_v49 = vld [vmem:[#allocation17 + $0x518] sm:$0xff] }
 0x7f8   :  { %11189 = vmatprep.mubr.bf16.mxu1 %v19451_v35  ;;  %11117 = vmatpush1.bf16.msra.mxu0 %v16300_v7  ;;  %v16277_v35 = vcombine.high %v9116_v18, %v9120_v31  ;;  %v16252_v7 = vcombine.low %v9092_v30, %v9096_v60  ;;  %v8941_v18 = vld [vmem:[#allocation17 + $0x398] sm:$0xff] }
 0x7f9   :  { %11159 = vmatprep.subr.bf16.mxu1 %v16039_v27  ;;  %11118 = vmatprep.subr.bf16.mxu0 %v16293_v63  ;;  %v15991_v27 = vcombine.high %v8829_v11, %v8833_v24  ;;  %v16245_v63 = vcombine.high %v9084_v2, %v9088_v46  ;;  %v8945_v31 = vld [vmem:[#allocation17 + $0x3b8] sm:$0xff] }
 0x7fa   :  { %11148 = vmatprep.mubr.bf16.mxu0 %v19017_v38  ;;  %v16103_v45 = vcombine.high %v8941_v18, %v8945_v31  ;;  %v16102_v17 = vcombine.low %v8941_v18, %v8945_v31  ;;  %v8993_v16 = vld [vmem:[#allocation17 + $0x538] sm:$0xff] }
 0x7fb   :  { %11160 = vmatpush1.bf16.msra.mxu1 %v16038_v55  ;;  %v9017_v55 = vld [vmem:[#allocation17 + $0x5f8] sm:$0xff] }
 0x7fc   :  { %11119 = vmatpush1.bf16.msra.mxu0 %v16292_v22  ;;  %11161 = vmatprep.subr.bf16.mxu1 %v16031_v32  ;;  %v15990_v22 = vcombine.low %v8829_v11, %v8833_v24  ;;  %v16244_v32 = vcombine.low %v9084_v2, %v9088_v46  ;;  %v16175_v54 = vcombine.high %v9013_v39, %v9017_v55  ;;  %v8981_v11 = vld [vmem:[#allocation17 + $0x4d8] sm:$0xff] }
 0x7fd   :  { %11120 = vmatprep.subr.bf16.mxu0 %v16285_v50  ;;  %v16111_v50 = vcombine.high %v8949_v9, %v8953_v15  ;;  %v8985_v24 = vld [vmem:[#allocation17 + $0x4f8] sm:$0xff]  ;;  %v16150_v46 = vcombine.low %v8989_v49, %v8993_v16 }
 0x7fe   :  { %v8969_v18 = vld [vmem:[#allocation17 + $0x478] sm:$0xff] }
 0x7ff   :  { %11162 = vmatpush1.bf16.msra.mxu1 %v16030_v59  ;;  %v9005_v59 = vld [vmem:[#allocation17 + $0x598] sm:$0xff] }
 0x800   :  { %11121 = vmatpush1.bf16.msra.mxu0 %v16284_v25  ;;  %11163 = vmatprep.subr.bf16.mxu1 %v16023_v58  ;;  %v9009_v25 = vld [vmem:[#allocation17 + $0x5b8] sm:$0xff]  ;;  %v16110_v58 = vcombine.low %v8949_v9, %v8953_v15 }
 0x801   :  { %11122 = vmatprep.subr.bf16.mxu0 %v16277_v35  ;;  %v16174_v35 = vcombine.low %v9013_v39, %v9017_v55  ;;  %v16167_v28 = vcombine.high %v9005_v59, %v9009_v25  ;;  %v16166_v47 = vcombine.low %v9005_v59, %v9009_v25  ;;  %v8973_v9 = vld [vmem:[#allocation17 + $0x498] sm:$0xff]  ;;  %v16142_v55 = vcombine.low %v8981_v11, %v8985_v24 }
 0x802   :  { %v8977_v15 = vld [vmem:[#allocation17 + $0x4b8] sm:$0xff] }
 0x803   :  { %11164 = vmatpush1.bf16.msra.mxu1 %v16022_v8  ;;  %v8937_v8 = vld [vmem:[#allocation17 + $0x378] sm:$0xff]  ;;  %v16134_v59 = vcombine.low %v8973_v9, %v8977_v15 }
 0x804   :  { %11123 = vmatpush1.bf16.msra.mxu0 %v16276_v34  ;;  %11165 = vmatprep.subr.bf16.mxu1 %v16015_v44  ;;  %v8997_v44 = vld [vmem:[#allocation17 + $0x558] sm:$0xff]  ;;  %v16095_v29 = vcombine.high %v8933_v41, %v8937_v8  ;;  %v16094_v30 = vcombine.low %v8933_v41, %v8937_v8 }
 0x805   :  { %11124 = vmatprep.subr.bf16.mxu0 %v16269_v0  ;;  %v9001_v0 = vld [vmem:[#allocation17 + $0x578] sm:$0xff] }
 0x807   :  { %11166 = vmatpush1.bf16.msra.mxu1 %v16014_v61  ;;  %v16159_v61 = vcombine.high %v8997_v44, %v9001_v0 }
 0x808   :  { %11125 = vmatpush1.bf16.msra.mxu0 %v16268_v19  ;;  %11167 = vmatprep.subr.bf16.mxu1 %v16007_v37  ;;  %v8925_v19 = vld [vmem:[#allocation17 + $0x318] sm:$0xff] }
 0x809   :  { %11126 = vmatprep.subr.bf16.mxu0 %v16261_v42  ;;  %v8929_v37 = vld [vmem:[#allocation17 + $0x338] sm:$0xff] }
 0x80a   :  { %v16086_v2 = vcombine.low %v8925_v19, %v8929_v37 }
 0x80b   :  { %11168 = vmatpush1.bf16.msra.mxu1 %v16006_v62  ;;  %v16158_v62 = vcombine.low %v8997_v44, %v9001_v0  ;;  %v9141_v0 = vld [vmem:[#allocation17 + $0x9d8] sm:$0xff] }
 0x80c   :  { %11127 = vmatpush1.bf16.msra.mxu0 %v16260_v33  ;;  %11169 = vmatprep.subr.bf16.mxu1 %v15999_v10  ;;  %v16087_v33 = vcombine.high %v8925_v19, %v8929_v37  ;;  %v8917_v10 = vld [vmem:[#allocation17 + $0x2d8] sm:$0xff] }
 0x80d   :  { %11128 = vmatprep.subr.bf16.mxu0 %v16253_v21  ;;  %v8921_v21 = vld [vmem:[#allocation17 + $0x2f8] sm:$0xff] }
 0x80e   :  { %v16078_v39 = vcombine.low %v8917_v10, %v8921_v21 }
 0x80f   :  { %11170 = vmatpush1.bf16.msra.mxu1 %v15998_v12  ;;  %v16079_v12 = vcombine.high %v8917_v10, %v8921_v21 }
 0x810   :  { %11129 = vmatpush1.bf16.msra.mxu0 %v16252_v7  ;;  %11171 = vmatprep.subr.bf16.mxu1 %v15991_v27  ;;  %v16143_v7 = vcombine.high %v8981_v11, %v8985_v24  ;;  %v8909_v27 = vld [vmem:[#allocation17 + $0x298] sm:$0xff] }
 0x811   :  { %11130 = vmatprep.subr.bf16.mxu0 %v16245_v63  ;;  %v8913_v63 = vld [vmem:[#allocation17 + $0x2b8] sm:$0xff] }
 0x812   :  { %v16070_v31 = vcombine.low %v8909_v27, %v8913_v63  ;;  %v9125_v11 = vld [vmem:[#allocation17 + $0x958] sm:$0xff] }
 0x813   :  { %11172 = vmatpush1.bf16.msra.mxu1 %v15990_v22  ;;  %v16071_v22 = vcombine.high %v8909_v27, %v8913_v63  ;;  %v9129_v24 = vld [vmem:[#allocation17 + $0x978] sm:$0xff] }
 0x814   :  { %11131 = vmatpush1.bf16.msra.mxu0 %v16244_v32  ;;  %11173 = vmatprep.subr.bf16.mxu1 %v16111_v50  ;;  %v16135_v32 = vcombine.high %v8973_v9, %v8977_v15  ;;  %v8901_v50 = vld [vmem:[#allocation17 + $0x258] sm:$0xff]  ;;  %v16287_v15 = vcombine.high %v9125_v11, %v9129_v24 }
 0x815   :  { %11198 = vmatprep.subr.bf16.mxu0 %v16175_v54  ;;  %v8965_v54 = vld [vmem:[#allocation17 + $0x458] sm:$0xff]  ;;  %v16063_v25 = vcombine.high %v8901_v50, %v8905_v3  ;;  %v16062_v41 = vcombine.low %v8901_v50, %v8905_v3 }
 0x816   :  { %v10863_v34 = vpop.f32.mrf.mxu1  ;;  %v16126_v8 = vcombine.low %v8965_v54, %v8969_v18  ;;  %v9057_v50 = vld [vmem:[#allocation17 + $0x738] sm:$0xff] }
 0x817   :  { %v19505_v40 = vadd.f32 %v10863_v34, %v10823_v23  ;;  %11149 = vmatmul.mubr.bf16.vlgmr.msra.gmra.mxu0 %v19479_v26  ;;  %11174 = vmatpush2.bf16.msra.mxu1 %v16110_v58  ;;  %v16127_v58 = vcombine.high %v8965_v54, %v8969_v18  ;;  %v8897_v23 = vld [vmem:[#allocation17 + $0x238] sm:$0xff]  ;;  %v16286_v54 = vcombine.low %v9125_v11, %v9129_v24 }
 0x818   :  { %11199 = vmatpush1.bf16.msra.mxu0 %v16174_v35  ;;  %11230 = vmatprep.mubr.bf16.mxu0 %v19469_v1  ;;  %v19509_v56 = vpop.f32.mrf.mxu1  ;;  %v16151_v1 = vcombine.high %v8989_v49, %v8993_v16  ;;  %v8893_v35 = vld [vmem:[#allocation17 + $0x218] sm:$0xff] }
 0x819   :  { %11175 = vmatprep.subr.bf16.mxu1 %v16103_v45  ;;  %11200 = vmatprep.subr.bf16.mxu0 %v16167_v28  ;;  %v8957_v45 = vld [vmem:[#allocation17 + $0x418] sm:$0xff]  ;;  %v16055_v34 = vcombine.high %v8893_v35, %v8897_v23 }
 0x81a   :  { %v10867_v42 = vpop.f32.mrf.mxu1  ;;  %v8961_v28 = vld [vmem:[#allocation17 + $0x438] sm:$0xff] }
 0x81b   :  { %11176 = vmatpush2.bf16.msra.mxu1 %v16102_v17  ;;  %v16119_v44 = vcombine.high %v8957_v45, %v8961_v28  ;;  %v9145_v17 = vld [vmem:[#allocation17 + $0x9f8] sm:$0xff]  ;;  %v16118_v19 = vcombine.low %v8957_v45, %v8961_v28 }
 0x81c   :  { %11201 = vmatpush1.bf16.msra.mxu0 %v16166_v47  ;;  %v10868_v60 = vpop.f32.mrf.mxu1  ;;  %11177 = vmatprep.subr.bf16.mxu1 %v16095_v29  ;;  %v9077_v47 = vld [vmem:[#allocation17 + $0x7d8] sm:$0xff]  ;;  %v16303_v37 = vcombine.high %v9141_v0, %v9145_v17 }
 0x81d   :  { %11202 = vmatprep.subr.bf16.mxu0 %v16159_v61  ;;  %v9081_v29 = vld [vmem:[#allocation17 + $0x7f8] sm:$0xff]  ;;  %v16054_v61 = vcombine.low %v8893_v35, %v8897_v23 }
 0x81e   :  { %v16239_v42 = vcombine.high %v9077_v47, %v9081_v29  ;;  %v9133_v49 = vld [vmem:[#allocation17 + $0x998] sm:$0xff] }
 0x81f   :  { %11178 = vmatpush2.bf16.msra.mxu1 %v16094_v30  ;;  %v9137_v16 = vld [vmem:[#allocation17 + $0x9b8] sm:$0xff]  ;;  %v9155_v30 = vrot.slane %v19500_v20, %v19178_v13 }
 0x820   :  { %11203 = vmatpush1.bf16.msra.mxu0 %v16158_v62  ;;  %11179 = vmatprep.subr.bf16.mxu1 %v16087_v33  ;;  %v9069_v60 = vld [vmem:[#allocation17 + $0x798] sm:$0xff]  ;;  %v16302_v33 = vcombine.low %v9141_v0, %v9145_v17  ;;  %v16295_v10 = vcombine.high %v9133_v49, %v9137_v16  ;;  %v16294_v27 = vcombine.low %v9133_v49, %v9137_v16 }
 0x821   :  { %11204 = vmatprep.subr.bf16.mxu0 %v16151_v1  ;;  %v9073_v62 = vld [vmem:[#allocation17 + $0x7b8] sm:$0xff]  ;;  %v16238_v1 = vcombine.low %v9077_v47, %v9081_v29 }
 0x822   :  { %v16231_v21 = vcombine.high %v9069_v60, %v9073_v62  ;;  %v16230_v9 = vcombine.low %v9069_v60, %v9073_v62  ;;  %v9045_v23 = vld [vmem:[#allocation17 + $0x6d8] sm:$0xff] }
 0x823   :  { %11180 = vmatpush2.bf16.msra.mxu1 %v16086_v2  ;;  %v10825_v2 = vadd.f32 %v19494_v52, %v9155_v30  ;;  %v9117_v52 = vld [vmem:[#allocation17 + $0x918] sm:$0xff] }
 0x824   :  { %11205 = vmatpush1.bf16.msra.mxu0 %v16150_v46  ;;  %11181 = vmatprep.subr.bf16.mxu1 %v16079_v12  ;;  %v9061_v46 = vld [vmem:[#allocation17 + $0x758] sm:$0xff] }
 0x825   :  { %11206 = vmatprep.subr.bf16.mxu0 %v16143_v7  ;;  %v9065_v12 = vld [vmem:[#allocation17 + $0x778] sm:$0xff]  ;;  %v10866_v63 = vadd.f32 %v19509_v56, %v10825_v2 }
 0x826   :  { %v9049_v45 = vld [vmem:[#allocation17 + $0x6f8] sm:$0xff] }
 0x827   :  { %11182 = vmatpush2.bf16.msra.mxu1 %v16078_v39  ;;  %v9105_v0 = vld [vmem:[#allocation17 + $0x8b8] sm:$0xff] }
 0x828   :  { %11207 = vmatpush1.bf16.msra.mxu0 %v16142_v55  ;;  %11183 = vmatprep.subr.bf16.mxu1 %v16071_v22  ;;  %v16223_v55 = vcombine.high %v9061_v46, %v9065_v12  ;;  %v9121_v22 = vld [vmem:[#allocation17 + $0x938] sm:$0xff] }
 0x829   :  { %11208 = vmatprep.subr.bf16.mxu0 %v16135_v32  ;;  %v9053_v32 = vld [vmem:[#allocation17 + $0x718] sm:$0xff]  ;;  %v16279_v56 = vcombine.high %v9117_v52, %v9121_v22  ;;  %v16278_v28 = vcombine.low %v9117_v52, %v9121_v22  ;;  %v17909_v52 = vld [vmem:[#allocation20 + $0x18c] ss:$28 sps:$4 sm:$0xff]  }
 0x82a   :  { %v9037_v17 = vld [vmem:[#allocation17 + $0x698] sm:$0xff]  ;;  %v17919_v22 = vld [vmem:[#allocation20 + $0x508] ss:$28 sps:$4 sm:$0xff]  }
 0x82b   :  { %11184 = vmatpush2.bf16.msra.mxu1 %v16070_v31  ;;  %v9041_v47 = vld [vmem:[#allocation17 + $0x6b8] sm:$0xff] }
 0x82c   :  { %11209 = vmatpush1.bf16.msra.mxu0 %v16134_v59  ;;  %11185 = vmatprep.subr.bf16.mxu1 %v16063_v25  ;;  %v16215_v59 = vcombine.high %v9053_v32, %v9057_v50  ;;  %v9109_v25 = vld [vmem:[#allocation17 + $0x8d8] sm:$0xff]  ;;  %v16198_v62 = vcombine.low %v9037_v17, %v9041_v47 }
 0x82d   :  { %11210 = vmatprep.subr.bf16.mxu0 %v16127_v58  ;;  %v9113_v58 = vld [vmem:[#allocation17 + $0x8f8] sm:$0xff] }
 0x82e   :  { %v16270_v29 = vcombine.low %v9109_v25, %v9113_v58  ;;  %v9097_v49 = vld [vmem:[#allocation17 + $0x878] sm:$0xff] }
 0x82f   :  { %11186 = vmatpush2.bf16.msra.mxu1 %v16062_v41  ;;  %v16214_v41 = vcombine.low %v9053_v32, %v9057_v50  ;;  %v9029_v16 = vld [vmem:[#allocation17 + $0x658] sm:$0xff] }
 0x830   :  { %11211 = vmatpush1.bf16.msra.mxu0 %v16126_v8  ;;  %11187 = vmatprep.subr.bf16.mxu1 %v16055_v34  ;;  %v16271_v8 = vcombine.high %v9109_v25, %v9113_v58  ;;  %v16207_v34 = vcombine.high %v9045_v23, %v9049_v45  ;;  %v9033_v30 = vld [vmem:[#allocation17 + $0x678] sm:$0xff] }
 0x831   :  { %11212 = vmatprep.subr.bf16.mxu0 %v16119_v44  ;;  %v9101_v44 = vld [vmem:[#allocation17 + $0x898] sm:$0xff] }
 0x832   :  { %v16262_v60 = vcombine.low %v9101_v44, %v9105_v0  ;;  %v9021_v11 = vld [vmem:[#allocation17 + $0x618] sm:$0xff] }
 0x833   :  { %11188 = vmatpush2.bf16.msra.mxu1 %v16054_v61  ;;  %v16206_v61 = vcombine.low %v9045_v23, %v9049_v45  ;;  %v9025_v24 = vld [vmem:[#allocation17 + $0x638] sm:$0xff]  ;;  %v17939_v23 = vld [vmem:[#allocation20 + $0x464] ss:$28 sps:$4 sm:$0xff]  }
 0x834   :  { %11213 = vmatpush1.bf16.msra.mxu0 %v16118_v19  ;;  %11239 = vmatprep.subr.bf16.mxu1 %v16303_v37  ;;  %v16263_v19 = vcombine.high %v9101_v44, %v9105_v0  ;;  %v16199_v37 = vcombine.high %v9037_v17, %v9041_v47  ;;  %v17927_v32 = vld [vmem:[#allocation20 + $0x4d4] ss:$28 sps:$4 sm:$0xff]   ;;  %v17943_v44 = vld [vmem:[#allocation20 + $0x428] ss:$28 sps:$4 sm:$0xff]  }
 0x835   :  { %11214 = vmatprep.subr.bf16.mxu0 %v16239_v42  ;;  %v9093_v42 = vld [vmem:[#allocation17 + $0x858] sm:$0xff]  ;;  %v17922_v0 = vld [vmem:[#allocation20 + $0xa8] ss:$28 sps:$4 sm:$0xff]  }
 0x836   :  { %11190 = vmatmul.mubr.bf16.vlgmr.msra.gmra.mxu1 %v19453_v14  ;;  %v16254_v2 = vcombine.low %v9093_v42, %v9097_v49  ;;  %v17912_v50 = vld [vmem:[#allocation20 + $0x154] ss:$28 sps:$4 sm:$0xff]  }
 0x837   :  { %11240 = vmatpush1.bf16.msra.mxu1 %v16302_v33  ;;  %v19515_v7 = vpop.f32.mrf.mxu0  ;;  %11271 = vmatprep.mubr.bf16.mxu1 %v19017_v38  ;;  %v16222_v38 = vcombine.low %v9061_v46, %v9065_v12  ;;  %v16255_v33 = vcombine.high %v9093_v42, %v9097_v49  ;;  %v16190_v46 = vcombine.low %v9029_v16, %v9033_v30  ;;  %v17931_v25 = vld [vmem:[#allocation20 + $0x498] ss:$28 sps:$4 sm:$0xff]  }
 0x838   :  { %11215 = vmatpush2.bf16.msra.mxu0 %v16238_v1  ;;  %11241 = vmatprep.subr.bf16.mxu1 %v16295_v10  ;;  %v16191_v1 = vcombine.high %v9029_v16, %v9033_v30  ;;  %v9085_v10 = vld [vmem:[#allocation17 + $0x818] sm:$0xff]  ;;  %v10905_v47 = vadd.f32 %v19515_v7, %v19505_v40  ;;  %v17936_v49 = vld [vmem:[#allocation20 + $0x3c] ss:$28 sps:$4 sm:$0xff]   ;;  %v17942_v40 = vld [vmem:[#allocation20 + $0x4] ss:$28 sps:$4 sm:$0xff]  }
 0x839   :  { %v10906_v39 = vpop.f32.mrf.mxu0  ;;  %11216 = vmatprep.subr.bf16.mxu0 %v16231_v21  ;;  %v9089_v21 = vld [vmem:[#allocation17 + $0x838] sm:$0xff]  ;;  %v17961_v7 = vld [vmem:[#allocation20 + $0x380] ss:$28 sps:$4 sm:$0xff]  }
 0x83a   :  { %v10907_v14 = vadd.f32 %v10906_v39, %v10866_v63  ;;  %v16247_v12 = vcombine.high %v9085_v10, %v9089_v21  ;;  %v16183_v63 = vcombine.high %v9021_v11, %v9025_v24  ;;  %v16182_v39 = vcombine.low %v9021_v11, %v9025_v24  ;;  %v17951_v17 = vld [vmem:[#allocation20 + $0x3f4] ss:$28 sps:$4 sm:$0xff]   ;;  %v17967_v11 = vld [vmem:[#allocation20 + $0x6c8] ss:$28 sps:$4 sm:$0xff]  }
 0x83b   :  { %11242 = vmatpush1.bf16.msra.mxu1 %v16294_v27  ;;  %v10908_v3 = vpop.f32.mrf.mxu0  ;;  %v11280_v42 = vsub.f32 0.0, %v10905_v47  ;;  %v17955_v16 = vld [vmem:[#allocation20 + $0x3b8] ss:$28 sps:$4 sm:$0xff]   ;;  %v9163_v24 = vrot.slane %v19500_v20, %v19226_v4  ;;  %v17991_v47 = vld [vmem:[#allocation20 + $0x5e8] ss:$28 sps:$4 sm:$0xff]  }
 0x83c   :  { %v11281_v18 = vsub.f32 0.0, %v10907_v14  ;;  %11217 = vmatpush2.bf16.msra.mxu0 %v16230_v9  ;;  %11243 = vmatprep.subr.bf16.mxu1 %v16287_v15  ;;  %v16246_v15 = vcombine.low %v9085_v10, %v9089_v21  ;;  %v17907_v14 = vld [vmem:[#allocation20 + $0x188] ss:$28 sps:$4 sm:$0xff]   ;;  %v17934_v30 = vld [vmem:[#allocation20 + $0x38] ss:$28 sps:$4 sm:$0xff]   ;;  %v9159_v21 = vrot.slane %v19500_v20, %v19211_v36 }
 0x83d   :  { %v10909_v31 = vpop.f32.mrf.mxu0  ;;  %11218 = vmatprep.subr.bf16.mxu0 %v16223_v55  ;;  %v17921_v55 = vld [vmem:[#allocation20 + $0x50c] ss:$28 sps:$4 sm:$0xff]   ;;  %v17981_v20 = vld [vmem:[#allocation20 + $0x65c] ss:$28 sps:$4 sm:$0xff]  }
 0x83e   :  { %v11290_v35 = vmul.f32 1.442695, %v11281_v18  ;;  %v17915_v31 = vld [vmem:[#allocation20 + $0x11c] ss:$28 sps:$4 sm:$0xff]   ;;  %v17948_v10 = vld [vmem:[#allocation20 + $0x34c] ss:$28 sps:$4 sm:$0xff]  }
 0x83f   :  { %11244 = vmatpush1.bf16.msra.mxu1 %v16286_v54  ;;  %v17925_v54 = vld [vmem:[#allocation20 + $0x4d0] ss:$28 sps:$4 sm:$0xff]  }
 0x840   :  { %18635 = vpow2.f32 %v11290_v35  ;;  %11219 = vmatpush2.bf16.msra.mxu0 %v16222_v38  ;;  %11245 = vmatprep.subr.bf16.mxu1 %v16279_v56  ;;  %v17910_v38 = vld [vmem:[#allocation20 + $0x150] ss:$28 sps:$4 sm:$0xff]   ;;  %v17933_v56 = vld [vmem:[#allocation20 + $0x49c] ss:$28 sps:$4 sm:$0xff]  }
 0x841   :  { %11220 = vmatprep.subr.bf16.mxu0 %v16215_v59  ;;  %v17913_v35 = vld [vmem:[#allocation20 + $0x118] ss:$28 sps:$4 sm:$0xff]  }
 0x843   :  { %11246 = vmatpush1.bf16.msra.mxu1 %v16278_v28  ;;  %v17937_v28 = vld [vmem:[#allocation20 + $0x460] ss:$28 sps:$4 sm:$0xff]  }
 0x844   :  { %11221 = vmatpush2.bf16.msra.mxu0 %v16214_v41  ;;  %11247 = vmatprep.subr.bf16.mxu1 %v16271_v8  ;;  %v17916_v41 = vld [vmem:[#allocation20 + $0xe0] ss:$28 sps:$4 sm:$0xff]   ;;  %v17945_v8 = vld [vmem:[#allocation20 + $0x42c] ss:$28 sps:$4 sm:$0xff]  }
 0x845   :  { %11222 = vmatprep.subr.bf16.mxu0 %v16207_v34  ;;  %v17924_v34 = vld [vmem:[#allocation20 + $0xac] ss:$28 sps:$4 sm:$0xff]  }
 0x847   :  { %11248 = vmatpush1.bf16.msra.mxu1 %v16270_v29  ;;  %v17930_v29 = vld [vmem:[#allocation20 + $0x74] ss:$28 sps:$4 sm:$0xff]  }
 0x848   :  { %11223 = vmatpush2.bf16.msra.mxu0 %v16206_v61  ;;  %11249 = vmatprep.subr.bf16.mxu1 %v16263_v19  ;;  %v17949_v61 = vld [vmem:[#allocation20 + $0x3f0] ss:$28 sps:$4 sm:$0xff]  }
 0x849   :  { %11224 = vmatprep.subr.bf16.mxu0 %v16199_v37  ;;  %v17928_v19 = vld [vmem:[#allocation20 + $0x70] ss:$28 sps:$4 sm:$0xff]   ;;  %v17957_v37 = vld [vmem:[#allocation20 + $0x3bc] ss:$28 sps:$4 sm:$0xff]  }
 0x84b   :  { %11250 = vmatpush1.bf16.msra.mxu1 %v16262_v60  ;;  %v17963_v60 = vld [vmem:[#allocation20 + $0x384] ss:$28 sps:$4 sm:$0xff]  }
 0x84c   :  { %11225 = vmatpush2.bf16.msra.mxu0 %v16198_v62  ;;  %11251 = vmatprep.subr.bf16.mxu1 %v16255_v33  ;;  %v11288_v62 = vmul.f32 1.442695, %v11280_v42  ;;  %v17940_v33 = vld [vmem:[#allocation20] ss:$28 sps:$4 sm:$0xff]   ;;  %v17976_v42 = vld [vmem:[#allocation20 + $0x230] ss:$28 sps:$4 sm:$0xff]  }
 0x84d   :  { %v18636_v27 = vpop.eup %18635  ;;  %11226 = vmatprep.subr.bf16.mxu0 %v16191_v1  ;;  %v17969_v1 = vld [vmem:[#allocation20 + $0x6cc] ss:$28 sps:$4 sm:$0xff]  }
 0x84e   :  { %v11305_v9 = vadd.f32 1.0, %v18636_v27 }
 0x84f   :  { %11252 = vmatpush1.bf16.msra.mxu1 %v16254_v2  ;;  %v17946_v2 = vld [vmem:[#allocation20 + $0x348] ss:$28 sps:$4 sm:$0xff]  }
 0x850   :  { %18637 = vrcp.f32 %v11305_v9  ;;  %11227 = vmatpush2.bf16.msra.mxu0 %v16190_v46  ;;  %11253 = vmatprep.subr.bf16.mxu1 %v16247_v12  ;;  %v17975_v46 = vld [vmem:[#allocation20 + $0x694] ss:$28 sps:$4 sm:$0xff]  }
 0x851   :  { %11228 = vmatprep.subr.bf16.mxu0 %v16183_v63  ;;  %18639 = vpow2.f32 %v11288_v62  ;;  %v17954_v12 = vld [vmem:[#allocation20 + $0x314] ss:$28 sps:$4 sm:$0xff]   ;;  %v18002_v62 = vld [vmem:[#allocation20 + $0x544] ss:$28 sps:$4 sm:$0xff]  }
 0x853   :  { %11254 = vmatpush1.bf16.msra.mxu1 %v16246_v15  ;;  %v17973_v15 = vld [vmem:[#allocation20 + $0x690] ss:$28 sps:$4 sm:$0xff]  }
 0x854   :  { %11229 = vmatpush2.bf16.msra.mxu0 %v16182_v39  ;;  %14222 = vmatprep.subr.bf16.mxu1 %v17921_v55 }
 0x855   :  { %14181 = vmatprep.subr.bf16.mxu0 %v17909_v52 }
 0x856   :  { %v19519_v3 = vpop.f32.mrf.mxu1  ;;  %11272 = vmatmul.mubr.bf16.vlgmr.msra.gmra.mxu1 %v19479_v26 }
 0x857   :  { %11231 = vmatmul.mubr.bf16.vlgmr.msra.gmra.mxu0 %v19471_v53  ;;  %14223 = vmatpush1.bf16.msra.mxu1 %v17919_v22  ;;  %v17918_v53 = vld [vmem:[#allocation20 + $0xe4] ss:$28 sps:$4 sm:$0xff]   ;;  %v10946_v27 = vadd.f32 %v19519_v3, %v9159_v21  ;;  %v17952_v22 = vld [vmem:[#allocation20 + $0x310] ss:$28 sps:$4 sm:$0xff]   ;;  %v17979_v3 = vld [vmem:[#allocation20 + $0x658] ss:$28 sps:$4 sm:$0xff]  }
 0x858   :  { %v19523_v18 = vpop.f32.mrf.mxu1  ;;  %14182 = vmatpush1.bf16.msra.mxu0 %v17907_v14  ;;  %14224 = vmatprep.subr.bf16.mxu1 %v17927_v32  ;;  %v17960_v32 = vld [vmem:[#allocation20 + $0x2dc] ss:$28 sps:$4 sm:$0xff]  }
 0x859   :  { %14183 = vmatprep.subr.bf16.mxu0 %v17912_v50  ;;  %v10948_v39 = vadd.f32 %v19523_v18, %v9163_v24  ;;  %v17958_v18 = vld [vmem:[#allocation20 + $0x2d8] ss:$28 sps:$4 sm:$0xff]   ;;  %v18056_v24 = vld [vmem:[#allocation20 + $0xc0c] ss:$28 sps:$4 sm:$0xff]  }
 0x85a   :  { %v10949_v59 = vpop.f32.mrf.mxu1 }
 0x85b   :  { %14225 = vmatpush1.bf16.msra.mxu1 %v17925_v54 }
 0x85c   :  { %v10950_v58 = vpop.f32.mrf.mxu1  ;;  %14184 = vmatpush1.bf16.msra.mxu0 %v17910_v38  ;;  %14226 = vmatprep.subr.bf16.mxu1 %v17933_v56 }
 0x85d   :  { %v18638_v26 = vpop.eup %18637  ;;  %14185 = vmatprep.subr.bf16.mxu0 %v17915_v31  ;;  %v17987_v58 = vld [vmem:[#allocation20 + $0x624] ss:$28 sps:$4 sm:$0xff]  }
 0x85e   :  { %v19525_v45 = vpack.c.bf16 %v18638_v26, %v18638_v26  ;;  %v17966_v26 = vld [vmem:[#allocation20 + $0x2a4] ss:$28 sps:$4 sm:$0xff]  }
 0x85f   :  { %14227 = vmatpush1.bf16.msra.mxu1 %v17931_v25 }
 0x860   :  { %14186 = vmatpush1.bf16.msra.mxu0 %v17913_v35  ;;  %14213 = vmatprep.mubr.bf16.mxu0 %v19525_v45 }
 0x861   :  { %14187 = vmatprep.subr.bf16.mxu0 %v17918_v53  ;;  %14228 = vmatprep.subr.bf16.mxu1 %v17939_v23  ;;  %v18640_v53 = vpop.eup %18639 }
 0x863   :  { %14229 = vmatpush1.bf16.msra.mxu1 %v17937_v28 }
 0x864   :  { %14188 = vmatpush1.bf16.msra.mxu0 %v17916_v41  ;;  %14230 = vmatprep.subr.bf16.mxu1 %v17945_v8  ;;  %v17985_v41 = vld [vmem:[#allocation20 + $0x620] ss:$28 sps:$4 sm:$0xff]  }
 0x865   :  { %14189 = vmatprep.subr.bf16.mxu0 %v17924_v34  ;;  %v17964_v34 = vld [vmem:[#allocation20 + $0x2a0] ss:$28 sps:$4 sm:$0xff]  }
 0x867   :  { %14231 = vmatpush1.bf16.msra.mxu1 %v17943_v44  ;;  %v17993_v44 = vld [vmem:[#allocation20 + $0x5ec] ss:$28 sps:$4 sm:$0xff]  }
 0x868   :  { %14190 = vmatpush1.bf16.msra.mxu0 %v17922_v0  ;;  %14232 = vmatprep.subr.bf16.mxu1 %v17951_v17  ;;  %v11304_v0 = vadd.f32 1.0, %v18640_v53  ;;  %v17972_v17 = vld [vmem:[#allocation20 + $0x26c] ss:$28 sps:$4 sm:$0xff]   ;;  %v18072_v53 = vld [vmem:[#allocation20 + $0xb60] ss:$28 sps:$4 sm:$0xff]  }
 0x869   :  { %14191 = vmatprep.subr.bf16.mxu0 %v17930_v29  ;;  %v17970_v29 = vld [vmem:[#allocation20 + $0x268] ss:$28 sps:$4 sm:$0xff]  }
 0x86b   :  { %14233 = vmatpush1.bf16.msra.mxu1 %v17949_v61  ;;  %v17996_v61 = vld [vmem:[#allocation20 + $0x5b4] ss:$28 sps:$4 sm:$0xff]  }
 0x86c   :  { %14192 = vmatpush1.bf16.msra.mxu0 %v17928_v19  ;;  %14234 = vmatprep.subr.bf16.mxu1 %v17957_v37  ;;  %v17978_v19 = vld [vmem:[#allocation20 + $0x234] ss:$28 sps:$4 sm:$0xff]  }
 0x86d   :  { %14193 = vmatprep.subr.bf16.mxu0 %v17936_v49  ;;  %v17994_v37 = vld [vmem:[#allocation20 + $0x5b0] ss:$28 sps:$4 sm:$0xff]   ;;  %v17999_v49 = vld [vmem:[#allocation20 + $0x57c] ss:$28 sps:$4 sm:$0xff]  }
 0x86f   :  { %14235 = vmatpush1.bf16.msra.mxu1 %v17955_v16  ;;  %v17984_v16 = vld [vmem:[#allocation20 + $0x1fc] ss:$28 sps:$4 sm:$0xff]  }
 0x870   :  { %14194 = vmatpush1.bf16.msra.mxu0 %v17934_v30  ;;  %14236 = vmatprep.subr.bf16.mxu1 %v17963_v60  ;;  %v17997_v30 = vld [vmem:[#allocation20 + $0x578] ss:$28 sps:$4 sm:$0xff]  }
 0x871   :  { %14195 = vmatprep.subr.bf16.mxu0 %v17942_v40  ;;  %v17982_v60 = vld [vmem:[#allocation20 + $0x1f8] ss:$28 sps:$4 sm:$0xff]  }
 0x873   :  { %14237 = vmatpush1.bf16.msra.mxu1 %v17961_v7  ;;  %v17990_v7 = vld [vmem:[#allocation20 + $0x1c4] ss:$28 sps:$4 sm:$0xff]  }
 0x874   :  { %14196 = vmatpush1.bf16.msra.mxu0 %v17940_v33  ;;  %14238 = vmatprep.subr.bf16.mxu1 %v17969_v1 }
 0x875   :  { %14197 = vmatprep.subr.bf16.mxu0 %v17948_v10  ;;  %v18000_v10 = vld [vmem:[#allocation20 + $0x540] ss:$28 sps:$4 sm:$0xff]  }
 0x876   :  { %v11027_v63 = vpop.f32.mrf.mxu1 }
 0x877   :  { %v10986_v9 = vpop.f32.mrf.mxu0  ;;  %14239 = vmatpush2.bf16.msra.mxu1 %v17967_v11  ;;  %v17988_v11 = vld [vmem:[#allocation20 + $0x1c0] ss:$28 sps:$4 sm:$0xff]  }
 0x878   :  { %v10987_v55 = vadd.f32 %v10986_v9, %v10946_v27  ;;  %v11029_v52 = vpop.f32.mrf.mxu1  ;;  %14198 = vmatpush2.bf16.msra.mxu0 %v17946_v2  ;;  %14240 = vmatprep.subr.bf16.mxu1 %v17975_v46  ;;  %v18005_v2 = vld [vmem:[#allocation20 + $0x88c] ss:$28 sps:$4 sm:$0xff]  }
 0x879   :  { %v10988_v14 = vpop.f32.mrf.mxu0  ;;  %14199 = vmatprep.subr.bf16.mxu0 %v17954_v12  ;;  %v18003_v12 = vld [vmem:[#allocation20 + $0x888] ss:$28 sps:$4 sm:$0xff]   ;;  %v18006_v9 = vld [vmem:[#allocation20 + $0x850] ss:$28 sps:$4 sm:$0xff]  }
 0x87a   :  { %v11028_v50 = vadd.f32 %v11027_v63, %v10987_v55  ;;  %v10989_v54 = vadd.f32 %v10988_v14, %v10948_v39  ;;  %v11031_v38 = vpop.f32.mrf.mxu1  ;;  %v18008_v63 = vld [vmem:[#allocation20 + $0x854] ss:$28 sps:$4 sm:$0xff]   ;;  %v18014_v55 = vld [vmem:[#allocation20 + $0x7e4] ss:$28 sps:$4 sm:$0xff]  }
 0x87b   :  { %v10990_v56 = vpop.f32.mrf.mxu0  ;;  %14241 = vmatpush2.bf16.msra.mxu1 %v17973_v15  ;;  %v18011_v15 = vld [vmem:[#allocation20 + $0x81c] ss:$28 sps:$4 sm:$0xff]   ;;  %v18062_v38 = vld [vmem:[#allocation20 + $0xbd4] ss:$28 sps:$4 sm:$0xff]  }
 0x87c   :  { %v11282_v31 = vsub.f32 0.0, %v11028_v50  ;;  %v11030_v59 = vadd.f32 %v11029_v52, %v10989_v54  ;;  %v11032_v25 = vpop.f32.mrf.mxu1  ;;  %14200 = vmatpush2.bf16.msra.mxu0 %v17952_v22  ;;  %14242 = vmatprep.subr.bf16.mxu1 %v17981_v20  ;;  %v18009_v39 = vld [vmem:[#allocation20 + $0x818] ss:$28 sps:$4 sm:$0xff]   ;;  %v18012_v14 = vld [vmem:[#allocation20 + $0x7e0] ss:$28 sps:$4 sm:$0xff]  }
 0x87d   :  { %v10991_v35 = vpop.f32.mrf.mxu0  ;;  %14201 = vmatprep.subr.bf16.mxu0 %v17960_v32  ;;  %v18054_v32 = vld [vmem:[#allocation20 + $0xc08] ss:$28 sps:$4 sm:$0xff]   ;;  %v18018_v25 = vld [vmem:[#allocation20 + $0x770] ss:$28 sps:$4 sm:$0xff]  }
 0x87e   :  { %v11292_v23 = vmul.f32 1.442695, %v11282_v31  ;;  %v11283_v28 = vsub.f32 0.0, %v11030_v59  ;;  %v18017_v54 = vld [vmem:[#allocation20 + $0x7ac] ss:$28 sps:$4 sm:$0xff]  }
 0x87f   :  { %14243 = vmatpush2.bf16.msra.mxu1 %v17979_v3  ;;  %v18015_v56 = vld [vmem:[#allocation20 + $0x7a8] ss:$28 sps:$4 sm:$0xff]   ;;  %v18060_v3 = vld [vmem:[#allocation20 + $0xbd0] ss:$28 sps:$4 sm:$0xff]   ;;  %v18068_v59 = vld [vmem:[#allocation20 + $0xb9c] ss:$28 sps:$4 sm:$0xff]  }
 0x880   :  { %18641 = vpow2.f32 %v11292_v23  ;;  %v11294_v8 = vmul.f32 1.442695, %v11283_v28  ;;  %14202 = vmatpush2.bf16.msra.mxu0 %v17958_v18  ;;  %14244 = vmatprep.subr.bf16.mxu1 %v17987_v58  ;;  %v18020_v31 = vld [vmem:[#allocation20 + $0x774] ss:$28 sps:$4 sm:$0xff]   ;;  %v18023_v58 = vld [vmem:[#allocation20 + $0x73c] ss:$28 sps:$4 sm:$0xff]  }
 0x881   :  { %14203 = vmatprep.subr.bf16.mxu0 %v17966_v26  ;;  %v18066_v18 = vld [vmem:[#allocation20 + $0xb98] ss:$28 sps:$4 sm:$0xff]   ;;  %v18074_v35 = vld [vmem:[#allocation20 + $0xb64] ss:$28 sps:$4 sm:$0xff]   ;;  %v18080_v28 = vld [vmem:[#allocation20 + $0xb2c] ss:$28 sps:$4 sm:$0xff]  }
 0x882   :  { %18643 = vpow2.f32 %v11294_v8  ;;  %v18021_v26 = vld [vmem:[#allocation20 + $0x738] ss:$28 sps:$4 sm:$0xff]   ;;  %v18026_v23 = vld [vmem:[#allocation20 + $0x704] ss:$28 sps:$4 sm:$0xff]  }
 0x883   :  { %14245 = vmatpush2.bf16.msra.mxu1 %v17985_v41  ;;  %18645 = vrcp.f32 %v11304_v0  ;;  %v18024_v41 = vld [vmem:[#allocation20 + $0x700] ss:$28 sps:$4 sm:$0xff]   ;;  %v18078_v8 = vld [vmem:[#allocation20 + $0xb28] ss:$28 sps:$4 sm:$0xff]  }
 0x884   :  { %14204 = vmatpush2.bf16.msra.mxu0 %v17964_v34  ;;  %14246 = vmatprep.subr.bf16.mxu1 %v17993_v44  ;;  %v18029_v34 = vld [vmem:[#allocation20 + $0xa4c] ss:$28 sps:$4 sm:$0xff]   ;;  %v18086_v44 = vld [vmem:[#allocation20 + $0xaf4] ss:$28 sps:$4 sm:$0xff]  }
 0x885   :  { %14205 = vmatprep.subr.bf16.mxu0 %v17972_v17  ;;  %v18027_v0 = vld [vmem:[#allocation20 + $0xa48] ss:$28 sps:$4 sm:$0xff]   ;;  %v18084_v17 = vld [vmem:[#allocation20 + $0xaf0] ss:$28 sps:$4 sm:$0xff]  }
 0x887   :  { %14247 = vmatpush2.bf16.msra.mxu1 %v17991_v47  ;;  %v18032_v47 = vld [vmem:[#allocation20 + $0xa14] ss:$28 sps:$4 sm:$0xff]  }
 0x888   :  { %14206 = vmatpush2.bf16.msra.mxu0 %v17970_v29  ;;  %14248 = vmatprep.subr.bf16.mxu1 %v17996_v61  ;;  %v18092_v29 = vld [vmem:[#allocation20 + $0xabc] ss:$28 sps:$4 sm:$0xff]  }
 0x889   :  { %14207 = vmatprep.subr.bf16.mxu0 %v17978_v19 }
 0x88b   :  { %14249 = vmatpush2.bf16.msra.mxu1 %v17994_v37 }
 0x88c   :  { %14208 = vmatpush2.bf16.msra.mxu0 %v17976_v42  ;;  %14250 = vmatprep.subr.bf16.mxu1 %v17999_v49  ;;  %v18030_v42 = vld [vmem:[#allocation20 + $0xa10] ss:$28 sps:$4 sm:$0xff]   ;;  %v18090_v49 = vld [vmem:[#allocation20 + $0xab8] ss:$28 sps:$4 sm:$0xff]  }
 0x88d   :  { %v18642_v40 = vpop.eup %18641  ;;  %14209 = vmatprep.subr.bf16.mxu0 %v17984_v16 }
 0x88e   :  { %v11306_v33 = vadd.f32 1.0, %v18642_v40 }
 0x88f   :  { %v18644_v1 = vpop.eup %18643  ;;  %14251 = vmatpush2.bf16.msra.mxu1 %v17997_v30  ;;  %v18035_v30 = vld [vmem:[#allocation20 + $0x9dc] ss:$28 sps:$4 sm:$0xff]  }
 0x890   :  { %v11307_v21 = vadd.f32 1.0, %v18644_v1  ;;  %14210 = vmatpush2.bf16.msra.mxu0 %v17982_v60  ;;  %14252 = vmatprep.subr.bf16.mxu1 %v18002_v62  ;;  %18647 = vrcp.f32 %v11306_v33  ;;  %v18646_v46 = vpop.eup %18645  ;;  %v18098_v60 = vld [vmem:[#allocation20 + $0xa84] ss:$28 sps:$4 sm:$0xff]   ;;  %v18033_v33 = vld [vmem:[#allocation20 + $0x9d8] ss:$28 sps:$4 sm:$0xff]  }
 0x891   :  { %14211 = vmatprep.subr.bf16.mxu0 %v17990_v7  ;;  %v19536_v27 = vpack.c.bf16 %v18646_v46, %v18646_v46  ;;  %v18096_v1 = vld [vmem:[#allocation20 + $0xa80] ss:$28 sps:$4 sm:$0xff]   ;;  %v18041_v46 = vld [vmem:[#allocation20 + $0x96c] ss:$28 sps:$4 sm:$0xff]  }
 0x892   :  { %18649 = vrcp.f32 %v11307_v21  ;;  %v18038_v21 = vld [vmem:[#allocation20 + $0x9a4] ss:$28 sps:$4 sm:$0xff]  }
 0x893   :  { %14253 = vmatpush2.bf16.msra.mxu1 %v18000_v10 }
 0x894   :  { %14212 = vmatpush2.bf16.msra.mxu0 %v17988_v11  ;;  %14304 = vmatprep.subr.bf16.mxu1 %v18056_v24  ;;  %v18104_v11 = vld [vmem:[#allocation20 + $0xdcc] ss:$28 sps:$4 sm:$0xff]   ;;  %v18036_v24 = vld [vmem:[#allocation20 + $0x9a0] ss:$28 sps:$4 sm:$0xff]  }
 0x895   :  { %14263 = vmatprep.subr.bf16.mxu0 %v18005_v2  ;;  %v18102_v2 = vld [vmem:[#allocation20 + $0xdc8] ss:$28 sps:$4 sm:$0xff]  }
 0x897   :  { %14214 = vmatmul.mubr.bf16.vlgmr.msra.gmra.mxu0 %v19536_v27 }
 0x898   :  { %14264 = vmatpush1.bf16.msra.mxu0 %v18003_v12  ;;  %v18110_v12 = vld [vmem:[#allocation20 + $0xd94] ss:$28 sps:$4 sm:$0xff]  }
 0x899   :  { %14265 = vmatprep.subr.bf16.mxu0 %v18008_v63  ;;  %v18039_v63 = vld [vmem:[#allocation20 + $0x968] ss:$28 sps:$4 sm:$0xff]  }
 0x89c   :  { %14266 = vmatpush1.bf16.msra.mxu0 %v18006_v9  ;;  %v18108_v9 = vld [vmem:[#allocation20 + $0xd90] ss:$28 sps:$4 sm:$0xff]  }
 0x89d   :  { %14267 = vmatprep.subr.bf16.mxu0 %v18011_v15  ;;  %v18648_v52 = vpop.eup %18647  ;;  %v18044_v15 = vld [vmem:[#allocation20 + $0x934] ss:$28 sps:$4 sm:$0xff]  }
 0x89e   :  { %v19541_v50 = vpack.c.bf16 %v18648_v52, %v18648_v52  ;;  %v18114_v52 = vld [vmem:[#allocation20 + $0xd58] ss:$28 sps:$4 sm:$0xff]  }
 0x89f   :  { %v18650_v22 = vpop.eup %18649 }
 0x8a0   :  { %v19539_v20 = vpack.c.bf16 %v18650_v22, %v18650_v22  ;;  %14268 = vmatpush1.bf16.msra.mxu0 %v18009_v39  ;;  %v18116_v39 = vld [vmem:[#allocation20 + $0xd5c] ss:$28 sps:$4 sm:$0xff]  }
 0x8a1   :  { %14269 = vmatprep.subr.bf16.mxu0 %v18014_v55  ;;  %v18042_v55 = vld [vmem:[#allocation20 + $0x930] ss:$28 sps:$4 sm:$0xff]   ;;  %v18047_v22 = vld [vmem:[#allocation20 + $0x8fc] ss:$28 sps:$4 sm:$0xff]  }
 0x8a2   :  { %14254 = vmatprep.mubr.bf16.mxu1 %v19539_v20 }
 0x8a3   :  { %14255 = vmatmul.mubr.bf16.vlgmr.msra.gmra.mxu1 %v19541_v50 }
 0x8a4   :  { %14270 = vmatpush1.bf16.msra.mxu0 %v18012_v14  ;;  %14305 = vmatpush1.bf16.msra.mxu1 %v18054_v32  ;;  %v18122_v14 = vld [vmem:[#allocation20 + $0xd24] ss:$28 sps:$4 sm:$0xff]   ;;  %v18045_v32 = vld [vmem:[#allocation20 + $0x8f8] ss:$28 sps:$4 sm:$0xff]  }
 0x8a5   :  { %14271 = vmatprep.subr.bf16.mxu0 %v18017_v54  ;;  %14306 = vmatprep.subr.bf16.mxu1 %v18062_v38  ;;  %v18120_v54 = vld [vmem:[#allocation20 + $0xd20] ss:$28 sps:$4 sm:$0xff]  }
 0x8a6   :  { %v18050_v38 = vld [vmem:[#allocation20 + $0x8c4] ss:$28 sps:$4 sm:$0xff]  }
 0x8a8   :  { %14272 = vmatpush1.bf16.msra.mxu0 %v18015_v56  ;;  %14307 = vmatpush1.bf16.msra.mxu1 %v18060_v3  ;;  %v18128_v56 = vld [vmem:[#allocation20 + $0xcec] ss:$28 sps:$4 sm:$0xff]   ;;  %v19551_v3 = vld [vmem:[#allocation19] sm:$0xff] }
 0x8a9   :  { %14273 = vmatprep.subr.bf16.mxu0 %v18020_v31  ;;  %14308 = vmatprep.subr.bf16.mxu1 %v18068_v59  ;;  %v9167_v31 = vrot.slane %v19551_v3, %v19269_v48  ;;  %v9171_v59 = vrot.slane %v19551_v3, %v19272_v51 }
 0x8ac   :  { %14274 = vmatpush1.bf16.msra.mxu0 %v18018_v25  ;;  %14309 = vmatpush1.bf16.msra.mxu1 %v18066_v18  ;;  %v18048_v25 = vld [vmem:[#allocation20 + $0x8c0] ss:$28 sps:$4 sm:$0xff]   ;;  %v18126_v18 = vld [vmem:[#allocation20 + $0xce8] ss:$28 sps:$4 sm:$0xff]  }
 0x8ad   :  { %14275 = vmatprep.subr.bf16.mxu0 %v18023_v58  ;;  %14310 = vmatprep.subr.bf16.mxu1 %v18074_v35  ;;  %v18053_v58 = vld [vmem:[#allocation20 + $0x194] ss:$28 sps:$4 sm:$0xff]  }
 0x8ae   :  { %v18134_v35 = vld [vmem:[#allocation20 + $0xcb4] ss:$28 sps:$4 sm:$0xff]  }
 0x8b0   :  { %14276 = vmatpush1.bf16.msra.mxu0 %v18021_v26  ;;  %14311 = vmatpush1.bf16.msra.mxu1 %v18072_v53 }
 0x8b1   :  { %14277 = vmatprep.subr.bf16.mxu0 %v18026_v23  ;;  %14312 = vmatprep.subr.bf16.mxu1 %v18080_v28  ;;  %v18132_v23 = vld [vmem:[#allocation20 + $0xcb0] ss:$28 sps:$4 sm:$0xff]   ;;  %v18140_v28 = vld [vmem:[#allocation20 + $0xc7c] ss:$28 sps:$4 sm:$0xff]  }
 0x8b4   :  { %14278 = vmatpush1.bf16.msra.mxu0 %v18024_v41  ;;  %14313 = vmatpush1.bf16.msra.mxu1 %v18078_v8 }
 0x8b5   :  { %14279 = vmatprep.subr.bf16.mxu0 %v18029_v34  ;;  %14314 = vmatprep.subr.bf16.mxu1 %v18086_v44 }
 0x8b6   :  { %v19545_v61 = vpop.f32.mrf.mxu1 }
 0x8b7   :  { %v19547_v19 = vpop.f32.mrf.mxu0 }
 0x8b8   :  { %v19549_v37 = vpop.f32.mrf.mxu1  ;;  %14280 = vmatpush2.bf16.msra.mxu0 %v18027_v0  ;;  %14315 = vmatpush1.bf16.msra.mxu1 %v18084_v17  ;;  %v11069_v26 = vadd.f32 %v19547_v19, %v9167_v31  ;;  %v18138_v0 = vld [vmem:[#allocation20 + $0xc78] ss:$28 sps:$4 sm:$0xff]   ;;  %v18089_v31 = vld [vmem:[#allocation20 + $0x44] ss:$28 sps:$4 sm:$0xff]  }
 0x8b9   :  { %v11070_v16 = vpop.f32.mrf.mxu0  ;;  %14281 = vmatprep.subr.bf16.mxu0 %v18032_v47  ;;  %14316 = vmatprep.subr.bf16.mxu1 %v18092_v29  ;;  %v18146_v47 = vld [vmem:[#allocation20 + $0xc44] ss:$28 sps:$4 sm:$0xff]  }
 0x8ba   :  { %v11113_v62 = vpop.f32.mrf.mxu1  ;;  %v11071_v53 = vadd.f32 %v11070_v16, %v9171_v59  ;;  %v11110_v41 = vadd.f32 %v19545_v61, %v11069_v26  ;;  %v9179_v59 = vrot.slane %v19551_v3, %v702_v5  ;;  %v18095_v26 = vld [vmem:[#allocation20 + $0xc] ss:$28 sps:$4 sm:$0xff]  }
 0x8bb   :  { %v11072_v40 = vpop.f32.mrf.mxu0  ;;  %v18152_v62 = vld [vmem:[#allocation20 + $0x514] ss:$28 sps:$4 sm:$0xff]  }
 0x8bc   :  { %v11114_v7 = vpop.f32.mrf.mxu1  ;;  %14282 = vmatpush2.bf16.msra.mxu0 %v18030_v42  ;;  %14317 = vmatpush1.bf16.msra.mxu1 %v18090_v49  ;;  %v11112_v44 = vadd.f32 %v19549_v37, %v11071_v53 }
 0x8bd   :  { %v11073_v10 = vpop.f32.mrf.mxu0  ;;  %14283 = vmatprep.subr.bf16.mxu0 %v18035_v30  ;;  %14318 = vmatprep.subr.bf16.mxu1 %v18098_v60  ;;  %v18144_v30 = vld [vmem:[#allocation20 + $0xc40] ss:$28 sps:$4 sm:$0xff]  }
 0x8c0   :  { %14284 = vmatpush2.bf16.msra.mxu0 %v18033_v33  ;;  %14319 = vmatpush1.bf16.msra.mxu1 %v18096_v1 }
 0x8c1   :  { %14285 = vmatprep.subr.bf16.mxu0 %v18038_v21  ;;  %14320 = vmatprep.subr.bf16.mxu1 %v18104_v11 }
 0x8c4   :  { %14286 = vmatpush2.bf16.msra.mxu0 %v18036_v24  ;;  %14321 = vmatpush2.bf16.msra.mxu1 %v18102_v2 }
 0x8c5   :  { %14287 = vmatprep.subr.bf16.mxu0 %v18041_v46  ;;  %14322 = vmatprep.subr.bf16.mxu1 %v18110_v12  ;;  %v18051_v12 = vld [vmem:[#allocation20 + $0x190] ss:$28 sps:$4 sm:$0xff]  }
 0x8c8   :  { %14288 = vmatpush2.bf16.msra.mxu0 %v18039_v63  ;;  %14323 = vmatpush2.bf16.msra.mxu1 %v18108_v9  ;;  %v18059_v9 = vld [vmem:[#allocation20 + $0x15c] ss:$28 sps:$4 sm:$0xff]  }
 0x8c9   :  { %14289 = vmatprep.subr.bf16.mxu0 %v18044_v15  ;;  %14324 = vmatprep.subr.bf16.mxu1 %v18116_v39  ;;  %v18057_v15 = vld [vmem:[#allocation20 + $0x158] ss:$28 sps:$4 sm:$0xff]   ;;  %v18065_v39 = vld [vmem:[#allocation20 + $0x124] ss:$28 sps:$4 sm:$0xff]  }
 0x8cc   :  { %14290 = vmatpush2.bf16.msra.mxu0 %v18042_v55  ;;  %14325 = vmatpush2.bf16.msra.mxu1 %v18114_v52  ;;  %v18063_v55 = vld [vmem:[#allocation20 + $0x120] ss:$28 sps:$4 sm:$0xff]   ;;  %v18071_v52 = vld [vmem:[#allocation20 + $0xec] ss:$28 sps:$4 sm:$0xff]  }
 0x8cd   :  { %14291 = vmatprep.subr.bf16.mxu0 %v18047_v22  ;;  %14326 = vmatprep.subr.bf16.mxu1 %v18122_v14  ;;  %v18069_v22 = vld [vmem:[#allocation20 + $0xe8] ss:$28 sps:$4 sm:$0xff]   ;;  %v18077_v14 = vld [vmem:[#allocation20 + $0xb4] ss:$28 sps:$4 sm:$0xff]  }
 0x8d0   :  { %14292 = vmatpush2.bf16.msra.mxu0 %v18045_v32  ;;  %14327 = vmatpush2.bf16.msra.mxu1 %v18120_v54  ;;  %v18075_v32 = vld [vmem:[#allocation20 + $0xb0] ss:$28 sps:$4 sm:$0xff]   ;;  %v18083_v54 = vld [vmem:[#allocation20 + $0x7c] ss:$28 sps:$4 sm:$0xff]  }
 0x8d1   :  { %14293 = vmatprep.subr.bf16.mxu0 %v18050_v38  ;;  %14328 = vmatprep.subr.bf16.mxu1 %v18128_v56  ;;  %v9175_v38 = vrot.slane %v19551_v3, %v19298_v43  ;;  %v18081_v56 = vld [vmem:[#allocation20 + $0x78] ss:$28 sps:$4 sm:$0xff]  }
 0x8d4   :  { %14294 = vmatpush2.bf16.msra.mxu0 %v18048_v25  ;;  %14329 = vmatpush2.bf16.msra.mxu1 %v18126_v18 }
 0x8d5   :  { %14345 = vmatprep.subr.bf16.mxu0 %v18053_v58  ;;  %14330 = vmatprep.subr.bf16.mxu1 %v18134_v35  ;;  %v18087_v58 = vld [vmem:[#allocation20 + $0x40] ss:$28 sps:$4 sm:$0xff]  }
 0x8d7   :  { %v11150_v8 = vpop.f32.mrf.mxu0 }
 0x8d8   :  { %v11151_v34 = vadd.f32 %v11150_v8, %v11110_v41  ;;  %14331 = vmatpush2.bf16.msra.mxu1 %v18132_v23 }
 0x8d9   :  { %v11152_v17 = vpop.f32.mrf.mxu0  ;;  %14332 = vmatprep.subr.bf16.mxu1 %v18140_v28 }
 0x8da   :  { %v11284_v29 = vsub.f32 0.0, %v11151_v34  ;;  %v11153_v19 = vadd.f32 %v11152_v17, %v11112_v44 }
 0x8db   :  { %v11154_v42 = vpop.f32.mrf.mxu0 }
 0x8dc   :  { %v11296_v49 = vmul.f32 1.442695, %v11284_v29  ;;  %v11285_v16 = vsub.f32 0.0, %v11153_v19  ;;  %14333 = vmatpush2.bf16.msra.mxu1 %v18138_v0  ;;  %v18093_v0 = vld [vmem:[#allocation20 + $0x8] ss:$28 sps:$4 sm:$0xff]  }
 0x8dd   :  { %v11155_v60 = vpop.f32.mrf.mxu0  ;;  %14334 = vmatprep.subr.bf16.mxu1 %v18146_v47 }
 0x8de   :  { %18651 = vpow2.f32 %v11296_v49  ;;  %v11298_v61 = vmul.f32 1.442695, %v11285_v16  ;;  %v18099_v49 = vld [vmem:[#allocation20 + $0x350] ss:$28 sps:$4 sm:$0xff]   ;;  %v18107_v16 = vld [vmem:[#allocation20 + $0x31c] ss:$28 sps:$4 sm:$0xff]  }
 0x8df   :  { %v18105_v60 = vld [vmem:[#allocation20 + $0x318] ss:$28 sps:$4 sm:$0xff]  }
 0x8e0   :  { %18653 = vpow2.f32 %v11298_v61  ;;  %14335 = vmatpush2.bf16.msra.mxu1 %v18144_v30  ;;  %v18111_v61 = vld [vmem:[#allocation20 + $0x2e0] ss:$28 sps:$4 sm:$0xff]  }
 0x8e1   :  { %14386 = vmatprep.subr.bf16.mxu1 %v18152_v62  ;;  %v18113_v62 = vld [vmem:[#allocation20 + $0x2e4] ss:$28 sps:$4 sm:$0xff]  }
 0x8eb   :  { %v18652_v37 = vpop.eup %18651 }
 0x8ec   :  { %v11308_v40 = vadd.f32 1.0, %v18652_v37  ;;  %v18119_v37 = vld [vmem:[#allocation20 + $0x2ac] ss:$28 sps:$4 sm:$0xff]  }
 0x8ed   :  { %v18654_v7 = vpop.eup %18653 }
 0x8ee   :  { %v11309_v33 = vadd.f32 1.0, %v18654_v7  ;;  %18655 = vrcp.f32 %v11308_v40  ;;  %v18117_v40 = vld [vmem:[#allocation20 + $0x2a8] ss:$28 sps:$4 sm:$0xff]   ;;  %v18125_v7 = vld [vmem:[#allocation20 + $0x274] ss:$28 sps:$4 sm:$0xff]  }
 0x8f0   :  { %18657 = vrcp.f32 %v11309_v33 }
 0x8f6   :  { %v11191_v1 = vpop.f32.mrf.mxu1 }
 0x8f7   :  { %v11192_v25 = vadd.f32 %v11191_v1, %v9175_v38  ;;  %v18150_v38 = vld [vmem:[#allocation20 + $0x510] ss:$28 sps:$4 sm:$0xff]  }
 0x8f8   :  { %v11193_v10 = vpop.f32.mrf.mxu1 }
 0x8f9   :  { %v11194_v53 = vadd.f32 %v11193_v10, %v9179_v59  ;;  %v18123_v10 = vld [vmem:[#allocation20 + $0x270] ss:$28 sps:$4 sm:$0xff]   ;;  %v18158_v59 = vld [vmem:[#allocation20 + $0x4dc] ss:$28 sps:$4 sm:$0xff]  }
 0x8fa   :  { %v11195_v21 = vpop.f32.mrf.mxu1 }
 0x8fb   :  { %v18656_v11 = vpop.eup %18655 }
 0x8fc   :  { %v11196_v24 = vpop.f32.mrf.mxu1  ;;  %v19562_v63 = vpack.c.bf16 %v18656_v11, %v18656_v11  ;;  %v18131_v11 = vld [vmem:[#allocation20 + $0x23c] ss:$28 sps:$4 sm:$0xff]  }
 0x8fd   :  { %v18658_v2 = vpop.eup %18657 }
 0x8fe   :  { %v19560_v46 = vpack.c.bf16 %v18658_v2, %v18658_v2  ;;  %v18129_v2 = vld [vmem:[#allocation20 + $0x238] ss:$28 sps:$4 sm:$0xff]  }
 0x900   :  { %14295 = vmatprep.mubr.bf16.mxu0 %v19560_v46 }
 0x901   :  { %14296 = vmatmul.mubr.bf16.vlgmr.msra.gmra.mxu0 %v19562_v63 }
 0x902   :  { %14346 = vmatpush1.bf16.msra.mxu0 %v18051_v12  ;;  %14377 = vmatprep.mubr.bf16.mxu0 %v19525_v45  ;;  %v18137_v12 = vld [vmem:[#allocation20 + $0x204] ss:$28 sps:$4 sm:$0xff]  }
 0x903   :  { %14347 = vmatprep.subr.bf16.mxu0 %v18059_v9  ;;  %v18135_v9 = vld [vmem:[#allocation20 + $0x200] ss:$28 sps:$4 sm:$0xff]  }
 0x906   :  { %14348 = vmatpush1.bf16.msra.mxu0 %v18057_v15  ;;  %v18143_v15 = vld [vmem:[#allocation20 + $0x1cc] ss:$28 sps:$4 sm:$0xff]  }
 0x907   :  { %14349 = vmatprep.subr.bf16.mxu0 %v18065_v39  ;;  %v18141_v39 = vld [vmem:[#allocation20 + $0x1c8] ss:$28 sps:$4 sm:$0xff]  }
 0x90a   :  { %14350 = vmatpush1.bf16.msra.mxu0 %v18063_v55  ;;  %v18149_v55 = vld [vmem:[#allocation20 + $0x894] ss:$28 sps:$4 sm:$0xff]  }
 0x90b   :  { %14351 = vmatprep.subr.bf16.mxu0 %v18071_v52 }
 0x90e   :  { %14352 = vmatpush1.bf16.msra.mxu0 %v18069_v22  ;;  %v18147_v22 = vld [vmem:[#allocation20 + $0x890] ss:$28 sps:$4 sm:$0xff]  }
 0x90f   :  { %14353 = vmatprep.subr.bf16.mxu0 %v18077_v14 }
 0x912   :  { %14354 = vmatpush1.bf16.msra.mxu0 %v18075_v32  ;;  %v18155_v32 = vld [vmem:[#allocation20 + $0x85c] ss:$28 sps:$4 sm:$0xff]  }
 0x913   :  { %14355 = vmatprep.subr.bf16.mxu0 %v18083_v54 }
 0x916   :  { %14356 = vmatpush1.bf16.msra.mxu0 %v18081_v56  ;;  %v11273_v18 = vpop.f32.mrf.mxu1 }
 0x917   :  { %v11232_v35 = vpop.f32.mrf.mxu0  ;;  %14357 = vmatprep.subr.bf16.mxu0 %v18089_v31  ;;  %v18153_v31 = vld [vmem:[#allocation20 + $0x858] ss:$28 sps:$4 sm:$0xff]  }
 0x918   :  { %v11233_v23 = vadd.f32 %v11232_v35, %v11192_v25  ;;  %v11275_v28 = vpop.f32.mrf.mxu1  ;;  %v18161_v25 = vld [vmem:[#allocation20 + $0x824] ss:$28 sps:$4 sm:$0xff]  }
 0x919   :  { %v11234_v41 = vpop.f32.mrf.mxu0  ;;  %v18164_v35 = vld [vmem:[#allocation20 + $0x4a4] ss:$28 sps:$4 sm:$0xff]  }
 0x91a   :  { %v11274_v8 = vadd.f32 %v11273_v18, %v11233_v23  ;;  %v11235_v34 = vadd.f32 %v11234_v41, %v11194_v53  ;;  %14358 = vmatpush1.bf16.msra.mxu0 %v18087_v58  ;;  %v11277_v44 = vpop.f32.mrf.mxu1  ;;  %v18156_v18 = vld [vmem:[#allocation20 + $0x4d8] ss:$28 sps:$4 sm:$0xff]   ;;  %v18159_v58 = vld [vmem:[#allocation20 + $0x820] ss:$28 sps:$4 sm:$0xff]   ;;  %v18165_v23 = vld [vmem:[#allocation20 + $0x7e8] ss:$28 sps:$4 sm:$0xff]  }
 0x91b   :  { %v11236_v17 = vpop.f32.mrf.mxu0  ;;  %14359 = vmatprep.subr.bf16.mxu0 %v18095_v26  ;;  %v18167_v26 = vld [vmem:[#allocation20 + $0x7ec] ss:$28 sps:$4 sm:$0xff]   ;;  %v18162_v53 = vld [vmem:[#allocation20 + $0x4a0] ss:$28 sps:$4 sm:$0xff]   ;;  %v18173_v41 = vld [vmem:[#allocation20 + $0x7b4] ss:$28 sps:$4 sm:$0xff]  }
 0x91c   :  { %v11286_v5 = vsub.f32 0.0, %v11274_v8  ;;  %v11276_v3 = vadd.f32 %v11275_v28, %v11235_v34  ;;  %v11278_v47 = vpop.f32.mrf.mxu1  ;;  %v18170_v28 = vld [vmem:[#allocation20 + $0x46c] ss:$28 sps:$4 sm:$0xff]   ;;  %v18176_v44 = vld [vmem:[#allocation20 + $0x434] ss:$28 sps:$4 sm:$0xff]  }
 0x91d   :  { %v11237_v29 = vpop.f32.mrf.mxu0  ;;  %v18168_v8 = vld [vmem:[#allocation20 + $0x468] ss:$28 sps:$4 sm:$0xff]   ;;  %v18171_v34 = vld [vmem:[#allocation20 + $0x7b0] ss:$28 sps:$4 sm:$0xff]   ;;  %v18180_v47 = vld [vmem:[#allocation20 + $0x3f8] ss:$28 sps:$4 sm:$0xff]  }
 0x91e   :  { %v11300_v19 = vmul.f32 1.442695, %v11286_v5  ;;  %v11287_v42 = vsub.f32 0.0, %v11276_v3  ;;  %14360 = vmatpush1.bf16.msra.mxu0 %v18093_v0  ;;  %v18179_v0 = vld [vmem:[#allocation20 + $0x77c] ss:$28 sps:$4 sm:$0xff]  }
 0x91f   :  { %14361 = vmatprep.subr.bf16.mxu0 %v18101_v57  ;;  %v18174_v17 = vld [vmem:[#allocation20 + $0x430] ss:$28 sps:$4 sm:$0xff]   ;;  %v18177_v57 = vld [vmem:[#allocation20 + $0x778] ss:$28 sps:$4 sm:$0xff]   ;;  %v18185_v3 = vld [vmem:[#allocation20 + $0x744] ss:$28 sps:$4 sm:$0xff]  }
 0x920   :  { %18659 = vpow2.f32 %v11300_v19  ;;  %v11302_v30 = vmul.f32 1.442695, %v11287_v42  ;;  %v18182_v5 = vld [vmem:[#allocation20 + $0x3fc] ss:$28 sps:$4 sm:$0xff]   ;;  %v18188_v19 = vld [vmem:[#allocation20 + $0x3c4] ss:$28 sps:$4 sm:$0xff]  }
 0x921   :  { %v18183_v29 = vld [vmem:[#allocation20 + $0x740] ss:$28 sps:$4 sm:$0xff]  }
 0x922   :  { %18661 = vpow2.f32 %v11302_v30  ;;  %14362 = vmatpush2.bf16.msra.mxu0 %v18099_v49  ;;  %v18191_v49 = vld [vmem:[#allocation20 + $0x70c] ss:$28 sps:$4 sm:$0xff]   ;;  %v18186_v30 = vld [vmem:[#allocation20 + $0x3c0] ss:$28 sps:$4 sm:$0xff]  }
 0x923   :  { %14363 = vmatprep.subr.bf16.mxu0 %v18107_v16 }
 0x926   :  { %14364 = vmatpush2.bf16.msra.mxu0 %v18105_v60  ;;  %v18189_v60 = vld [vmem:[#allocation20 + $0x708] ss:$28 sps:$4 sm:$0xff]  }
 0x927   :  { %14365 = vmatprep.subr.bf16.mxu0 %v18113_v62  ;;  %v18194_v62 = vld [vmem:[#allocation20 + $0x38c] ss:$28 sps:$4 sm:$0xff]  }
 0x92a   :  { %14366 = vmatpush2.bf16.msra.mxu0 %v18111_v61  ;;  %v11840_v61 = vld [vmem:[#allocation22] sm:$0xff] }
 0x92b   :  { %14367 = vmatprep.subr.bf16.mxu0 %v18119_v37 }
 0x92d   :  { %v18660_v33 = vpop.eup %18659 }
 0x92e   :  { %v11310_v1 = vadd.f32 1.0, %v18660_v33  ;;  %14368 = vmatpush2.bf16.msra.mxu0 %v18117_v40  ;;  %v18197_v40 = vld [vmem:[#allocation20 + $0xa54] ss:$28 sps:$4 sm:$0xff]   ;;  %v18192_v33 = vld [vmem:[#allocation20 + $0x388] ss:$28 sps:$4 sm:$0xff]  }
 0x92f   :  { %v18662_v21 = vpop.eup %18661  ;;  %14369 = vmatprep.subr.bf16.mxu0 %v18125_v7 }
 0x930   :  { %v11311_v24 = vadd.f32 1.0, %v18662_v21  ;;  %18663 = vrcp.f32 %v11310_v1  ;;  %v11845_v1 = vrot.slane %v11840_v61, %v19175_v6  ;;  %v18200_v21 = vld [vmem:[#allocation20 + $0x6d4] ss:$28 sps:$4 sm:$0xff]  }
 0x932   :  { %18665 = vrcp.f32 %v11311_v24  ;;  %14370 = vmatpush2.bf16.msra.mxu0 %v18123_v10  ;;  %v18195_v10 = vld [vmem:[#allocation20 + $0xa50] ss:$28 sps:$4 sm:$0xff]   ;;  %v11849_v24 = vrot.slane %v11840_v61, %v19178_v13  ;;  %v18207_v13 = vld [vmem:[#allocation20 + $0x9e0] ss:$28 sps:$4 sm:$0xff]  }
 0x933   :  { %14371 = vmatprep.subr.bf16.mxu0 %v18131_v11  ;;  %v18203_v11 = vld [vmem:[#allocation20 + $0xa1c] ss:$28 sps:$4 sm:$0xff]  }
 0x934   :  { %v18249_v61 = vld [vmem:[#allocation20 + $0x160] ss:$28 sps:$4 sm:$0xff]  }
 0x936   :  { %14372 = vmatpush2.bf16.msra.mxu0 %v18129_v2  ;;  %v18198_v2 = vld [vmem:[#allocation20 + $0x6d0] ss:$28 sps:$4 sm:$0xff]  }
 0x937   :  { %14373 = vmatprep.subr.bf16.mxu0 %v18137_v12 }
 0x93a   :  { %14374 = vmatpush2.bf16.msra.mxu0 %v18135_v9  ;;  %v18201_v9 = vld [vmem:[#allocation20 + $0xa18] ss:$28 sps:$4 sm:$0xff]  }
 0x93b   :  { %14375 = vmatprep.subr.bf16.mxu0 %v18143_v15  ;;  %v18206_v15 = vld [vmem:[#allocation20 + $0x69c] ss:$28 sps:$4 sm:$0xff]  }
 0x93d   :  { %v18664_v52 = vpop.eup %18663 }
 0x93e   :  { %14376 = vmatpush2.bf16.msra.mxu0 %v18141_v39  ;;  %v19576_v56 = vpack.c.bf16 %v18664_v52, %v18664_v52 }
 0x93f   :  { %v18666_v14 = vpop.eup %18665  ;;  %14427 = vmatprep.subr.bf16.mxu0 %v18149_v55  ;;  %v18209_v55 = vld [vmem:[#allocation20 + $0x9e4] ss:$28 sps:$4 sm:$0xff]  }
 0x940   :  { %v19572_v54 = vpack.c.bf16 %v18666_v14, %v18666_v14  ;;  %v18204_v14 = vld [vmem:[#allocation20 + $0x698] ss:$28 sps:$4 sm:$0xff]  }
 0x941   :  { %14378 = vmatmul.mubr.bf16.vlgmr.msra.gmra.mxu0 %v19536_v27 }
 0x942   :  { %14428 = vmatpush1.bf16.msra.mxu0 %v18147_v22  ;;  %14459 = vmatprep.mubr.bf16.mxu0 %v19560_v46 }
 0x943   :  { %14336 = vmatprep.mubr.bf16.mxu1 %v19572_v54  ;;  %14429 = vmatprep.subr.bf16.mxu0 %v18155_v32 }
 0x944   :  { %14337 = vmatmul.mubr.bf16.vlgmr.msra.gmra.mxu1 %v19576_v56 }
 0x945   :  { %14387 = vmatpush1.bf16.msra.mxu1 %v18150_v38  ;;  %14418 = vmatprep.mubr.bf16.mxu1 %v19539_v20  ;;  %v18212_v38 = vld [vmem:[#allocation20 + $0x664] ss:$28 sps:$4 sm:$0xff]  }
 0x946   :  { %14430 = vmatpush1.bf16.msra.mxu0 %v18153_v31  ;;  %14388 = vmatprep.subr.bf16.mxu1 %v18158_v59  ;;  %v18215_v59 = vld [vmem:[#allocation20 + $0x9ac] ss:$28 sps:$4 sm:$0xff]  }
 0x947   :  { %14431 = vmatprep.subr.bf16.mxu0 %v18161_v25 }
 0x949   :  { %14389 = vmatpush1.bf16.msra.mxu1 %v18156_v18  ;;  %v18210_v18 = vld [vmem:[#allocation20 + $0x660] ss:$28 sps:$4 sm:$0xff]  }
 0x94a   :  { %14432 = vmatpush1.bf16.msra.mxu0 %v18159_v58  ;;  %14390 = vmatprep.subr.bf16.mxu1 %v18164_v35  ;;  %v18213_v58 = vld [vmem:[#allocation20 + $0x9a8] ss:$28 sps:$4 sm:$0xff]  }
 0x94b   :  { %14433 = vmatprep.subr.bf16.mxu0 %v18167_v26  ;;  %v18218_v35 = vld [vmem:[#allocation20 + $0x62c] ss:$28 sps:$4 sm:$0xff]   ;;  %v18221_v26 = vld [vmem:[#allocation20 + $0x974] ss:$28 sps:$4 sm:$0xff]  }
 0x94d   :  { %14391 = vmatpush1.bf16.msra.mxu1 %v18162_v53  ;;  %v18216_v53 = vld [vmem:[#allocation20 + $0x628] ss:$28 sps:$4 sm:$0xff]  }
 0x94e   :  { %14434 = vmatpush1.bf16.msra.mxu0 %v18165_v23  ;;  %14392 = vmatprep.subr.bf16.mxu1 %v18170_v28  ;;  %v18219_v23 = vld [vmem:[#allocation20 + $0x970] ss:$28 sps:$4 sm:$0xff]  }
 0x94f   :  { %14435 = vmatprep.subr.bf16.mxu0 %v18173_v41  ;;  %v18224_v28 = vld [vmem:[#allocation20 + $0x5f4] ss:$28 sps:$4 sm:$0xff]   ;;  %v18227_v41 = vld [vmem:[#allocation20 + $0x93c] ss:$28 sps:$4 sm:$0xff]  }
 0x951   :  { %14393 = vmatpush1.bf16.msra.mxu1 %v18168_v8  ;;  %v18222_v8 = vld [vmem:[#allocation20 + $0x5f0] ss:$28 sps:$4 sm:$0xff]  }
 0x952   :  { %14436 = vmatpush1.bf16.msra.mxu0 %v18171_v34  ;;  %14394 = vmatprep.subr.bf16.mxu1 %v18176_v44  ;;  %v18225_v34 = vld [vmem:[#allocation20 + $0x938] ss:$28 sps:$4 sm:$0xff]  }
 0x953   :  { %14437 = vmatprep.subr.bf16.mxu0 %v18179_v0  ;;  %v18230_v44 = vld [vmem:[#allocation20 + $0x5bc] ss:$28 sps:$4 sm:$0xff]   ;;  %v18233_v0 = vld [vmem:[#allocation20 + $0x904] ss:$28 sps:$4 sm:$0xff]  }
 0x955   :  { %14395 = vmatpush1.bf16.msra.mxu1 %v18174_v17  ;;  %v18228_v17 = vld [vmem:[#allocation20 + $0x5b8] ss:$28 sps:$4 sm:$0xff]  }
 0x956   :  { %14438 = vmatpush1.bf16.msra.mxu0 %v18177_v57  ;;  %14396 = vmatprep.subr.bf16.mxu1 %v18182_v5  ;;  %v18231_v57 = vld [vmem:[#allocation20 + $0x900] ss:$28 sps:$4 sm:$0xff]  }
 0x957   :  { %v14215_v42 = vpop.f32.mrf.mxu0  ;;  %14439 = vmatprep.subr.bf16.mxu0 %v18185_v3  ;;  %v18236_v5 = vld [vmem:[#allocation20 + $0x584] ss:$28 sps:$4 sm:$0xff]   ;;  %v18239_v3 = vld [vmem:[#allocation20 + $0x8cc] ss:$28 sps:$4 sm:$0xff]  }
 0x958   :  { %v14216_v12 = vadd.f32 %v14215_v42, %v11845_v1  ;;  %v18245_v42 = vld [vmem:[#allocation20 + $0x19c] ss:$28 sps:$4 sm:$0xff]   ;;  %v18260_v1 = vld [vmem:[#allocation20 + $0xba4] ss:$28 sps:$4 sm:$0xff]  }
 0x959   :  { %14397 = vmatpush1.bf16.msra.mxu1 %v18180_v47  ;;  %v14217_v16 = vpop.f32.mrf.mxu0  ;;  %v18234_v47 = vld [vmem:[#allocation20 + $0x580] ss:$28 sps:$4 sm:$0xff]  }
 0x95a   :  { %14440 = vmatpush1.bf16.msra.mxu0 %v18183_v29  ;;  %14398 = vmatprep.subr.bf16.mxu1 %v18188_v19  ;;  %v14218_v52 = vadd.f32 %v14217_v16, %v11849_v24  ;;  %v18237_v29 = vld [vmem:[#allocation20 + $0x8c8] ss:$28 sps:$4 sm:$0xff]   ;;  %v18243_v16 = vld [vmem:[#allocation20 + $0x198] ss:$28 sps:$4 sm:$0xff]  }
 0x95b   :  { %v14219_v37 = vpop.f32.mrf.mxu0  ;;  %14441 = vmatprep.subr.bf16.mxu0 %v18191_v49  ;;  %v18242_v19 = vld [vmem:[#allocation20 + $0x54c] ss:$28 sps:$4 sm:$0xff]  }
 0x95c   :  { %v18240_v49 = vld [vmem:[#allocation20 + $0x548] ss:$28 sps:$4 sm:$0xff]   ;;  %v18254_v37 = vld [vmem:[#allocation20 + $0xbdc] ss:$28 sps:$4 sm:$0xff]  }
 0x95d   :  { %14399 = vmatpush1.bf16.msra.mxu1 %v18186_v30  ;;  %v14220_v7 = vpop.f32.mrf.mxu0  ;;  %v18248_v30 = vld [vmem:[#allocation20 + $0xc14] ss:$28 sps:$4 sm:$0xff]   ;;  %v18266_v24 = vld [vmem:[#allocation20 + $0xb6c] ss:$28 sps:$4 sm:$0xff]  }
 0x95e   :  { %14442 = vmatpush1.bf16.msra.mxu0 %v18189_v60  ;;  %14400 = vmatprep.subr.bf16.mxu1 %v18194_v62  ;;  %v18251_v60 = vld [vmem:[#allocation20 + $0x164] ss:$28 sps:$4 sm:$0xff]   ;;  %v18246_v62 = vld [vmem:[#allocation20 + $0xc10] ss:$28 sps:$4 sm:$0xff]   ;;  %v18252_v7 = vld [vmem:[#allocation20 + $0xbd8] ss:$28 sps:$4 sm:$0xff]  }
 0x95f   :  { %14443 = vmatprep.subr.bf16.mxu0 %v18197_v40  ;;  %v18257_v40 = vld [vmem:[#allocation20 + $0x12c] ss:$28 sps:$4 sm:$0xff]  }
 0x961   :  { %14401 = vmatpush1.bf16.msra.mxu1 %v18192_v33  ;;  %v18255_v33 = vld [vmem:[#allocation20 + $0x128] ss:$28 sps:$4 sm:$0xff]  }
 0x962   :  { %14444 = vmatpush2.bf16.msra.mxu0 %v18195_v10  ;;  %14402 = vmatprep.subr.bf16.mxu1 %v18200_v21  ;;  %v18263_v10 = vld [vmem:[#allocation20 + $0xf4] ss:$28 sps:$4 sm:$0xff]   ;;  %v18258_v21 = vld [vmem:[#allocation20 + $0xba0] ss:$28 sps:$4 sm:$0xff]  }
 0x963   :  { %v14256_v39 = vpop.f32.mrf.mxu1  ;;  %14445 = vmatprep.subr.bf16.mxu0 %v18203_v11  ;;  %v18261_v11 = vld [vmem:[#allocation20 + $0xf0] ss:$28 sps:$4 sm:$0xff]  }
 0x964   :  { %v19583_v6 = vadd.f32 %v14256_v39, %v14216_v12  ;;  %v18264_v12 = vld [vmem:[#allocation20 + $0xb68] ss:$28 sps:$4 sm:$0xff]  }
 0x965   :  { %14403 = vmatpush2.bf16.msra.mxu1 %v18198_v2  ;;  %v14258_v22 = vpop.f32.mrf.mxu1  ;;  %v18269_v2 = vld [vmem:[#allocation20 + $0xbc] ss:$28 sps:$4 sm:$0xff]   ;;  %v18275_v39 = vld [vmem:[#allocation20 + $0x84] ss:$28 sps:$4 sm:$0xff]  }
 0x966   :  { %v19585_v32 = vadd.f32 %v14258_v22, %v14218_v52  ;;  %14446 = vmatpush2.bf16.msra.mxu0 %v18201_v9  ;;  %14404 = vmatprep.subr.bf16.mxu1 %v18206_v15  ;;  %v18267_v9 = vld [vmem:[#allocation20 + $0xb8] ss:$28 sps:$4 sm:$0xff]   ;;  %v18273_v52 = vld [vmem:[#allocation20 + $0x80] ss:$28 sps:$4 sm:$0xff]  }
 0x967   :  { %v14260_v31 = vpop.f32.mrf.mxu1  ;;  %14447 = vmatprep.subr.bf16.mxu0 %v18209_v55  ;;  %v18272_v15 = vld [vmem:[#allocation20 + $0xb34] ss:$28 sps:$4 sm:$0xff]   ;;  %v18278_v22 = vld [vmem:[#allocation20 + $0xafc] ss:$28 sps:$4 sm:$0xff]  }
 0x968   :  { %v18270_v55 = vld [vmem:[#allocation20 + $0xb30] ss:$28 sps:$4 sm:$0xff]   ;;  %v18284_v31 = vld [vmem:[#allocation20 + $0xac4] ss:$28 sps:$4 sm:$0xff]  }
 0x969   :  { %14405 = vmatpush2.bf16.msra.mxu1 %v18204_v14  ;;  %v14261_v25 = vpop.f32.mrf.mxu1  ;;  %v18281_v14 = vld [vmem:[#allocation20 + $0x4c] ss:$28 sps:$4 sm:$0xff]  }
 0x96a   :  { %14448 = vmatpush2.bf16.msra.mxu0 %v18207_v13  ;;  %14406 = vmatprep.subr.bf16.mxu1 %v18212_v38  ;;  %v18276_v13 = vld [vmem:[#allocation20 + $0xaf8] ss:$28 sps:$4 sm:$0xff]   ;;  %v18279_v38 = vld [vmem:[#allocation20 + $0x48] ss:$28 sps:$4 sm:$0xff]   ;;  %v18282_v25 = vld [vmem:[#allocation20 + $0xac0] ss:$28 sps:$4 sm:$0xff]  }
 0x96b   :  { %14449 = vmatprep.subr.bf16.mxu0 %v18215_v59  ;;  %v18287_v59 = vld [vmem:[#allocation20 + $0x14] ss:$28 sps:$4 sm:$0xff]  }
 0x96d   :  { %14407 = vmatpush2.bf16.msra.mxu1 %v18210_v18  ;;  %v18285_v18 = vld [vmem:[#allocation20 + $0x10] ss:$28 sps:$4 sm:$0xff]  }
 0x96e   :  { %14450 = vmatpush2.bf16.msra.mxu0 %v18213_v58  ;;  %14408 = vmatprep.subr.bf16.mxu1 %v18218_v35  ;;  %v18290_v58 = vld [vmem:[#allocation20 + $0xa8c] ss:$28 sps:$4 sm:$0xff]   ;;  %v18293_v35 = vld [vmem:[#allocation20 + $0x35c] ss:$28 sps:$4 sm:$0xff]  }
 0x96f   :  { %14451 = vmatprep.subr.bf16.mxu0 %v18221_v26  ;;  %v18288_v26 = vld [vmem:[#allocation20 + $0xa88] ss:$28 sps:$4 sm:$0xff]  }
 0x971   :  { %14409 = vmatpush2.bf16.msra.mxu1 %v18216_v53  ;;  %v18291_v53 = vld [vmem:[#allocation20 + $0x358] ss:$28 sps:$4 sm:$0xff]  }
 0x972   :  { %14452 = vmatpush2.bf16.msra.mxu0 %v18219_v23  ;;  %14410 = vmatprep.subr.bf16.mxu1 %v18224_v28  ;;  %v18296_v23 = vld [vmem:[#allocation20 + $0xdd4] ss:$28 sps:$4 sm:$0xff]   ;;  %v18299_v28 = vld [vmem:[#allocation20 + $0x324] ss:$28 sps:$4 sm:$0xff]  }
 0x973   :  { %14453 = vmatprep.subr.bf16.mxu0 %v18227_v41  ;;  %v18294_v41 = vld [vmem:[#allocation20 + $0xdd0] ss:$28 sps:$4 sm:$0xff]  }
 0x975   :  { %14411 = vmatpush2.bf16.msra.mxu1 %v18222_v8  ;;  %v18297_v8 = vld [vmem:[#allocation20 + $0x320] ss:$28 sps:$4 sm:$0xff]  }
 0x976   :  { %14454 = vmatpush2.bf16.msra.mxu0 %v18225_v34  ;;  %14412 = vmatprep.subr.bf16.mxu1 %v18230_v44  ;;  %v18302_v34 = vld [vmem:[#allocation20 + $0xd9c] ss:$28 sps:$4 sm:$0xff]   ;;  %v18305_v44 = vld [vmem:[#allocation20 + $0x2ec] ss:$28 sps:$4 sm:$0xff]  }
 0x977   :  { %14455 = vmatprep.subr.bf16.mxu0 %v18233_v0  ;;  %v18300_v0 = vld [vmem:[#allocation20 + $0xd98] ss:$28 sps:$4 sm:$0xff]  }
 0x979   :  { %14413 = vmatpush2.bf16.msra.mxu1 %v18228_v17  ;;  %v18303_v17 = vld [vmem:[#allocation20 + $0x2e8] ss:$28 sps:$4 sm:$0xff]  }
 0x97a   :  { %14456 = vmatpush2.bf16.msra.mxu0 %v18231_v57  ;;  %14414 = vmatprep.subr.bf16.mxu1 %v18236_v5  ;;  %v18308_v57 = vld [vmem:[#allocation20 + $0xd64] ss:$28 sps:$4 sm:$0xff]   ;;  %v18311_v5 = vld [vmem:[#allocation20 + $0x2b4] ss:$28 sps:$4 sm:$0xff]  }
 0x97b   :  { %14457 = vmatprep.subr.bf16.mxu0 %v18239_v3  ;;  %v18306_v3 = vld [vmem:[#allocation20 + $0xd60] ss:$28 sps:$4 sm:$0xff]  }
 0x97d   :  { %14415 = vmatpush2.bf16.msra.mxu1 %v18234_v47  ;;  %v18309_v47 = vld [vmem:[#allocation20 + $0x2b0] ss:$28 sps:$4 sm:$0xff]  }
 0x97e   :  { %14458 = vmatpush2.bf16.msra.mxu0 %v18237_v29  ;;  %14416 = vmatprep.subr.bf16.mxu1 %v18242_v19  ;;  %v18314_v29 = vld [vmem:[#allocation20 + $0xd2c] ss:$28 sps:$4 sm:$0xff]   ;;  %v18317_v19 = vld [vmem:[#allocation20 + $0x27c] ss:$28 sps:$4 sm:$0xff]  }
 0x97f   :  { %14509 = vmatprep.subr.bf16.mxu0 %v18245_v42  ;;  %v18312_v42 = vld [vmem:[#allocation20 + $0xd28] ss:$28 sps:$4 sm:$0xff]  }
 0x981   :  { %14417 = vmatpush2.bf16.msra.mxu1 %v18240_v49  ;;  %14460 = vmatmul.mubr.bf16.vlgmr.msra.gmra.mxu0 %v19562_v63  ;;  %v18315_v49 = vld [vmem:[#allocation20 + $0x278] ss:$28 sps:$4 sm:$0xff]  }
 0x982   :  { %14510 = vmatpush1.bf16.msra.mxu0 %v18243_v16  ;;  %14541 = vmatprep.mubr.bf16.mxu0 %v19525_v45  ;;  %v18320_v16 = vld [vmem:[#allocation20 + $0xcf4] ss:$28 sps:$4 sm:$0xff]  }
 0x983   :  { %14468 = vmatprep.subr.bf16.mxu1 %v18248_v30  ;;  %14511 = vmatprep.subr.bf16.mxu0 %v18251_v60  ;;  %v18323_v30 = vld [vmem:[#allocation20 + $0x244] ss:$28 sps:$4 sm:$0xff]   ;;  %v18318_v60 = vld [vmem:[#allocation20 + $0xcf0] ss:$28 sps:$4 sm:$0xff]  }
 0x984   :  { %14419 = vmatmul.mubr.bf16.vlgmr.msra.gmra.mxu1 %v19541_v50 }
 0x985   :  { %14469 = vmatpush1.bf16.msra.mxu1 %v18246_v62  ;;  %14500 = vmatprep.mubr.bf16.mxu1 %v19572_v54  ;;  %v18321_v62 = vld [vmem:[#allocation20 + $0x240] ss:$28 sps:$4 sm:$0xff]  }
 0x986   :  { %14512 = vmatpush1.bf16.msra.mxu0 %v18249_v61  ;;  %14470 = vmatprep.subr.bf16.mxu1 %v18254_v37  ;;  %v18326_v61 = vld [vmem:[#allocation20 + $0xcbc] ss:$28 sps:$4 sm:$0xff]   ;;  %v18329_v37 = vld [vmem:[#allocation20 + $0x20c] ss:$28 sps:$4 sm:$0xff]  }
 0x987   :  { %14513 = vmatprep.subr.bf16.mxu0 %v18257_v40  ;;  %v18324_v40 = vld [vmem:[#allocation20 + $0xcb8] ss:$28 sps:$4 sm:$0xff]  }
 0x989   :  { %14471 = vmatpush1.bf16.msra.mxu1 %v18252_v7  ;;  %v18327_v7 = vld [vmem:[#allocation20 + $0x208] ss:$28 sps:$4 sm:$0xff]  }
 0x98a   :  { %14514 = vmatpush1.bf16.msra.mxu0 %v18255_v33  ;;  %14472 = vmatprep.subr.bf16.mxu1 %v18260_v1  ;;  %v18332_v33 = vld [vmem:[#allocation20 + $0xc84] ss:$28 sps:$4 sm:$0xff]   ;;  %v18335_v1 = vld [vmem:[#allocation20 + $0x1d4] ss:$28 sps:$4 sm:$0xff]  }
 0x98b   :  { %14515 = vmatprep.subr.bf16.mxu0 %v18263_v10  ;;  %v18330_v10 = vld [vmem:[#allocation20 + $0xc80] ss:$28 sps:$4 sm:$0xff]  }
 0x98d   :  { %14473 = vmatpush1.bf16.msra.mxu1 %v18258_v21  ;;  %v18333_v21 = vld [vmem:[#allocation20 + $0x1d0] ss:$28 sps:$4 sm:$0xff]  }
 0x98e   :  { %14516 = vmatpush1.bf16.msra.mxu0 %v18261_v11  ;;  %14474 = vmatprep.subr.bf16.mxu1 %v18266_v24  ;;  %v18338_v11 = vld [vmem:[#allocation20 + $0xc4c] ss:$28 sps:$4 sm:$0xff]   ;;  %v18341_v24 = vld [vmem:[#allocation20 + $0x89c] ss:$28 sps:$4 sm:$0xff]  }
 0x98f   :  { %14517 = vmatprep.subr.bf16.mxu0 %v18269_v2  ;;  %v18336_v2 = vld [vmem:[#allocation20 + $0xc48] ss:$28 sps:$4 sm:$0xff]  }
 0x991   :  { %14475 = vmatpush1.bf16.msra.mxu1 %v18264_v12  ;;  %v18339_v12 = vld [vmem:[#allocation20 + $0x898] ss:$28 sps:$4 sm:$0xff]  }
 0x992   :  { %14518 = vmatpush1.bf16.msra.mxu0 %v18267_v9  ;;  %14476 = vmatprep.subr.bf16.mxu1 %v18272_v15  ;;  %v18344_v9 = vld [vmem:[#allocation20 + $0x51c] ss:$28 sps:$4 sm:$0xff]   ;;  %v18347_v15 = vld [vmem:[#allocation20 + $0x864] ss:$28 sps:$4 sm:$0xff]  }
 0x993   :  { %14519 = vmatprep.subr.bf16.mxu0 %v18275_v39 }
 0x995   :  { %14477 = vmatpush1.bf16.msra.mxu1 %v18270_v55  ;;  %v18342_v55 = vld [vmem:[#allocation20 + $0x518] ss:$28 sps:$4 sm:$0xff]  }
 0x996   :  { %14520 = vmatpush1.bf16.msra.mxu0 %v18273_v52  ;;  %14478 = vmatprep.subr.bf16.mxu1 %v18278_v22  ;;  %v18345_v22 = vld [vmem:[#allocation20 + $0x860] ss:$28 sps:$4 sm:$0xff]  }
 0x997   :  { %14521 = vmatprep.subr.bf16.mxu0 %v18281_v14  ;;  %v18350_v14 = vld [vmem:[#allocation20 + $0x4e4] ss:$28 sps:$4 sm:$0xff]  }
 0x999   :  { %14479 = vmatpush1.bf16.msra.mxu1 %v18276_v13 }
 0x99a   :  { %14522 = vmatpush1.bf16.msra.mxu0 %v18279_v38  ;;  %14480 = vmatprep.subr.bf16.mxu1 %v18284_v31  ;;  %v18353_v38 = vld [vmem:[#allocation20 + $0x82c] ss:$28 sps:$4 sm:$0xff]  }
 0x99b   :  { %14523 = vmatprep.subr.bf16.mxu0 %v18287_v59 }
 0x99d   :  { %14481 = vmatpush1.bf16.msra.mxu1 %v18282_v25  ;;  %v18351_v25 = vld [vmem:[#allocation20 + $0x828] ss:$28 sps:$4 sm:$0xff]  }
 0x99e   :  { %14524 = vmatpush1.bf16.msra.mxu0 %v18285_v18  ;;  %14482 = vmatprep.subr.bf16.mxu1 %v18290_v58  ;;  %v18356_v18 = vld [vmem:[#allocation20 + $0x4ac] ss:$28 sps:$4 sm:$0xff]  }
 0x99f   :  { %14525 = vmatprep.subr.bf16.mxu0 %v18293_v35  ;;  %v18359_v35 = vld [vmem:[#allocation20 + $0x7f4] ss:$28 sps:$4 sm:$0xff]  }
 0x9a1   :  { %14483 = vmatpush1.bf16.msra.mxu1 %v18288_v26  ;;  %v18354_v26 = vld [vmem:[#allocation20 + $0x4a8] ss:$28 sps:$4 sm:$0xff]  }
 0x9a2   :  { %14526 = vmatpush2.bf16.msra.mxu0 %v18291_v53  ;;  %14484 = vmatprep.subr.bf16.mxu1 %v18296_v23  ;;  %v18357_v53 = vld [vmem:[#allocation20 + $0x7f0] ss:$28 sps:$4 sm:$0xff]  }
 0x9a3   :  { %14527 = vmatprep.subr.bf16.mxu0 %v18299_v28  ;;  %v18362_v23 = vld [vmem:[#allocation20 + $0x474] ss:$28 sps:$4 sm:$0xff]  }
 0x9a4   :  { %v18360_v28 = vld [vmem:[#allocation20 + $0x470] ss:$28 sps:$4 sm:$0xff]  }
 0x9a5   :  { %14485 = vmatpush2.bf16.msra.mxu1 %v18294_v41  ;;  %v18363_v41 = vld [vmem:[#allocation20 + $0x7b8] ss:$28 sps:$4 sm:$0xff]  }
 0x9a6   :  { %14528 = vmatpush2.bf16.msra.mxu0 %v18297_v8  ;;  %14486 = vmatprep.subr.bf16.mxu1 %v18302_v34  ;;  %v18368_v8 = vld [vmem:[#allocation20 + $0x43c] ss:$28 sps:$4 sm:$0xff]   ;;  %v18371_v34 = vld [vmem:[#allocation20 + $0x784] ss:$28 sps:$4 sm:$0xff]  }
 0x9a7   :  { %14529 = vmatprep.subr.bf16.mxu0 %v18305_v44  ;;  %v18366_v44 = vld [vmem:[#allocation20 + $0x438] ss:$28 sps:$4 sm:$0xff]  }
 0x9a9   :  { %14487 = vmatpush2.bf16.msra.mxu1 %v18300_v0  ;;  %v18369_v0 = vld [vmem:[#allocation20 + $0x780] ss:$28 sps:$4 sm:$0xff]  }
 0x9aa   :  { %14530 = vmatpush2.bf16.msra.mxu0 %v18303_v17  ;;  %14488 = vmatprep.subr.bf16.mxu1 %v18308_v57  ;;  %v18374_v17 = vld [vmem:[#allocation20 + $0x404] ss:$28 sps:$4 sm:$0xff]   ;;  %v18377_v57 = vld [vmem:[#allocation20 + $0x74c] ss:$28 sps:$4 sm:$0xff]  }
 0x9ab   :  { %14531 = vmatprep.subr.bf16.mxu0 %v18311_v5  ;;  %v18372_v5 = vld [vmem:[#allocation20 + $0x400] ss:$28 sps:$4 sm:$0xff]  }
 0x9ad   :  { %14489 = vmatpush2.bf16.msra.mxu1 %v18306_v3  ;;  %v18375_v3 = vld [vmem:[#allocation20 + $0x748] ss:$28 sps:$4 sm:$0xff]  }
 0x9ae   :  { %14532 = vmatpush2.bf16.msra.mxu0 %v18309_v47  ;;  %14490 = vmatprep.subr.bf16.mxu1 %v18314_v29  ;;  %v18380_v47 = vld [vmem:[#allocation20 + $0x3cc] ss:$28 sps:$4 sm:$0xff]   ;;  %v18383_v29 = vld [vmem:[#allocation20 + $0x714] ss:$28 sps:$4 sm:$0xff]  }
 0x9af   :  { %14533 = vmatprep.subr.bf16.mxu0 %v18317_v19  ;;  %v18378_v19 = vld [vmem:[#allocation20 + $0x3c8] ss:$28 sps:$4 sm:$0xff]  }
 0x9b1   :  { %14491 = vmatpush2.bf16.msra.mxu1 %v18312_v42  ;;  %v18381_v42 = vld [vmem:[#allocation20 + $0x710] ss:$28 sps:$4 sm:$0xff]  }
 0x9b2   :  { %14534 = vmatpush2.bf16.msra.mxu0 %v18315_v49  ;;  %14492 = vmatprep.subr.bf16.mxu1 %v18320_v16  ;;  %v18386_v49 = vld [vmem:[#allocation20 + $0x394] ss:$28 sps:$4 sm:$0xff]   ;;  %v18389_v16 = vld [vmem:[#allocation20 + $0xa5c] ss:$28 sps:$4 sm:$0xff]  }
 0x9b3   :  { %14535 = vmatprep.subr.bf16.mxu0 %v18323_v30  ;;  %v18384_v30 = vld [vmem:[#allocation20 + $0x390] ss:$28 sps:$4 sm:$0xff]  }
 0x9b5   :  { %14493 = vmatpush2.bf16.msra.mxu1 %v18318_v60  ;;  %v18387_v60 = vld [vmem:[#allocation20 + $0xa58] ss:$28 sps:$4 sm:$0xff]  }
 0x9b6   :  { %14536 = vmatpush2.bf16.msra.mxu0 %v18321_v62  ;;  %14494 = vmatprep.subr.bf16.mxu1 %v18326_v61  ;;  %v18392_v62 = vld [vmem:[#allocation20 + $0x6dc] ss:$28 sps:$4 sm:$0xff]   ;;  %v18395_v61 = vld [vmem:[#allocation20 + $0xa24] ss:$28 sps:$4 sm:$0xff]  }
 0x9b7   :  { %14537 = vmatprep.subr.bf16.mxu0 %v18329_v37  ;;  %v18390_v37 = vld [vmem:[#allocation20 + $0x6d8] ss:$28 sps:$4 sm:$0xff]  }
 0x9b9   :  { %14495 = vmatpush2.bf16.msra.mxu1 %v18324_v40  ;;  %v18393_v40 = vld [vmem:[#allocation20 + $0xa20] ss:$28 sps:$4 sm:$0xff]  }
 0x9ba   :  { %14538 = vmatpush2.bf16.msra.mxu0 %v18327_v7  ;;  %14496 = vmatprep.subr.bf16.mxu1 %v18332_v33  ;;  %v18398_v7 = vld [vmem:[#allocation20 + $0x6a4] ss:$28 sps:$4 sm:$0xff]   ;;  %v18401_v33 = vld [vmem:[#allocation20 + $0x9ec] ss:$28 sps:$4 sm:$0xff]  }
 0x9bb   :  { %14539 = vmatprep.subr.bf16.mxu0 %v18335_v1  ;;  %v18396_v1 = vld [vmem:[#allocation20 + $0x6a0] ss:$28 sps:$4 sm:$0xff]  }
 0x9bd   :  { %14497 = vmatpush2.bf16.msra.mxu1 %v18330_v10  ;;  %v18399_v10 = vld [vmem:[#allocation20 + $0x9e8] ss:$28 sps:$4 sm:$0xff]  }
 0x9be   :  { %14540 = vmatpush2.bf16.msra.mxu0 %v18333_v21  ;;  %14498 = vmatprep.subr.bf16.mxu1 %v18338_v11  ;;  %v18404_v21 = vld [vmem:[#allocation20 + $0x66c] ss:$28 sps:$4 sm:$0xff]   ;;  %v18407_v11 = vld [vmem:[#allocation20 + $0x9b4] ss:$28 sps:$4 sm:$0xff]  }
 0x9bf   :  { %14591 = vmatprep.subr.bf16.mxu0 %v18341_v24  ;;  %v18402_v24 = vld [vmem:[#allocation20 + $0x668] ss:$28 sps:$4 sm:$0xff]  }
 0x9c1   :  { %14499 = vmatpush2.bf16.msra.mxu1 %v18336_v2  ;;  %14542 = vmatmul.mubr.bf16.vlgmr.msra.gmra.mxu0 %v19536_v27  ;;  %v14297_v39 = vpop.f32.mrf.mxu0  ;;  %v18405_v2 = vld [vmem:[#allocation20 + $0x9b0] ss:$28 sps:$4 sm:$0xff]  }
 0x9c2   :  { %v19593_v52 = vadd.f32 %v14297_v39, %v19583_v6  ;;  %14592 = vmatpush1.bf16.msra.mxu0 %v18339_v12  ;;  %14623 = vmatprep.mubr.bf16.mxu0 %v19560_v46  ;;  %v18348_v6 = vld [vmem:[#allocation20 + $0x4e0] ss:$28 sps:$4 sm:$0xff]   ;;  %v18410_v12 = vld [vmem:[#allocation20 + $0x634] ss:$28 sps:$4 sm:$0xff]  }
 0x9c3   :  { %14550 = vmatprep.subr.bf16.mxu1 %v18344_v9  ;;  %v14299_v13 = vpop.f32.mrf.mxu0  ;;  %14593 = vmatprep.subr.bf16.mxu0 %v18347_v15  ;;  %v18413_v9 = vld [vmem:[#allocation20 + $0x97c] ss:$28 sps:$4 sm:$0xff]   ;;  %v18408_v15 = vld [vmem:[#allocation20 + $0x630] ss:$28 sps:$4 sm:$0xff]  }
 0x9c4   :  { %14501 = vmatmul.mubr.bf16.vlgmr.msra.gmra.mxu1 %v19576_v56  ;;  %v19598_v31 = vadd.f32 %v14299_v13, %v19585_v32  ;;  %v18365_v32 = vld [vmem:[#allocation20 + $0x7bc] ss:$28 sps:$4 sm:$0xff]  }
 0x9c5   :  { %14551 = vmatpush1.bf16.msra.mxu1 %v18342_v55  ;;  %14582 = vmatprep.mubr.bf16.mxu1 %v19539_v20  ;;  %v14301_v59 = vpop.f32.mrf.mxu0  ;;  %v18411_v39 = vld [vmem:[#allocation20 + $0x978] ss:$28 sps:$4 sm:$0xff]   ;;  %v18417_v13 = vld [vmem:[#allocation20 + $0x940] ss:$28 sps:$4 sm:$0xff]  }
 0x9c6   :  { %14594 = vmatpush1.bf16.msra.mxu0 %v18345_v22  ;;  %14552 = vmatprep.subr.bf16.mxu1 %v18350_v14  ;;  %v18416_v55 = vld [vmem:[#allocation20 + $0x5fc] ss:$28 sps:$4 sm:$0xff]   ;;  %v18419_v22 = vld [vmem:[#allocation20 + $0x944] ss:$28 sps:$4 sm:$0xff]   ;;  %v18425_v59 = vld [vmem:[#allocation20 + $0x90c] ss:$28 sps:$4 sm:$0xff]  }
 0x9c7   :  { %v14302_v58 = vpop.f32.mrf.mxu0  ;;  %14595 = vmatprep.subr.bf16.mxu0 %v18353_v38  ;;  %v18414_v14 = vld [vmem:[#allocation20 + $0x5f8] ss:$28 sps:$4 sm:$0xff]   ;;  %v18422_v38 = vld [vmem:[#allocation20 + $0x5c4] ss:$28 sps:$4 sm:$0xff]  }
 0x9c8   :  { %v18431_v58 = vld [vmem:[#allocation20 + $0x8d4] ss:$28 sps:$4 sm:$0xff]  }
 0x9c9   :  { %14553 = vmatpush1.bf16.msra.mxu1 %v18348_v6  ;;  %v18420_v6 = vld [vmem:[#allocation20 + $0x5c0] ss:$28 sps:$4 sm:$0xff]  }
 0x9ca   :  { %14596 = vmatpush1.bf16.msra.mxu0 %v18351_v25  ;;  %14554 = vmatprep.subr.bf16.mxu1 %v18356_v18  ;;  %v18423_v25 = vld [vmem:[#allocation20 + $0x908] ss:$28 sps:$4 sm:$0xff]  }
 0x9cb   :  { %14597 = vmatprep.subr.bf16.mxu0 %v18359_v35  ;;  %v18428_v18 = vld [vmem:[#allocation20 + $0x58c] ss:$28 sps:$4 sm:$0xff]  }
 0x9cc   :  { %v18426_v35 = vld [vmem:[#allocation20 + $0x588] ss:$28 sps:$4 sm:$0xff]  }
 0x9cd   :  { %14555 = vmatpush1.bf16.msra.mxu1 %v18354_v26  ;;  %v18429_v26 = vld [vmem:[#allocation20 + $0x8d0] ss:$28 sps:$4 sm:$0xff]  }
 0x9ce   :  { %14598 = vmatpush1.bf16.msra.mxu0 %v18357_v53  ;;  %14556 = vmatprep.subr.bf16.mxu1 %v18362_v23  ;;  %v18434_v53 = vld [vmem:[#allocation20 + $0x554] ss:$28 sps:$4 sm:$0xff]   ;;  %v18435_v23 = vld [vmem:[#allocation20 + $0x360] ss:$28 sps:$4 sm:$0xff]  }
 0x9cf   :  { %14599 = vmatprep.subr.bf16.mxu0 %v18365_v32  ;;  %v18432_v32 = vld [vmem:[#allocation20 + $0x550] ss:$28 sps:$4 sm:$0xff]  }
 0x9d1   :  { %14557 = vmatpush1.bf16.msra.mxu1 %v18360_v28  ;;  %v18436_v28 = vld [vmem:[#allocation20 + $0x1a0] ss:$28 sps:$4 sm:$0xff]  }
 0x9d2   :  { %14600 = vmatpush1.bf16.msra.mxu0 %v18363_v41  ;;  %14558 = vmatprep.subr.bf16.mxu1 %v18368_v8  ;;  %v18439_v41 = vld [vmem:[#allocation20 + $0xc1c] ss:$28 sps:$4 sm:$0xff]   ;;  %v18440_v8 = vld [vmem:[#allocation20 + $0x328] ss:$28 sps:$4 sm:$0xff]  }
 0x9d3   :  { %14601 = vmatprep.subr.bf16.mxu0 %v18371_v34 }
 0x9d5   :  { %14559 = vmatpush1.bf16.msra.mxu1 %v18366_v44  ;;  %v18437_v44 = vld [vmem:[#allocation20 + $0xc18] ss:$28 sps:$4 sm:$0xff]  }
 0x9d6   :  { %14602 = vmatpush1.bf16.msra.mxu0 %v18369_v0  ;;  %14560 = vmatprep.subr.bf16.mxu1 %v18374_v17  ;;  %v18441_v0 = vld [vmem:[#allocation20 + $0x168] ss:$28 sps:$4 sm:$0xff]  }
 0x9d7   :  { %14603 = vmatprep.subr.bf16.mxu0 %v18377_v57  ;;  %v18444_v17 = vld [vmem:[#allocation20 + $0xbe4] ss:$28 sps:$4 sm:$0xff]  }
 0x9d9   :  { %14561 = vmatpush1.bf16.msra.mxu1 %v18372_v5  ;;  %v18445_v5 = vld [vmem:[#allocation20 + $0x2f0] ss:$28 sps:$4 sm:$0xff]  }
 0x9da   :  { %14604 = vmatpush1.bf16.msra.mxu0 %v18375_v3  ;;  %14562 = vmatprep.subr.bf16.mxu1 %v18380_v47 }
 0x9db   :  { %14605 = vmatprep.subr.bf16.mxu0 %v18383_v29 }
 0x9dd   :  { %14563 = vmatpush1.bf16.msra.mxu1 %v18378_v19  ;;  %v18442_v19 = vld [vmem:[#allocation20 + $0xbe0] ss:$28 sps:$4 sm:$0xff]  }
 0x9de   :  { %14606 = vmatpush1.bf16.msra.mxu0 %v18381_v42  ;;  %14564 = vmatprep.subr.bf16.mxu1 %v18386_v49  ;;  %v18449_v49 = vld [vmem:[#allocation20 + $0xbac] ss:$28 sps:$4 sm:$0xff]  }
 0x9df   :  { %14607 = vmatprep.subr.bf16.mxu0 %v18389_v16 }
 0x9e1   :  { %14565 = vmatpush1.bf16.msra.mxu1 %v18384_v30 }
 0x9e2   :  { %14608 = vmatpush2.bf16.msra.mxu0 %v18387_v60  ;;  %14566 = vmatprep.subr.bf16.mxu1 %v18392_v62  ;;  %v18450_v62 = vld [vmem:[#allocation20 + $0x2b8] ss:$28 sps:$4 sm:$0xff]  }
 0x9e3   :  { %14609 = vmatprep.subr.bf16.mxu0 %v18395_v61 }
 0x9e5   :  { %14567 = vmatpush2.bf16.msra.mxu1 %v18390_v37 }
 0x9e6   :  { %14610 = vmatpush2.bf16.msra.mxu0 %v18393_v40  ;;  %14568 = vmatprep.subr.bf16.mxu1 %v18398_v7 }
 0x9e7   :  { %14611 = vmatprep.subr.bf16.mxu0 %v18401_v33  ;;  %v18451_v33 = vld [vmem:[#allocation20 + $0xf8] ss:$28 sps:$4 sm:$0xff]  }
 0x9e9   :  { %14569 = vmatpush2.bf16.msra.mxu1 %v18396_v1  ;;  %v18454_v1 = vld [vmem:[#allocation20 + $0xb74] ss:$28 sps:$4 sm:$0xff]  }
 0x9ea   :  { %14612 = vmatpush2.bf16.msra.mxu0 %v18399_v10  ;;  %14570 = vmatprep.subr.bf16.mxu1 %v18404_v21  ;;  %v18455_v21 = vld [vmem:[#allocation20 + $0x280] ss:$28 sps:$4 sm:$0xff]  }
 0x9eb   :  { %14613 = vmatprep.subr.bf16.mxu0 %v18407_v11  ;;  %v18456_v11 = vld [vmem:[#allocation20 + $0xc0] ss:$28 sps:$4 sm:$0xff]  }
 0x9ed   :  { %14571 = vmatpush2.bf16.msra.mxu1 %v18402_v24  ;;  %v18459_v24 = vld [vmem:[#allocation20 + $0xb3c] ss:$28 sps:$4 sm:$0xff]  }
 0x9ee   :  { %14614 = vmatpush2.bf16.msra.mxu0 %v18405_v2  ;;  %14572 = vmatprep.subr.bf16.mxu1 %v18410_v12  ;;  %v18460_v2 = vld [vmem:[#allocation20 + $0x248] ss:$28 sps:$4 sm:$0xff]   ;;  %v18457_v12 = vld [vmem:[#allocation20 + $0xb38] ss:$28 sps:$4 sm:$0xff]  }
 0x9ef   :  { %14615 = vmatprep.subr.bf16.mxu0 %v18413_v9  ;;  %v18461_v9 = vld [vmem:[#allocation20 + $0x88] ss:$28 sps:$4 sm:$0xff]  }
 0x9f1   :  { %14573 = vmatpush2.bf16.msra.mxu1 %v18408_v15  ;;  %v18464_v15 = vld [vmem:[#allocation20 + $0xb04] ss:$28 sps:$4 sm:$0xff]  }
 0x9f2   :  { %14616 = vmatpush2.bf16.msra.mxu0 %v18411_v39  ;;  %14574 = vmatprep.subr.bf16.mxu1 %v18416_v55  ;;  %v18465_v39 = vld [vmem:[#allocation20 + $0x210] ss:$28 sps:$4 sm:$0xff]   ;;  %v18462_v55 = vld [vmem:[#allocation20 + $0xb00] ss:$28 sps:$4 sm:$0xff]  }
 0x9f3   :  { %14617 = vmatprep.subr.bf16.mxu0 %v18419_v22  ;;  %v18466_v22 = vld [vmem:[#allocation20 + $0x50] ss:$28 sps:$4 sm:$0xff]  }
 0x9f5   :  { %14575 = vmatpush2.bf16.msra.mxu1 %v18414_v14  ;;  %v18469_v14 = vld [vmem:[#allocation20 + $0xacc] ss:$28 sps:$4 sm:$0xff]  }
 0x9f6   :  { %14618 = vmatpush2.bf16.msra.mxu0 %v18417_v13  ;;  %14576 = vmatprep.subr.bf16.mxu1 %v18422_v38  ;;  %v18470_v13 = vld [vmem:[#allocation20 + $0x1d8] ss:$28 sps:$4 sm:$0xff]  }
 0x9f7   :  { %14619 = vmatprep.subr.bf16.mxu0 %v18425_v59 }
 0x9f9   :  { %14577 = vmatpush2.bf16.msra.mxu1 %v18420_v6  ;;  %v18467_v6 = vld [vmem:[#allocation20 + $0xac8] ss:$28 sps:$4 sm:$0xff]  }
 0x9fa   :  { %14620 = vmatpush2.bf16.msra.mxu0 %v18423_v25  ;;  %14578 = vmatprep.subr.bf16.mxu1 %v18428_v18  ;;  %v18471_v18 = vld [vmem:[#allocation20 + $0x18] ss:$28 sps:$4 sm:$0xff]  }
 0x9fb   :  { %14621 = vmatprep.subr.bf16.mxu0 %v18431_v58  ;;  %v18474_v58 = vld [vmem:[#allocation20 + $0xa94] ss:$28 sps:$4 sm:$0xff]  }
 0x9fd   :  { %14579 = vmatpush2.bf16.msra.mxu1 %v18426_v35 }
 0x9fe   :  { %14622 = vmatpush2.bf16.msra.mxu0 %v18429_v26  ;;  %14580 = vmatprep.subr.bf16.mxu1 %v18434_v53  ;;  %v18475_v26 = vld [vmem:[#allocation20 + $0xa60] ss:$28 sps:$4 sm:$0xff]   ;;  %v18472_v53 = vld [vmem:[#allocation20 + $0xa90] ss:$28 sps:$4 sm:$0xff]  }
 0x9ff   :  { %16884 = vmatprep.subr.bf16.mxu0 %v18435_v23  ;;  %v18476_v23 = vld [vmem:[#allocation20 + $0x8a0] ss:$28 sps:$4 sm:$0xff]  }
 0xa01   :  { %14581 = vmatpush2.bf16.msra.mxu1 %v18432_v32  ;;  %v19601_v34 = vpop.f32.mrf.mxu0  ;;  %14624 = vmatmul.mubr.bf16.vlgmr.msra.gmra.mxu0 %v19562_v63  ;;  %v18479_v32 = vld [vmem:[#allocation20 + $0xddc] ss:$28 sps:$4 sm:$0xff]  }
 0xa02   :  { %16885 = vmatpush3.bf16.msra.mxu0 %v18436_v28  ;;  %14705 = vmatprep.mubr.bf16.mxu0 %v19525_v45  ;;  %v18446_v45 = vld [vmem:[#allocation20 + $0x130] ss:$28 sps:$4 sm:$0xff]   ;;  %v18480_v28 = vld [vmem:[#allocation20 + $0xa28] ss:$28 sps:$4 sm:$0xff]  }
 0xa03   :  { %v19605_v57 = vpop.f32.mrf.mxu0  ;;  %14632 = vmatprep.subr.bf16.mxu1 %v18439_v41  ;;  %16886 = vmatprep.subr.bf16.mxu0 %v18440_v8  ;;  %v18477_v41 = vld [vmem:[#allocation20 + $0xdd8] ss:$28 sps:$4 sm:$0xff]   ;;  %v18481_v8 = vld [vmem:[#allocation20 + $0x868] ss:$28 sps:$4 sm:$0xff]  }
 0xa04   :  { %14583 = vmatmul.mubr.bf16.vlgmr.msra.gmra.mxu1 %v19541_v50  ;;  %v14338_v3 = vpop.f32.mrf.mxu1 }
 0xa05   :  { %v14339_v47 = vadd.f32 %v14338_v3, %v19593_v52  ;;  %14633 = vmatpush1.bf16.msra.mxu1 %v18437_v44  ;;  %14664 = vmatprep.mubr.bf16.mxu1 %v19572_v54  ;;  %v14383_v29 = vpop.f32.mrf.mxu0  ;;  %v18447_v52 = vld [vmem:[#allocation20 + $0xba8] ss:$28 sps:$4 sm:$0xff]  }
 0xa06   :  { %v14340_v42 = vpop.f32.mrf.mxu1  ;;  %16887 = vmatpush3.bf16.msra.mxu0 %v18441_v0  ;;  %14634 = vmatprep.subr.bf16.mxu1 %v18444_v17  ;;  %v18484_v44 = vld [vmem:[#allocation20 + $0xda4] ss:$28 sps:$4 sm:$0xff]   ;;  %v18485_v0 = vld [vmem:[#allocation20 + $0x9f0] ss:$28 sps:$4 sm:$0xff]  }
 0xa07   :  { %v14833_v16 = vsub.f32 0.0, %v14339_v47  ;;  %v14341_v30 = vadd.f32 %v14340_v42, %v19598_v31  ;;  %v14384_v60 = vpop.f32.mrf.mxu0  ;;  %16888 = vmatprep.subr.bf16.mxu0 %v18445_v5  ;;  %v18452_v31 = vld [vmem:[#allocation20 + $0xb70] ss:$28 sps:$4 sm:$0xff]   ;;  %v18482_v17 = vld [vmem:[#allocation20 + $0xda0] ss:$28 sps:$4 sm:$0xff]  }
 0xa08   :  { %v14342_v61 = vpop.f32.mrf.mxu1  ;;  %v18486_v5 = vld [vmem:[#allocation20 + $0x830] ss:$28 sps:$4 sm:$0xff]   ;;  %v18490_v47 = vld [vmem:[#allocation20 + $0x9b8] ss:$28 sps:$4 sm:$0xff]   ;;  %v18500_v60 = vld [vmem:[#allocation20 + $0x948] ss:$28 sps:$4 sm:$0xff]  }
 0xa09   :  { %v14840_v37 = vmul.f32 1.442695, %v14833_v16  ;;  %v14834_v40 = vsub.f32 0.0, %v14341_v30  ;;  %14635 = vmatpush1.bf16.msra.mxu1 %v18442_v19  ;;  %v18489_v3 = vld [vmem:[#allocation20 + $0xd6c] ss:$28 sps:$4 sm:$0xff]  }
 0xa0a   :  { %v14343_v7 = vpop.f32.mrf.mxu1  ;;  %16889 = vmatpush3.bf16.msra.mxu0 %v18446_v45  ;;  %14636 = vmatprep.subr.bf16.mxu1 %v18449_v49  ;;  %v18494_v42 = vld [vmem:[#allocation20 + $0xd34] ss:$28 sps:$4 sm:$0xff]   ;;  %v18495_v45 = vld [vmem:[#allocation20 + $0x980] ss:$28 sps:$4 sm:$0xff]   ;;  %v18501_v61 = vld [vmem:[#allocation20 + $0x788] ss:$28 sps:$4 sm:$0xff]  }
 0xa0b   :  { %18667 = vpow2.f32 %v14840_v37  ;;  %v14842_v10 = vmul.f32 1.442695, %v14834_v40  ;;  %16890 = vmatprep.subr.bf16.mxu0 %v18450_v62  ;;  %v18492_v49 = vld [vmem:[#allocation20 + $0xd30] ss:$28 sps:$4 sm:$0xff]   ;;  %v18496_v16 = vld [vmem:[#allocation20 + $0x7c0] ss:$28 sps:$4 sm:$0xff]  }
 0xa0c   :  { %v18499_v30 = vld [vmem:[#allocation20 + $0xcfc] ss:$28 sps:$4 sm:$0xff]   ;;  %v18504_v37 = vld [vmem:[#allocation20 + $0xcc4] ss:$28 sps:$4 sm:$0xff]   ;;  %v18505_v40 = vld [vmem:[#allocation20 + $0x910] ss:$28 sps:$4 sm:$0xff]  }
 0xa0d   :  { %18669 = vpow2.f32 %v14842_v10  ;;  %14637 = vmatpush1.bf16.msra.mxu1 %v18447_v52  ;;  %v18497_v62 = vld [vmem:[#allocation20 + $0xcf8] ss:$28 sps:$4 sm:$0xff]   ;;  %v18502_v52 = vld [vmem:[#allocation20 + $0xcc0] ss:$28 sps:$4 sm:$0xff]   ;;  %v18506_v7 = vld [vmem:[#allocation20 + $0x750] ss:$28 sps:$4 sm:$0xff]  }
 0xa0e   :  { %16891 = vmatpush3.bf16.msra.mxu0 %v18451_v33  ;;  %14638 = vmatprep.subr.bf16.mxu1 %v18454_v1  ;;  %v18509_v33 = vld [vmem:[#allocation20 + $0xc8c] ss:$28 sps:$4 sm:$0xff]   ;;  %v18510_v1 = vld [vmem:[#allocation20 + $0x8d8] ss:$28 sps:$4 sm:$0xff]  }
 0xa0f   :  { %16892 = vmatprep.subr.bf16.mxu0 %v18455_v21  ;;  %v18507_v10 = vld [vmem:[#allocation20 + $0xc88] ss:$28 sps:$4 sm:$0xff]   ;;  %v18511_v21 = vld [vmem:[#allocation20 + $0x718] ss:$28 sps:$4 sm:$0xff]  }
 0xa11   :  { %14639 = vmatpush1.bf16.msra.mxu1 %v18452_v31  ;;  %v18514_v31 = vld [vmem:[#allocation20 + $0xc54] ss:$28 sps:$4 sm:$0xff]  }
 0xa12   :  { %16893 = vmatpush3.bf16.msra.mxu0 %v18456_v11  ;;  %14640 = vmatprep.subr.bf16.mxu1 %v18459_v24  ;;  %v18512_v11 = vld [vmem:[#allocation20 + $0xc50] ss:$28 sps:$4 sm:$0xff]   ;;  %v18515_v24 = vld [vmem:[#allocation20 + $0x6e0] ss:$28 sps:$4 sm:$0xff]  }
 0xa13   :  { %16894 = vmatprep.subr.bf16.mxu0 %v18460_v2  ;;  %v19613_v2 = vld [vmem:[#allocation22] sm:$0xff] }
 0xa15   :  { %14641 = vmatpush1.bf16.msra.mxu1 %v18457_v12  ;;  %v11853_v12 = vrot.slane %v19613_v2, %v19211_v36 }
 0xa16   :  { %16895 = vmatpush3.bf16.msra.mxu0 %v18461_v9  ;;  %14642 = vmatprep.subr.bf16.mxu1 %v18464_v15  ;;  %v11857_v9 = vrot.slane %v19613_v2, %v19226_v4  ;;  %v18518_v4 = vld [vmem:[#allocation20 + $0x4e8] ss:$28 sps:$4 sm:$0xff]  }
 0xa17   :  { %16896 = vmatprep.subr.bf16.mxu0 %v18465_v39  ;;  %v18516_v39 = vld [vmem:[#allocation20 + $0x520] ss:$28 sps:$4 sm:$0xff]  }
 0xa18   :  { %v18668_v38 = vpop.eup %18667 }
 0xa19   :  { %v14854_v59 = vadd.f32 1.0, %v18668_v38  ;;  %14643 = vmatpush1.bf16.msra.mxu1 %v18462_v55  ;;  %v18517_v55 = vld [vmem:[#allocation20 + $0x6a8] ss:$28 sps:$4 sm:$0xff]   ;;  %v14382_v38 = vadd.f32 %v19605_v57, %v11857_v9  ;;  %v18521_v57 = vld [vmem:[#allocation20 + $0x638] ss:$28 sps:$4 sm:$0xff]  }
 0xa1a   :  { %v18670_v25 = vpop.eup %18669  ;;  %16897 = vmatpush3.bf16.msra.mxu0 %v18466_v22  ;;  %14644 = vmatprep.subr.bf16.mxu1 %v18469_v14  ;;  %v14380_v22 = vadd.f32 %v19601_v34, %v11853_v12 }
 0xa1b   :  { %18671 = vrcp.f32 %v14854_v59  ;;  %v14855_v35 = vadd.f32 1.0, %v18670_v25  ;;  %16898 = vmatprep.subr.bf16.mxu0 %v18470_v13 }
 0xa1d   :  { %18673 = vrcp.f32 %v14855_v35  ;;  %14645 = vmatpush1.bf16.msra.mxu1 %v18467_v6  ;;  %v18520_v35 = vld [vmem:[#allocation20 + $0x4b0] ss:$28 sps:$4 sm:$0xff]  }
 0xa1e   :  { %16899 = vmatpush3.bf16.msra.mxu0 %v18471_v18  ;;  %14646 = vmatprep.subr.bf16.mxu1 %v18474_v58 }
 0xa1f   :  { %16928 = vmatprep.subr.bf16.mxu0 %v18475_v26 }
 0xa21   :  { %14647 = vmatpush1.bf16.msra.mxu1 %v18472_v53  ;;  %14706 = vmatmul.mubr.bf16.vlgmr.msra.gmra.mxu0 %v19536_v27  ;;  %v18487_v27 = vld [vmem:[#allocation20 + $0xd68] ss:$28 sps:$4 sm:$0xff]  }
 0xa22   :  { %16929 = vmatpush3.bf16.msra.mxu0 %v18476_v23  ;;  %14785 = vmatprep.mubr.bf16.mxu0 %v19560_v46  ;;  %v18491_v46 = vld [vmem:[#allocation20 + $0x7f8] ss:$28 sps:$4 sm:$0xff]  }
 0xa23   :  { %14648 = vmatprep.subr.bf16.mxu1 %v18479_v32  ;;  %16930 = vmatprep.subr.bf16.mxu0 %v18480_v28  ;;  %v18522_v23 = vld [vmem:[#allocation20 + $0x478] ss:$28 sps:$4 sm:$0xff]   ;;  %v18524_v32 = vld [vmem:[#allocation20 + $0x440] ss:$28 sps:$4 sm:$0xff]   ;;  %v18525_v28 = vld [vmem:[#allocation20 + $0x5c8] ss:$28 sps:$4 sm:$0xff]  }
 0xa25   :  { %14649 = vmatpush2.bf16.msra.mxu1 %v18477_v41  ;;  %v18526_v41 = vld [vmem:[#allocation20 + $0x408] ss:$28 sps:$4 sm:$0xff]  }
 0xa26   :  { %16931 = vmatpush3.bf16.msra.mxu0 %v18481_v8  ;;  %14650 = vmatprep.subr.bf16.mxu1 %v18484_v44  ;;  %v18527_v8 = vld [vmem:[#allocation20 + $0x590] ss:$28 sps:$4 sm:$0xff]  }
 0xa27   :  { %16932 = vmatprep.subr.bf16.mxu0 %v18485_v0  ;;  %v18528_v44 = vld [vmem:[#allocation20 + $0x3d0] ss:$28 sps:$4 sm:$0xff]   ;;  %v18529_v0 = vld [vmem:[#allocation20 + $0x558] ss:$28 sps:$4 sm:$0xff]  }
 0xa28   :  { %v18672_v29 = vpop.eup %18671 }
 0xa29   :  { %14868 = vst [vmem:[#allocation23] sm:$0xff] %v18672_v29  ;;  %14651 = vmatpush2.bf16.msra.mxu1 %v18482_v17  ;;  %v18530_v17 = vld [vmem:[#allocation20 + $0x398] ss:$28 sps:$4 sm:$0xff]   ;;  %v18534_v29 = vld [vmem:[#allocation20 + $0xbe8] ss:$28 sps:$4 sm:$0xff]  }
 0xa2a   :  { %v18674_v19 = vpop.eup %18673  ;;  %16933 = vmatpush3.bf16.msra.mxu0 %v18486_v5  ;;  %14652 = vmatprep.subr.bf16.mxu1 %v18489_v3  ;;  %v18531_v5 = vld [vmem:[#allocation20 + $0xde0] ss:$28 sps:$4 sm:$0xff]  }
 0xa2b   :  { %14869 = vst [vmem:[#allocation23 + $0x8] sm:$0xff] %v18674_v19  ;;  %16934 = vmatprep.subr.bf16.mxu0 %v18490_v47  ;;  %v18532_v3 = vld [vmem:[#allocation20 + $0xc20] ss:$28 sps:$4 sm:$0xff]   ;;  %v18533_v47 = vld [vmem:[#allocation20 + $0xda8] ss:$28 sps:$4 sm:$0xff]  }
 0xa2c   :  { %v18536_v19 = vld [vmem:[#allocation20 + $0xbb0] ss:$28 sps:$4 sm:$0xff]  }
 0xa2d   :  { %14653 = vmatpush2.bf16.msra.mxu1 %v18487_v27  ;;  %v18535_v27 = vld [vmem:[#allocation20 + $0xd70] ss:$28 sps:$4 sm:$0xff]  }
 0xa2e   :  { %16935 = vmatpush3.bf16.msra.mxu0 %v18491_v46  ;;  %14654 = vmatprep.subr.bf16.mxu1 %v18494_v42  ;;  %v18537_v46 = vld [vmem:[#allocation20 + $0xd38] ss:$28 sps:$4 sm:$0xff]  }
 0xa2f   :  { %16936 = vmatprep.subr.bf16.mxu0 %v18495_v45  ;;  %v18538_v42 = vld [vmem:[#allocation20 + $0xb78] ss:$28 sps:$4 sm:$0xff]   ;;  %v18539_v45 = vld [vmem:[#allocation20 + $0xd00] ss:$28 sps:$4 sm:$0xff]  }
 0xa31   :  { %14655 = vmatpush2.bf16.msra.mxu1 %v18492_v49  ;;  %v18540_v49 = vld [vmem:[#allocation20 + $0xb40] ss:$28 sps:$4 sm:$0xff]  }
 0xa32   :  { %16937 = vmatpush3.bf16.msra.mxu0 %v18496_v16  ;;  %14656 = vmatprep.subr.bf16.mxu1 %v18499_v30  ;;  %v18541_v16 = vld [vmem:[#allocation20 + $0xcc8] ss:$28 sps:$4 sm:$0xff]   ;;  %v18543_v30 = vld [vmem:[#allocation20 + $0xc90] ss:$28 sps:$4 sm:$0xff]  }
 0xa33   :  { %16938 = vmatprep.subr.bf16.mxu0 %v18500_v60  ;;  %v18545_v60 = vld [vmem:[#allocation20 + $0xc58] ss:$28 sps:$4 sm:$0xff]  }
 0xa35   :  { %14657 = vmatpush2.bf16.msra.mxu1 %v18497_v62  ;;  %v18546_v62 = vld [vmem:[#allocation20 + $0xa98] ss:$28 sps:$4 sm:$0xff]  }
 0xa36   :  { %16939 = vmatpush3.bf16.msra.mxu0 %v18501_v61  ;;  %14658 = vmatprep.subr.bf16.mxu1 %v18504_v37 }
 0xa37   :  { %16940 = vmatprep.subr.bf16.mxu0 %v18505_v40 }
 0xa39   :  { %14659 = vmatpush2.bf16.msra.mxu1 %v18502_v52 }
 0xa3a   :  { %16941 = vmatpush3.bf16.msra.mxu0 %v18506_v7  ;;  %14660 = vmatprep.subr.bf16.mxu1 %v18509_v33 }
 0xa3b   :  { %16942 = vmatprep.subr.bf16.mxu0 %v18510_v1 }
 0xa3d   :  { %14661 = vmatpush2.bf16.msra.mxu1 %v18507_v10 }
 0xa3e   :  { %16943 = vmatpush3.bf16.msra.mxu0 %v18511_v21  ;;  %14662 = vmatprep.subr.bf16.mxu1 %v18514_v31 }
 0xa41   :  { %14663 = vmatpush2.bf16.msra.mxu1 %v18512_v11  ;;  %v14461_v15 = vpop.f32.mrf.mxu0  ;;  %14786 = vmatmul.mubr.bf16.vlgmr.msra.gmra.mxu0 %v19562_v63  ;;  %v18519_v63 = vld [vmem:[#allocation20 + $0x670] ss:$28 sps:$4 sm:$0xff]  }
 0xa42   :  { %16906 = vmatprep.subr.bf16.mxu1 %v18515_v24 }
 0xa43   :  { %v14463_v14 = vpop.f32.mrf.mxu0 }
 0xa44   :  { %v14420_v13 = vpop.f32.mrf.mxu1  ;;  %14665 = vmatmul.mubr.bf16.vlgmr.msra.gmra.mxu1 %v19576_v56 }
 0xa45   :  { %v14421_v59 = vadd.f32 %v14420_v13, %v14380_v22  ;;  %16907 = vmatpush3.bf16.msra.mxu1 %v18516_v39  ;;  %14745 = vmatprep.mubr.bf16.mxu1 %v19539_v20  ;;  %v14465_v36 = vpop.f32.mrf.mxu0  ;;  %v18523_v20 = vld [vmem:[#allocation20 + $0x600] ss:$28 sps:$4 sm:$0xff]   ;;  %v11861_v13 = vrot.slane %v19613_v2, %v19269_v48 }
 0xa46   :  { %v14422_v6 = vpop.f32.mrf.mxu1  ;;  %16908 = vmatprep.subr.bf16.mxu1 %v18517_v55 }
 0xa47   :  { %v14423_v25 = vadd.f32 %v14422_v6, %v14382_v38  ;;  %v14466_v18 = vpop.f32.mrf.mxu0  ;;  %v19624_v58 = vadd.f32 %v14461_v15, %v14421_v59  ;;  %v11865_v38 = vrot.slane %v19613_v2, %v19272_v51 }
 0xa48   :  { %v14424_v34 = vpop.f32.mrf.mxu1 }
 0xa49   :  { %16909 = vmatpush3.bf16.msra.mxu1 %v18518_v4  ;;  %v19626_v26 = vadd.f32 %v14463_v14, %v14423_v25 }
 0xa4a   :  { %v14425_v53 = vpop.f32.mrf.mxu1  ;;  %16910 = vmatprep.subr.bf16.mxu1 %v18519_v63 }
 0xa4d   :  { %16911 = vmatpush3.bf16.msra.mxu1 %v18520_v35 }
 0xa4e   :  { %16912 = vmatprep.subr.bf16.mxu1 %v18521_v57 }
 0xa51   :  { %16913 = vmatpush3.bf16.msra.mxu1 %v18522_v23 }
 0xa52   :  { %16914 = vmatprep.subr.bf16.mxu1 %v18523_v20 }
 0xa55   :  { %16915 = vmatpush3.bf16.msra.mxu1 %v18524_v32 }
 0xa56   :  { %16916 = vmatprep.subr.bf16.mxu1 %v18525_v28 }
 0xa59   :  { %16917 = vmatpush3.bf16.msra.mxu1 %v18526_v41 }
 0xa5a   :  { %16918 = vmatprep.subr.bf16.mxu1 %v18527_v8 }
 0xa5d   :  { %16919 = vmatpush3.bf16.msra.mxu1 %v18528_v44 }
 0xa5e   :  { %16920 = vmatprep.subr.bf16.mxu1 %v18529_v0 }
 0xa61   :  { %16921 = vmatpush3.bf16.msra.mxu1 %v18530_v17 }
 0xa62   :  { %16950 = vmatprep.subr.bf16.mxu1 %v18531_v5 }
 0xa64   :  { %14746 = vmatmul.mubr.bf16.vlgmr.msra.gmra.mxu1 %v19541_v50  ;;  %v18542_v50 = vld [vmem:[#allocation20 + $0xb08] ss:$28 sps:$4 sm:$0xff]  }
 0xa65   :  { %16951 = vmatpush3.bf16.msra.mxu1 %v18532_v3  ;;  %14825 = vmatprep.mubr.bf16.mxu1 %v19572_v54  ;;  %v18544_v54 = vld [vmem:[#allocation20 + $0xad0] ss:$28 sps:$4 sm:$0xff]  }
 0xa66   :  { %16952 = vmatprep.subr.bf16.mxu1 %v18533_v47 }
 0xa69   :  { %16953 = vmatpush3.bf16.msra.mxu1 %v18534_v29 }
 0xa6a   :  { %16954 = vmatprep.subr.bf16.mxu1 %v18535_v27 }
 0xa6d   :  { %16955 = vmatpush3.bf16.msra.mxu1 %v18536_v19 }
 0xa6e   :  { %16956 = vmatprep.subr.bf16.mxu1 %v18537_v46 }
 0xa71   :  { %16957 = vmatpush3.bf16.msra.mxu1 %v18538_v42 }
 0xa72   :  { %16958 = vmatprep.subr.bf16.mxu1 %v18539_v45 }
 0xa75   :  { %16959 = vmatpush3.bf16.msra.mxu1 %v18540_v49 }
 0xa76   :  { %16960 = vmatprep.subr.bf16.mxu1 %v18541_v16 }
 0xa79   :  { %16961 = vmatpush3.bf16.msra.mxu1 %v18542_v50 }
 0xa7a   :  { %16962 = vmatprep.subr.bf16.mxu1 %v18543_v30 }
 0xa7d   :  { %16963 = vmatpush3.bf16.msra.mxu1 %v18544_v54 }
 0xa7e   :  { %16964 = vmatprep.subr.bf16.mxu1 %v18545_v60  ;;  %v11869_v60 = vrot.slane %v19613_v2, %v19298_v43 }
 0xa81   :  { %16965 = vmatpush3.bf16.msra.mxu1 %v18546_v62  ;;  %v14543_v61 = vpop.f32.mrf.mxu0 }
 0xa82   :  { %v14544_v36 = vadd.f32 %v14543_v61, %v11861_v13 }
 0xa83   :  { %v14545_v37 = vpop.f32.mrf.mxu0 }
 0xa84   :  { %v14502_v40 = vpop.f32.mrf.mxu1  ;;  %14826 = vmatmul.mubr.bf16.vlgmr.msra.gmra.mxu1 %v19576_v56  ;;  %v14546_v63 = vadd.f32 %v14545_v37, %v11865_v38 }
 0xa85   :  { %v14503_v52 = vadd.f32 %v14502_v40, %v19624_v58  ;;  %v14547_v7 = vpop.f32.mrf.mxu0 }
 0xa86   :  { %v14504_v33 = vpop.f32.mrf.mxu1 }
 0xa87   :  { %v14835_v1 = vsub.f32 0.0, %v14503_v52  ;;  %v14505_v10 = vadd.f32 %v14504_v33, %v19626_v26  ;;  %v14548_v21 = vpop.f32.mrf.mxu0 }
 0xa88   :  { %v14506_v31 = vpop.f32.mrf.mxu1 }
 0xa89   :  { %v14844_v11 = vmul.f32 1.442695, %v14835_v1  ;;  %v14836_v24 = vsub.f32 0.0, %v14505_v10 }
 0xa8a   :  { %v14507_v12 = vpop.f32.mrf.mxu1 }
 0xa8b   :  { %18675 = vpow2.f32 %v14844_v11  ;;  %v14846_v9 = vmul.f32 1.442695, %v14836_v24 }
 0xa8d   :  { %18677 = vpow2.f32 %v14846_v9 }
 0xa98   :  { %v18676_v15 = vpop.eup %18675 }
 0xa99   :  { %v14856_v39 = vadd.f32 1.0, %v18676_v15 }
 0xa9a   :  { %v18678_v55 = vpop.eup %18677 }
 0xa9b   :  { %18679 = vrcp.f32 %v14856_v39  ;;  %v14857_v56 = vadd.f32 1.0, %v18678_v55 }
 0xa9d   :  { %18681 = vrcp.f32 %v14857_v56 }
 0xaa8   :  { %v18680_v22 = vpop.eup %18679 }
 0xaa9   :  { %14870 = vst [vmem:[#allocation23 + $0x10] sm:$0xff] %v18680_v22 }
 0xaaa   :  { %v18682_v14 = vpop.eup %18681 }
 0xaab   :  { %14871 = vst [vmem:[#allocation23 + $0x18] sm:$0xff] %v18682_v14 }
 0xac1   :  { %v14625_v59 = vpop.f32.mrf.mxu0 }
 0xac3   :  { %v14627_v4 = vpop.f32.mrf.mxu0 }
 0xac4   :  { %v14584_v6 = vpop.f32.mrf.mxu1 }
 0xac5   :  { %v14585_v25 = vadd.f32 %v14584_v6, %v14544_v36  ;;  %v14629_v18 = vpop.f32.mrf.mxu0 }
 0xac6   :  { %v14586_v58 = vpop.f32.mrf.mxu1 }
 0xac7   :  { %v14587_v34 = vadd.f32 %v14586_v58, %v14546_v63  ;;  %v14630_v35 = vpop.f32.mrf.mxu0  ;;  %v14626_v26 = vadd.f32 %v14625_v59, %v14585_v25 }
 0xac8   :  { %v14588_v53 = vpop.f32.mrf.mxu1 }
 0xac9   :  { %v14628_v57 = vadd.f32 %v14627_v4, %v14587_v34 }
 0xaca   :  { %v14589_v23 = vpop.f32.mrf.mxu1 }
 0xae1   :  { %v16900_v20 = vpop.f32.mrf.mxu0 }
 0xae3   :  { %v16901_v32 = vpop.f32.mrf.mxu0 }
 0xae4   :  { %v16902_v48 = vadd.f32 %v16901_v32, %v16900_v20 }
 0xae5   :  { %v16903_v28 = vpop.f32.mrf.mxu0 }
 0xae6   :  { %v14708_v37 = vadd.f32 %v16902_v48, %v11869_v60 }
 0xae7   :  { %v16904_v41 = vpop.f32.mrf.mxu0 }
 0xb01   :  { %v16944_v51 = vpop.f32.mrf.mxu0 }
 0xb03   :  { %v16945_v8 = vpop.f32.mrf.mxu0 }
 0xb04   :  { %v14666_v44 = vpop.f32.mrf.mxu1  ;;  %v16946_v0 = vadd.f32 %v16945_v8, %v16944_v51 }
 0xb05   :  { %v14667_v17 = vadd.f32 %v14666_v44, %v14626_v26  ;;  %v16947_v5 = vpop.f32.mrf.mxu0 }
 0xb06   :  { %v14668_v3 = vpop.f32.mrf.mxu1 }
 0xb07   :  { %v14837_v47 = vsub.f32 0.0, %v14667_v17  ;;  %v14669_v29 = vadd.f32 %v14668_v3, %v14628_v57  ;;  %v16948_v27 = vpop.f32.mrf.mxu0 }
 0xb08   :  { %v14670_v19 = vpop.f32.mrf.mxu1 }
 0xb09   :  { %v14848_v46 = vmul.f32 1.442695, %v14837_v47  ;;  %v14838_v42 = vsub.f32 0.0, %v14669_v29 }
 0xb0a   :  { %v14671_v45 = vpop.f32.mrf.mxu1 }
 0xb0b   :  { %18683 = vpow2.f32 %v14848_v46  ;;  %v14850_v49 = vmul.f32 1.442695, %v14838_v42 }
 0xb0d   :  { %18685 = vpow2.f32 %v14850_v49 }
 0xb18   :  { %v18684_v16 = vpop.eup %18683 }
 0xb19   :  { %v14858_v50 = vadd.f32 1.0, %v18684_v16 }
 0xb1a   :  { %v18686_v30 = vpop.eup %18685 }
 0xb1b   :  { %18687 = vrcp.f32 %v14858_v50  ;;  %v14859_v54 = vadd.f32 1.0, %v18686_v30 }
 0xb1d   :  { %18689 = vrcp.f32 %v14859_v54 }
 0xb24   :  { %v16922_v62 = vpop.f32.mrf.mxu1 }
 0xb26   :  { %v16923_v61 = vpop.f32.mrf.mxu1 }
 0xb27   :  { %v16924_v40 = vadd.f32 %v16923_v61, %v16922_v62 }
 0xb28   :  { %v18688_v52 = vpop.eup %18687  ;;  %v16925_v7 = vpop.f32.mrf.mxu1 }
 0xb29   :  { %14872 = vst [vmem:[#allocation23 + $0x20] sm:$0xff] %v18688_v52  ;;  %v14748_v33 = vadd.f32 %v16924_v40, %v14708_v37 }
 0xb2a   :  { %v18690_v1 = vpop.eup %18689  ;;  %v16926_v10 = vpop.f32.mrf.mxu1 }
 0xb2b   :  { %14873 = vst [vmem:[#allocation23 + $0x28] sm:$0xff] %v18690_v1  ;;  %v14788_v21 = vadd.f32 %v16946_v0, %v14748_v33 }
 0xb44   :  { %v16966_v31 = vpop.f32.mrf.mxu1 }
 0xb46   :  { %v16967_v11 = vpop.f32.mrf.mxu1 }
 0xb47   :  { %v16968_v24 = vadd.f32 %v16967_v11, %v16966_v31 }
 0xb48   :  { %v16969_v12 = vpop.f32.mrf.mxu1 }
 0xb49   :  { %v14828_v9 = vadd.f32 %v16968_v24, %v14788_v21 }
 0xb4a   :  { %v16970_v15 = vpop.f32.mrf.mxu1 }
 0xb4b   :  { %v14839_v39 = vsub.f32 0.0, %v14828_v9 }
 0xb4d   :  { %v14852_v43 = vmul.f32 1.442695, %v14839_v39 }
 0xb4f   :  { %18691 = vpow2.f32 %v14852_v43 }
 0xb5c   :  { %v18692_v2 = vpop.eup %18691 }
 0xb5d   :  { %v14860_v55 = vadd.f32 1.0, %v18692_v2 }
 0xb5f   :  { %18693 = vrcp.f32 %v14860_v55 }
 0xb6c   :  { %v18694_v56 = vpop.eup %18693 }
 0xb6d   :  { %14874 = vst [vmem:[#allocation23 + $0x30] sm:$0xff] %v18694_v56 }
 0xb6e   :  { %18971 = shalt.err (!%p18968_p13)
}
 0xb6f   :  { %14884 = dma.vmem_to_hbm [thread:$0]  %s14882_s12, 896, %s19655_s13, [#allocation4]  }
 0xb70   :  { %18994 = dma.done.wait [#allocation4], 896  }
 0xb71   :  { %18995 = vsyncadd [#allocation4], 4294966400 }
 0xb72   :  { %14888 = vsyncpa [#allocation3], 1 }
 0xb73   :  { %14889 = vsyncpa [#allocation6], 1 }
 0xb74   :  { %14890 = vsyncpa [#allocation9], 1 }
 0xb75   :  { %14891 = vsyncpa [#allocation12], 1 }
 0xb76   :  { %14892 = vsyncpa [#allocation15], 1 }
 0xb77   :  { %14893 = vsyncpa [#allocation18], 1 }
 0xb78   :  { %14894 = vsyncpa [#allocation21], 1 }
 0xb79   :  { %14895 = vsyncpa [#allocation4], 1 }

</bundles_post_ra>
